<compile_context>
chip_gen: v6e
topology: v6e:2x2x1
jax: 0.10.0
libtpu: 0.0.40
codegen_flags: <defaults>
</compile_context>

<pallas_src>
import numpy as np
import jax
import jax.numpy as jnp
from jax import lax
from jax.experimental import pallas as pl
from jax.experimental.pallas import tpu as pltpu

# ---------------- example problem sizes (small, consistent with the module) ------------
B = 2       # batch
T = 16      # time frames
F = 32      # frequency channels
NKERN = 8   # total Gabor-STRF kernels (real_only=False -> NKERN//2 real + NKERN//2 imag)
KT = 5      # supn (time support, odd)
KF = 5      # supk (freq support, odd)


# ---------------- Pallas kernel factory: STRF generation + conv on the VPU -------------
def _make_gabor_strf_kernel(supn, supk, t, f, taps):
    """taps: list of (dt_idx, df_idx, n_offset, k_offset, window) with Python numbers.

    Kernel refs:
      params_ref: (M, 3)                 per-kernel [rate, scale, phase]
                                         (phase 0 -> cos kernel, pi/2 -> sin kernel)
      x_ref:      (1, t+2pt, f+2pf)      zero-padded spectrogram for this batch element
      o_ref:      (1, M, t, f)           modulation output for this batch element
    """
    def kernel(params_ref, x_ref, o_ref):
        m = params_ref.shape[0]
        rate = params_ref[:, 0:1]      # (M, 1)
        scale = params_ref[:, 1:2]     # (M, 1)
        phase = params_ref[:, 2:3]     # (M, 1)

        acc = jnp.zeros((m, t, f), jnp.float32)       # unnormalized correlation
        sumsq = jnp.zeros((m, 1), jnp.float32)        # per-kernel L2 of the STRF

        # Unrolled loop over the 25 STRF taps.  All tap constants are Python
        # floats (compile-time), so each iteration is: one EUP cos, a couple of
        # VPU ops on an (M,1) column, one static VMEM slice, and one
        # broadcast-multiply-add into the (M, T, F) register accumulator.
        for (dt_i, df_i, dn, dk, w) in taps:
            col = jnp.cos(rate * dn + scale * dk - phase) * w      # (M, 1)
            sumsq = sumsq + col * col
            x_slice = x_ref[0, dt_i:dt_i + t, df_i:df_i + f]       # (T, F), static slice
            acc = acc + col[:, :, None] * x_slice[None, :, :]      # (M, T, F)

        # norm_strf=True: unit L2 norm per kernel, applied once at the end.
        inv_norm = lax.rsqrt(sumsq)                                # (M, 1), EUP
        o_ref[0] = acc * inv_norm[:, :, None]

    return kernel


# ---------------- wrapper: parameter packing, padding, pallas_call ----------------------
def gabor_strf_conv(sigspec, rates, scales, supn=KT, supk=KF):
    """Forward pass of GaborSTRFConv (real_only=False, norm_strf=True).

    sigspec: (B, T, F) or (T, F) float32 spectrogram
    rates, scales: (nkern//2,) learnable modulation parameters
    returns: (B, nkern, T, F) float32
    """
    if sigspec.ndim == 2:
        sigspec = sigspec[None]
    if supn % 2 == 0:
        supn += 1
    if supk % 2 == 0:
        supk += 1

    b, t, f = sigspec.shape
    nk_half = rates.shape[0]
    m = 2 * nk_half
    pt, pf = supn // 2, supk // 2
    tp, fp = t + 2 * pt, f + 2 * pf

    # ---- tap constants baked into the kernel (no DMA): offsets + raised-cosine window --
    n_idx = np.arange(supn, dtype=np.float64)
    k_idx = np.arange(supk, dtype=np.float64)
    nwind = 0.5 - 0.5 * np.cos(2.0 * np.pi * (n_idx + 1) / (supn + 1))
    kwind = 0.5 - 0.5 * np.cos(2.0 * np.pi * (k_idx + 1) / (supk + 1))
    taps = [(int(i), int(j), float(i - pt), float(j - pf), float(nwind[i] * kwind[j]))
            for i in range(supn) for j in range(supk)]

    # ---- per-kernel params: [rate, scale, phase]; second half = imaginary (sin) kernels
    rates_full = jnp.concatenate([rates, rates]).astype(jnp.float32)
    scales_full = jnp.concatenate([scales, scales]).astype(jnp.float32)
    phase = jnp.concatenate([jnp.zeros((nk_half,), jnp.float32),
                             jnp.full((nk_half,), np.pi / 2.0, jnp.float32)])
    params = jnp.stack([rates_full, scales_full, phase], axis=1)      # (M, 3)

    # ---- zero-pad once (the only host-side layout op; ~5.6 KB) -------------------------
    x_pad = jnp.pad(sigspec.astype(jnp.float32), ((0, 0), (pt, pt), (pf, pf)))

    kernel = _make_gabor_strf_kernel(supn, supk, t, f, taps)

    flops = 2 * b * m * supn * supk * t * f
    transcendentals = b * m * supn * supk
    bytes_accessed = 4 * (params.size + x_pad.size + b * m * t * f)

    out = pl.pallas_call(
        kernel,
        out_shape=jax.ShapeDtypeStruct((b, m, t, f), jnp.float32),
        grid_spec=pltpu.PrefetchScalarGridSpec(
            num_scalar_prefetch=0,
            grid=(b,),                                   # one grid step per batch element
            in_specs=[
                pl.BlockSpec((m, 3), lambda i: (0, 0)),            # params (revisited)
                pl.BlockSpec((1, tp, fp), lambda i: (i, 0, 0)),    # padded spectrogram
            ],
            out_specs=pl.BlockSpec((1, m, t, f), lambda i: (i, 0, 0, 0)),
        ),
        compiler_params=pltpu.CompilerParams(
            dimension_semantics=("parallel",)),          # megacore-ready on v7x
        cost_estimate=pl.CostEstimate(flops=flops,
                                      transcendentals=transcendentals,
                                      bytes_accessed=bytes_accessed),
    )(params, x_pad)

    return out                                           # already (B, M, T, F); no post-ops


# ---------------- pure-JAX reference (mirrors the PyTorch module exactly) ---------------
def _ref_strfs(rates, scales, supn=KT, supk=KF):
    n = jnp.arange(supn, dtype=jnp.float32)
    k = jnp.arange(supk, dtype=jnp.float32)
    n0, k0 = supn // 2, supk // 2
    nwind = 0.5 - 0.5 * jnp.cos(2.0 * np.pi * (n + 1) / (supn + 1))
    kwind = 0.5 - 0.5 * jnp.cos(2.0 * np.pi * (k + 1) / (supk + 1))
    wind = nwind[:, None] * kwind[None, :]
    inside = (rates[:, None, None] * (n - n0)[None, :, None]
              + scales[:, None, None] * (k - k0)[None, None, :])
    real = jnp.cos(inside) * wind[None]
    imag = jnp.sin(inside) * wind[None]
    strf = jnp.concatenate([real, imag], axis=0)                      # (M, supn, supk)
    strf = strf / jnp.sqrt(jnp.sum(strf ** 2, axis=(1, 2), keepdims=True))
    return strf


def _ref_forward(sigspec, rates, scales, supn=KT, supk=KF):
    strf = _ref_strfs(rates, scales, supn, supk)
    b, t, f = sigspec.shape
    m = strf.shape[0]
    pt, pf = supn // 2, supk // 2
    x_pad = jnp.pad(sigspec, ((0, 0), (pt, pt), (pf, pf)))
    out = jnp.zeros((b, m, t, f), jnp.float32)
    for dt in range(supn):          # exact f32 elementwise reference (no dot/conv prims)
        for df in range(supk):
            w = strf[:, dt, df][None, :, None, None]
            out = out + w * x_pad[:, None, dt:dt + t, df:df + f]
    return out


if __name__ == "__main__":
    key = jax.random.PRNGKey(0)
    k1, k2, k3 = jax.random.split(key, 3)
    sigspec = jax.random.normal(k1, (B, T, F), dtype=jnp.float32)
    # Learnable params, initialized as in GaborSTRFConv.__init__ (nkern//2 each):
    #   rates ~ U(0, pi/2), scales ~ U(-pi/2, pi/2)
    rates = jax.random.uniform(k2, (NKERN // 2,), dtype=jnp.float32) * (np.pi / 2.0)
    scales = (jax.random.uniform(k3, (NKERN // 2,), dtype=jnp.float32) * 2.0 - 1.0) * (np.pi / 2.0)

    out = gabor_strf_conv(sigspec, rates, scales)
    out = jax.block_until_ready(out)
    ref = _ref_forward(sigspec, rates, scales)

    assert out.shape == ref.shape == (B, NKERN, T, F)
    assert bool(jnp.all(jnp.isfinite(out))), "output is not finite"
    max_abs_err = float(jnp.max(jnp.abs(out - ref)))
    rel_fro_err = float(jnp.sqrt(jnp.sum((out - ref) ** 2) / jnp.sum(ref ** 2)))
    # Kernel path is all-f32 VPU/EUP math (no MXU bf16 passes); differences come only
    # from cos/rsqrt approximations and summation order.
    assert jnp.allclose(out, ref, rtol=1e-2, atol=1e-2), (max_abs_err, rel_fro_err)
    assert rel_fro_err < 1e-2, rel_fro_err

    print("KERNEL_OK")
</pallas_src>

<mosaic_0001>
module attributes {stable_mosaic.version = 11 : i64} {
  func.func @kernel(%arg0: i32, %arg1: memref<8x3xf32, #tpu.memory_space<vmem>>, %arg2: memref<1x20x36xf32, #tpu.memory_space<vmem>>, %arg3: memref<1x8x16x32xf32, #tpu.memory_space<vmem>>) attributes {dimension_semantics = [#tpu.dimension_semantics<parallel>], iteration_bounds = array<i64: 2>, scalar_prefetch = 0 : i64, scratch_operands = 0 : i64, tpu.core_type = #tpu.core_type<tc>, window_params = [{pipeline_mode = #tpu.pipeline_mode<synchronous>, transform_indices = @transform_0, window_bounds = array<i64: 8, 3>}, {transform_indices = @transform_1, window_bounds = array<i64: 1, 20, 36>}, {transform_indices = @transform_2, window_bounds = array<i64: 1, 8, 16, 32>}]} {
    %c0 = arith.constant 0 : index
    %c0_0 = arith.constant 0 : index
    %0 = vector.load %arg1[%c0, %c0_0] : memref<8x3xf32, #tpu.memory_space<vmem>>, vector<8x1xf32>
    %c0_1 = arith.constant 0 : index
    %c1 = arith.constant 1 : index
    %1 = vector.load %arg1[%c0_1, %c1] : memref<8x3xf32, #tpu.memory_space<vmem>>, vector<8x1xf32>
    %c0_2 = arith.constant 0 : index
    %c2 = arith.constant 2 : index
    %2 = vector.load %arg1[%c0_2, %c2] : memref<8x3xf32, #tpu.memory_space<vmem>>, vector<8x1xf32>
    %cst = arith.constant 0.000000e+00 : f32
    %3 = vector.broadcast %cst : f32 to vector<8x16x32xf32>
    %cst_3 = arith.constant 0.000000e+00 : f32
    %4 = vector.broadcast %cst_3 : f32 to vector<8x1xf32>
    %cst_4 = arith.constant -2.000000e+00 : f32
    %5 = vector.broadcast %cst_4 : f32 to vector<8x1xf32>
    %6 = arith.mulf %0, %5 : vector<8x1xf32>
    %cst_5 = arith.constant -2.000000e+00 : f32
    %7 = vector.broadcast %cst_5 : f32 to vector<8x1xf32>
    %8 = arith.mulf %1, %7 : vector<8x1xf32>
    %9 = arith.addf %6, %8 : vector<8x1xf32>
    %10 = arith.subf %9, %2 : vector<8x1xf32>
    %11 = math.cos %10 : vector<8x1xf32>
    %cst_6 = arith.constant 6.250000e-02 : f32
    %12 = vector.broadcast %cst_6 : f32 to vector<8x1xf32>
    %13 = arith.mulf %11, %12 : vector<8x1xf32>
    %14 = arith.mulf %13, %13 : vector<8x1xf32>
    %15 = arith.addf %4, %14 : vector<8x1xf32>
    %c0_7 = arith.constant 0 : index
    %c0_8 = arith.constant 0 : index
    %c0_9 = arith.constant 0 : index
    %16 = vector.load %arg2[%c0_7, %c0_8, %c0_9] : memref<1x20x36xf32, #tpu.memory_space<vmem>>, vector<1x16x32xf32>
    %17 = vector.shape_cast %16 : vector<1x16x32xf32> to vector<16x32xf32>
    %18 = vector.shape_cast %13 : vector<8x1xf32> to vector<8x1x1xf32>
    %19 = vector.shape_cast %17 : vector<16x32xf32> to vector<1x16x32xf32>
    %20 = vector.broadcast %18 : vector<8x1x1xf32> to vector<8x16x32xf32>
    %21 = vector.broadcast %19 : vector<1x16x32xf32> to vector<8x16x32xf32>
    %22 = arith.mulf %20, %21 : vector<8x16x32xf32>
    %23 = arith.addf %3, %22 : vector<8x16x32xf32>
    %cst_10 = arith.constant -2.000000e+00 : f32
    %24 = vector.broadcast %cst_10 : f32 to vector<8x1xf32>
    %25 = arith.mulf %0, %24 : vector<8x1xf32>
    %cst_11 = arith.constant -1.000000e+00 : f32
    %26 = vector.broadcast %cst_11 : f32 to vector<8x1xf32>
    %27 = arith.mulf %1, %26 : vector<8x1xf32>
    %28 = arith.addf %25, %27 : vector<8x1xf32>
    %29 = arith.subf %28, %2 : vector<8x1xf32>
    %30 = math.cos %29 : vector<8x1xf32>
    %cst_12 = arith.constant 1.875000e-01 : f32
    %31 = vector.broadcast %cst_12 : f32 to vector<8x1xf32>
    %32 = arith.mulf %30, %31 : vector<8x1xf32>
    %33 = arith.mulf %32, %32 : vector<8x1xf32>
    %34 = arith.addf %15, %33 : vector<8x1xf32>
    %c0_13 = arith.constant 0 : index
    %c0_14 = arith.constant 0 : index
    %c1_15 = arith.constant 1 : index
    %35 = vector.load %arg2[%c0_13, %c0_14, %c1_15] : memref<1x20x36xf32, #tpu.memory_space<vmem>>, vector<1x16x32xf32>
    %36 = vector.shape_cast %35 : vector<1x16x32xf32> to vector<16x32xf32>
    %37 = vector.shape_cast %32 : vector<8x1xf32> to vector<8x1x1xf32>
    %38 = vector.shape_cast %36 : vector<16x32xf32> to vector<1x16x32xf32>
    %39 = vector.broadcast %37 : vector<8x1x1xf32> to vector<8x16x32xf32>
    %40 = vector.broadcast %38 : vector<1x16x32xf32> to vector<8x16x32xf32>
    %41 = arith.mulf %39, %40 : vector<8x16x32xf32>
    %42 = arith.addf %23, %41 : vector<8x16x32xf32>
    %cst_16 = arith.constant -2.000000e+00 : f32
    %43 = vector.broadcast %cst_16 : f32 to vector<8x1xf32>
    %44 = arith.mulf %0, %43 : vector<8x1xf32>
    %cst_17 = arith.constant 0.000000e+00 : f32
    %45 = vector.broadcast %cst_17 : f32 to vector<8x1xf32>
    %46 = arith.mulf %1, %45 : vector<8x1xf32>
    %47 = arith.addf %44, %46 : vector<8x1xf32>
    %48 = arith.subf %47, %2 : vector<8x1xf32>
    %49 = math.cos %48 : vector<8x1xf32>
    %cst_18 = arith.constant 2.500000e-01 : f32
    %50 = vector.broadcast %cst_18 : f32 to vector<8x1xf32>
    %51 = arith.mulf %49, %50 : vector<8x1xf32>
    %52 = arith.mulf %51, %51 : vector<8x1xf32>
    %53 = arith.addf %34, %52 : vector<8x1xf32>
    %c0_19 = arith.constant 0 : index
    %c0_20 = arith.constant 0 : index
    %c2_21 = arith.constant 2 : index
    %54 = vector.load %arg2[%c0_19, %c0_20, %c2_21] : memref<1x20x36xf32, #tpu.memory_space<vmem>>, vector<1x16x32xf32>
    %55 = vector.shape_cast %54 : vector<1x16x32xf32> to vector<16x32xf32>
    %56 = vector.shape_cast %51 : vector<8x1xf32> to vector<8x1x1xf32>
    %57 = vector.shape_cast %55 : vector<16x32xf32> to vector<1x16x32xf32>
    %58 = vector.broadcast %56 : vector<8x1x1xf32> to vector<8x16x32xf32>
    %59 = vector.broadcast %57 : vector<1x16x32xf32> to vector<8x16x32xf32>
    %60 = arith.mulf %58, %59 : vector<8x16x32xf32>
    %61 = arith.addf %42, %60 : vector<8x16x32xf32>
    %cst_22 = arith.constant -2.000000e+00 : f32
    %62 = vector.broadcast %cst_22 : f32 to vector<8x1xf32>
    %63 = arith.mulf %0, %62 : vector<8x1xf32>
    %cst_23 = arith.constant 1.000000e+00 : f32
    %64 = vector.broadcast %cst_23 : f32 to vector<8x1xf32>
    %65 = arith.mulf %1, %64 : vector<8x1xf32>
    %66 = arith.addf %63, %65 : vector<8x1xf32>
    %67 = arith.subf %66, %2 : vector<8x1xf32>
    %68 = math.cos %67 : vector<8x1xf32>
    %cst_24 = arith.constant 1.875000e-01 : f32
    %69 = vector.broadcast %cst_24 : f32 to vector<8x1xf32>
    %70 = arith.mulf %68, %69 : vector<8x1xf32>
    %71 = arith.mulf %70, %70 : vector<8x1xf32>
    %72 = arith.addf %53, %71 : vector<8x1xf32>
    %c0_25 = arith.constant 0 : index
    %c0_26 = arith.constant 0 : index
    %c3 = arith.constant 3 : index
    %73 = vector.load %arg2[%c0_25, %c0_26, %c3] : memref<1x20x36xf32, #tpu.memory_space<vmem>>, vector<1x16x32xf32>
    %74 = vector.shape_cast %73 : vector<1x16x32xf32> to vector<16x32xf32>
    %75 = vector.shape_cast %70 : vector<8x1xf32> to vector<8x1x1xf32>
    %76 = vector.shape_cast %74 : vector<16x32xf32> to vector<1x16x32xf32>
    %77 = vector.broadcast %75 : vector<8x1x1xf32> to vector<8x16x32xf32>
    %78 = vector.broadcast %76 : vector<1x16x32xf32> to vector<8x16x32xf32>
    %79 = arith.mulf %77, %78 : vector<8x16x32xf32>
    %80 = arith.addf %61, %79 : vector<8x16x32xf32>
    %cst_27 = arith.constant -2.000000e+00 : f32
    %81 = vector.broadcast %cst_27 : f32 to vector<8x1xf32>
    %82 = arith.mulf %0, %81 : vector<8x1xf32>
    %cst_28 = arith.constant 2.000000e+00 : f32
    %83 = vector.broadcast %cst_28 : f32 to vector<8x1xf32>
    %84 = arith.mulf %1, %83 : vector<8x1xf32>
    %85 = arith.addf %82, %84 : vector<8x1xf32>
    %86 = arith.subf %85, %2 : vector<8x1xf32>
    %87 = math.cos %86 : vector<8x1xf32>
    %cst_29 = arith.constant 6.250000e-02 : f32
    %88 = vector.broadcast %cst_29 : f32 to vector<8x1xf32>
    %89 = arith.mulf %87, %88 : vector<8x1xf32>
    %90 = arith.mulf %89, %89 : vector<8x1xf32>
    %91 = arith.addf %72, %90 : vector<8x1xf32>
    %c0_30 = arith.constant 0 : index
    %c0_31 = arith.constant 0 : index
    %c4 = arith.constant 4 : index
    %92 = vector.load %arg2[%c0_30, %c0_31, %c4] : memref<1x20x36xf32, #tpu.memory_space<vmem>>, vector<1x16x32xf32>
    %93 = vector.shape_cast %92 : vector<1x16x32xf32> to vector<16x32xf32>
    %94 = vector.shape_cast %89 : vector<8x1xf32> to vector<8x1x1xf32>
    %95 = vector.shape_cast %93 : vector<16x32xf32> to vector<1x16x32xf32>
    %96 = vector.broadcast %94 : vector<8x1x1xf32> to vector<8x16x32xf32>
    %97 = vector.broadcast %95 : vector<1x16x32xf32> to vector<8x16x32xf32>
    %98 = arith.mulf %96, %97 : vector<8x16x32xf32>
    %99 = arith.addf %80, %98 : vector<8x16x32xf32>
    %cst_32 = arith.constant -1.000000e+00 : f32
    %100 = vector.broadcast %cst_32 : f32 to vector<8x1xf32>
    %101 = arith.mulf %0, %100 : vector<8x1xf32>
    %cst_33 = arith.constant -2.000000e+00 : f32
    %102 = vector.broadcast %cst_33 : f32 to vector<8x1xf32>
    %103 = arith.mulf %1, %102 : vector<8x1xf32>
    %104 = arith.addf %101, %103 : vector<8x1xf32>
    %105 = arith.subf %104, %2 : vector<8x1xf32>
    %106 = math.cos %105 : vector<8x1xf32>
    %cst_34 = arith.constant 1.875000e-01 : f32
    %107 = vector.broadcast %cst_34 : f32 to vector<8x1xf32>
    %108 = arith.mulf %106, %107 : vector<8x1xf32>
    %109 = arith.mulf %108, %108 : vector<8x1xf32>
    %110 = arith.addf %91, %109 : vector<8x1xf32>
    %c0_35 = arith.constant 0 : index
    %c1_36 = arith.constant 1 : index
    %c0_37 = arith.constant 0 : index
    %111 = vector.load %arg2[%c0_35, %c1_36, %c0_37] : memref<1x20x36xf32, #tpu.memory_space<vmem>>, vector<1x16x32xf32>
    %112 = vector.shape_cast %111 : vector<1x16x32xf32> to vector<16x32xf32>
    %113 = vector.shape_cast %108 : vector<8x1xf32> to vector<8x1x1xf32>
    %114 = vector.shape_cast %112 : vector<16x32xf32> to vector<1x16x32xf32>
    %115 = vector.broadcast %113 : vector<8x1x1xf32> to vector<8x16x32xf32>
    %116 = vector.broadcast %114 : vector<1x16x32xf32> to vector<8x16x32xf32>
    %117 = arith.mulf %115, %116 : vector<8x16x32xf32>
    %118 = arith.addf %99, %117 : vector<8x16x32xf32>
    %cst_38 = arith.constant -1.000000e+00 : f32
    %119 = vector.broadcast %cst_38 : f32 to vector<8x1xf32>
    %120 = arith.mulf %0, %119 : vector<8x1xf32>
    %cst_39 = arith.constant -1.000000e+00 : f32
    %121 = vector.broadcast %cst_39 : f32 to vector<8x1xf32>
    %122 = arith.mulf %1, %121 : vector<8x1xf32>
    %123 = arith.addf %120, %122 : vector<8x1xf32>
    %124 = arith.subf %123, %2 : vector<8x1xf32>
    %125 = math.cos %124 : vector<8x1xf32>
    %cst_40 = arith.constant 5.625000e-01 : f32
    %126 = vector.broadcast %cst_40 : f32 to vector<8x1xf32>
    %127 = arith.mulf %125, %126 : vector<8x1xf32>
    %128 = arith.mulf %127, %127 : vector<8x1xf32>
    %129 = arith.addf %110, %128 : vector<8x1xf32>
    %c0_41 = arith.constant 0 : index
    %c1_42 = arith.constant 1 : index
    %c1_43 = arith.constant 1 : index
    %130 = vector.load %arg2[%c0_41, %c1_42, %c1_43] : memref<1x20x36xf32, #tpu.memory_space<vmem>>, vector<1x16x32xf32>
    %131 = vector.shape_cast %130 : vector<1x16x32xf32> to vector<16x32xf32>
    %132 = vector.shape_cast %127 : vector<8x1xf32> to vector<8x1x1xf32>
    %133 = vector.shape_cast %131 : vector<16x32xf32> to vector<1x16x32xf32>
    %134 = vector.broadcast %132 : vector<8x1x1xf32> to vector<8x16x32xf32>
    %135 = vector.broadcast %133 : vector<1x16x32xf32> to vector<8x16x32xf32>
    %136 = arith.mulf %134, %135 : vector<8x16x32xf32>
    %137 = arith.addf %118, %136 : vector<8x16x32xf32>
    %cst_44 = arith.constant -1.000000e+00 : f32
    %138 = vector.broadcast %cst_44 : f32 to vector<8x1xf32>
    %139 = arith.mulf %0, %138 : vector<8x1xf32>
    %cst_45 = arith.constant 0.000000e+00 : f32
    %140 = vector.broadcast %cst_45 : f32 to vector<8x1xf32>
    %141 = arith.mulf %1, %140 : vector<8x1xf32>
    %142 = arith.addf %139, %141 : vector<8x1xf32>
    %143 = arith.subf %142, %2 : vector<8x1xf32>
    %144 = math.cos %143 : vector<8x1xf32>
    %cst_46 = arith.constant 7.500000e-01 : f32
    %145 = vector.broadcast %cst_46 : f32 to vector<8x1xf32>
    %146 = arith.mulf %144, %145 : vector<8x1xf32>
    %147 = arith.mulf %146, %146 : vector<8x1xf32>
    %148 = arith.addf %129, %147 : vector<8x1xf32>
    %c0_47 = arith.constant 0 : index
    %c1_48 = arith.constant 1 : index
    %c2_49 = arith.constant 2 : index
    %149 = vector.load %arg2[%c0_47, %c1_48, %c2_49] : memref<1x20x36xf32, #tpu.memory_space<vmem>>, vector<1x16x32xf32>
    %150 = vector.shape_cast %149 : vector<1x16x32xf32> to vector<16x32xf32>
    %151 = vector.shape_cast %146 : vector<8x1xf32> to vector<8x1x1xf32>
    %152 = vector.shape_cast %150 : vector<16x32xf32> to vector<1x16x32xf32>
    %153 = vector.broadcast %151 : vector<8x1x1xf32> to vector<8x16x32xf32>
    %154 = vector.broadcast %152 : vector<1x16x32xf32> to vector<8x16x32xf32>
    %155 = arith.mulf %153, %154 : vector<8x16x32xf32>
    %156 = arith.addf %137, %155 : vector<8x16x32xf32>
    %cst_50 = arith.constant -1.000000e+00 : f32
    %157 = vector.broadcast %cst_50 : f32 to vector<8x1xf32>
    %158 = arith.mulf %0, %157 : vector<8x1xf32>
    %cst_51 = arith.constant 1.000000e+00 : f32
    %159 = vector.broadcast %cst_51 : f32 to vector<8x1xf32>
    %160 = arith.mulf %1, %159 : vector<8x1xf32>
    %161 = arith.addf %158, %160 : vector<8x1xf32>
    %162 = arith.subf %161, %2 : vector<8x1xf32>
    %163 = math.cos %162 : vector<8x1xf32>
    %cst_52 = arith.constant 5.625000e-01 : f32
    %164 = vector.broadcast %cst_52 : f32 to vector<8x1xf32>
    %165 = arith.mulf %163, %164 : vector<8x1xf32>
    %166 = arith.mulf %165, %165 : vector<8x1xf32>
    %167 = arith.addf %148, %166 : vector<8x1xf32>
    %c0_53 = arith.constant 0 : index
    %c1_54 = arith.constant 1 : index
    %c3_55 = arith.constant 3 : index
    %168 = vector.load %arg2[%c0_53, %c1_54, %c3_55] : memref<1x20x36xf32, #tpu.memory_space<vmem>>, vector<1x16x32xf32>
    %169 = vector.shape_cast %168 : vector<1x16x32xf32> to vector<16x32xf32>
    %170 = vector.shape_cast %165 : vector<8x1xf32> to vector<8x1x1xf32>
    %171 = vector.shape_cast %169 : vector<16x32xf32> to vector<1x16x32xf32>
    %172 = vector.broadcast %170 : vector<8x1x1xf32> to vector<8x16x32xf32>
    %173 = vector.broadcast %171 : vector<1x16x32xf32> to vector<8x16x32xf32>
    %174 = arith.mulf %172, %173 : vector<8x16x32xf32>
    %175 = arith.addf %156, %174 : vector<8x16x32xf32>
    %cst_56 = arith.constant -1.000000e+00 : f32
    %176 = vector.broadcast %cst_56 : f32 to vector<8x1xf32>
    %177 = arith.mulf %0, %176 : vector<8x1xf32>
    %cst_57 = arith.constant 2.000000e+00 : f32
    %178 = vector.broadcast %cst_57 : f32 to vector<8x1xf32>
    %179 = arith.mulf %1, %178 : vector<8x1xf32>
    %180 = arith.addf %177, %179 : vector<8x1xf32>
    %181 = arith.subf %180, %2 : vector<8x1xf32>
    %182 = math.cos %181 : vector<8x1xf32>
    %cst_58 = arith.constant 1.875000e-01 : f32
    %183 = vector.broadcast %cst_58 : f32 to vector<8x1xf32>
    %184 = arith.mulf %182, %183 : vector<8x1xf32>
    %185 = arith.mulf %184, %184 : vector<8x1xf32>
    %186 = arith.addf %167, %185 : vector<8x1xf32>
    %c0_59 = arith.constant 0 : index
    %c1_60 = arith.constant 1 : index
    %c4_61 = arith.constant 4 : index
    %187 = vector.load %arg2[%c0_59, %c1_60, %c4_61] : memref<1x20x36xf32, #tpu.memory_space<vmem>>, vector<1x16x32xf32>
    %188 = vector.shape_cast %187 : vector<1x16x32xf32> to vector<16x32xf32>
    %189 = vector.shape_cast %184 : vector<8x1xf32> to vector<8x1x1xf32>
    %190 = vector.shape_cast %188 : vector<16x32xf32> to vector<1x16x32xf32>
    %191 = vector.broadcast %189 : vector<8x1x1xf32> to vector<8x16x32xf32>
    %192 = vector.broadcast %190 : vector<1x16x32xf32> to vector<8x16x32xf32>
    %193 = arith.mulf %191, %192 : vector<8x16x32xf32>
    %194 = arith.addf %175, %193 : vector<8x16x32xf32>
    %cst_62 = arith.constant 0.000000e+00 : f32
    %195 = vector.broadcast %cst_62 : f32 to vector<8x1xf32>
    %196 = arith.mulf %0, %195 : vector<8x1xf32>
    %cst_63 = arith.constant -2.000000e+00 : f32
    %197 = vector.broadcast %cst_63 : f32 to vector<8x1xf32>
    %198 = arith.mulf %1, %197 : vector<8x1xf32>
    %199 = arith.addf %196, %198 : vector<8x1xf32>
    %200 = arith.subf %199, %2 : vector<8x1xf32>
    %201 = math.cos %200 : vector<8x1xf32>
    %cst_64 = arith.constant 2.500000e-01 : f32
    %202 = vector.broadcast %cst_64 : f32 to vector<8x1xf32>
    %203 = arith.mulf %201, %202 : vector<8x1xf32>
    %204 = arith.mulf %203, %203 : vector<8x1xf32>
    %205 = arith.addf %186, %204 : vector<8x1xf32>
    %c0_65 = arith.constant 0 : index
    %c2_66 = arith.constant 2 : index
    %c0_67 = arith.constant 0 : index
    %206 = vector.load %arg2[%c0_65, %c2_66, %c0_67] : memref<1x20x36xf32, #tpu.memory_space<vmem>>, vector<1x16x32xf32>
    %207 = vector.shape_cast %206 : vector<1x16x32xf32> to vector<16x32xf32>
    %208 = vector.shape_cast %203 : vector<8x1xf32> to vector<8x1x1xf32>
    %209 = vector.shape_cast %207 : vector<16x32xf32> to vector<1x16x32xf32>
    %210 = vector.broadcast %208 : vector<8x1x1xf32> to vector<8x16x32xf32>
    %211 = vector.broadcast %209 : vector<1x16x32xf32> to vector<8x16x32xf32>
    %212 = arith.mulf %210, %211 : vector<8x16x32xf32>
    %213 = arith.addf %194, %212 : vector<8x16x32xf32>
    %cst_68 = arith.constant 0.000000e+00 : f32
    %214 = vector.broadcast %cst_68 : f32 to vector<8x1xf32>
    %215 = arith.mulf %0, %214 : vector<8x1xf32>
    %cst_69 = arith.constant -1.000000e+00 : f32
    %216 = vector.broadcast %cst_69 : f32 to vector<8x1xf32>
    %217 = arith.mulf %1, %216 : vector<8x1xf32>
    %218 = arith.addf %215, %217 : vector<8x1xf32>
    %219 = arith.subf %218, %2 : vector<8x1xf32>
    %220 = math.cos %219 : vector<8x1xf32>
    %cst_70 = arith.constant 7.500000e-01 : f32
    %221 = vector.broadcast %cst_70 : f32 to vector<8x1xf32>
    %222 = arith.mulf %220, %221 : vector<8x1xf32>
    %223 = arith.mulf %222, %222 : vector<8x1xf32>
    %224 = arith.addf %205, %223 : vector<8x1xf32>
    %c0_71 = arith.constant 0 : index
    %c2_72 = arith.constant 2 : index
    %c1_73 = arith.constant 1 : index
    %225 = vector.load %arg2[%c0_71, %c2_72, %c1_73] : memref<1x20x36xf32, #tpu.memory_space<vmem>>, vector<1x16x32xf32>
    %226 = vector.shape_cast %225 : vector<1x16x32xf32> to vector<16x32xf32>
    %227 = vector.shape_cast %222 : vector<8x1xf32> to vector<8x1x1xf32>
    %228 = vector.shape_cast %226 : vector<16x32xf32> to vector<1x16x32xf32>
    %229 = vector.broadcast %227 : vector<8x1x1xf32> to vector<8x16x32xf32>
    %230 = vector.broadcast %228 : vector<1x16x32xf32> to vector<8x16x32xf32>
    %231 = arith.mulf %229, %230 : vector<8x16x32xf32>
    %232 = arith.addf %213, %231 : vector<8x16x32xf32>
    %cst_74 = arith.constant 0.000000e+00 : f32
    %233 = vector.broadcast %cst_74 : f32 to vector<8x1xf32>
    %234 = arith.mulf %0, %233 : vector<8x1xf32>
    %cst_75 = arith.constant 0.000000e+00 : f32
    %235 = vector.broadcast %cst_75 : f32 to vector<8x1xf32>
    %236 = arith.mulf %1, %235 : vector<8x1xf32>
    %237 = arith.addf %234, %236 : vector<8x1xf32>
    %238 = arith.subf %237, %2 : vector<8x1xf32>
    %239 = math.cos %238 : vector<8x1xf32>
    %cst_76 = arith.constant 1.000000e+00 : f32
    %240 = vector.broadcast %cst_76 : f32 to vector<8x1xf32>
    %241 = arith.mulf %239, %240 : vector<8x1xf32>
    %242 = arith.mulf %241, %241 : vector<8x1xf32>
    %243 = arith.addf %224, %242 : vector<8x1xf32>
    %c0_77 = arith.constant 0 : index
    %c2_78 = arith.constant 2 : index
    %c2_79 = arith.constant 2 : index
    %244 = vector.load %arg2[%c0_77, %c2_78, %c2_79] : memref<1x20x36xf32, #tpu.memory_space<vmem>>, vector<1x16x32xf32>
    %245 = vector.shape_cast %244 : vector<1x16x32xf32> to vector<16x32xf32>
    %246 = vector.shape_cast %241 : vector<8x1xf32> to vector<8x1x1xf32>
    %247 = vector.shape_cast %245 : vector<16x32xf32> to vector<1x16x32xf32>
    %248 = vector.broadcast %246 : vector<8x1x1xf32> to vector<8x16x32xf32>
    %249 = vector.broadcast %247 : vector<1x16x32xf32> to vector<8x16x32xf32>
    %250 = arith.mulf %248, %249 : vector<8x16x32xf32>
    %251 = arith.addf %232, %250 : vector<8x16x32xf32>
    %cst_80 = arith.constant 0.000000e+00 : f32
    %252 = vector.broadcast %cst_80 : f32 to vector<8x1xf32>
    %253 = arith.mulf %0, %252 : vector<8x1xf32>
    %cst_81 = arith.constant 1.000000e+00 : f32
    %254 = vector.broadcast %cst_81 : f32 to vector<8x1xf32>
    %255 = arith.mulf %1, %254 : vector<8x1xf32>
    %256 = arith.addf %253, %255 : vector<8x1xf32>
    %257 = arith.subf %256, %2 : vector<8x1xf32>
    %258 = math.cos %257 : vector<8x1xf32>
    %cst_82 = arith.constant 7.500000e-01 : f32
    %259 = vector.broadcast %cst_82 : f32 to vector<8x1xf32>
    %260 = arith.mulf %258, %259 : vector<8x1xf32>
    %261 = arith.mulf %260, %260 : vector<8x1xf32>
    %262 = arith.addf %243, %261 : vector<8x1xf32>
    %c0_83 = arith.constant 0 : index
    %c2_84 = arith.constant 2 : index
    %c3_85 = arith.constant 3 : index
    %263 = vector.load %arg2[%c0_83, %c2_84, %c3_85] : memref<1x20x36xf32, #tpu.memory_space<vmem>>, vector<1x16x32xf32>
    %264 = vector.shape_cast %263 : vector<1x16x32xf32> to vector<16x32xf32>
    %265 = vector.shape_cast %260 : vector<8x1xf32> to vector<8x1x1xf32>
    %266 = vector.shape_cast %264 : vector<16x32xf32> to vector<1x16x32xf32>
    %267 = vector.broadcast %265 : vector<8x1x1xf32> to vector<8x16x32xf32>
    %268 = vector.broadcast %266 : vector<1x16x32xf32> to vector<8x16x32xf32>
    %269 = arith.mulf %267, %268 : vector<8x16x32xf32>
    %270 = arith.addf %251, %269 : vector<8x16x32xf32>
    %cst_86 = arith.constant 0.000000e+00 : f32
    %271 = vector.broadcast %cst_86 : f32 to vector<8x1xf32>
    %272 = arith.mulf %0, %271 : vector<8x1xf32>
    %cst_87 = arith.constant 2.000000e+00 : f32
    %273 = vector.broadcast %cst_87 : f32 to vector<8x1xf32>
    %274 = arith.mulf %1, %273 : vector<8x1xf32>
    %275 = arith.addf %272, %274 : vector<8x1xf32>
    %276 = arith.subf %275, %2 : vector<8x1xf32>
    %277 = math.cos %276 : vector<8x1xf32>
    %cst_88 = arith.constant 2.500000e-01 : f32
    %278 = vector.broadcast %cst_88 : f32 to vector<8x1xf32>
    %279 = arith.mulf %277, %278 : vector<8x1xf32>
    %280 = arith.mulf %279, %279 : vector<8x1xf32>
    %281 = arith.addf %262, %280 : vector<8x1xf32>
    %c0_89 = arith.constant 0 : index
    %c2_90 = arith.constant 2 : index
    %c4_91 = arith.constant 4 : index
    %282 = vector.load %arg2[%c0_89, %c2_90, %c4_91] : memref<1x20x36xf32, #tpu.memory_space<vmem>>, vector<1x16x32xf32>
    %283 = vector.shape_cast %282 : vector<1x16x32xf32> to vector<16x32xf32>
    %284 = vector.shape_cast %279 : vector<8x1xf32> to vector<8x1x1xf32>
    %285 = vector.shape_cast %283 : vector<16x32xf32> to vector<1x16x32xf32>
    %286 = vector.broadcast %284 : vector<8x1x1xf32> to vector<8x16x32xf32>
    %287 = vector.broadcast %285 : vector<1x16x32xf32> to vector<8x16x32xf32>
    %288 = arith.mulf %286, %287 : vector<8x16x32xf32>
    %289 = arith.addf %270, %288 : vector<8x16x32xf32>
    %cst_92 = arith.constant 1.000000e+00 : f32
    %290 = vector.broadcast %cst_92 : f32 to vector<8x1xf32>
    %291 = arith.mulf %0, %290 : vector<8x1xf32>
    %cst_93 = arith.constant -2.000000e+00 : f32
    %292 = vector.broadcast %cst_93 : f32 to vector<8x1xf32>
    %293 = arith.mulf %1, %292 : vector<8x1xf32>
    %294 = arith.addf %291, %293 : vector<8x1xf32>
    %295 = arith.subf %294, %2 : vector<8x1xf32>
    %296 = math.cos %295 : vector<8x1xf32>
    %cst_94 = arith.constant 1.875000e-01 : f32
    %297 = vector.broadcast %cst_94 : f32 to vector<8x1xf32>
    %298 = arith.mulf %296, %297 : vector<8x1xf32>
    %299 = arith.mulf %298, %298 : vector<8x1xf32>
    %300 = arith.addf %281, %299 : vector<8x1xf32>
    %c0_95 = arith.constant 0 : index
    %c3_96 = arith.constant 3 : index
    %c0_97 = arith.constant 0 : index
    %301 = vector.load %arg2[%c0_95, %c3_96, %c0_97] : memref<1x20x36xf32, #tpu.memory_space<vmem>>, vector<1x16x32xf32>
    %302 = vector.shape_cast %301 : vector<1x16x32xf32> to vector<16x32xf32>
    %303 = vector.shape_cast %298 : vector<8x1xf32> to vector<8x1x1xf32>
    %304 = vector.shape_cast %302 : vector<16x32xf32> to vector<1x16x32xf32>
    %305 = vector.broadcast %303 : vector<8x1x1xf32> to vector<8x16x32xf32>
    %306 = vector.broadcast %304 : vector<1x16x32xf32> to vector<8x16x32xf32>
    %307 = arith.mulf %305, %306 : vector<8x16x32xf32>
    %308 = arith.addf %289, %307 : vector<8x16x32xf32>
    %cst_98 = arith.constant 1.000000e+00 : f32
    %309 = vector.broadcast %cst_98 : f32 to vector<8x1xf32>
    %310 = arith.mulf %0, %309 : vector<8x1xf32>
    %cst_99 = arith.constant -1.000000e+00 : f32
    %311 = vector.broadcast %cst_99 : f32 to vector<8x1xf32>
    %312 = arith.mulf %1, %311 : vector<8x1xf32>
    %313 = arith.addf %310, %312 : vector<8x1xf32>
    %314 = arith.subf %313, %2 : vector<8x1xf32>
    %315 = math.cos %314 : vector<8x1xf32>
    %cst_100 = arith.constant 5.625000e-01 : f32
    %316 = vector.broadcast %cst_100 : f32 to vector<8x1xf32>
    %317 = arith.mulf %315, %316 : vector<8x1xf32>
    %318 = arith.mulf %317, %317 : vector<8x1xf32>
    %319 = arith.addf %300, %318 : vector<8x1xf32>
    %c0_101 = arith.constant 0 : index
    %c3_102 = arith.constant 3 : index
    %c1_103 = arith.constant 1 : index
    %320 = vector.load %arg2[%c0_101, %c3_102, %c1_103] : memref<1x20x36xf32, #tpu.memory_space<vmem>>, vector<1x16x32xf32>
    %321 = vector.shape_cast %320 : vector<1x16x32xf32> to vector<16x32xf32>
    %322 = vector.shape_cast %317 : vector<8x1xf32> to vector<8x1x1xf32>
    %323 = vector.shape_cast %321 : vector<16x32xf32> to vector<1x16x32xf32>
    %324 = vector.broadcast %322 : vector<8x1x1xf32> to vector<8x16x32xf32>
    %325 = vector.broadcast %323 : vector<1x16x32xf32> to vector<8x16x32xf32>
    %326 = arith.mulf %324, %325 : vector<8x16x32xf32>
    %327 = arith.addf %308, %326 : vector<8x16x32xf32>
    %cst_104 = arith.constant 1.000000e+00 : f32
    %328 = vector.broadcast %cst_104 : f32 to vector<8x1xf32>
    %329 = arith.mulf %0, %328 : vector<8x1xf32>
    %cst_105 = arith.constant 0.000000e+00 : f32
    %330 = vector.broadcast %cst_105 : f32 to vector<8x1xf32>
    %331 = arith.mulf %1, %330 : vector<8x1xf32>
    %332 = arith.addf %329, %331 : vector<8x1xf32>
    %333 = arith.subf %332, %2 : vector<8x1xf32>
    %334 = math.cos %333 : vector<8x1xf32>
    %cst_106 = arith.constant 7.500000e-01 : f32
    %335 = vector.broadcast %cst_106 : f32 to vector<8x1xf32>
    %336 = arith.mulf %334, %335 : vector<8x1xf32>
    %337 = arith.mulf %336, %336 : vector<8x1xf32>
    %338 = arith.addf %319, %337 : vector<8x1xf32>
    %c0_107 = arith.constant 0 : index
    %c3_108 = arith.constant 3 : index
    %c2_109 = arith.constant 2 : index
    %339 = vector.load %arg2[%c0_107, %c3_108, %c2_109] : memref<1x20x36xf32, #tpu.memory_space<vmem>>, vector<1x16x32xf32>
    %340 = vector.shape_cast %339 : vector<1x16x32xf32> to vector<16x32xf32>
    %341 = vector.shape_cast %336 : vector<8x1xf32> to vector<8x1x1xf32>
    %342 = vector.shape_cast %340 : vector<16x32xf32> to vector<1x16x32xf32>
    %343 = vector.broadcast %341 : vector<8x1x1xf32> to vector<8x16x32xf32>
    %344 = vector.broadcast %342 : vector<1x16x32xf32> to vector<8x16x32xf32>
    %345 = arith.mulf %343, %344 : vector<8x16x32xf32>
    %346 = arith.addf %327, %345 : vector<8x16x32xf32>
    %cst_110 = arith.constant 1.000000e+00 : f32
    %347 = vector.broadcast %cst_110 : f32 to vector<8x1xf32>
    %348 = arith.mulf %0, %347 : vector<8x1xf32>
    %cst_111 = arith.constant 1.000000e+00 : f32
    %349 = vector.broadcast %cst_111 : f32 to vector<8x1xf32>
    %350 = arith.mulf %1, %349 : vector<8x1xf32>
    %351 = arith.addf %348, %350 : vector<8x1xf32>
    %352 = arith.subf %351, %2 : vector<8x1xf32>
    %353 = math.cos %352 : vector<8x1xf32>
    %cst_112 = arith.constant 5.625000e-01 : f32
    %354 = vector.broadcast %cst_112 : f32 to vector<8x1xf32>
    %355 = arith.mulf %353, %354 : vector<8x1xf32>
    %356 = arith.mulf %355, %355 : vector<8x1xf32>
    %357 = arith.addf %338, %356 : vector<8x1xf32>
    %c0_113 = arith.constant 0 : index
    %c3_114 = arith.constant 3 : index
    %c3_115 = arith.constant 3 : index
    %358 = vector.load %arg2[%c0_113, %c3_114, %c3_115] : memref<1x20x36xf32, #tpu.memory_space<vmem>>, vector<1x16x32xf32>
    %359 = vector.shape_cast %358 : vector<1x16x32xf32> to vector<16x32xf32>
    %360 = vector.shape_cast %355 : vector<8x1xf32> to vector<8x1x1xf32>
    %361 = vector.shape_cast %359 : vector<16x32xf32> to vector<1x16x32xf32>
    %362 = vector.broadcast %360 : vector<8x1x1xf32> to vector<8x16x32xf32>
    %363 = vector.broadcast %361 : vector<1x16x32xf32> to vector<8x16x32xf32>
    %364 = arith.mulf %362, %363 : vector<8x16x32xf32>
    %365 = arith.addf %346, %364 : vector<8x16x32xf32>
    %cst_116 = arith.constant 1.000000e+00 : f32
    %366 = vector.broadcast %cst_116 : f32 to vector<8x1xf32>
    %367 = arith.mulf %0, %366 : vector<8x1xf32>
    %cst_117 = arith.constant 2.000000e+00 : f32
    %368 = vector.broadcast %cst_117 : f32 to vector<8x1xf32>
    %369 = arith.mulf %1, %368 : vector<8x1xf32>
    %370 = arith.addf %367, %369 : vector<8x1xf32>
    %371 = arith.subf %370, %2 : vector<8x1xf32>
    %372 = math.cos %371 : vector<8x1xf32>
    %cst_118 = arith.constant 1.875000e-01 : f32
    %373 = vector.broadcast %cst_118 : f32 to vector<8x1xf32>
    %374 = arith.mulf %372, %373 : vector<8x1xf32>
    %375 = arith.mulf %374, %374 : vector<8x1xf32>
    %376 = arith.addf %357, %375 : vector<8x1xf32>
    %c0_119 = arith.constant 0 : index
    %c3_120 = arith.constant 3 : index
    %c4_121 = arith.constant 4 : index
    %377 = vector.load %arg2[%c0_119, %c3_120, %c4_121] : memref<1x20x36xf32, #tpu.memory_space<vmem>>, vector<1x16x32xf32>
    %378 = vector.shape_cast %377 : vector<1x16x32xf32> to vector<16x32xf32>
    %379 = vector.shape_cast %374 : vector<8x1xf32> to vector<8x1x1xf32>
    %380 = vector.shape_cast %378 : vector<16x32xf32> to vector<1x16x32xf32>
    %381 = vector.broadcast %379 : vector<8x1x1xf32> to vector<8x16x32xf32>
    %382 = vector.broadcast %380 : vector<1x16x32xf32> to vector<8x16x32xf32>
    %383 = arith.mulf %381, %382 : vector<8x16x32xf32>
    %384 = arith.addf %365, %383 : vector<8x16x32xf32>
    %cst_122 = arith.constant 2.000000e+00 : f32
    %385 = vector.broadcast %cst_122 : f32 to vector<8x1xf32>
    %386 = arith.mulf %0, %385 : vector<8x1xf32>
    %cst_123 = arith.constant -2.000000e+00 : f32
    %387 = vector.broadcast %cst_123 : f32 to vector<8x1xf32>
    %388 = arith.mulf %1, %387 : vector<8x1xf32>
    %389 = arith.addf %386, %388 : vector<8x1xf32>
    %390 = arith.subf %389, %2 : vector<8x1xf32>
    %391 = math.cos %390 : vector<8x1xf32>
    %cst_124 = arith.constant 6.250000e-02 : f32
    %392 = vector.broadcast %cst_124 : f32 to vector<8x1xf32>
    %393 = arith.mulf %391, %392 : vector<8x1xf32>
    %394 = arith.mulf %393, %393 : vector<8x1xf32>
    %395 = arith.addf %376, %394 : vector<8x1xf32>
    %c0_125 = arith.constant 0 : index
    %c4_126 = arith.constant 4 : index
    %c0_127 = arith.constant 0 : index
    %396 = vector.load %arg2[%c0_125, %c4_126, %c0_127] : memref<1x20x36xf32, #tpu.memory_space<vmem>>, vector<1x16x32xf32>
    %397 = vector.shape_cast %396 : vector<1x16x32xf32> to vector<16x32xf32>
    %398 = vector.shape_cast %393 : vector<8x1xf32> to vector<8x1x1xf32>
    %399 = vector.shape_cast %397 : vector<16x32xf32> to vector<1x16x32xf32>
    %400 = vector.broadcast %398 : vector<8x1x1xf32> to vector<8x16x32xf32>
    %401 = vector.broadcast %399 : vector<1x16x32xf32> to vector<8x16x32xf32>
    %402 = arith.mulf %400, %401 : vector<8x16x32xf32>
    %403 = arith.addf %384, %402 : vector<8x16x32xf32>
    %cst_128 = arith.constant 2.000000e+00 : f32
    %404 = vector.broadcast %cst_128 : f32 to vector<8x1xf32>
    %405 = arith.mulf %0, %404 : vector<8x1xf32>
    %cst_129 = arith.constant -1.000000e+00 : f32
    %406 = vector.broadcast %cst_129 : f32 to vector<8x1xf32>
    %407 = arith.mulf %1, %406 : vector<8x1xf32>
    %408 = arith.addf %405, %407 : vector<8x1xf32>
    %409 = arith.subf %408, %2 : vector<8x1xf32>
    %410 = math.cos %409 : vector<8x1xf32>
    %cst_130 = arith.constant 1.875000e-01 : f32
    %411 = vector.broadcast %cst_130 : f32 to vector<8x1xf32>
    %412 = arith.mulf %410, %411 : vector<8x1xf32>
    %413 = arith.mulf %412, %412 : vector<8x1xf32>
    %414 = arith.addf %395, %413 : vector<8x1xf32>
    %c0_131 = arith.constant 0 : index
    %c4_132 = arith.constant 4 : index
    %c1_133 = arith.constant 1 : index
    %415 = vector.load %arg2[%c0_131, %c4_132, %c1_133] : memref<1x20x36xf32, #tpu.memory_space<vmem>>, vector<1x16x32xf32>
    %416 = vector.shape_cast %415 : vector<1x16x32xf32> to vector<16x32xf32>
    %417 = vector.shape_cast %412 : vector<8x1xf32> to vector<8x1x1xf32>
    %418 = vector.shape_cast %416 : vector<16x32xf32> to vector<1x16x32xf32>
    %419 = vector.broadcast %417 : vector<8x1x1xf32> to vector<8x16x32xf32>
    %420 = vector.broadcast %418 : vector<1x16x32xf32> to vector<8x16x32xf32>
    %421 = arith.mulf %419, %420 : vector<8x16x32xf32>
    %422 = arith.addf %403, %421 : vector<8x16x32xf32>
    %cst_134 = arith.constant 2.000000e+00 : f32
    %423 = vector.broadcast %cst_134 : f32 to vector<8x1xf32>
    %424 = arith.mulf %0, %423 : vector<8x1xf32>
    %cst_135 = arith.constant 0.000000e+00 : f32
    %425 = vector.broadcast %cst_135 : f32 to vector<8x1xf32>
    %426 = arith.mulf %1, %425 : vector<8x1xf32>
    %427 = arith.addf %424, %426 : vector<8x1xf32>
    %428 = arith.subf %427, %2 : vector<8x1xf32>
    %429 = math.cos %428 : vector<8x1xf32>
    %cst_136 = arith.constant 2.500000e-01 : f32
    %430 = vector.broadcast %cst_136 : f32 to vector<8x1xf32>
    %431 = arith.mulf %429, %430 : vector<8x1xf32>
    %432 = arith.mulf %431, %431 : vector<8x1xf32>
    %433 = arith.addf %414, %432 : vector<8x1xf32>
    %c0_137 = arith.constant 0 : index
    %c4_138 = arith.constant 4 : index
    %c2_139 = arith.constant 2 : index
    %434 = vector.load %arg2[%c0_137, %c4_138, %c2_139] : memref<1x20x36xf32, #tpu.memory_space<vmem>>, vector<1x16x32xf32>
    %435 = vector.shape_cast %434 : vector<1x16x32xf32> to vector<16x32xf32>
    %436 = vector.shape_cast %431 : vector<8x1xf32> to vector<8x1x1xf32>
    %437 = vector.shape_cast %435 : vector<16x32xf32> to vector<1x16x32xf32>
    %438 = vector.broadcast %436 : vector<8x1x1xf32> to vector<8x16x32xf32>
    %439 = vector.broadcast %437 : vector<1x16x32xf32> to vector<8x16x32xf32>
    %440 = arith.mulf %438, %439 : vector<8x16x32xf32>
    %441 = arith.addf %422, %440 : vector<8x16x32xf32>
    %cst_140 = arith.constant 2.000000e+00 : f32
    %442 = vector.broadcast %cst_140 : f32 to vector<8x1xf32>
    %443 = arith.mulf %0, %442 : vector<8x1xf32>
    %cst_141 = arith.constant 1.000000e+00 : f32
    %444 = vector.broadcast %cst_141 : f32 to vector<8x1xf32>
    %445 = arith.mulf %1, %444 : vector<8x1xf32>
    %446 = arith.addf %443, %445 : vector<8x1xf32>
    %447 = arith.subf %446, %2 : vector<8x1xf32>
    %448 = math.cos %447 : vector<8x1xf32>
    %cst_142 = arith.constant 1.875000e-01 : f32
    %449 = vector.broadcast %cst_142 : f32 to vector<8x1xf32>
    %450 = arith.mulf %448, %449 : vector<8x1xf32>
    %451 = arith.mulf %450, %450 : vector<8x1xf32>
    %452 = arith.addf %433, %451 : vector<8x1xf32>
    %c0_143 = arith.constant 0 : index
    %c4_144 = arith.constant 4 : index
    %c3_145 = arith.constant 3 : index
    %453 = vector.load %arg2[%c0_143, %c4_144, %c3_145] : memref<1x20x36xf32, #tpu.memory_space<vmem>>, vector<1x16x32xf32>
    %454 = vector.shape_cast %453 : vector<1x16x32xf32> to vector<16x32xf32>
    %455 = vector.shape_cast %450 : vector<8x1xf32> to vector<8x1x1xf32>
    %456 = vector.shape_cast %454 : vector<16x32xf32> to vector<1x16x32xf32>
    %457 = vector.broadcast %455 : vector<8x1x1xf32> to vector<8x16x32xf32>
    %458 = vector.broadcast %456 : vector<1x16x32xf32> to vector<8x16x32xf32>
    %459 = arith.mulf %457, %458 : vector<8x16x32xf32>
    %460 = arith.addf %441, %459 : vector<8x16x32xf32>
    %cst_146 = arith.constant 2.000000e+00 : f32
    %461 = vector.broadcast %cst_146 : f32 to vector<8x1xf32>
    %462 = arith.mulf %0, %461 : vector<8x1xf32>
    %cst_147 = arith.constant 2.000000e+00 : f32
    %463 = vector.broadcast %cst_147 : f32 to vector<8x1xf32>
    %464 = arith.mulf %1, %463 : vector<8x1xf32>
    %465 = arith.addf %462, %464 : vector<8x1xf32>
    %466 = arith.subf %465, %2 : vector<8x1xf32>
    %467 = math.cos %466 : vector<8x1xf32>
    %cst_148 = arith.constant 6.250000e-02 : f32
    %468 = vector.broadcast %cst_148 : f32 to vector<8x1xf32>
    %469 = arith.mulf %467, %468 : vector<8x1xf32>
    %470 = arith.mulf %469, %469 : vector<8x1xf32>
    %471 = arith.addf %452, %470 : vector<8x1xf32>
    %c0_149 = arith.constant 0 : index
    %c4_150 = arith.constant 4 : index
    %c4_151 = arith.constant 4 : index
    %472 = vector.load %arg2[%c0_149, %c4_150, %c4_151] : memref<1x20x36xf32, #tpu.memory_space<vmem>>, vector<1x16x32xf32>
    %473 = vector.shape_cast %472 : vector<1x16x32xf32> to vector<16x32xf32>
    %474 = vector.shape_cast %469 : vector<8x1xf32> to vector<8x1x1xf32>
    %475 = vector.shape_cast %473 : vector<16x32xf32> to vector<1x16x32xf32>
    %476 = vector.broadcast %474 : vector<8x1x1xf32> to vector<8x16x32xf32>
    %477 = vector.broadcast %475 : vector<1x16x32xf32> to vector<8x16x32xf32>
    %478 = arith.mulf %476, %477 : vector<8x16x32xf32>
    %479 = arith.addf %460, %478 : vector<8x16x32xf32>
    %480 = math.rsqrt %471 : vector<8x1xf32>
    %481 = vector.shape_cast %480 : vector<8x1xf32> to vector<8x1x1xf32>
    %482 = vector.broadcast %481 : vector<8x1x1xf32> to vector<8x16x32xf32>
    %483 = arith.mulf %479, %482 : vector<8x16x32xf32>
    %c0_152 = arith.constant 0 : index
    %c0_153 = arith.constant 0 : index
    %c0_154 = arith.constant 0 : index
    %c0_155 = arith.constant 0 : index
    %484 = vector.load %arg3[%c0_152, %c0_153, %c0_154, %c0_155] : memref<1x8x16x32xf32, #tpu.memory_space<vmem>>, vector<1x8x16x32xf32>
    %485 = vector.shape_cast %484 : vector<1x8x16x32xf32> to vector<8x16x32xf32>
    %486 = vector.shape_cast %483 : vector<8x16x32xf32> to vector<1x8x16x32xf32>
    tpu.vector_store %arg3[%c0_152, %c0_153, %c0_154, %c0_155], %486 {strides = array<i32>} : memref<1x8x16x32xf32, #tpu.memory_space<vmem>>, vector<1x8x16x32xf32>,
    return
  }
  func.func @transform_0(%arg0: i32) -> (i32, i32) {
    %c0_i32 = arith.constant 0 : i32
    %c0_i32_0 = arith.constant 0 : i32
    %c0_i32_1 = arith.constant 0 : i32
    return %c0_i32, %c0_i32_0 : i32, i32
  }
  func.func @transform_1(%arg0: i32) -> (i32, i32, i32) {
    %c0_i32 = arith.constant 0 : i32
    %c0_i32_0 = arith.constant 0 : i32
    %c0_i32_1 = arith.constant 0 : i32
    return %arg0, %c0_i32, %c0_i32_0 : i32, i32, i32
  }
  func.func @transform_2(%arg0: i32) -> (i32, i32, i32, i32) {
    %c0_i32 = arith.constant 0 : i32
    %c0_i32_0 = arith.constant 0 : i32
    %c0_i32_1 = arith.constant 0 : i32
    %c0_i32_2 = arith.constant 0 : i32
    return %arg0, %c0_i32, %c0_i32_0, %c0_i32_1 : i32, i32, i32, i32
  }
}

</mosaic_0001>

<bundles_post_ra>
// kernel: tpu_custom_call.1
= control target key start
LH: loop header
LB: loop body
LE: loop exit
PB: predicated region body
PF: predicated region fallthrough
CT: control target
= control target key end

     0   :  { %7 = vsyncpa [#allocation3], 0  ;;  %s14511_s0 = inlined_call_operand.vmem [shape: f32[8,3], index: 0, kind: input, shape index: {}]   ;;  %s14512_s1 = inlined_call_operand.vmem [shape: f32[2,20,36], index: 1, kind: input, shape index: {}]   ;;  %s14513_s2 = inlined_call_operand.hbm [shape: f32[2,8,16,32], index: 2, kind: output, shape index: {}]  }
   0x1   :  { %9 = vsyncpa [#allocation3 + $0x1], 0  ;;  %s8553_s9 = smov 0   ;;  %s8555_s10 = smov 0  }
   0x2   :  { %s8557_s11 = smov 0   ;;  %s8559_s12 = smov 0  }
   0x3 LB: > { %s8574_s13 = sadd.s32 4294967295, %s8521_s12   ;;  %s8073_s14 = sadd.s32 4294967294, %s8521_s12   ;;  %s8521_s12 = sphi %s8559_s12, %s15670_s12   ;;  %s8517_s11 = sphi %s8557_s11, %s15669_s11   ;;  %s8513_s10 = sphi %s8555_s10, %s15668_s10   ;;  %s8509_s9 = sphi %s8553_s9, %s15667_s9  }
   0x4   : > { %s8578_s15 = sadd.s32 1, %s8521_s12   ;;  %s69_s16 = sadd.s32 1, %s8517_s11 }
   0x5   : > { %s66_s17 = ssub.s32 %s8521_s12, %s8578_s15  ;;  %p79_p0 = scmp.ne.s32.totalorder %s8517_s11, %s8513_s10 }
   0x6   : > { %p67_p1 = scmp.eq.s32.totalorder %s66_s17, 0  ;;  %p80_p2 = scmp.eq.s32.totalorder %s8574_s13, 1 }
   0x7   : > { %p85_p3 = scmp.ne.s32.totalorder %s8513_s10, %s8509_s9  ;;  %p86_p4 = scmp.eq.s32.totalorder %s8073_s14, 1 }
   0x8   : > { %s8589_s18 = scalar_select %p67_p1, %s8517_s11, %s69_s16  }
   0x9   : > { %p8591_p5 = por %p80_p2, %p79_p0  ;;  %p8595_p6 = por %p86_p4, %p85_p3 }
   0xa   : > { %p8076_p7 = scmp.ge.s32.totalorder %s8521_s12, 1  ;;  %p115_p8 = scmp.lt.s32.totalorder %s8521_s12, 3 }
   0xc   : > { %p116_p9 = pnand %p8076_p7, %p115_p8 }
   0xe   : > { %119 = sbr.rel (%p116_p9) target bundleno = 3062 (0xbf6), region = 28 }
  0x13   : > { %v8604_v0 = vld [vmem:[%s14511_s0] sm:$0xff]  ;;  %s8523_s23 = smov 127   ;;  %s8524_s24 = smov 126   ;;  %v8525_v18 = vmov 0   ;;  %v14534_v43 = vmov 1326507024  }
  0x14   : > { %v408_v1 = vmul.f32 -1.0, %v8604_v0  ;;  %v8608_v2 = vmul.f32 -2.0, %v8604_v0  ;;  %v8618_v3 = vmul.f32 0.0, %v8604_v0  ;;  %v8623_v4 = vmul.f32 2.0, %v8604_v0  ;;  %8340 = vset.pattern.permute.xlu1 %v8525_v18  ;;  %8339 = vset.pattern.permute.xlu0 %v8525_v18  ;;  %p137_p10 = scmp.lt.s32.totalorder %s8574_s13, 1  ;;  %s8533_s4 = smov 125  }
  0x15   : > { %v14528_v48 = vmov 920167782   ;;  %v14536_v56 = vmov 2131351028   ;;  %v14526_v58 = vmov 2102212464  }
  0x16   : > { %410 = vrot.lane.b32.xlu1 %v408_v1, %s8523_s23  ;;  %145 = vrot.lane.b32.xlu0 %v8608_v2, %s8523_s23  ;;  %14726 = vst [vmem:[#allocation5_spill] sm:$0xff] %v8618_v3  ;;  %14727 = vst [vmem:[#allocation6_spill] sm:$0xff] %v8623_v4  ;;  %v14538_v62 = vmov 2475754826   ;;  %s10760_s27 = scalar_select %p137_p10, %s8574_s13, 1 }
  0x17   : > { %s8534_s5 = smov 124   ;;  %s134_s6 = sand.u32 1, %s8513_s10  }
  0x18   : > { %s8185_s28 = smul.u32 24, %s10760_s27  ;;  %s8077_s7 = sshll.u32 %s134_s6, 7 }
  0x19   : > { %s14402_s8 = scalar_lea.vmem [#allocation2], %s8077_s7  ;;  %s8184_s14 = sshll.u32 %s8574_s13, 11 }
  0x1a   : > { %1058 = vrot.lane.b32.xlu1 %v8604_v0, %s8523_s23  ;;  %150 = vrot.lane.b32.xlu0 %v8604_v0, %s8524_s24  ;;  %s10813_s3 = scalar_lea.vmem %s14512_s1, %s8185_s28  ;;  %s8011_s16 = sshll.u32 %s14402_s8, 4  ;;  %s14461_s16 = int_to_ptr.vmem [resolvable:$true] %s8011_s16 }
  0x1b   : > { %s14459_s22 = scalar_lea.hbm %s14513_s2, %s8184_s14  ;;  %s14471_s13 = scalar_lea.sflag [#allocation3], %s134_s6 }
  0x1e   : > { %735 = vrot.lane.b32.xlu0 %v8618_v3, %s8523_s23 }
  0x22   : > { %1383 = vrot.lane.b32.xlu0 %v8623_v4, %s8523_s23 }
  0x88   : > { %v8627_v5 = vpop.permute.xlu0 %145  ;;  %v8648_v23 = vpop.permute.xlu1 %410 }
  0x89   : > { %14728 = vst [vmem:[#allocation7_spill] sm:$0xff] %v8627_v5  ;;  %14734 = vst [vmem:[#allocation13_spill] sm:$0xff] %v8648_v23  ;;  %v8661_v33 = vadd.f32 %v8648_v23, %v8608_v2  ;;  %v8664_v34 = vadd.f32 %v8648_v23, %v408_v1  ;;  %v8671_v37 = vadd.f32 %v8618_v3, %v8648_v23 }
  0x8a   : > { %v8675_v38 = vadd.f32 %v8648_v23, %v8604_v0  ;;  %v8679_v39 = vadd.f32 %v8627_v5, %v8608_v2  ;;  %v8682_v40 = vadd.f32 %v408_v1, %v8627_v5  ;;  %v8686_v41 = vadd.f32 %v8618_v3, %v8627_v5 }
  0x8b   : > { %14736 = vst [vmem:[#allocation15_spill] sm:$0xff] %v8664_v34  ;;  %14738 = vst [vmem:[#allocation17_spill] sm:$0xff] %v8671_v37  ;;  %v8693_v46 = vadd.f32 %v8627_v5, %v8604_v0 }
  0x8c   : > { %v8629_v6 = vpop.permute.xlu0 %150  ;;  %v8666_v35 = vpop.permute.xlu1 %1058  ;;  %14739 = vst [vmem:[#allocation18_spill] sm:$0xff] %v8675_v38  ;;  %14740 = vst [vmem:[#allocation19_spill] sm:$0xff] %v8682_v40 }
  0x8d   : > { %14729 = vst [vmem:[#allocation8_spill] sm:$0xff] %v8629_v6  ;;  %14737 = vst [vmem:[#allocation16_spill] sm:$0xff] %v8666_v35  ;;  %v2602_v47 = vadd.f32 %v8666_v35, %v408_v1 }
  0x8e   : > { %14741 = vst [vmem:[#allocation20_spill] sm:$0xff] %v8686_v41  ;;  %14742 = vst [vmem:[#allocation21_spill] sm:$0xff] %v8693_v46  ;;  %v14747_v46 = vmov 920167782  }
  0x8f   : > { %v8716_v18 = vsub.f32 %v2602_v47, %v8629_v6 }
  0x90   : > { %v736_v7 = vpop.permute.xlu0 %735 }
  0x91   : > { %v3818_v8 = vadd.f32 %v736_v7, %v8618_v3  ;;  %v5353_v13 = vadd.f32 %v736_v7, %v8604_v0  ;;  %v738_v22 = vadd.f32 %v736_v7, %v8608_v2  ;;  %v2282_v24 = vadd.f32 %v736_v7, %v408_v1 }
  0x92   : > { %v6889_v54 = vadd.f32 %v8623_v4, %v736_v7 }
  0x93   : > { %v8633_v9 = vsub.f32 %v3818_v8, %v8629_v6  ;;  %v8641_v17 = vsub.f32 %v5353_v13, %v8629_v6  ;;  %v8652_v28 = vsub.f32 %v738_v22, %v8629_v6  ;;  %v8655_v29 = vsub.f32 %v2282_v24, %v8629_v6 }
  0x94   : > { %v8637_v14 = vpop.permute.xlu0 %1383 }
  0x95   : > { %14730 = vst [vmem:[#allocation9_spill] sm:$0xff] %v8633_v9  ;;  %v3823_v10 = vand.u32 2139095040, %v8633_v9  ;;  %14731 = vst [vmem:[#allocation10_spill] sm:$0xff] %v8637_v14  ;;  %v2922_v16 = vadd.f32 %v8637_v14, %v408_v1  ;;  %v5358_v21 = vand.u32 2139095040, %v8641_v17  ;;  %v743_v36 = vand.u32 2139095040, %v8652_v28 }
  0x96   : > { %14732 = vst [vmem:[#allocation11_spill] sm:$0xff] %v8641_v17  ;;  %14735 = vst [vmem:[#allocation14_spill] sm:$0xff] %v8655_v29  ;;  %v2287_v42 = vand.u32 2139095040, %v8655_v29  ;;  %v14516_v52 = vand.u32 2147483647, %v8633_v9 }
  0x97   : > { %v3824_v11 = vshrl.u32 %v3823_v10, 23  ;;  %v8644_v19 = vsub.f32 %v2922_v16, %v8629_v6  ;;  %v5359_v27 = vshrl.u32 %v5358_v21, 23  ;;  %v744_v51 = vshrl.u32 %v743_v36, 23 }
  0x98   : > { %v2288_v61 = vshrl.u32 %v2287_v42, 23  ;;  %v3827_v13 = vand.u32 8388607, %v14516_v52  ;;  %v14515_v22 = vand.u32 2147483647, %v8641_v17  ;;  %v8729_v36 = vsub.f32 %v6889_v54, %v8629_v6 }
  0x99   : > { %v8127_v12 = vadd.s32 4294967169, %v3824_v11  ;;  %14733 = vst [vmem:[#allocation12_spill] sm:$0xff] %v8644_v19  ;;  %v2927_v26 = vand.u32 2139095040, %v8644_v19  ;;  %v8147_v32 = vadd.s32 4294967169, %v5359_v27  ;;  %v14748_v41 = vand.u32 2147483647, %v8644_v19 }
  0x9a   : > { %14743 = vst [vmem:[#allocation22_spill] sm:$0xff] %v8729_v36  ;;  %v5362_v54 = vand.u32 8388607, %v14515_v22 }
  0x9b   : > { %v3830_v15 = vadd.s32 1, %v8127_v12  ;;  %v2928_v31 = vshrl.u32 %v2927_v26, 23  ;;  %v5365_v50 = vadd.s32 1, %v8147_v32  ;;  %v8087_v12 = vadd.s32 4294967169, %v744_v51 }
  0x9c   : > { %v2931_v9 = vand.u32 8388607, %v14748_v41 }
  0x9d   : > { %vm3831_vm0 = vcmp.gt.s32.totalorder %v3830_v15, 0  ;;  %v8115_v45 = vadd.s32 4294967169, %v2928_v31  ;;  %vm5366_vm1 = vcmp.gt.s32.totalorder %v5365_v50, 0  ;;  %v8724_v31 = vadd.f32 %v8666_v35, %v8608_v2 }
  0x9e   : > { %v3832_v20 = vsel %vm3831_vm0, %v3830_v15, 0  ;;  %v14518_v15 = vmov 683565275   ;;  %v5367_v27 = vsel %vm5366_vm1, %v5365_v50, 0  ;;  %v750_v42 = vadd.s32 1, %v8087_v12 }
  0x9f   : > { %v3834_v25 = vand.u32 31, %v3832_v20  ;;  %v8701_v55 = vshrl.u32 %v3832_v20, 5  ;;  %v2934_v8 = vadd.s32 1, %v8115_v45 }
  0xa0   : > { %vm751_vm7 = vcmp.gt.s32.totalorder %v750_v42, 0 }
  0xa1   : > { %v8657_v30 = vsub.s32 32, %v3834_v25  ;;  %v3849_v53 = vshll.u32 %v14528_v48, %v3834_v25  ;;  %v3846_v60 = vshll.u32 %v14526_v58, %v3834_v25  ;;  %v3840_v7 = vshll.u32 %v14538_v62, %v3834_v25 }
  0xa2   : > { %v3843_v10 = vshll.u32 %v14536_v56, %v3834_v25  ;;  %v3837_v16 = vshll.u32 %v14518_v15, %v3834_v25  ;;  %vm3855_vm2 = vcmp.lt.s32.totalorder %v8701_v55, 4  ;;  %vm2935_vm3 = vcmp.gt.s32.totalorder %v2934_v8, 0 }
  0xa3   : > { %v3850_v44 = vshrl.u32 %v14534_v43, %v8657_v30  ;;  %v3847_v49 = vshrl.u32 %v14528_v48, %v8657_v30  ;;  %v3841_v57 = vshrl.u32 %v14536_v56, %v8657_v30  ;;  %v3844_v59 = vshrl.u32 %v14526_v58, %v8657_v30 }
  0xa4   : > { %v3838_v63 = vshrl.u32 %v14538_v62, %v8657_v30  ;;  %v8107_v25 = vadd.s32 4294967169, %v2288_v61  ;;  %vm3852_vm4 = vcmp.lt.s32.totalorder %v8701_v55, 1  ;;  %vm3854_vm5 = vcmp.lt.s32.totalorder %v8701_v55, 3 }
  0xa5   : > { %v3851_v1 = vor.u32 %v3850_v44, %v3849_v53  ;;  %v3848_v11 = vor.u32 %v3847_v49, %v3846_v60  ;;  %v3842_v20 = vor.u32 %v3841_v57, %v3840_v7  ;;  %v3845_v21 = vor.u32 %v3844_v59, %v3843_v10 }
  0xa6   : > { %v3839_v24 = vor.u32 %v3838_v63, %v3837_v16  ;;  %v3828_v44 = vor.u32 8388608, %v3827_v13  ;;  %v8737_v49 = vand.u32 31, %v5367_v27  ;;  %v2936_v50 = vsel %vm2935_vm3, %v2934_v8, 0 }
  0xa7   : > { %v3865_v26 = vsel %vm3855_vm2, %v3851_v1, 1326507024  ;;  %v3861_v32 = vsel %vm3855_vm2, %v3848_v11, 920167782  ;;  %v3864_v45 = vsel %vm3852_vm4, %v3842_v20, %v3845_v21  ;;  %v14517_v57 = vand.u32 2147483647, %v8716_v18 }
  0xa8   : > { %v3866_v47 = vsel %vm3854_vm5, %v3848_v11, %v3865_v26  ;;  %v3860_v51 = vsel %vm3852_vm4, %v3839_v24, %v3842_v20  ;;  %v3862_v53 = vsel %vm3854_vm5, %v3845_v21, %v3861_v32  ;;  %v2294_v59 = vadd.s32 1, %v8107_v25 }
  0xa9   : > { %vm3853_vm6 = vcmp.lt.s32.totalorder %v8701_v55, 2  ;;  %v3857_v60 = vsel %vm3855_vm2, %v3845_v21, 2102212464  ;;  %v6894_v61 = vand.u32 2139095040, %v8729_v36  ;;  %v3836_v63 = vshrl.u32 %v14518_v15, %v8657_v30 }
  0xaa   : > { %v3867_v1 = vsel %vm3853_vm6, %v3864_v45, %v3866_v47  ;;  %v2938_v8 = vand.u32 31, %v2936_v50  ;;  %v2607_v7 = vand.u32 2139095040, %v8716_v18  ;;  %v3863_v10 = vsel %vm3853_vm6, %v3860_v51, %v3862_v53 }
  0xab   : > { %v8757_v11 = vshll.u32 %v3828_v44, 8  ;;  %v8760_v12 = vsub.s32 32, %v8737_v49  ;;  %v3856_v13 = vsel %vm3852_vm4, %v3836_v63, %v3839_v24  ;;  %v3858_v30 = vsel %vm3854_vm5, %v3842_v20, %v3857_v60 }
  0xac   : > { %v5363_v16 = vor.u32 8388608, %v5362_v54  ;;  %v14514_v21 = vand.u32 2147483647, %v8729_v36  ;;  %vm2295_vm8 = vcmp.gt.s32.totalorder %v2294_v59, 0  ;;  %v6895_v32 = vshrl.u32 %v6894_v61, 23 }
  0xad   : > { %v8768_v26 = vmul.u32.u64.low %v8757_v11, %v3867_v1  ;;  %v8769_v25 = vmul.u32.u64.high %v8757_v11, %v3867_v1, %v8768_v26  ;;  %v8771_v44 = vsel %vm751_vm7, %v750_v42, 0  ;;  %v8778_v24 = vsub.s32 32, %v2938_v8 }
  0xae   : > { %v8774_v45 = vmul.u32.u64.low %v8757_v11, %v3863_v10  ;;  %v8775_v47 = vmul.u32.u64.high %v8757_v11, %v3863_v10, %v8774_v45  ;;  %v3859_v20 = vsel %vm3853_vm6, %v3856_v13, %v3858_v30  ;;  %v5373_v51 = vshrl.u32 %v14538_v62, %v8760_v12 }
  0xaf   : > { %v2608_v53 = vshrl.u32 %v2607_v7, 23  ;;  %v8786_v54 = vand.u32 8388607, %v14517_v57  ;;  %v8788_v42 = vsel %vm2295_vm8, %v2294_v59, 0  ;;  %v8790_v60 = vshll.u32 %v5363_v16, 8 }
  0xb0   : > { %v8794_v61 = vand.u32 8388607, %v14514_v21  ;;  %v1386_v55 = vadd.f32 %v8637_v14, %v8608_v2  ;;  %v8799_v63 = vshrl.u32 %v8771_v44, 5  ;;  %v8801_v1 = vshrl.u32 %v5367_v27, 5 }
  0xb1   : > { %14744 = vst [vmem:[#allocation23_spill] sm:$0xff] %v8790_v60  ;;  %v5372_v7 = vshll.u32 %v14518_v15, %v8737_v49  ;;  %v8167_v10 = vadd.s32 4294967169, %v6895_v32  ;;  %v3875_v59 = vmul.u32 %v8757_v11, %v3859_v20  ;;  %v5375_v13 = vshll.u32 %v14538_v62, %v8737_v49 }
  0xb2   : > { %14745 = vst [vmem:[#allocation24_spill] sm:$0xff] %v8794_v61  ;;  %v5376_v30 = vshrl.u32 %v14536_v56, %v8760_v12  ;;  %v2951_v2 = vshrl.u32 %v14528_v48, %v8778_v24  ;;  %v5379_v27 = vshrl.u32 %v14526_v58, %v8760_v12  ;;  %v5381_v26 = vshll.u32 %v14526_v58, %v8737_v49 }
  0xb3   : > { %v8812_v16 = vor.u32 %v5373_v51, %v5372_v7  ;;  %v2954_v11 = vshrl.u32 %v14534_v43, %v8778_v24  ;;  %v5382_v32 = vshrl.u32 %v14528_v48, %v8760_v12  ;;  %v8823_v21 = vshrl.u32 %v2936_v50, 5 }
  0xb4   : > { %v2950_v22 = vshll.u32 %v14526_v58, %v2938_v8  ;;  %v2942_v51 = vshrl.u32 %v14538_v62, %v8778_v24  ;;  %v2945_v7 = vshrl.u32 %v14536_v56, %v8778_v24  ;;  %v2948_v52 = vshrl.u32 %v14526_v58, %v8778_v24 }
  0xb5   : > { %v2953_v57 = vshll.u32 %v14528_v48, %v2938_v8  ;;  %vm3877_vm9 = vc.u32 %v8769_v25, %v8774_v45  ;;  %v3878_v20 = vadd.s32 1, %v8775_v47  ;;  %v5385_v50 = vshrl.u32 %v14534_v43, %v8760_v12 }
  0xb6   : > { %v2952_v15 = vor.u32 %v2951_v2, %v2950_v22  ;;  %v14746_v36 = vmov 683565275   ;;  %v2944_v5 = vshll.u32 %v14538_v62, %v2938_v8  ;;  %v2947_v17 = vshll.u32 %v14536_v56, %v2938_v8 }
  0xb7   : > { %v2941_v23 = vshll.u32 %v14746_v36, %v2938_v8  ;;  %v2955_v38 = vor.u32 %v2954_v11, %v2953_v57  ;;  %v5378_v58 = vshll.u32 %v14536_v56, %v8737_v49  ;;  %v5383_v48 = vor.u32 %v5382_v32, %v5381_v26 }
  0xb8   : > { %v5384_v37 = vshll.u32 %v14747_v46, %v8737_v49  ;;  %v2946_v43 = vor.u32 %v2945_v7, %v2944_v5  ;;  %v2949_v22 = vor.u32 %v2948_v52, %v2947_v17  ;;  %vm2959_vm10 = vcmp.lt.s32.totalorder %v8823_v21, 4 }
  0xb9   : > { %v2943_v4 = vor.u32 %v2942_v51, %v2941_v23  ;;  %v3879_v57 = vsel %vm3877_vm9, %v3878_v20, %v8775_v47  ;;  %v5377_v8 = vor.u32 %v5376_v30, %v5375_v13  ;;  %v2965_v2 = vsel %vm2959_vm10, %v2952_v15, 920167782 }
  0xba   : > { %v4457_v49 = vadd.f32 %v8637_v14, %v8618_v3  ;;  %v5380_v26 = vor.u32 %v5379_v27, %v5378_v58  ;;  %v5386_v11 = vor.u32 %v5385_v50, %v5384_v37  ;;  %vm5390_vm11 = vcmp.lt.s32.totalorder %v8801_v1, 4 }
  0xbb   : > { %v2969_v5 = vsel %vm2959_vm10, %v2955_v38, 1326507024  ;;  %v5396_v17 = vsel %vm5390_vm11, %v5383_v48, 920167782  ;;  %vm2956_vm12 = vcmp.lt.s32.totalorder %v8823_v21, 1  ;;  %vm2958_vm13 = vcmp.lt.s32.totalorder %v8823_v21, 3 }
  0xbc   : > { %v8111_v23 = vadd.s32 4294967169, %v2608_v53  ;;  %v8863_v41 = vadd.s32 %v3879_v57, %v3875_v59  ;;  %v2932_v52 = vor.u32 8388608, %v2931_v9  ;;  %v2964_v58 = vsel %vm2956_vm12, %v2943_v4, %v2946_v43 }
  0xbd   : > { %v2966_v37 = vsel %vm2958_vm13, %v2949_v22, %v2965_v2  ;;  %v8870_v47 = vsub.f32 %v1386_v55, %v8629_v6  ;;  %v2968_v38 = vsel %vm2956_vm12, %v2946_v43, %v2949_v22  ;;  %v2970_v13 = vsel %vm2958_vm13, %v2952_v15, %v2969_v5 }
  0xbe   : > { %v8877_v53 = vsub.f32 %v4457_v49, %v8629_v6  ;;  %v5371_v9 = vshrl.u32 %v14746_v36, %v8760_v12  ;;  %vm5387_vm14 = vcmp.lt.s32.totalorder %v8801_v1, 1  ;;  %v6901_v59 = vadd.s32 1, %v8167_v10 }
  0xbf   : > { %vm2957_vm15 = vcmp.lt.s32.totalorder %v8823_v21, 2  ;;  %vm5389_vm0 = vcmp.lt.s32.totalorder %v8801_v1, 3  ;;  %v5395_v55 = vsel %vm5387_vm14, %v8812_v16, %v5377_v8  ;;  %v2614_v30 = vadd.s32 1, %v8111_v23 }
  0xc0   : > { %14749 = vst [vmem:[#allocation25_spill] sm:$0xff] %v8877_v53  ;;  %v2967_v15 = vsel %vm2957_vm15, %v2964_v58, %v2966_v37  ;;  %v5392_v27 = vsel %vm5390_vm11, %v5380_v26, 2102212464  ;;  %v5397_v12 = vsel %vm5389_vm0, %v5380_v26, %v5396_v17  ;;  %v2971_v10 = vsel %vm2957_vm15, %v2968_v38, %v2970_v13 }
  0xc1   : > { %v8895_v32 = vshll.u32 %v2932_v52, 8  ;;  %v3881_v20 = vadd.s32 536870912, %v8863_v41  ;;  %v5400_v51 = vsel %vm5390_vm11, %v5386_v11, 1326507024  ;;  %v1391_v7 = vand.u32 2139095040, %v8870_v47 }
  0xc2   : > { %v4462_v50 = vand.u32 2139095040, %v8877_v53  ;;  %vm5388_vm1 = vcmp.lt.s32.totalorder %v8801_v1, 2  ;;  %v5391_v57 = vsel %vm5387_vm14, %v5371_v9, %v8812_v16  ;;  %v5399_v5 = vsel %vm5387_vm14, %v5377_v8, %v5380_v26 }
  0xc3   : > { %v8907_v2 = vmul.u32.u64.low %v8895_v32, %v2967_v15  ;;  %v8908_v49 = vmul.u32.u64.high %v8895_v32, %v2967_v15, %v8907_v2  ;;  %v8914_v11 = vmul.u32.u64.low %v8895_v32, %v2971_v10  ;;  %v8915_v17 = vmul.u32.u64.high %v8895_v32, %v2971_v10, %v8914_v11 }
  0xc4   : > { %vm2615_vm2 = vcmp.gt.s32.totalorder %v2614_v30, 0  ;;  %v5393_v23 = vsel %vm5389_vm0, %v5377_v8, %v5392_v27  ;;  %v8921_v52 = vsel %vm5388_vm1, %v5395_v55, %v5397_v12  ;;  %v5401_v16 = vsel %vm5389_vm0, %v5383_v48, %v5400_v51 }
  0xc5   : > { %14750 = vst [vmem:[#allocation26_spill] sm:$0xff] %v8907_v2  ;;  %14751 = vst [vmem:[#allocation27_spill] sm:$0xff] %v8915_v17  ;;  %v2961_v58 = vsel %vm2959_vm10, %v2949_v22, 2102212464  ;;  %v8927_v37 = vshrl.u32 %v3881_v20, 30  ;;  %v1392_v26 = vshrl.u32 %v1391_v7, 23  ;;  %v2940_v38 = vshrl.u32 %v14746_v36, %v8778_v24 }
  0xc6   : > { %v4463_v13 = vshrl.u32 %v4462_v50, 23  ;;  %v8932_v9 = vand.u32 31, %v8771_v44  ;;  %v8935_v8 = vshrl.u32 %v8788_v42, 5  ;;  %v8938_v55 = vand.u32 31, %v8788_v42 }
  0xc7   : > { %14752 = vst [vmem:[#allocation28_spill] sm:$0xff] %v8927_v37  ;;  %v2616_v48 = vsel %vm2615_vm2, %v2614_v30, 0  ;;  %v8942_v22 = vsel %vm5388_vm1, %v5391_v57, %v5393_v23  ;;  %v2960_v24 = vsel %vm2956_vm12, %v2940_v38, %v2943_v4  ;;  %v2962_v44 = vsel %vm2958_vm13, %v2946_v43, %v2961_v58 }
  0xc8   : > { %14753 = vst [vmem:[#allocation29_spill] sm:$0xff] %v8935_v8  ;;  %14754 = vst [vmem:[#allocation30_spill] sm:$0xff] %v8938_v55  ;;  %v8951_v27 = vsel %vm5388_vm1, %v5399_v5, %v5401_v16  ;;  %v8955_v42 = vmul.u32.u64.low %v8790_v60, %v8921_v52  ;;  %v8956_v30 = vmul.u32.u64.high %v8790_v60, %v8921_v52, %v8955_v42  ;;  %v2618_v12 = vand.u32 31, %v2616_v48 }
  0xc9   : > { %14755 = vst [vmem:[#allocation31_spill] sm:$0xff] %v8942_v22  ;;  %v3883_v10 = vshll.u32 %v8927_v37, 30  ;;  %vm6902_vm3 = vcmp.gt.s32.totalorder %v6901_v59, 0  ;;  %v8095_v20 = vadd.s32 4294967169, %v1392_v26  ;;  %v8135_v51 = vadd.s32 4294967169, %v4463_v13 }
  0xca   : > { %14756 = vst [vmem:[#allocation32_spill] sm:$0xff] %v8955_v42  ;;  %v8961_v4 = vsub.s32 32, %v8932_v9  ;;  %v2963_v43 = vsel %vm2957_vm15, %v2960_v24, %v2962_v44  ;;  %v2982_v1 = vadd.s32 1, %v8908_v49  ;;  %v2619_v7 = vsub.s32 32, %v2618_v12 }
  0xcb   : > { %v8967_v50 = vsub.s32 32, %v8938_v55  ;;  %v8971_v57 = vmul.u32.u64.low %v8790_v60, %v8951_v27  ;;  %v8972_v5 = vmul.u32.u64.high %v8790_v60, %v8951_v27, %v8971_v57  ;;  %vm2981_vm4 = vc.u32 %v8915_v17, %v8907_v2 }
  0xcc   : > { %v8978_v11 = vadd.s32 %v8774_v45, %v8769_v25  ;;  %v6903_v23 = vsel %vm6902_vm3, %v6901_v59, 0  ;;  %v2622_v52 = vshrl.u32 %v14538_v62, %v2619_v7  ;;  %v8984_v16 = vsub.s32 %v8863_v41, %v3883_v10 }
  0xcd   : > { %14757 = vst [vmem:[#allocation33_spill] sm:$0xff] %v8967_v50  ;;  %14758 = vst [vmem:[#allocation34_spill] sm:$0xff] %v8972_v5  ;;  %v1398_v58 = vadd.s32 1, %v8095_v20  ;;  %v2979_v26 = vmul.u32 %v8895_v32, %v2963_v43  ;;  %v4469_v38 = vadd.s32 1, %v8135_v51  ;;  %v2983_v13 = vsel %vm2981_vm4, %v2982_v1, %v8908_v49 }
  0xce   : > { %14759 = vst [vmem:[#allocation35_spill] sm:$0xff] %v8978_v11  ;;  %14760 = vst [vmem:[#allocation36_spill] sm:$0xff] %v8984_v16  ;;  %v2621_v24 = vshll.u32 %v14746_v36, %v2618_v12  ;;  %v2624_v25 = vshll.u32 %v14538_v62, %v2618_v12  ;;  %v2625_v45 = vshrl.u32 %v14536_v56, %v2619_v7  ;;  %v2612_v44 = vor.u32 8388608, %v8786_v54 }
  0xcf   : > { %v2617_v59 = vshrl.u32 %v2616_v48, 5  ;;  %v2627_v27 = vshll.u32 %v14536_v56, %v2618_v12  ;;  %v14761_v57 = vmov 2102212464   ;;  %v2631_v51 = vshrl.u32 %v14747_v46, %v2619_v7 }
  0xd0   : > { %v2628_v41 = vshrl.u32 %v14761_v57, %v2619_v7  ;;  %v2623_v10 = vor.u32 %v2622_v52, %v2621_v24  ;;  %v2626_v20 = vor.u32 %v2625_v45, %v2624_v25  ;;  %v2630_v32 = vshll.u32 %v14761_v57, %v2618_v12 }
  0xd1   : > { %vm4470_vm5 = vcmp.gt.s32.totalorder %v4469_v38, 0  ;;  %v2633_v43 = vshll.u32 %v14747_v46, %v2618_v12  ;;  %v14762_v1 = vmov 1326507024   ;;  %v3886_v21 = vsub.s32 0, %v8984_v16 }
  0xd2   : > { %v2629_v49 = vor.u32 %v2628_v41, %v2627_v27  ;;  %v2634_v15 = vshrl.u32 %v14762_v1, %v2619_v7  ;;  %vm1399_vm6 = vcmp.gt.s32.totalorder %v1398_v58, 0  ;;  %v2632_v48 = vor.u32 %v2631_v51, %v2630_v32 }
  0xd3   : > { %v9000_v56 = vadd.s32 %v2983_v13, %v2979_v26  ;;  %vm2636_vm7 = vcmp.lt.s32.totalorder %v2617_v59, 1  ;;  %vm2639_vm8 = vcmp.lt.s32.totalorder %v2617_v59, 4  ;;  %v4471_v24 = vsel %vm4470_vm5, %v4469_v38, 0 }
  0xd4   : > { %v2635_v52 = vor.u32 %v2634_v15, %v2633_v43  ;;  %v2641_v25 = vsel %vm2639_vm8, %v2629_v49, 2102212464  ;;  %v2644_v45 = vsel %vm2636_vm7, %v2623_v10, %v2626_v20  ;;  %v2652_v62 = vshll.u32 %v2612_v44, 8 }
  0xd5   : > { %v2620_v27 = vshrl.u32 %v14746_v36, %v2619_v7  ;;  %vm2638_vm9 = vcmp.lt.s32.totalorder %v2617_v59, 3  ;;  %v2645_v12 = vsel %vm2639_vm8, %v2632_v48, 920167782  ;;  %v2648_v41 = vsel %vm2636_vm7, %v2626_v20, %v2629_v49 }
  0xd6   : > { %vm2637_vm10 = vcmp.lt.s32.totalorder %v2617_v59, 2  ;;  %v2646_v37 = vsel %vm2638_vm9, %v2629_v49, %v2645_v12  ;;  %v2649_v61 = vsel %vm2639_vm8, %v2635_v52, 1326507024  ;;  %v9005_v32 = vsub.f32 %v8724_v31, %v8629_v6 }
  0xd7   : > { %v2640_v26 = vsel %vm2636_vm7, %v2620_v27, %v2623_v10  ;;  %v2642_v15 = vsel %vm2638_vm9, %v2626_v20, %v2641_v25  ;;  %v2647_v13 = vsel %vm2637_vm10, %v2644_v45, %v2646_v37  ;;  %v2650_v38 = vsel %vm2638_vm9, %v2632_v48, %v2649_v61 }
  0xd8   : > { %v8128_v51 = vmin.u32 %v3886_v21, %v8984_v16  ;;  %v2651_v44 = vsel %vm2637_vm10, %v2648_v41, %v2650_v38  ;;  %v9010_v7 = vmul.u32.u64.low %v2652_v62, %v2647_v13  ;;  %v9011_v43 = vmul.u32.u64.high %v2652_v62, %v2647_v13, %v9010_v7 }
  0xd9   : > { %v9014_v54 = vand.u32 31, %v6903_v23  ;;  %v14764_v49 = vand.u32 2147483647, %v8877_v53  ;;  %v9018_v31 = vmul.u32.u64.low %v2652_v62, %v2651_v44  ;;  %v9019_v12 = vmul.u32.u64.high %v2652_v62, %v2651_v44, %v9018_v31 }
  0xda   : > { %v1400_v10 = vsel %vm1399_vm6, %v1398_v58, 0  ;;  %v4473_v37 = vand.u32 31, %v4471_v24  ;;  %v2643_v61 = vsel %vm2637_vm10, %v2640_v26, %v2642_v15  ;;  %v1066_v21 = vand.u32 2139095040, %v9005_v32 }
  0xdb   : > { %14763 = vst [vmem:[#allocation37_spill] sm:$0xff] %v9014_v54  ;;  %v4466_v52 = vand.u32 8388607, %v14764_v49  ;;  %v5413_v20 = vadd.s32 1, %v8956_v30  ;;  %v9025_v48 = vshrl.u32 %v6903_v23, 5  ;;  %v2985_v25 = vadd.s32 536870912, %v9000_v56 }
  0xdc   : > { %v9030_v45 = vadd.f32 %v8637_v14, %v8604_v0  ;;  %v3888_v27 = vclz %v8128_v51  ;;  %vm5412_vm11 = vc.u32 %v8972_v5, %v8955_v42  ;;  %v2662_v58 = vadd.s32 1, %v9011_v43 }
  0xdd   : > { %14765 = vst [vmem:[#allocation38_spill] sm:$0xff] %v9025_v48  ;;  %v1067_v59 = vshrl.u32 %v1066_v21, 23  ;;  %v9035_v41 = vand.u32 31, %v1400_v10  ;;  %v4467_v26 = vor.u32 8388608, %v4466_v52  ;;  %v2659_v15 = vmul.u32 %v2652_v62, %v2643_v61 }
  0xde   : > { %14766 = vst [vmem:[#allocation39_spill] sm:$0xff] %v9030_v45  ;;  %vm2661_vm12 = vc.u32 %v9019_v12, %v9010_v7  ;;  %v9040_v23 = vsub.s32 32, %v9014_v54  ;;  %v9042_v13 = vsub.s32 32, %v4473_v37  ;;  %v9047_v51 = vshll.u32 %v14746_v36, %v9014_v54 }
  0xdf   : > { %v2663_v0 = vsel %vm2661_vm12, %v2662_v58, %v9011_v43  ;;  %v8091_v38 = vadd.s32 4294967169, %v1067_v59  ;;  %v14770_v44 = vmov 2475754826   ;;  %v9053_v62 = vshrl.u32 %v2985_v25, 30 }
  0xe0   : > { %14767 = vst [vmem:[#allocation40_spill] sm:$0xff] %v9040_v23  ;;  %14768 = vst [vmem:[#allocation41_spill] sm:$0xff] %v9042_v13  ;;  %v9051_v49 = vshll.u32 %v14770_v44, %v9014_v54  ;;  %v2664_v52 = vadd.s32 %v2663_v0, %v2659_v15  ;;  %v9055_v31 = vadd.s32 4294967294, %v3888_v27  ;;  %v9061_v61 = vsel %vm5412_vm11, %v5413_v20, %v8956_v30 }
  0xe1   : > { %14769 = vst [vmem:[#allocation42_spill] sm:$0xff] %v9047_v51  ;;  %14772 = vst [vmem:[#allocation44_spill] sm:$0xff] %v9053_v62  ;;  %v1073_v43 = vadd.s32 1, %v8091_v38  ;;  %v9065_v21 = vsub.f32 %v8679_v39, %v8629_v6  ;;  %v9067_v58 = vshrl.u32 %v1400_v10, 5  ;;  %v9070_v59 = vsub.s32 32, %v9035_v41 }
  0xe2   : > { %14771 = vst [vmem:[#allocation43_spill] sm:$0xff] %v9051_v49  ;;  %14773 = vst [vmem:[#allocation45_spill] sm:$0xff] %v9055_v31  ;;  %v9072_v25 = vshll.u32 %v4467_v26, 8  ;;  %v2665_v27 = vadd.s32 536870912, %v2664_v52  ;;  %v9074_v15 = vshrl.u32 %v4471_v24, 5  ;;  %v4477_v0 = vshrl.u32 %v14770_v44, %v9042_v13 }
  0xe3   : > { %14774 = vst [vmem:[#allocation46_spill] sm:$0xff] %v9061_v61  ;;  %v14776_v30 = vmov 2131351028   ;;  %vm1074_vm13 = vcmp.gt.s32.totalorder %v1073_v43, 0  ;;  %v2987_v39 = vshll.u32 %v9053_v62, 30  ;;  %v4483_v10 = vshrl.u32 %v14761_v57, %v9042_v13 }
  0xe4   : > { %14775 = vst [vmem:[#allocation47_spill] sm:$0xff] %v9072_v25  ;;  %v4480_v20 = vshrl.u32 %v14776_v30, %v9042_v13  ;;  %v9083_v38 = vshrl.u32 %v2665_v27, 30  ;;  %v1075_v42 = vsel %vm1074_vm13, %v1073_v43, 0  ;;  %v4486_v26 = vshrl.u32 %v14747_v46, %v9042_v13 }
  0xe5   : > { %v1077_v5 = vand.u32 31, %v1075_v42  ;;  %v157_v53 = vand.u32 2139095040, %v9065_v21  ;;  %v4476_v14 = vshll.u32 %v14746_v36, %v4473_v37  ;;  %v4479_v35 = vshll.u32 %v14770_v44, %v4473_v37 }
  0xe6   : > { %v4482_v62 = vshll.u32 %v14776_v30, %v4473_v37  ;;  %v2667_v3 = vshll.u32 %v9083_v38, 30  ;;  %v4485_v27 = vshll.u32 %v14761_v57, %v4473_v37  ;;  %v9095_v43 = vshll.u32 %v14747_v46, %v4473_v37 }
  0xe7   : > { %v9099_v11 = vshrl.u32 %v14762_v1, %v9042_v13  ;;  %v1078_v24 = vsub.s32 32, %v1077_v5  ;;  %v9101_v16 = vor.u32 %v4477_v0, %v4476_v14  ;;  %v9103_v45 = vor.u32 %v4480_v20, %v4479_v35 }
  0xe8   : > { %v9105_v48 = vor.u32 %v4483_v10, %v4482_v62  ;;  %v2668_v19 = vsub.s32 %v2664_v52, %v2667_v3  ;;  %v9108_v49 = vsub.s32 %v9000_v56, %v2987_v39  ;;  %v9110_v51 = vor.u32 %v4486_v26, %v4485_v27 }
  0xe9   : > { %14777 = vst [vmem:[#allocation48_spill] sm:$0xff] %v9101_v16  ;;  %v14778_v37 = vand.u32 2147483647, %v9005_v32  ;;  %v158_v22 = vshrl.u32 %v157_v53, 23  ;;  %v1080_v31 = vshll.u32 %v14746_v36, %v1077_v5  ;;  %v1081_v14 = vshrl.u32 %v14770_v44, %v1078_v24 }
  0xea   : > { %v2670_v60 = vsub.s32 0, %v2668_v19  ;;  %v1084_v35 = vshrl.u32 %v14776_v30, %v1078_v24  ;;  %v1083_v62 = vshll.u32 %v14770_v44, %v1077_v5  ;;  %v1086_v3 = vshll.u32 %v14776_v30, %v1077_v5 }
  0xeb   : > { %v1070_v61 = vand.u32 8388607, %v14778_v37  ;;  %v1087_v56 = vshrl.u32 %v14761_v57, %v1078_v24  ;;  %v1090_v52 = vshrl.u32 %v14747_v46, %v1078_v24  ;;  %v1076_v53 = vshrl.u32 %v1075_v42, 5 }
  0xec   : > { %v8112_v20 = vmin.u32 %v2670_v60, %v2668_v19  ;;  %v1089_v39 = vshll.u32 %v14761_v57, %v1077_v5  ;;  %v1082_v10 = vor.u32 %v1081_v14, %v1080_v31  ;;  %v1085_v26 = vor.u32 %v1084_v35, %v1083_v62 }
  0xed   : > { %v1088_v27 = vor.u32 %v1087_v56, %v1086_v3  ;;  %v267_v37 = vlaneseq  ;;  %v1093_v2 = vshrl.u32 %v14762_v1, %v1078_v24  ;;  %v2660_v17 = vadd.s32 %v9010_v7, %v9019_v12 }
  0xee   : > { %v2672_v54 = vclz %v8112_v20  ;;  %v1091_v23 = vor.u32 %v1090_v52, %v1089_v39  ;;  %v1071_v13 = vor.u32 8388608, %v1070_v61  ;;  %v1092_v8 = vshll.u32 %v14747_v46, %v1077_v5 }
  0xef   : > { %v8079_v50 = vadd.s32 4294967169, %v158_v22  ;;  %vm4491_vm14 = vcmp.lt.s32.totalorder %v9074_v15, 1  ;;  %vm1095_vm15 = vcmp.lt.s32.totalorder %v1076_v53, 1  ;;  %vm1097_vm0 = vcmp.lt.s32.totalorder %v1076_v53, 3 }
  0xf0   : > { %v8113_v60 = vadd.s32 4294967294, %v2672_v54  ;;  %vm1098_vm1 = vcmp.lt.s32.totalorder %v1076_v53, 4  ;;  %v1094_v42 = vor.u32 %v1093_v2, %v1092_v8  ;;  %v1103_v14 = vsel %vm1095_vm15, %v1082_v10, %v1085_v26 }
  0xf1   : > { %v1100_v31 = vsel %vm1098_vm1, %v1088_v27, 2102212464  ;;  %v1104_v35 = vsel %vm1098_vm1, %v1091_v23, 920167782  ;;  %v1079_v7 = vshrl.u32 %v14746_v36, %v1078_v24  ;;  %vm1096_vm3 = vcmp.lt.s32.totalorder %v1076_v53, 2 }
  0xf2   : > { %vm8114_vm2 = vcmp.lt.s32.totalorder %v8113_v60, 0  ;;  %v1105_v5 = vsel %vm1097_vm0, %v1088_v27, %v1104_v35  ;;  %v1111_v54 = vshll.u32 %v1071_v13, 8  ;;  %v164_v61 = vadd.s32 1, %v8079_v50 }
  0xf3   : > { %v2675_v22 = vsel %vm8114_vm2, 0, %v8113_v60  ;;  %v1106_v12 = vsel %vm1096_vm3, %v1103_v14, %v1105_v5  ;;  %v1099_v2 = vsel %vm1095_vm15, %v1079_v7, %v1082_v10  ;;  %v1101_v8 = vsel %vm1097_vm0, %v1085_v26, %v1100_v31 }
  0xf4   : > { %v2676_v62 = vsub.s32 32, %v2675_v22  ;;  %v2680_v3 = vsub.s32 4294967266, %v2675_v22  ;;  %v1107_v56 = vsel %vm1095_vm15, %v1085_v26, %v1088_v27  ;;  %v1108_v52 = vsel %vm1098_vm1, %v1094_v42, 1326507024 }
  0xf5   : > { %v9139_v20 = vmul.u32.u64.low %v1111_v54, %v1106_v12  ;;  %v9140_v24 = vmul.u32.u64.high %v1111_v54, %v1106_v12, %v9139_v20  ;;  %v2677_v39 = vshll.u32 %v2668_v19, %v2675_v22  ;;  %v1109_v13 = vsel %vm1097_vm0, %v1091_v23, %v1108_v52 }
  0xf6   : > { %v2678_v60 = vshrl.u32 %v2660_v17, %v2676_v62  ;;  %v2681_v35 = vadd.s32 127, %v2680_v3  ;;  %v1102_v50 = vsel %vm1096_vm3, %v1099_v2, %v1101_v8  ;;  %v1110_v14 = vsel %vm1096_vm3, %v1107_v56, %v1109_v13 }
  0xf7   : > { %v14568_v10 = vand.u32 2147483647, %v9065_v21  ;;  %vm165_vm4 = vcmp.gt.s32.totalorder %v164_v61, 0  ;;  %v9147_v27 = vmul.u32.u64.low %v1111_v54, %v1110_v14  ;;  %v9148_v42 = vmul.u32.u64.high %v1111_v54, %v1110_v14, %v9147_v27 }
  0xf8   : > { %v2679_v31 = vor.u32 %v2678_v60, %v2677_v39  ;;  %v2682_v26 = vshll.u32 %v2681_v35, 23  ;;  %v9154_v19 = vsel %vm4491_vm14, %v9101_v16, %v9103_v45  ;;  %vm2606_vm5 = vcmp.lt.s32.totalorder %v8716_v18, 0 }
  0xf9   : > { %v1121_v17 = vadd.s32 1, %v9140_v24  ;;  %v166_v23 = vsel %vm165_vm4, %v164_v61, 0  ;;  %v9160_v53 = vsub.f32 %v8661_v33, %v8629_v6  ;;  %v8532_v5 = vmov 1966171168  }
  0xfa   : > { %v9163_v22 = vunpack.c.l.s4 %v8532_v5  ;;  %v14779_v12 = vand.u32 2147483647, %v8716_v18  ;;  %v2683_v3 = vor.u32 4788187, %v2682_v26  ;;  %v168_v2 = vand.u32 31, %v166_v23 }
  0xfb   : > { %v9171_v8 = vshrl.u32 %v267_v37, 7  ;;  %v2690_v61 = vsub.s32 4, %v9083_v38  ;;  %v1118_v56 = vmul.u32 %v1111_v54, %v1102_v50  ;;  %v161_v33 = vand.u32 8388607, %v14568_v10 }
  0xfc   : > { %vm9167_vm6 = vcmp.le.f32.partialorder %v14779_v12, 0.7853982  ;;  %v2684_v52 = vand.u32 2147483647, %v2683_v3  ;;  %v2686_v39 = vcvt.s32.f32 %v2679_v31  ;;  %vm1120_vm7 = vc.u32 %v9148_v42, %v9139_v20 }
  0xfd   : > { %v169_v60 = vsub.s32 32, %v168_v2  ;;  %v1122_v35 = vsel %vm1120_vm7, %v1121_v17, %v9140_v24  ;;  %v9179_v13 = vshrl.u32 %v166_v23, 5  ;;  %v171_v14 = vshll.u32 %v14746_v36, %v168_v2 }
  0xfe   : > { %v418_v37 = vand.u32 2139095040, %v9160_v53  ;;  %v2687_v26 = vmul.f32 %v2686_v39, %v2684_v52  ;;  %v1123_v27 = vadd.s32 %v1122_v35, %v1118_v56  ;;  %v174_v50 = vshll.u32 %v14770_v44, %v168_v2 }
  0xff   : > { %v172_v54 = vshrl.u32 %v14770_v44, %v169_v60  ;;  %v175_v31 = vshrl.u32 %v14776_v30, %v169_v60  ;;  %v178_v5 = vshrl.u32 %v14761_v57, %v169_v60  ;;  %v180_v12 = vshll.u32 %v14761_v57, %v168_v2 }
 0x100   : > { %v181_v24 = vshrl.u32 %v14747_v46, %v169_v60  ;;  %v2688_v17 = vxor.u32 2147483648, %v2687_v26  ;;  %v1124_v23 = vadd.s32 536870912, %v1123_v27  ;;  %v162_v3 = vor.u32 8388608, %v161_v33 }
 0x101   : > { %v177_v7 = vshll.u32 %v14776_v30, %v168_v2  ;;  %vm4494_vm8 = vcmp.lt.s32.totalorder %v9074_v15, 4  ;;  %v173_v56 = vor.u32 %v172_v54, %v171_v14  ;;  %v176_v52 = vor.u32 %v175_v31, %v174_v50 }
 0x102   : > { %v182_v39 = vor.u32 %v181_v24, %v180_v12  ;;  %v184_v35 = vshrl.u32 %v14762_v1, %v169_v60  ;;  %v2689_v0 = vsel %vm2606_vm5, %v2688_v17, %v2687_v26  ;;  %v1125_v10 = vshrl.u32 %v1124_v23, 30 }
 0x103   : > { %v179_v16 = vor.u32 %v178_v5, %v177_v7  ;;  %v183_v55 = vshll.u32 %v14747_v46, %v168_v2  ;;  %v2691_v33 = vsel %vm2606_vm5, %v2690_v61, %v9083_v38  ;;  %v2692_v25 = vsel %vm9167_vm6, %v8716_v18, %v2689_v0 }
 0x104   : > { %vm186_vm9 = vcmp.lt.s32.totalorder %v9179_v13, 1  ;;  %v419_v14 = vshrl.u32 %v418_v37, 23  ;;  %8341 = vcosq.f32 %v2692_v25  ;;  %v1126_v54 = vshll.u32 %v1125_v10, 30 }
 0x105   : > { %v185_v50 = vor.u32 %v184_v35, %v183_v55  ;;  %vm189_vm10 = vcmp.lt.s32.totalorder %v9179_v13, 4  ;;  %8343 = vsinq.f32 %v2692_v25  ;;  %vm188_vm11 = vcmp.lt.s32.totalorder %v9179_v13, 3 }
 0x106   : > { %v194_v7 = vsel %vm186_vm9, %v173_v56, %v176_v52  ;;  %v195_v38 = vsel %vm189_vm10, %v182_v39, 920167782  ;;  %v266_v2 = vunpack.c.0.s8 %v9163_v22  ;;  %v9209_v0 = vsub.s32 %v1123_v27, %v1126_v54 }
 0x107   : > { %vm187_vm12 = vcmp.lt.s32.totalorder %v9179_v13, 2  ;;  %v196_v55 = vsel %vm188_vm11, %v179_v16, %v195_v38  ;;  %v2693_v25 = vsel %vm9167_vm6, 0, %v2691_v33  ;;  %v170_v61 = vshrl.u32 %v14746_v36, %v169_v60 }
 0x108   : > { %v197_v37 = vsel %vm187_vm12, %v194_v7, %v196_v55  ;;  %v202_v26 = vshll.u32 %v162_v3, 8  ;;  %v1129_v31 = vsub.s32 0, %v9209_v0  ;;  %v191_v22 = vsel %vm189_vm10, %v179_v16, 2102212464 }
 0x109   : > { %v198_v27 = vsel %vm186_vm9, %v176_v52, %v179_v16  ;;  %v199_v5 = vsel %vm189_vm10, %v185_v50, 1326507024  ;;  %v8083_v24 = vadd.s32 4294967169, %v419_v14  ;;  %v9235_v17 = vsel %vm4494_vm8, %v9110_v51, 920167782 }
 0x10a   : > { %v200_v62 = vsel %vm188_vm11, %v182_v39, %v199_v5  ;;  %v9228_v12 = vmul.u32.u64.low %v202_v26, %v197_v37  ;;  %v9229_v60 = vmul.u32.u64.high %v202_v26, %v197_v37, %v9228_v12  ;;  %v9238_v23 = vsub.s32 %v266_v2, %v9171_v8 }
 0x10b   : > { %v2697_v16 = vand.u32 3, %v2693_v25  ;;  %v8092_v3 = vmin.u32 %v1129_v31, %v9209_v0  ;;  %v190_v35 = vsel %vm186_vm9, %v170_v61, %v173_v56  ;;  %v192_v39 = vsel %vm188_vm11, %v176_v52, %v191_v22 }
 0x10c   : > { %14782 = vst [vmem:[#allocation49_spill] sm:$0xff] %v9238_v23  ;;  %v201_v33 = vsel %vm187_vm12, %v198_v27, %v200_v62  ;;  %v425_v14 = vadd.s32 1, %v8083_v24  ;;  %v1149_v50 = vsub.s32 4, %v1125_v10  ;;  %v9251_v2 = vsub.s32 0, %v9171_v8 }
 0x10d   : > { %v1131_v54 = vclz %v8092_v3  ;;  %v9247_v7 = vmul.u32.u64.low %v202_v26, %v201_v33  ;;  %v9248_v38 = vmul.u32.u64.high %v202_v26, %v201_v33, %v9247_v7  ;;  %v212_v55 = vadd.s32 1, %v9229_v60 }
 0x10e   : > { %14783 = vst [vmem:[#allocation50_spill] sm:$0xff] %v9251_v2  ;;  %v14573_v25 = vand.u32 2147483647, %v9160_v53  ;;  %vm426_vm13 = vcmp.gt.s32.totalorder %v425_v14, 0  ;;  %vm2696_vm15 = vweird.f32 %v8716_v18  ;;  %v193_v52 = vsel %vm187_vm12, %v190_v35, %v192_v39 }
 0x10f   : > { %v8093_v56 = vadd.s32 4294967294, %v1131_v54  ;;  %v427_v61 = vsel %vm426_vm13, %v425_v14, 0  ;;  %vm2699_vm0 = vcmp.eq.s32.totalorder %v2697_v16, 0  ;;  %v14784_v37 = vand.u32 2147483647, %v9005_v32 }
 0x110   : > { %vm1065_vm2 = vcmp.lt.s32.totalorder %v9005_v32, 0  ;;  %v429_v8 = vand.u32 31, %v427_v61  ;;  %vm2702_vm3 = vcmp.eq.s32.totalorder %v2697_v16, 2  ;;  %vm211_vm5 = vc.u32 %v9248_v38, %v9228_v12 }
 0x111   : > { %vm9260_vm1 = vcmp.le.f32.partialorder %v14784_v37, 0.7853982  ;;  %vm8094_vm4 = vcmp.lt.s32.totalorder %v8093_v56, 0  ;;  %v1150_v22 = vsel %vm1065_vm2, %v1149_v50, %v1125_v10  ;;  %v8342_v13 = vpop.eup %8341  ;;  %v209_v5 = vmul.u32 %v202_v26, %v193_v52 }
 0x112   : > { %v1134_v27 = vsel %vm8094_vm4, 0, %v8093_v56  ;;  %v213_v62 = vsel %vm211_vm5, %v212_v55, %v9229_v60  ;;  %v422_v24 = vand.u32 8388607, %v14573_v25  ;;  %v8344_v3 = vpop.eup %8343  ;;  %v2703_v35 = vxor.u32 2147483648, %v8342_v13 }
 0x113   : > { %v1119_v39 = vadd.s32 %v9139_v20, %v9148_v42  ;;  %v1135_v33 = vsub.s32 32, %v1134_v27  ;;  %v1139_v14 = vsub.s32 4294967266, %v1134_v27  ;;  %v2700_v54 = vxor.u32 2147483648, %v8344_v3 }
 0x114   : > { %v1152_v10 = vsel %vm9260_vm1, 0, %v1150_v22  ;;  %v214_v50 = vadd.s32 %v213_v62, %v209_v5  ;;  %v430_v7 = vsub.s32 32, %v429_v8  ;;  %v2704_v26 = vsel %vm2702_vm3, %v2703_v35, %v8344_v3 }
 0x115   : > { %v1136_v60 = vshll.u32 %v9209_v0, %v1134_v27  ;;  %v1137_v55 = vshrl.u32 %v1119_v39, %v1135_v33  ;;  %v1140_v56 = vadd.s32 127, %v1139_v14  ;;  %vm2698_vm6 = vcmp.lt.s32.totalorder %v2697_v16, 2 }
 0x116   : > { %v2701_v52 = vsel %vm2699_vm0, %v8342_v13, %v2700_v54  ;;  %v215_v37 = vadd.s32 536870912, %v214_v50  ;;  %v9280_v34 = vand.u32 3, %v1152_v10  ;;  %v423_v62 = vor.u32 8388608, %v422_v24 }
 0x117   : > { %v2705_v42 = vsel %vm2698_vm6, %v2701_v52, %v2704_v26  ;;  %v1138_v25 = vor.u32 %v1137_v55, %v1136_v60  ;;  %v1141_v29 = vshll.u32 %v1140_v56, 23  ;;  %v9286_v0 = vshrl.u32 %v427_v61, 5 }
 0x118   : > { %v2706_v22 = vsel %vm2696_vm15, nan, %v2705_v42  ;;  %v9284_v5 = vshrl.u32 %v215_v37, 30  ;;  %v433_v13 = vshrl.u32 %v14770_v44, %v430_v7  ;;  %v436_v3 = vshrl.u32 %v14776_v30, %v430_v7 }
 0x119   : > { %v9288_v27 = vmul.f32 0.5625, %v2706_v22  ;;  %v1142_v16 = vor.u32 4788187, %v1141_v29  ;;  %v432_v39 = vshll.u32 %v14746_v36, %v429_v8  ;;  %v439_v33 = vshrl.u32 %v14761_v57, %v430_v7 }
 0x11a   : > { %v217_v35 = vshll.u32 %v9284_v5, 30  ;;  %v442_v18 = vshrl.u32 %v14747_v46, %v430_v7  ;;  %v1145_v14 = vcvt.s32.f32 %v1138_v25  ;;  %v435_v29 = vshll.u32 %v14770_v44, %v429_v8 }
 0x11b   : > { %14787 = vst [vmem:[#allocation51_spill] sm:$0xff] %v9288_v27  ;;  %v9298_v24 = vrot.slane %v9288_v27, %v9238_v23  ;;  %v1143_v61 = vand.u32 2147483647, %v1142_v16  ;;  %v438_v10 = vshll.u32 %v14776_v30, %v429_v8  ;;  %v441_v26 = vshll.u32 %v14761_v57, %v429_v8 }
 0x11c   : > { %v9301_v54 = vsub.s32 %v214_v50, %v217_v35  ;;  %v445_v60 = vshrl.u32 %v14762_v1, %v430_v7  ;;  %v434_v52 = vor.u32 %v433_v13, %v432_v39  ;;  %v437_v37 = vor.u32 %v436_v3, %v435_v29 }
 0x11d   : > { %14788 = vst [vmem:[#allocation52_spill] sm:$0xff] %v9298_v24  ;;  %v9308_v55 = vrot.slane %v9298_v24, %v9238_v23  ;;  %v1146_v56 = vmul.f32 %v1145_v14, %v1143_v61  ;;  %v440_v25 = vor.u32 %v439_v33, %v438_v10  ;;  %v443_v22 = vor.u32 %v442_v18, %v441_v26 }
 0x11e   : > { %v220_v42 = vsub.s32 0, %v9301_v54  ;;  %v444_v50 = vshll.u32 %v14747_v46, %v429_v8  ;;  %v431_v20 = vshrl.u32 %v14746_v36, %v430_v7  ;;  %v463_v27 = vshll.u32 %v423_v62, 8 }
 0x11f   : > { %v2765_v16 = vrot.slane %v9308_v55, %v9251_v2  ;;  %v1147_v35 = vxor.u32 2147483648, %v1146_v56  ;;  %vm447_vm7 = vcmp.lt.s32.totalorder %v9286_v0, 1  ;;  %vm448_vm9 = vcmp.lt.s32.totalorder %v9286_v0, 2 }
 0x120   : > { %v8080_v40 = vmin.u32 %v220_v42, %v9301_v54  ;;  %v446_v24 = vor.u32 %v445_v60, %v444_v50  ;;  %vm449_vm10 = vcmp.lt.s32.totalorder %v9286_v0, 3  ;;  %vm450_vm11 = vcmp.lt.s32.totalorder %v9286_v0, 4 }
 0x121   : > { %2795 = vperm.xlu1 %8340, %v2765_v16   ;;  %v1148_v13 = vsel %vm1065_vm2, %v1147_v35, %v1146_v56  ;;  %v455_v8 = vsel %vm447_vm7, %v434_v52, %v437_v37  ;;  %v452_v3 = vsel %vm450_vm11, %v440_v25, 2102212464  ;;  %v456_v39 = vsel %vm450_vm11, %v443_v22, 920167782 }
 0x122   : > { %v1151_v7 = vsel %vm9260_vm1, %v9005_v32, %v1148_v13  ;;  %v222_v62 = vclz %v8080_v40  ;;  %v451_v33 = vsel %vm447_vm7, %v431_v20, %v434_v52  ;;  %v457_v18 = vsel %vm449_vm10, %v440_v25, %v456_v39 }
 0x123   : > { %8345 = vcosq.f32 %v1151_v7  ;;  %v459_v61 = vsel %vm447_vm7, %v437_v37, %v440_v25  ;;  %v458_v29 = vsel %vm448_vm9, %v455_v8, %v457_v18  ;;  %v460_v10 = vsel %vm450_vm11, %v446_v24, 1326507024 }
 0x124   : > { %8347 = vsinq.f32 %v1151_v7  ;;  %v8081_v14 = vadd.s32 4294967294, %v222_v62  ;;  %v453_v26 = vsel %vm449_vm10, %v437_v37, %v452_v3  ;;  %v461_v40 = vsel %vm449_vm10, %v443_v22, %v460_v10 }
 0x125   : > { %v9333_v31 = vmul.u32.u64.low %v463_v27, %v458_v29  ;;  %v9334_v60 = vmul.u32.u64.high %v463_v27, %v458_v29, %v9333_v31  ;;  %v462_v20 = vsel %vm448_vm9, %v459_v61, %v461_v40  ;;  %v14789_v56 = vand.u32 2147483647, %v8652_v28 }
 0x126   : > { %vm8082_vm12 = vcmp.lt.s32.totalorder %v8081_v14, 0  ;;  %v758_v24 = vshrl.u32 %v14770_v44, %v8961_v4  ;;  %v210_v37 = vadd.s32 %v9228_v12, %v9248_v38  ;;  %v454_v35 = vsel %vm448_vm9, %v451_v33, %v453_v26 }
 0x127   : > { %v9341_v52 = vand.u32 8388607, %v14789_v56  ;;  %v225_v42 = vsel %vm8082_vm12, 0, %v8081_v14  ;;  %v9347_v25 = vmul.u32.u64.low %v463_v27, %v462_v20  ;;  %v9348_v22 = vmul.u32.u64.high %v463_v27, %v462_v20, %v9347_v25 }
 0x128   : > { %v226_v50 = vsub.s32 32, %v225_v42  ;;  %v230_v16 = vsub.s32 4294967266, %v225_v42  ;;  %v760_v13 = vshll.u32 %v14770_v44, %v8932_v9  ;;  %v227_v8 = vshll.u32 %v9301_v54, %v225_v42 }
 0x129   : > { %v473_v7 = vadd.s32 1, %v9334_v60  ;;  %v761_v62 = vshrl.u32 %v14776_v30, %v8961_v4  ;;  %v767_v12 = vshrl.u32 %v14747_v46, %v8961_v4  ;;  %v764_v39 = vshrl.u32 %v14761_v57, %v8961_v4 }
 0x12a   : > { %v228_v38 = vshrl.u32 %v210_v37, %v226_v50  ;;  %v231_v3 = vadd.s32 127, %v230_v16  ;;  %v770_v0 = vshrl.u32 %v14762_v1, %v8961_v4  ;;  %vm1158_vm13 = vcmp.eq.s32.totalorder %v9280_v34, 0 }
 0x12b   : > { %v470_v33 = vmul.u32 %v463_v27, %v454_v35  ;;  %vm472_vm15 = vc.u32 %v9348_v22, %v9333_v31  ;;  %v763_v54 = vshll.u32 %v14776_v30, %v8932_v9  ;;  %v766_v18 = vshll.u32 %v14761_v57, %v8932_v9 }
 0x12c   : > { %vm1157_vm0 = vcmp.lt.s32.totalorder %v9280_v34, 2  ;;  %v229_v61 = vor.u32 %v228_v38, %v227_v8  ;;  %v232_v14 = vshll.u32 %v231_v3, 23  ;;  %v474_v29 = vsel %vm472_vm15, %v473_v7, %v9334_v60 }
 0x12d   : > { %v769_v10 = vshll.u32 %v14747_v46, %v8932_v9  ;;  %vm1155_vm1 = vweird.f32 %v9005_v32  ;;  %vm1161_vm2 = vcmp.eq.s32.totalorder %v9280_v34, 2  ;;  %vm156_vm3 = vcmp.lt.s32.totalorder %v9065_v21, 0 }
 0x12e   : > { %v475_v27 = vadd.s32 %v474_v29, %v470_v33  ;;  %v757_v26 = vshll.u32 %v14746_v36, %v8932_v9  ;;  %v768_v40 = vor.u32 %v767_v12, %v766_v18  ;;  %v14790_v20 = vand.u32 2147483647, %v9065_v21 }
 0x12f   : > { %v233_v60 = vor.u32 4788187, %v232_v14  ;;  %v762_v37 = vor.u32 %v761_v62, %v760_v13  ;;  %v765_v42 = vor.u32 %v764_v39, %v763_v54  ;;  %v771_v25 = vor.u32 %v770_v0, %v769_v10 }
 0x130   : > { %vm9382_vm4 = vcmp.le.f32.partialorder %v14790_v20, 0.7853982  ;;  %v240_v50 = vsub.s32 4, %v9284_v5  ;;  %v476_v16 = vadd.s32 536870912, %v475_v27  ;;  %v748_v35 = vor.u32 8388608, %v9341_v52  ;;  %v8346_v7 = vpop.eup %8345 }
 0x131   : > { %v759_v8 = vor.u32 %v758_v24, %v757_v26  ;;  %v234_v38 = vand.u32 2147483647, %v233_v60  ;;  %v236_v9 = vcvt.s32.f32 %v229_v61  ;;  %vm772_vm5 = vcmp.lt.s32.totalorder %v8799_v63, 1  ;;  %v8348_v12 = vpop.eup %8347 }
 0x132   : > { %vm775_vm6 = vcmp.lt.s32.totalorder %v8799_v63, 4  ;;  %vm4493_vm7 = vcmp.lt.s32.totalorder %v9074_v15, 3  ;;  %v1162_v3 = vxor.u32 2147483648, %v8346_v7  ;;  %v477_v13 = vshrl.u32 %v476_v16, 30 }
 0x133   : > { %vm774_vm9 = vcmp.lt.s32.totalorder %v8799_v63, 3  ;;  %v781_v62 = vsel %vm775_vm6, %v768_v40, 920167782  ;;  %v1159_v39 = vxor.u32 2147483648, %v8348_v12  ;;  %v237_v52 = vmul.f32 %v236_v9, %v234_v38 }
 0x134   : > { %v784_v24 = vsel %vm772_vm5, %v762_v37, %v765_v42  ;;  %v785_v0 = vsel %vm775_vm6, %v771_v25, 1326507024  ;;  %v1163_v33 = vsel %vm1161_vm2, %v1162_v3, %v8348_v12  ;;  %v478_v54 = vshll.u32 %v477_v13, 30 }
 0x135   : > { %v756_v18 = vshrl.u32 %v14746_v36, %v8961_v4  ;;  %v786_v61 = vsel %vm774_vm9, %v768_v40, %v785_v0  ;;  %v1160_v14 = vsel %vm1158_vm13, %v8346_v7, %v1159_v39  ;;  %v238_v29 = vxor.u32 2147483648, %v237_v52 }
 0x136   : > { %vm773_vm10 = vcmp.lt.s32.totalorder %v8799_v63, 2  ;;  %v780_v10 = vsel %vm772_vm5, %v759_v8, %v762_v37  ;;  %v1164_v26 = vsel %vm1157_vm0, %v1160_v14, %v1163_v33  ;;  %v9411_v20 = vsub.s32 %v475_v27, %v478_v54 }
 0x137   : > { %v782_v4 = vsel %vm774_vm9, %v765_v42, %v781_v62  ;;  %v787_v40 = vsel %vm773_vm10, %v784_v24, %v786_v61  ;;  %v1165_v60 = vsel %vm1155_vm1, nan, %v1164_v26  ;;  %v239_v25 = vsel %vm156_vm3, %v238_v29, %v237_v52 }
 0x138   : > { %v241_v16 = vsel %vm156_vm3, %v240_v50, %v9284_v5  ;;  %v788_v34 = vshll.u32 %v748_v35, 8  ;;  %v9424_v7 = vmul.f32 0.1875, %v1165_v60  ;;  %v242_v27 = vsel %vm9382_vm4, %v9065_v21, %v239_v25 }
 0x139   : > { %v481_v38 = vsub.s32 0, %v9411_v20  ;;  %v777_v32 = vsel %vm775_vm6, %v765_v42, 2102212464  ;;  %8349 = vcosq.f32 %v242_v27  ;;  %v783_v9 = vsel %vm773_vm10, %v780_v10, %v782_v4 }
 0x13a   : > { %v9434_v12 = vmul.u32.u64.low %v788_v34, %v787_v40  ;;  %v9435_v3 = vmul.u32.u64.high %v788_v34, %v787_v40, %v9434_v12  ;;  %v9439_v5 = vrot.slane %v9424_v7, %v9238_v23  ;;  %8351 = vsinq.f32 %v242_v27 }
 0x13b   : > { %v8084_v50 = vmin.u32 %v481_v38, %v9411_v20  ;;  %v501_v35 = vsub.s32 4, %v477_v13  ;;  %v4501_v42 = vsel %vm4493_vm7, %v9105_v48, %v9235_v17  ;;  %v14793_v62 = vor.u32 %v9099_v11, %v9095_v43 }
 0x13c   : > { %v776_v52 = vsel %vm772_vm5, %v756_v18, %v759_v8  ;;  %v778_v24 = vsel %vm774_vm9, %v762_v37, %v777_v32  ;;  %v9457_v0 = vrot.slane %v9439_v5, %v9238_v23  ;;  %vm4492_vm11 = vcmp.lt.s32.totalorder %v9074_v15, 2 }
 0x13d   : > { %v4504_v39 = vsel %vm4494_vm8, %v14793_v62, 1326507024  ;;  %v483_v33 = vclz %v8084_v50  ;;  %v9459_v54 = vmul.u32.u64.low %v788_v34, %v783_v9  ;;  %v9460_v61 = vmul.u32.u64.high %v788_v34, %v783_v9, %v9459_v54 }
 0x13e   : > { %v4503_v11 = vsel %vm4491_vm14, %v9103_v45, %v9105_v48  ;;  %v243_v43 = vsel %vm9382_vm4, 0, %v241_v16  ;;  %vm417_vm12 = vcmp.lt.s32.totalorder %v9160_v53, 0  ;;  %v1224_v17 = vrot.slane %v9457_v0, %v9251_v2 }
 0x13f   : > { %v8085_v37 = vadd.s32 4294967294, %v483_v33  ;;  %v502_v8 = vsel %vm417_vm12, %v501_v35, %v477_v13  ;;  %v779_v18 = vsel %vm773_vm10, %v776_v52, %v778_v24  ;;  %v14794_v14 = vsub.s32 0, %v9108_v49 }
 0x140   : > { %v9485_v56 = vsel %vm4492_vm11, %v9154_v19, %v4501_v42  ;;  %v4505_v10 = vsel %vm4493_vm7, %v9110_v51, %v4504_v39  ;;  %vm797_vm13 = vc.u32 %v9435_v3, %v9459_v54  ;;  %1254 = vperm.xlu0 %8339, %v1224_v17   ;;  %v247_v63 = vand.u32 3, %v243_v43 }
 0x141   : > { %v9480_v29 = vmin.u32 %v14794_v14, %v9108_v49  ;;  %v14795_v13 = vand.u32 2147483647, %v9160_v53  ;;  %vm8086_vm0 = vcmp.lt.s32.totalorder %v8085_v37, 0  ;;  %v798_v4 = vadd.s32 1, %v9460_v61 }
 0x142   : > { %v471_v19 = vadd.s32 %v9333_v31, %v9348_v22  ;;  %v486_v40 = vsel %vm8086_vm0, 0, %v8085_v37  ;;  %v795_v60 = vmul.u32 %v788_v34, %v779_v18  ;;  %v14581_v38 = vand.u32 2147483647, %v8870_v47 }
 0x143   : > { %vm9494_vm15 = vcmp.le.f32.partialorder %v14795_v13, 0.7853982  ;;  %v487_v25 = vsub.s32 32, %v486_v40  ;;  %v491_v16 = vsub.s32 4294967266, %v486_v40  ;;  %v799_v27 = vsel %vm797_vm13, %v798_v4, %v9460_v61 }
 0x144   : > { %v504_v51 = vsel %vm9494_vm15, 0, %v502_v8  ;;  %v9508_v9 = vsel %vm4492_vm11, %v4503_v11, %v4505_v10  ;;  %vm246_vm1 = vweird.f32 %v9065_v21  ;;  %v800_v31 = vadd.s32 %v799_v27, %v795_v60 }
 0x145   : > { %vm248_vm2 = vcmp.lt.s32.totalorder %v247_v63, 2  ;;  %v488_v22 = vshll.u32 %v9411_v20, %v486_v40  ;;  %v489_v12 = vshrl.u32 %v471_v19, %v487_v25  ;;  %v492_v34 = vadd.s32 127, %v491_v16 }
 0x146   : > { %vm249_vm3 = vcmp.eq.s32.totalorder %v247_v63, 0  ;;  %vm252_vm4 = vcmp.eq.s32.totalorder %v247_v63, 2  ;;  %v9512_v50 = vand.u32 3, %v504_v51  ;;  %v801_v35 = vadd.s32 536870912, %v800_v31  ;;  %v8350_v42 = vpop.eup %8349 }
 0x147   : > { %v490_v62 = vor.u32 %v489_v12, %v488_v22  ;;  %v493_v39 = vshll.u32 %v492_v34, 23  ;;  %v1172_v52 = vcombine.high %v9424_v7, %v9424_v7  ;;  %v1395_v24 = vand.u32 8388607, %v14581_v38  ;;  %v8352_v33 = vpop.eup %8351 }
 0x148   : > { %v253_v61 = vxor.u32 2147483648, %v8350_v42  ;;  %v9518_v11 = vshrl.u32 %v801_v35, 30  ;;  %v1405_v20 = vshll.u32 %v14746_v36, %v9035_v41  ;;  %v1415_v43 = vshrl.u32 %v14747_v46, %v9070_v59 }
 0x149   : > { %v250_v17 = vxor.u32 2147483648, %v8352_v33  ;;  %v494_v37 = vor.u32 4788187, %v493_v39  ;;  %v1406_v8 = vshrl.u32 %v14770_v44, %v9070_v59  ;;  %v1409_v18 = vshrl.u32 %v14776_v30, %v9070_v59 }
 0x14a   : > { %v254_v14 = vsel %vm252_vm4, %v253_v61, %v8352_v33  ;;  %v803_v10 = vshll.u32 %v9518_v11, 30  ;;  %v1412_v13 = vshrl.u32 %v14761_v57, %v9070_v59  ;;  %v1414_v4 = vshll.u32 %v14761_v57, %v9035_v41 }
 0x14b   : > { %v251_v19 = vsel %vm249_vm3, %v8350_v42, %v250_v17  ;;  %v495_v40 = vand.u32 2147483647, %v494_v37  ;;  %v497_v51 = vcvt.s32.f32 %v490_v62  ;;  %v1418_v60 = vshrl.u32 %v14762_v1, %v9070_v59 }
 0x14c   : > { %v255_v25 = vsel %vm248_vm2, %v251_v19, %v254_v14  ;;  %v9538_v16 = vsub.s32 %v800_v31, %v803_v10  ;;  %v1408_v27 = vshll.u32 %v14770_v44, %v9035_v41  ;;  %v1416_v22 = vor.u32 %v1415_v43, %v1414_v4 }
 0x14d   : > { %v256_v12 = vsel %vm246_vm1, nan, %v255_v25  ;;  %v498_v34 = vmul.f32 %v497_v51, %v495_v40  ;;  %v1411_v35 = vshll.u32 %v14776_v30, %v9035_v41  ;;  %v1417_v42 = vshll.u32 %v14747_v46, %v9035_v41 }
 0x14e   : > { %v9548_v62 = vmul.f32 0.0625, %v256_v12  ;;  %v806_v63 = vsub.s32 0, %v9538_v16  ;;  %v1407_v31 = vor.u32 %v1406_v8, %v1405_v20  ;;  %v1410_v39 = vor.u32 %v1409_v18, %v1408_v27 }
 0x14f   : > { %v499_v33 = vxor.u32 2147483648, %v498_v34  ;;  %v1413_v61 = vor.u32 %v1412_v13, %v1411_v35  ;;  %v1419_v17 = vor.u32 %v1418_v60, %v1417_v42  ;;  %vm1423_vm5 = vcmp.lt.s32.totalorder %v9067_v58, 4 }
 0x150   : > { %v9554_v21 = vrot.slane %v9548_v62, %v9238_v23  ;;  %v796_v43 = vadd.s32 %v9459_v54, %v9435_v3  ;;  %v8088_v41 = vmin.u32 %v806_v63, %v9538_v16  ;;  %v1429_v37 = vsel %vm1423_vm5, %v1416_v22, 920167782 }
 0x151   : > { %v500_v20 = vsel %vm417_vm12, %v499_v33, %v498_v34  ;;  %v1396_v8 = vor.u32 8388608, %v1395_v24  ;;  %vm1420_vm6 = vcmp.lt.s32.totalorder %v9067_v58, 1  ;;  %vm1422_vm9 = vcmp.lt.s32.totalorder %v9067_v58, 3  ;;  %v14801_v34 = vld [vmem:[#allocation19_spill] sm:$0xff] }
 0x152   : > { %v9567_v18 = vrot.slane %v9554_v21, %v9238_v23  ;;  %v503_v3 = vsel %vm9494_vm15, %v9160_v53, %v500_v20  ;;  %vm742_vm10 = vcmp.lt.s32.totalorder %v8652_v28, 0  ;;  %v808_v54 = vclz %v8088_v41 }
 0x153   : > { %v1428_v14 = vsel %vm1420_vm6, %v1407_v31, %v1410_v39  ;;  %8353 = vcosq.f32 %v503_v3  ;;  %v1430_v24 = vsel %vm1422_vm9, %v1413_v61, %v1429_v37  ;;  %v1432_v10 = vsel %vm1420_vm6, %v1410_v39, %v1413_v61 }
 0x154   : > { %v1433_v13 = vsel %vm1423_vm5, %v1419_v17, 1326507024  ;;  %v315_v26 = vrot.slane %v9567_v18, %v9251_v2  ;;  %8355 = vsinq.f32 %v503_v3  ;;  %v8089_v4 = vadd.s32 4294967294, %v808_v54 }
 0x155   : > { %v1404_v19 = vshrl.u32 %v14746_v36, %v9070_v59  ;;  %vm1421_vm12 = vcmp.lt.s32.totalorder %v9067_v58, 2  ;;  %v1425_v40 = vsel %vm1423_vm5, %v1413_v61, 2102212464  ;;  %v1434_v51 = vsel %vm1422_vm9, %v1416_v22, %v1433_v13 }
 0x156   : > { %v1436_v60 = vshll.u32 %v1396_v8, 8  ;;  %345 = vperm.xlu1 %8340, %v315_v26   ;;  %v14798_v25 = vand.u32 2147483647, %v8652_v28  ;;  %vm8090_vm15 = vcmp.lt.s32.totalorder %v8089_v4, 0  ;;  %v1431_v59 = vsel %vm1421_vm12, %v1428_v14, %v1430_v24 }
 0x157   : > { %v1435_v12 = vsel %vm1421_vm12, %v1432_v10, %v1434_v51  ;;  %v9602_v35 = vsub.f32 %v14801_v34, %v8629_v6  ;;  %v811_v22 = vsel %vm8090_vm15, 0, %v8089_v4  ;;  %v826_v42 = vsub.s32 4, %v9518_v11 }
 0x158   : > { %vm9592_vm13 = vcmp.le.f32.partialorder %v14798_v25, 0.7853982  ;;  %v9605_v63 = vmul.u32.u64.low %v1436_v60, %v1435_v12  ;;  %v9606_v33 = vmul.u32.u64.high %v1436_v60, %v1435_v12, %v9605_v63  ;;  %v812_v61 = vsub.s32 32, %v811_v22 }
 0x159   : > { %v816_v17 = vsub.s32 4294967266, %v811_v22  ;;  %v1424_v41 = vsel %vm1420_vm6, %v1404_v19, %v1407_v31  ;;  %v1426_v37 = vsel %vm1422_vm9, %v1410_v39, %v1425_v40  ;;  %v9614_v20 = vmul.f32 %v9424_v7, %v9424_v7 }
 0x15a   : > { %v1187_v8 = vcombine.high %v9439_v5, %v9439_v5  ;;  %v9618_v3 = vmul.u32.u64.low %v1436_v60, %v1431_v59  ;;  %v9619_v54 = vmul.u32.u64.high %v1436_v60, %v1431_v59, %v9618_v3  ;;  %v813_v14 = vshll.u32 %v9538_v16, %v811_v22 }
 0x15b   : > { %v814_v24 = vshrl.u32 %v796_v43, %v812_v61  ;;  %v817_v10 = vadd.s32 127, %v816_v17  ;;  %v1711_v31 = vand.u32 2139095040, %v9602_v35  ;;  %v827_v39 = vsel %vm742_vm10, %v826_v42, %v9518_v11  ;;  %v14803_v17 = vld [vmem:[#allocation52_spill] sm:$0xff] }
 0x15c   : > { %v1217_v13 = vcombine.high %v9457_v0, %v9457_v0  ;;  %v9633_v5 = vrot.slane %v1172_v52, %v9238_v23  ;;  %v1427_v16 = vsel %vm1421_vm12, %v1424_v41, %v1426_v37  ;;  %vm509_vm0 = vcmp.lt.s32.totalorder %v9512_v50, 2 }
 0x15d   : > { %v815_v43 = vor.u32 %v814_v24, %v813_v14  ;;  %v818_v26 = vshll.u32 %v817_v10, 23  ;;  %vm1445_vm1 = vc.u32 %v9606_v33, %v9618_v3  ;;  %v1712_v11 = vshrl.u32 %v1711_v31, 23 }
 0x15e   : > { %14802 = vst [vmem:[#allocation19_spill] sm:$0xff] %v9633_v5  ;;  %vm507_vm2 = vweird.f32 %v9160_v53  ;;  %vm510_vm3 = vcmp.eq.s32.totalorder %v9512_v50, 0  ;;  %vm513_vm4 = vcmp.eq.s32.totalorder %v9512_v50, 2  ;;  %v1446_v7 = vadd.s32 1, %v9619_v54 }
 0x15f   : > { %v14579_v0 = vand.u32 2147483647, %v9602_v35  ;;  %v819_v58 = vor.u32 4788187, %v818_v26  ;;  %v9646_v52 = vrot.slane %v1187_v8, %v9238_v23  ;;  %v1443_v4 = vmul.u32 %v1436_v60, %v1427_v16  ;;  %v14804_v8 = vld [vmem:[#allocation15_spill] sm:$0xff] }
 0x160   : > { %v8099_v19 = vadd.s32 4294967169, %v1712_v11  ;;  %v829_v40 = vsel %vm9592_vm13, 0, %v827_v39  ;;  %v9651_v51 = vrot.slane %v1217_v13, %v9251_v2  ;;  %v9655_v25 = vrot.slane %v9633_v5, %v9238_v23  ;;  %v8354_v12 = vpop.eup %8353 }
 0x161   : > { %v1447_v59 = vsel %vm1445_vm1, %v1446_v7, %v9619_v54  ;;  %v820_v34 = vand.u32 2147483647, %v819_v58  ;;  %v822_v22 = vcvt.s32.f32 %v815_v43  ;;  %v8356_v61 = vpop.eup %8355  ;;  %v514_v60 = vxor.u32 2147483648, %v8354_v12 }
 0x162   : > { %v1448_v42 = vadd.s32 %v1447_v59, %v1443_v4  ;;  %v1718_v63 = vadd.s32 1, %v8099_v19  ;;  %v2728_v41 = vcombine.high %v14803_v17, %v14803_v17  ;;  %v1715_v37 = vand.u32 8388607, %v14579_v0 }
 0x163   : > { %v9664_v14 = vsub.f32 %v14804_v8, %v8629_v6  ;;  %v511_v24 = vxor.u32 2147483648, %v8356_v61  ;;  %v823_v10 = vmul.f32 %v822_v22, %v820_v34  ;;  %v515_v31 = vsel %vm513_vm4, %v514_v60, %v8356_v61 }
 0x164   : > { %v1449_v54 = vadd.s32 536870912, %v1448_v42  ;;  %vm1719_vm5 = vcmp.gt.s32.totalorder %v1718_v63, 0  ;;  %v9674_v11 = vand.u32 3, %v829_v40  ;;  %v9681_v4 = vrot.slane %v2728_v41, %v9238_v23 }
 0x165   : > { %v1720_v16 = vsel %vm1719_vm5, %v1718_v63, 0  ;;  %v512_v43 = vsel %vm510_vm3, %v8354_v12, %v511_v24  ;;  %v824_v26 = vxor.u32 2147483648, %v823_v10  ;;  %v1716_v19 = vor.u32 8388608, %v1715_v37 }
 0x166   : > { %v9676_v7 = vshrl.u32 %v1449_v54, 30  ;;  %v516_v58 = vsel %vm509_vm0, %v512_v43, %v515_v31  ;;  %v1722_v59 = vand.u32 31, %v1720_v16  ;;  %v1967_v40 = vand.u32 2139095040, %v9664_v14 }
 0x167   : > { %v517_v34 = vsel %vm507_vm2, nan, %v516_v58  ;;  %v825_v22 = vsel %vm742_vm10, %v824_v26, %v823_v10  ;;  %v9691_v63 = vmul.f32 %v9548_v62, %v9548_v62  ;;  %v14580_v41 = vand.u32 2147483647, %v9664_v14 }
 0x168   : > { %v1451_v12 = vshll.u32 %v9676_v7, 30  ;;  %v9693_v50 = vmul.f32 0.1875, %v517_v34  ;;  %v828_v61 = vsel %vm9592_vm13, %v8652_v28, %v825_v22  ;;  %v1723_v60 = vsub.s32 32, %v1722_v59 }
 0x169   : > { %8357 = vcosq.f32 %v828_v61  ;;  %v1444_v8 = vadd.s32 %v9618_v3, %v9606_v33  ;;  %v9713_v10 = vshll.u32 %v1716_v19, 8  ;;  %v1968_v54 = vshrl.u32 %v1967_v40, 23 }
 0x16a   : > { %v9698_v53 = vsub.s32 %v1448_v42, %v1451_v12  ;;  %v9705_v37 = vrot.slane %v9693_v50, %v9238_v23  ;;  %8359 = vsinq.f32 %v828_v61  ;;  %v1726_v42 = vshrl.u32 %v14770_v44, %v1723_v60 }
 0x16b   : > { %v1725_v43 = vshll.u32 %v14746_v36, %v1722_v59  ;;  %v1728_v26 = vshll.u32 %v14770_v44, %v1722_v59  ;;  %v1729_v33 = vshrl.u32 %v14776_v30, %v1723_v60  ;;  %v1721_v58 = vshrl.u32 %v1720_v16, 5 }
 0x16c   : > { %14805 = vst [vmem:[#allocation52_spill] sm:$0xff] %v9705_v37  ;;  %v1454_v24 = vsub.s32 0, %v9698_v53  ;;  %v9717_v31 = vrot.slane %v9705_v37, %v9238_v23  ;;  %v1731_v34 = vshll.u32 %v14776_v30, %v1722_v59  ;;  %v9726_v19 = vand.u32 8388607, %v14580_v41 }
 0x16d   : > { %v1727_v12 = vor.u32 %v1726_v42, %v1725_v43  ;;  %v1730_v40 = vor.u32 %v1729_v33, %v1728_v26  ;;  %v1732_v61 = vshrl.u32 %v14761_v57, %v1723_v60  ;;  %v1734_v32 = vshll.u32 %v14761_v57, %v1722_v59 }
 0x16e   : > { %v8096_v3 = vmin.u32 %v1454_v24, %v9698_v53  ;;  %v576_v22 = vrot.slane %v9717_v31, %v9251_v2  ;;  %v1735_v39 = vshrl.u32 %v14747_v46, %v1723_v60  ;;  %v8103_v24 = vadd.s32 4294967169, %v1968_v54 }
 0x16f   : > { %vm838_vm6 = vcmp.eq.s32.totalorder %v9674_v11, 2  ;;  %v1724_v16 = vshrl.u32 %v14746_v36, %v1723_v60  ;;  %v1733_v41 = vor.u32 %v1732_v61, %v1731_v34  ;;  %v1737_v17 = vshll.u32 %v14747_v46, %v1722_v59 }
 0x170   : > { %v1456_v0 = vclz %v8096_v3  ;;  %606 = vperm.xlu0 %8339, %v576_v22   ;;  %v1738_v27 = vshrl.u32 %v14762_v1, %v1723_v60  ;;  %vm835_vm9 = vcmp.eq.s32.totalorder %v9674_v11, 0  ;;  %v1736_v43 = vor.u32 %v1735_v39, %v1734_v32 }
 0x171   : > { %vm1740_vm10 = vcmp.lt.s32.totalorder %v1721_v58, 1  ;;  %vm1743_vm12 = vcmp.lt.s32.totalorder %v1721_v58, 4  ;;  %vm834_vm13 = vcmp.lt.s32.totalorder %v9674_v11, 2  ;;  %vm1741_vm15 = vcmp.lt.s32.totalorder %v1721_v58, 2 }
 0x172   : > { %v8097_v42 = vadd.s32 4294967294, %v1456_v0  ;;  %v1739_v26 = vor.u32 %v1738_v27, %v1737_v17  ;;  %v1745_v54 = vsel %vm1743_vm12, %v1733_v41, 2102212464  ;;  %v1748_v33 = vsel %vm1740_vm10, %v1727_v12, %v1730_v40 }
 0x173   : > { %vm832_vm0 = vweird.f32 %v8652_v28  ;;  %vm1742_vm2 = vcmp.lt.s32.totalorder %v1721_v58, 3  ;;  %v1744_v3 = vsel %vm1740_vm10, %v1724_v16, %v1727_v12  ;;  %v1749_v59 = vsel %vm1743_vm12, %v1736_v43, 920167782 }
 0x174   : > { %vm8098_vm1 = vcmp.lt.s32.totalorder %v8097_v42, 0  ;;  %1262 = vperm.xlu0 %8339, %v9651_v51   ;;  %v1750_v34 = vsel %vm1742_vm2, %v1733_v41, %v1749_v59  ;;  %v1752_v0 = vsel %vm1740_vm10, %v1730_v40, %v1733_v41  ;;  %v1753_v32 = vsel %vm1743_vm12, %v1739_v26, 1326507024 }
 0x175   : > { %v1459_v60 = vsel %vm8098_vm1, 0, %v8097_v42  ;;  %v1746_v61 = vsel %vm1742_vm2, %v1730_v40, %v1745_v54  ;;  %v1751_v17 = vsel %vm1741_vm15, %v1748_v33, %v1750_v34  ;;  %v1754_v13 = vsel %vm1742_vm2, %v1736_v43, %v1753_v32 }
 0x176   : > { %v1460_v39 = vsub.s32 32, %v1459_v60  ;;  %v1464_v22 = vsub.s32 4294967266, %v1459_v60  ;;  %v8358_v27 = vpop.eup %8357  ;;  %v1461_v38 = vshll.u32 %v9698_v53, %v1459_v60  ;;  %vm1390_vm3 = vcmp.lt.s32.totalorder %v8870_v47, 0 }
 0x177   : > { %v9744_v5 = vmul.u32.u64.low %v9713_v10, %v1751_v17  ;;  %v9745_v37 = vmul.u32.u64.high %v9713_v10, %v1751_v17, %v9744_v5  ;;  %v8360_v12 = vpop.eup %8359  ;;  %v839_v51 = vxor.u32 2147483648, %v8358_v27  ;;  %v1755_v42 = vsel %vm1741_vm15, %v1752_v0, %v1754_v13 }
 0x178   : > { %v1462_v41 = vshrl.u32 %v1444_v8, %v1460_v39  ;;  %v1465_v16 = vadd.s32 127, %v1464_v22  ;;  %v836_v40 = vxor.u32 2147483648, %v8360_v12  ;;  %v14806_v26 = vrot.slane %v9655_v25, %v9251_v2 }
 0x179   : > { %v9754_v53 = vmul.u32.u64.low %v9713_v10, %v1755_v42  ;;  %v9755_v43 = vmul.u32.u64.high %v9713_v10, %v1755_v42, %v9754_v53  ;;  %v1974_v54 = vadd.s32 1, %v8103_v24  ;;  %v840_v33 = vsel %vm838_vm6, %v839_v51, %v8360_v12 }
 0x17a   : > { %1270 = vperm.xlu0 %8339, %v14806_v26   ;;  %v1463_v59 = vor.u32 %v1462_v41, %v1461_v38  ;;  %v1466_v60 = vshll.u32 %v1465_v16, 23  ;;  %v1747_v8 = vsel %vm1741_vm15, %v1744_v3, %v1746_v61  ;;  %v519_v13 = vmul.f32 %v9693_v50, %v9693_v50 }
 0x17b   : > { %v837_v34 = vsel %vm835_vm9, %v8358_v27, %v836_v40  ;;  %v1766_v0 = vadd.s32 1, %v9745_v37  ;;  %vm1975_vm4 = vcmp.gt.s32.totalorder %v1974_v54, 0  ;;  %v14807_v24 = vand.u32 2147483647, %v8870_v47 }
 0x17c   : > { %v841_v32 = vsel %vm834_vm13, %v837_v34, %v840_v33  ;;  %v1467_v38 = vor.u32 4788187, %v1466_v60  ;;  %v1474_v58 = vsub.s32 4, %v9676_v7  ;;  %v1976_v3 = vsel %vm1975_vm4, %v1974_v54, 0 }
 0x17d   : > { %vm9769_vm5 = vcmp.le.f32.partialorder %v14807_v24, 0.7853982  ;;  %v842_v22 = vsel %vm832_vm0, nan, %v841_v32  ;;  %v1470_v61 = vcvt.s32.f32 %v1463_v59  ;;  %v14810_v17 = vrot.slane %v9681_v4, %v9251_v2 }
 0x17e   : > { %v1763_v11 = vmul.u32 %v9713_v10, %v1747_v8  ;;  %vm1765_vm6 = vc.u32 %v9755_v43, %v9744_v5  ;;  %v9782_v27 = vmul.f32 0.25, %v842_v22  ;;  %v1468_v12 = vand.u32 2147483647, %v1467_v38 }
 0x17f   : > { %2799 = vperm.xlu0 %8339, %v14810_v17   ;;  %v1767_v51 = vsel %vm1765_vm6, %v1766_v0, %v9745_v37  ;;  %v1978_v41 = vand.u32 31, %v1976_v3  ;;  %v520_v16 = vadd.f32 %v519_v13, %v9691_v63  ;;  %v14811_v42 = vcombine.high %v9567_v18, %v9567_v18 }
 0x180   : > { %v1768_v28 = vadd.s32 %v1767_v51, %v1763_v11  ;;  %v1972_v26 = vor.u32 8388608, %v9726_v19  ;;  %v9793_v10 = vrot.slane %v9782_v27, %v9238_v23  ;;  %v844_v53 = vmul.f32 %v9782_v27, %v9782_v27 }
 0x181   : > { %v323_v40 = vrot.slane %v14811_v42, %v9251_v2  ;;  %v1471_v54 = vmul.f32 %v1470_v61, %v1468_v12  ;;  %v1979_v37 = vsub.s32 32, %v1978_v41  ;;  %v1475_v63 = vsel %vm1390_vm3, %v1474_v58, %v9676_v7 }
 0x182   : > { %v1769_v33 = vadd.s32 536870912, %v1768_v28  ;;  %v1977_v59 = vshrl.u32 %v1976_v3, 5  ;;  %v1981_v18 = vshll.u32 %v14746_v36, %v1978_v41  ;;  %v9803_v19 = vrot.slane %v9793_v10, %v9238_v23 }
 0x183   : > { %353 = vperm.xlu0 %8339, %v323_v40   ;;  %v845_v60 = vadd.f32 %v844_v53, %v520_v16  ;;  %v1472_v8 = vxor.u32 2147483648, %v1471_v54  ;;  %v1984_v13 = vshll.u32 %v14770_v44, %v1978_v41  ;;  %v1982_v0 = vshrl.u32 %v14770_v44, %v1979_v37 }
 0x184   : > { %v9806_v34 = vshrl.u32 %v1769_v33, 30  ;;  %v1985_v32 = vshrl.u32 %v14776_v30, %v1979_v37  ;;  %v1988_v7 = vshrl.u32 %v14761_v57, %v1979_v37  ;;  %v901_v24 = vrot.slane %v9803_v19, %v9251_v2 }
 0x185   : > { %v1473_v38 = vsel %vm1390_vm3, %v1472_v8, %v1471_v54  ;;  %v9816_v58 = vadd.f32 %v9614_v20, %v845_v60  ;;  %v1987_v3 = vshll.u32 %v14776_v30, %v1978_v41  ;;  %v1983_v17 = vor.u32 %v1982_v0, %v1981_v18 }
 0x186   : > { %v1476_v22 = vsel %vm9769_vm5, %v8870_v47, %v1473_v38  ;;  %v1771_v61 = vshll.u32 %v9806_v34, 30  ;;  %v1990_v11 = vshll.u32 %v14761_v57, %v1978_v41  ;;  %931 = vperm.xlu1 %8340, %v901_v24   ;;  %v1986_v12 = vor.u32 %v1985_v32, %v1984_v13 }
 0x187   : > { %8361 = vcosq.f32 %v1476_v22  ;;  %v1989_v51 = vor.u32 %v1988_v7, %v1987_v3  ;;  %v1991_v16 = vshrl.u32 %v14747_v46, %v1979_v37  ;;  %v1477_v20 = vsel %vm9769_vm5, 0, %v1475_v63 }
 0x188   : > { %8363 = vsinq.f32 %v1476_v22  ;;  %v9827_v42 = vsub.s32 %v1768_v28, %v1771_v61  ;;  %v2012_v40 = vshll.u32 %v1972_v26, 8  ;;  %v1993_v54 = vshll.u32 %v14747_v46, %v1978_v41 }
 0x189   : > { %v1992_v53 = vor.u32 %v1991_v16, %v1990_v11  ;;  %v1994_v33 = vshrl.u32 %v14762_v1, %v1979_v37  ;;  %v569_v18 = vcombine.high %v9717_v31, %v9717_v31  ;;  %v1980_v8 = vshrl.u32 %v14746_v36, %v1979_v37 }
 0x18a   : > { %v1774_v60 = vsub.s32 0, %v9827_v42  ;;  %vm1996_vm9 = vcmp.lt.s32.totalorder %v1977_v59, 1  ;;  %vm1999_vm10 = vcmp.lt.s32.totalorder %v1977_v59, 4  ;;  %v14812_v39 = vrot.slane %v9646_v52, %v9251_v2 }
 0x18b   : > { %v1995_v28 = vor.u32 %v1994_v33, %v1993_v54  ;;  %v2001_v26 = vsel %vm1999_vm10, %v1989_v51, 2102212464  ;;  %v2004_v63 = vsel %vm1996_vm9, %v1983_v17, %v1986_v12  ;;  %v2005_v13 = vsel %vm1999_vm10, %v1992_v53, 920167782 }
 0x18c   : > { %1258 = vperm.xlu1 %8340, %v14812_v39   ;;  %v1481_v41 = vand.u32 3, %v1477_v20  ;;  %v8100_v0 = vmin.u32 %v1774_v60, %v9827_v42  ;;  %vm1997_vm12 = vcmp.lt.s32.totalorder %v1977_v59, 2  ;;  %vm1998_vm13 = vcmp.lt.s32.totalorder %v1977_v59, 3 }
 0x18d   : > { %v2000_v31 = vsel %vm1996_vm9, %v1980_v8, %v1983_v17  ;;  %v2006_v32 = vsel %vm1998_vm13, %v1989_v51, %v2005_v13  ;;  %v2008_v7 = vsel %vm1996_vm9, %v1986_v12, %v1989_v51  ;;  %v2009_v24 = vsel %vm1999_vm10, %v1995_v28, 1326507024  ;;  %v14813_v17 = vld [vmem:[#allocation14_spill] sm:$0xff] }
 0x18e   : > { %v1776_v37 = vclz %v8100_v0  ;;  %v2002_v38 = vsel %vm1998_vm13, %v1986_v12, %v2001_v26  ;;  %v2007_v3 = vsel %vm1997_vm12, %v2004_v63, %v2006_v32  ;;  %v2010_v22 = vsel %vm1998_vm13, %v1992_v53, %v2009_v24  ;;  %v14815_v53 = vld [vmem:[#allocation47_spill] sm:$0xff] }
 0x18f   : > { %v2011_v61 = vsel %vm1997_vm12, %v2008_v7, %v2010_v22  ;;  %v9841_v11 = vmul.u32.u64.low %v2012_v40, %v2007_v3  ;;  %v9842_v16 = vmul.u32.u64.high %v2012_v40, %v2007_v3, %v9841_v11  ;;  %v584_v20 = vrot.slane %v569_v18, %v9251_v2 }
 0x190   : > { %v8101_v54 = vadd.s32 4294967294, %v1776_v37  ;;  %v9846_v33 = vmul.u32.u64.low %v2012_v40, %v2011_v61  ;;  %v9847_v60 = vmul.u32.u64.high %v2012_v40, %v2011_v61, %v9846_v33  ;;  %v14584_v51 = vand.u32 2147483647, %v14813_v17  ;;  %v14816_v37 = vld [vmem:[#allocation30_spill] sm:$0xff] }
 0x191   : > { %v14814_v8 = vclz %v9480_v29  ;;  %v9856_v39 = vmul.u32.u64.low %v14815_v53, %v9485_v56  ;;  %v9857_v28 = vmul.u32.u64.high %v14815_v53, %v9485_v56, %v9856_v39  ;;  %v2003_v26 = vsel %vm1997_vm12, %v2000_v31, %v2002_v38  ;;  %614 = vperm.xlu0 %8339, %v584_v20   ;;  %v14817_v20 = vld [vmem:[#allocation33_spill] sm:$0xff] }
 0x192   : > { %vm1480_vm15 = vweird.f32 %v8870_v47  ;;  %vm1482_vm0 = vcmp.lt.s32.totalorder %v1481_v41, 2  ;;  %vm1483_vm1 = vcmp.eq.s32.totalorder %v1481_v41, 0  ;;  %vm8102_vm2 = vcmp.lt.s32.totalorder %v8101_v54, 0 }
 0x193   : > { %v9852_v12 = vadd.s32 4294967294, %v14814_v8  ;;  %vm1486_vm3 = vcmp.eq.s32.totalorder %v1481_v41, 2  ;;  %v1764_v29 = vadd.s32 %v9744_v5, %v9755_v43  ;;  %v1779_v18 = vsel %vm8102_vm2, 0, %v8101_v54 }
 0x194   : > { %v2022_v63 = vadd.s32 1, %v9842_v16  ;;  %v8362_v13 = vpop.eup %8361  ;;  %v1780_v0 = vsub.s32 32, %v1779_v18  ;;  %v1784_v56 = vsub.s32 4294967266, %v1779_v18  ;;  %v2019_v32 = vmul.u32 %v2012_v40, %v2003_v26 }
 0x195   : > { %v9867_v59 = vand.u32 8388607, %v14584_v51  ;;  %v8364_v31 = vpop.eup %8363  ;;  %v1487_v7 = vxor.u32 2147483648, %v8362_v13  ;;  %v1781_v24 = vshll.u32 %v9827_v42, %v1779_v18  ;;  %vm2021_vm4 = vc.u32 %v9847_v60, %v9841_v11 }
 0x196   : > { %v2301_v5 = vshll.u32 %v14746_v36, %v14816_v37  ;;  %v1484_v43 = vxor.u32 2147483648, %v8364_v31  ;;  %v1782_v38 = vshrl.u32 %v1764_v29, %v1780_v0  ;;  %v1785_v3 = vadd.s32 127, %v1784_v56 }
 0x197   : > { %v2023_v22 = vsel %vm2021_vm4, %v2022_v63, %v9842_v16  ;;  %v1488_v40 = vsel %vm1486_vm3, %v1487_v7, %v8364_v31  ;;  %v2302_v54 = vshrl.u32 %v14770_v44, %v14817_v20  ;;  %v2304_v42 = vshll.u32 %v14770_v44, %v14816_v37 }
 0x198   : > { %v2024_v61 = vadd.s32 %v2023_v22, %v2019_v32  ;;  %v1485_v33 = vsel %vm1483_vm1, %v8362_v13, %v1484_v43  ;;  %v1783_v8 = vor.u32 %v1782_v38, %v1781_v24  ;;  %v1786_v26 = vshll.u32 %v1785_v3, 23 }
 0x199   : > { %v2311_v18 = vshrl.u32 %v14747_v46, %v14817_v20  ;;  %v1489_v29 = vsel %vm1482_vm0, %v1485_v33, %v1488_v40  ;;  %vm1710_vm5 = vcmp.lt.s32.totalorder %v9602_v35, 0  ;;  %v2305_v63 = vshrl.u32 %v14776_v30, %v14817_v20 }
 0x19a   : > { %v2025_v16 = vadd.s32 536870912, %v2024_v61  ;;  %v2308_v0 = vshrl.u32 %v14761_v57, %v14817_v20  ;;  %v1490_v56 = vsel %vm1480_vm15, nan, %v1489_v29  ;;  %v14818_v13 = vand.u32 2147483647, %v9602_v35 }
 0x19b   : > { %v1787_v41 = vor.u32 4788187, %v1786_v26  ;;  %v2310_v31 = vshll.u32 %v14761_v57, %v14816_v37  ;;  %v2314_v7 = vshrl.u32 %v14762_v1, %v14817_v20  ;;  %vm8118_vm9 = vcmp.lt.s32.totalorder %v9852_v12, 0 }
 0x19c   : > { %vm9893_vm6 = vcmp.le.f32.partialorder %v14818_v13, 0.7853982  ;;  %v9902_v24 = vmul.f32 0.0625, %v1490_v56  ;;  %v9904_v43 = vshrl.u32 %v2025_v16, 30  ;;  %v2303_v47 = vor.u32 %v2302_v54, %v2301_v5 }
 0x19d   : > { %v2307_v38 = vshll.u32 %v14776_v30, %v14816_v37  ;;  %v1788_v3 = vand.u32 2147483647, %v1787_v41  ;;  %v1790_v22 = vcvt.s32.f32 %v1783_v8  ;;  %v2312_v40 = vor.u32 %v2311_v18, %v2310_v31  ;;  %v14823_v31 = vld [vmem:[#allocation29_spill] sm:$0xff] }
 0x19e   : > { %14821 = vst [vmem:[#allocation15_spill] sm:$0xff] %v9902_v24  ;;  %v2313_v33 = vshll.u32 %v14747_v46, %v14816_v37  ;;  %v1492_v26 = vmul.f32 %v9902_v24, %v9902_v24  ;;  %v9914_v29 = vrot.slane %v9902_v24, %v9238_v23  ;;  %v2027_v16 = vshll.u32 %v9904_v43, 30 }
 0x19f   : > { %v2306_v56 = vor.u32 %v2305_v63, %v2304_v42  ;;  %v1791_v5 = vmul.f32 %v1790_v22, %v1788_v3  ;;  %v1794_v54 = vsub.s32 4, %v9806_v34  ;;  %v2309_v13 = vor.u32 %v2308_v0, %v2307_v38 }
 0x1a0   : > { %v2315_v41 = vor.u32 %v2314_v7, %v2313_v33  ;;  %v9920_v8 = vrot.slane %v9914_v29, %v9238_v23  ;;  %v9923_v37 = vadd.f32 %v1492_v26, %v9816_v58  ;;  %v9925_v18 = vsub.s32 %v2024_v61, %v2027_v16 }
 0x1a1   : > { %vm2319_vm10 = vcmp.lt.s32.totalorder %v14823_v31, 4  ;;  %v1792_v51 = vxor.u32 2147483648, %v1791_v5  ;;  %v2292_v24 = vor.u32 8388608, %v9867_v59  ;;  %vm2316_vm12 = vcmp.lt.s32.totalorder %v14823_v31, 1 }
 0x1a2   : > { %14822 = vst [vmem:[#allocation14_spill] sm:$0xff] %v9920_v8  ;;  %v2325_v42 = vsel %vm2319_vm10, %v2312_v40, 920167782  ;;  %v1549_v63 = vrot.slane %v9920_v8, %v9251_v2  ;;  %v2030_v0 = vsub.s32 0, %v9925_v18  ;;  %vm2318_vm13 = vcmp.lt.s32.totalorder %v14823_v31, 3 }
 0x1a3   : > { %v2324_v58 = vsel %vm2316_vm12, %v2303_v47, %v2306_v56  ;;  %v1793_v61 = vsel %vm1710_vm5, %v1792_v51, %v1791_v5  ;;  %v2326_v59 = vsel %vm2318_vm13, %v2309_v13, %v2325_v42  ;;  %v2328_v7 = vsel %vm2316_vm12, %v2306_v56, %v2309_v13 }
 0x1a4   : > { %v2329_v38 = vsel %vm2319_vm10, %v2315_v41, 1326507024  ;;  %1579 = vperm.xlu1 %8340, %v1549_v63   ;;  %v1796_v3 = vsel %vm9893_vm6, %v9602_v35, %v1793_v61  ;;  %v8104_v22 = vmin.u32 %v2030_v0, %v9925_v18  ;;  %v2300_v33 = vshrl.u32 %v14746_v36, %v14817_v20 }
 0x1a5   : > { %vm2317_vm15 = vcmp.lt.s32.totalorder %v14823_v31, 2  ;;  %8365 = vcosq.f32 %v1796_v3  ;;  %v2321_v51 = vsel %vm2319_vm10, %v2309_v13, 2102212464  ;;  %v2330_v16 = vsel %vm2318_vm13, %v2312_v40, %v2329_v38 }
 0x1a6   : > { %v2327_v26 = vsel %vm2317_vm15, %v2324_v58, %v2326_v59  ;;  %8367 = vsinq.f32 %v1796_v3  ;;  %v2032_v5 = vclz %v8104_v22  ;;  %v2331_v41 = vsel %vm2317_vm15, %v2328_v7, %v2330_v16 }
 0x1a7   : > { %v2332_v42 = vshll.u32 %v2292_v24, 8  ;;  %v9964_v20 = vsel %vm8118_vm9, 0, %v9852_v12  ;;  %v1795_v13 = vsel %vm1710_vm5, %v1794_v54, %v9806_v34  ;;  %v2320_v63 = vsel %vm2316_vm12, %v2300_v33, %v2303_v47  ;;  %v14825_v47 = vld [vmem:[#allocation41_spill] sm:$0xff] }
 0x1a8   : > { %v524_v40 = vcombine.high %v9693_v50, %v9693_v50  ;;  %v8105_v0 = vadd.s32 4294967294, %v2032_v5  ;;  %v2322_v58 = vsel %vm2318_vm13, %v2306_v56, %v2321_v51  ;;  %v864_v34 = vcombine.high %v9793_v10, %v9793_v10 }
 0x1a9   : > { %v9975_v24 = vmul.u32.u64.low %v2332_v42, %v2331_v41  ;;  %v9976_v61 = vmul.u32.u64.high %v2332_v42, %v2331_v41, %v9975_v24  ;;  %v9978_v59 = vmul.u32.u64.low %v2332_v42, %v2327_v26  ;;  %v9979_v12 = vmul.u32.u64.high %v2332_v42, %v2327_v26, %v9978_v59 }
 0x1aa   : > { %v9983_v7 = vrot.slane %v524_v40, %v9238_v23  ;;  %v4475_v50 = vshrl.u32 %v14746_v36, %v14825_v47  ;;  %v9991_v54 = vmul.u32.u64.low %v14815_v53, %v9508_v9  ;;  %v9992_v56 = vmul.u32.u64.high %v14815_v53, %v9508_v9, %v9991_v54  ;;  %v14827_v24 = vld [vmem:[#allocation26_spill] sm:$0xff] }
 0x1ab   : > { %vm8106_vm0 = vcmp.lt.s32.totalorder %v8105_v0, 0  ;;  %v3000_v38 = vsub.s32 4294967266, %v9964_v20  ;;  %v2323_v22 = vsel %vm2317_vm15, %v2320_v63, %v2322_v58  ;;  %v1797_v10 = vsel %vm9893_vm6, 0, %v1795_v13  ;;  %v14826_v58 = vld [vmem:[#allocation27_spill] sm:$0xff] }
 0x1ac   : > { %14824 = vst [vmem:[#allocation47_spill] sm:$0xff] %v9983_v7  ;;  %v2035_v3 = vsel %vm8106_vm0, 0, %v8105_v0  ;;  %v9999_v33 = vrot.slane %v9983_v7, %v9238_v23  ;;  %v2020_v51 = vadd.s32 %v9841_v11, %v9847_v60  ;;  %vm2341_vm1 = vc.u32 %v9976_v61, %v9978_v59 }
 0x1ad   : > { %v2036_v26 = vsub.s32 32, %v2035_v3  ;;  %v2040_v9 = vsub.s32 4294967266, %v2035_v3  ;;  %v2342_v16 = vadd.s32 1, %v9979_v12  ;;  %v10011_v5 = vrot.slane %v864_v34, %v9238_v23  ;;  %v14828_v34 = vld [vmem:[#allocation48_spill] sm:$0xff] }
 0x1ae   : > { %v592_v31 = vrot.slane %v9999_v33, %v9251_v2  ;;  %v2037_v41 = vshll.u32 %v9925_v18, %v2035_v3  ;;  %v2339_v63 = vmul.u32 %v2332_v42, %v2323_v22  ;;  %v2996_v11 = vsub.s32 32, %v9964_v20 }
 0x1af   : > { %v2038_v32 = vshrl.u32 %v2020_v51, %v2036_v26  ;;  %v2041_v13 = vadd.s32 127, %v2040_v9  ;;  %v3001_v60 = vadd.s32 127, %v3000_v38  ;;  %v1801_v40 = vand.u32 3, %v1797_v10 }
 0x1b0   : > { %v2343_v0 = vsel %vm2341_vm1, %v2342_v16, %v9979_v12  ;;  %622 = vperm.xlu0 %8339, %v592_v31   ;;  %v2980_v47 = vadd.s32 %v14827_v24, %v14826_v58  ;;  %v4495_v18 = vsel %vm4491_vm14, %v4475_v50, %v14828_v34  ;;  %v905_v42 = vrot.slane %v10011_v5, %v9251_v2 }
 0x1b1   : > { %v2039_v54 = vor.u32 %v2038_v32, %v2037_v41  ;;  %v2042_v7 = vshll.u32 %v2041_v13, 23  ;;  %v2344_v8 = vadd.s32 %v2343_v0, %v2339_v63  ;;  %v1218_v38 = vcombine.high %v9655_v25, %v9655_v25 }
 0x1b2   : > { %v1512_v12 = vcombine.high %v9914_v29, %v9914_v29  ;;  %v8366_v3 = vpop.eup %8365  ;;  %v2997_v22 = vshll.u32 %v9108_v49, %v9964_v20  ;;  %v4496_v10 = vsel %vm4494_vm8, %v9105_v48, 2102212464  ;;  %v2998_v9 = vshrl.u32 %v2980_v47, %v2996_v11 }
 0x1b3   : > { %v2043_v51 = vor.u32 4788187, %v2042_v7  ;;  %v2345_v26 = vadd.s32 536870912, %v2344_v8  ;;  %v8368_v50 = vpop.eup %8367  ;;  %v3002_v16 = vshll.u32 %v3001_v60, 23  ;;  %vm1806_vm14 = vcmp.eq.s32.totalorder %v1801_v40, 2 }
 0x1b4   : > { %v1807_v31 = vxor.u32 2147483648, %v8366_v3  ;;  %935 = vperm.xlu0 %8339, %v905_v42   ;;  %v1804_v25 = vxor.u32 2147483648, %v8368_v50  ;;  %v2046_v32 = vcvt.s32.f32 %v2039_v54  ;;  %vm1803_vm2 = vcmp.eq.s32.totalorder %v1801_v40, 0 }
 0x1b5   : > { %v2044_v41 = vand.u32 2147483647, %v2043_v51  ;;  %v10032_v29 = vshrl.u32 %v2345_v26, 30  ;;  %v1248_v49 = vrot.slane %v1218_v38, %v9251_v2  ;;  %v10036_v20 = vrot.slane %v1512_v12, %v9238_v23 }
 0x1b6   : > { %v1808_v13 = vsel %vm1806_vm14, %v1807_v31, %v8368_v50  ;;  %vm1802_vm8 = vcmp.lt.s32.totalorder %v1801_v40, 2  ;;  %v1805_v48 = vsel %vm1803_vm2, %v8366_v3, %v1804_v25  ;;  %v3003_v11 = vor.u32 4788187, %v3002_v16  ;;  %v14832_v25 = vld [vmem:[#allocation40_spill] sm:$0xff] }
 0x1b7   : > { %v2047_v7 = vmul.f32 %v2046_v32, %v2044_v41  ;;  %v2347_v63 = vshll.u32 %v10032_v29, 30  ;;  %v4497_v60 = vsel %vm4493_vm7, %v9103_v45, %v4496_v10  ;;  %vm1800_vm3 = vweird.f32 %v9602_v35  ;;  %v14840_v35 = vld [vmem:[#allocation43_spill] sm:$0xff] }
 0x1b8   : > { %v1809_v0 = vsel %vm1802_vm8, %v1805_v48, %v1808_v13  ;;  %1278 = vperm.xlu0 %8339, %v1248_v49   ;;  %v2999_v58 = vor.u32 %v2998_v9, %v2997_v22  ;;  %v4517_v40 = vadd.s32 1, %v9857_v28  ;;  %vm1966_vm4 = vcmp.lt.s32.totalorder %v9664_v14, 0  ;;  %v14833_v13 = vld [vmem:[#allocation37_spill] sm:$0xff] }
 0x1b9   : > { %v1810_v24 = vsel %vm1800_vm3, nan, %v1809_v0  ;;  %v2048_v47 = vxor.u32 2147483648, %v2047_v7  ;;  %v10043_v54 = vsub.s32 %v2344_v8, %v2347_v63  ;;  %v1553_v42 = vrot.slane %v10036_v20, %v9251_v2  ;;  %v14834_v63 = vld [vmem:[#allocation45_spill] sm:$0xff] }
 0x1ba   : > { %v10046_v34 = vmul.f32 0.1875, %v1810_v24  ;;  %vm4516_vm7 = vc.u32 %v9992_v56, %v9856_v39  ;;  %v14829_v45 = vand.u32 2147483647, %v9664_v14  ;;  %v3004_v12 = vand.u32 2147483647, %v3003_v11  ;;  %v14835_v11 = vld [vmem:[#allocation23_spill] sm:$0xff] }
 0x1bb   : > { %v2049_v8 = vsel %vm1966_vm4, %v2048_v47, %v2047_v7  ;;  %v2350_v38 = vsub.s32 0, %v10043_v54  ;;  %v3006_v51 = vcvt.s32.f32 %v2999_v58  ;;  %v4498_v26 = vsel %vm4492_vm11, %v4495_v18, %v4497_v60  ;;  %v14836_v60 = vld [vmem:[#allocation31_spill] sm:$0xff]  ;;  %v14838_v58 = vld [vmem:[#allocation46_spill] sm:$0xff] }
 0x1bc   : > { %vm10055_vm5 = vcmp.le.f32.partialorder %v14829_v45, 0.7853982  ;;  %v1812_v3 = vmul.f32 %v10046_v34, %v10046_v34  ;;  %v1824_v22 = vrot.slane %v10046_v34, %v9238_v23  ;;  %1583 = vperm.xlu0 %8339, %v1553_v42   ;;  %v2050_v31 = vsub.s32 4, %v9904_v43 }
 0x1bd   : > { %v2052_v10 = vsel %vm10055_vm5, %v9664_v14, %v2049_v8  ;;  %v8108_v50 = vmin.u32 %v2350_v38, %v10043_v54  ;;  %v6909_v41 = vshrl.u32 %v14770_v44, %v14832_v25  ;;  %v4518_v15 = vsel %vm4516_vm7, %v4517_v40, %v9857_v28  ;;  %v14839_v8 = vld [vmem:[#allocation42_spill] sm:$0xff] }
 0x1be   : > { %8369 = vcosq.f32 %v2052_v10  ;;  %v10073_v9 = vrot.slane %v1824_v22, %v9238_v23  ;;  %v10076_v16 = vadd.f32 %v1812_v3, %v9923_v37  ;;  %v1832_v32 = vcombine.high %v1824_v22, %v1824_v22 }
 0x1bf   : > { %8371 = vsinq.f32 %v2052_v10  ;;  %v2352_v18 = vclz %v8108_v50  ;;  %v6914_v49 = vshll.u32 %v14776_v30, %v14833_v13  ;;  %v3007_v48 = vmul.f32 %v3006_v51, %v3004_v12 }
 0x1c0   : > { %v4514_v37 = vmul.u32 %v14815_v53, %v4498_v26  ;;  %v1869_v7 = vrot.slane %v10073_v9, %v9251_v2  ;;  %vm8130_vm11 = vcmp.lt.s32.totalorder %v14834_v63, 0  ;;  %v14837_v0 = vmul.u32 %v14835_v11, %v14836_v60 }
 0x1c1   : > { %v8109_v28 = vadd.s32 4294967294, %v2352_v18  ;;  %v10098_v47 = vrot.slane %v1832_v32, %v9238_v23  ;;  %v6912_v40 = vshrl.u32 %v14776_v30, %v14832_v25  ;;  %v6915_v53 = vshrl.u32 %v14761_v57, %v14832_v25 }
 0x1c2   : > { %v10095_v24 = vadd.s32 %v14838_v58, %v14837_v0  ;;  %v10104_v42 = vadd.s32 %v4518_v15, %v4514_v37  ;;  %1899 = vperm.xlu1 %8340, %v1869_v7   ;;  %v2051_v45 = vsel %vm1966_vm4, %v2050_v31, %v9904_v43  ;;  %v10110_v38 = vor.u32 %v6909_v41, %v14839_v8  ;;  %v14841_v0 = vld [vmem:[#allocation12_spill] sm:$0xff] }
 0x1c3   : > { %v6917_v12 = vshll.u32 %v14761_v57, %v14833_v13  ;;  %vm8110_vm6 = vcmp.lt.s32.totalorder %v8109_v28, 0  ;;  %v1873_v3 = vrot.slane %v10098_v47, %v9251_v2  ;;  %v10117_v22 = vsel %vm8130_vm11, 0, %v14834_v63 }
 0x1c4   : > { %v6918_v10 = vshrl.u32 %v14747_v46, %v14832_v25  ;;  %v3008_v51 = vxor.u32 2147483648, %v3007_v48  ;;  %v2355_v26 = vsel %vm8110_vm6, 0, %v8109_v28  ;;  %v2053_v43 = vsel %vm10055_vm5, 0, %v2051_v45 }
 0x1c5   : > { %v2340_v50 = vadd.s32 %v9978_v59, %v9976_v61  ;;  %v2356_v31 = vsub.s32 32, %v2355_v26  ;;  %v2360_v41 = vsub.s32 4294967266, %v2355_v26  ;;  %1903 = vperm.xlu0 %8339, %v1873_v3   ;;  %v5416_v15 = vadd.s32 536870912, %v10095_v24 }
 0x1c6   : > { %v10128_v18 = vshll.u32 %v14747_v46, %v14833_v13  ;;  %v10132_v32 = vshrl.u32 %v14762_v1, %v14832_v25  ;;  %v4520_v37 = vadd.s32 536870912, %v10104_v42  ;;  %v10136_v7 = vor.u32 %v6912_v40, %v14840_v35 }
 0x1c7   : > { %v2357_v61 = vshll.u32 %v10043_v54, %v2355_v26  ;;  %v2358_v59 = vshrl.u32 %v2340_v50, %v2356_v31  ;;  %v2361_v63 = vadd.s32 127, %v2360_v41  ;;  %v3896_v11 = vsub.s32 4294967266, %v10117_v22  ;;  %v14843_v26 = vld [vmem:[#allocation38_spill] sm:$0xff] }
 0x1c8   : > { %v10140_v60 = vor.u32 %v6915_v53, %v6914_v49  ;;  %vm2926_vm9 = vcmp.lt.s32.totalorder %v14841_v0, 0  ;;  %v2057_v13 = vand.u32 3, %v2053_v43  ;;  %v10143_v58 = vor.u32 %v6918_v10, %v6917_v12 }
 0x1c9   : > { %v3009_v28 = vsel %vm2926_vm9, %v3008_v51, %v3007_v48  ;;  %v2359_v45 = vor.u32 %v2358_v59, %v2357_v61  ;;  %v2362_v8 = vshll.u32 %v2361_v63, 23  ;;  %v10147_v3 = vshrl.u32 %v5416_v15, 30  ;;  %v14848_v48 = vld [vmem:[#allocation39_spill] sm:$0xff] }
 0x1ca   : > { %v6922_v54 = vor.u32 %v10132_v32, %v10128_v18  ;;  %vm6926_vm10 = vcmp.lt.s32.totalorder %v14843_v26, 4  ;;  %v10152_v49 = vshrl.u32 %v4520_v37, 30  ;;  %v14845_v43 = vand.u32 2147483647, %v14841_v0 }
 0x1cb   : > { %v8370_v40 = vpop.eup %8369  ;;  %14842 = vst [vmem:[#allocation30_spill] sm:$0xff] %v10147_v3  ;;  %v10162_v10 = vsub.f32 %v14848_v48, %v8629_v6  ;;  %v2363_v50 = vor.u32 4788187, %v2362_v8  ;;  %v3897_v31 = vadd.s32 127, %v3896_v11  ;;  %vm2062_vm13 = vcmp.eq.s32.totalorder %v2057_v13, 2 }
 0x1cc   : > { %14844 = vst [vmem:[#allocation33_spill] sm:$0xff] %v10152_v49  ;;  %v8372_v53 = vpop.eup %8371  ;;  %vm10156_vm12 = vcmp.le.f32.partialorder %v14845_v43, 0.7853982  ;;  %v2063_v51 = vxor.u32 2147483648, %v8370_v40  ;;  %vm2059_vm15 = vcmp.eq.s32.totalorder %v2057_v13, 0  ;;  %v2366_v37 = vcvt.s32.f32 %v2359_v45 }
 0x1cd   : > { %14849 = vst [vmem:[#allocation29_spill] sm:$0xff] %v10162_v10  ;;  %v3012_v41 = vsel %vm10156_vm12, %v14841_v0, %v3009_v28  ;;  %v2060_v15 = vxor.u32 2147483648, %v8372_v53  ;;  %v2364_v32 = vand.u32 2147483647, %v2363_v50  ;;  %v3892_v35 = vsub.s32 32, %v10117_v22  ;;  %v14851_v50 = vld [vmem:[#allocation35_spill] sm:$0xff] }
 0x1ce   : > { %v2064_v18 = vsel %vm2062_vm13, %v2063_v51, %v8372_v53  ;;  %vm6923_vm0 = vcmp.lt.s32.totalorder %v14843_v26, 1  ;;  %v4522_v61 = vshll.u32 %v10152_v49, 30  ;;  %vm2058_vm1 = vcmp.lt.s32.totalorder %v2057_v13, 2 }
 0x1cf   : > { %v2061_v59 = vsel %vm2059_vm15, %v8370_v40, %v2060_v15  ;;  %v5418_v63 = vshll.u32 %v10147_v3, 30  ;;  %vm2056_vm14 = vweird.f32 %v9664_v14  ;;  %v2367_v28 = vmul.f32 %v2366_v37, %v2364_v32  ;;  %v14850_v40 = vld [vmem:[#allocation36_spill] sm:$0xff] }
 0x1d0   : > { %v2065_v11 = vsel %vm2058_vm1, %v2061_v59, %v2064_v18  ;;  %v3898_v8 = vshll.u32 %v3897_v31, 23  ;;  %8373 = vcosq.f32 %v3012_v41  ;;  %v5998_v53 = vand.u32 2139095040, %v10162_v10 }
 0x1d1   : > { %v2066_v43 = vsel %vm2056_vm14, nan, %v2065_v11  ;;  %v6932_v45 = vsel %vm6926_vm10, %v10143_v58, 920167782  ;;  %8375 = vsinq.f32 %v3012_v41  ;;  %v2368_v13 = vxor.u32 2147483648, %v2367_v28 }
 0x1d2   : > { %v10176_v48 = vmul.f32 0.5625, %v2066_v43  ;;  %v3893_v51 = vshll.u32 %v14850_v40, %v10117_v22  ;;  %v3894_v14 = vshrl.u32 %v14851_v50, %v3892_v35  ;;  %v10182_v15 = vsub.s32 %v10104_v42, %v4522_v61 }
 0x1d3   : > { %vm2286_vm2 = vcmp.lt.s32.totalorder %v14813_v17, 0  ;;  %v14852_v41 = vand.u32 2147483647, %v14813_v17  ;;  %v3899_v37 = vor.u32 4788187, %v3898_v8  ;;  %v5999_v42 = vshrl.u32 %v5998_v53, 23 }
 0x1d4   : > { %v2068_v31 = vmul.f32 %v10176_v48, %v10176_v48  ;;  %v2080_v18 = vrot.slane %v10176_v48, %v9238_v23  ;;  %v2369_v22 = vsel %vm2286_vm2, %v2368_v13, %v2367_v28  ;;  %v2370_v35 = vsub.s32 4, %v10032_v29 }
 0x1d5   : > { %vm10191_vm8 = vcmp.le.f32.partialorder %v14852_v41, 0.7853982  ;;  %v3895_v40 = vor.u32 %v3894_v14, %v3893_v51  ;;  %v6936_v28 = vsel %vm6926_vm10, %v6922_v54, 1326507024  ;;  %v4525_v8 = vsub.s32 0, %v10182_v15  ;;  %v14857_v41 = vld [vmem:[#allocation5_spill] sm:$0xff] }
 0x1d6   : > { %v2372_v61 = vsel %vm10191_vm8, %v14813_v17, %v2369_v22  ;;  %v10202_v59 = vrot.slane %v2080_v18, %v9238_v23  ;;  %v10205_v11 = vadd.f32 %v2068_v31, %v10076_v16  ;;  %v2088_v43 = vcombine.high %v2080_v18, %v2080_v18 }
 0x1d7   : > { %8377 = vcosq.f32 %v2372_v61  ;;  %vm6925_vm3 = vcmp.lt.s32.totalorder %v14843_v26, 3  ;;  %v6931_v53 = vsel %vm6923_vm0, %v10110_v38, %v10136_v7  ;;  %v3900_v51 = vand.u32 2147483647, %v3899_v37 }
 0x1d8   : > { %14855 = vst [vmem:[#allocation41_spill] sm:$0xff] %v10202_v59  ;;  %8379 = vsinq.f32 %v2372_v61  ;;  %v2125_v16 = vrot.slane %v10202_v59, %v9251_v2  ;;  %v10218_v13 = vrot.slane %v2088_v43, %v9238_v23  ;;  %v10221_v50 = vsub.s32 %v10095_v24, %v5418_v63 }
 0x1d9   : > { %v6933_v54 = vsel %vm6925_vm3, %v10140_v60, %v6932_v45  ;;  %v6935_v14 = vsel %vm6923_vm0, %v10136_v7, %v10140_v60  ;;  %v6937_v31 = vsel %vm6925_vm3, %v10143_v58, %v6936_v28  ;;  %v8155_v18 = vadd.s32 4294967169, %v5999_v42  ;;  %v14858_v45 = vld [vmem:[#allocation16_spill] sm:$0xff] }
 0x1da   : > { %14856 = vst [vmem:[#allocation27_spill] sm:$0xff] %v10221_v50  ;;  %2155 = vperm.xlu1 %8340, %v2125_v16   ;;  %v2371_v24 = vsel %vm2286_vm2, %v2370_v35, %v10032_v29  ;;  %v2129_v63 = vrot.slane %v10218_v13, %v9251_v2  ;;  %v10240_v22 = vadd.f32 %v14858_v45, %v14857_v41  ;;  %v3902_v37 = vcvt.s32.f32 %v3895_v40  ;;  %v14859_v35 = vld [vmem:[#allocation24_spill] sm:$0xff]  ;;  %v14864_v41 = vld [vmem:[#allocation6_spill] sm:$0xff] }
 0x1db   : > { %vm6924_vm4 = vcmp.lt.s32.totalorder %v14843_v26, 2  ;;  %v8136_v61 = vmin.u32 %v4525_v8, %v10182_v15  ;;  %v6907_v58 = vshrl.u32 %v14746_v36, %v14832_v25  ;;  %v6928_v42 = vsel %vm6926_vm10, %v10140_v60, 2102212464 }
 0x1dc   : > { %v10251_v29 = vsel %vm6924_vm4, %v6931_v53, %v6933_v54  ;;  %v14860_v43 = vor.u32 8388608, %v14859_v35  ;;  %2159 = vperm.xlu0 %8339, %v2129_v63   ;;  %v3903_v40 = vmul.f32 %v3902_v37, %v3900_v51  ;;  %v5421_v16 = vsub.s32 0, %v10221_v50  ;;  %v8443_v53 = vld [vmem:[%s14511_s0] sm:$0xff] }
 0x1dd   : > { %v10260_v8 = vsel %vm6924_vm4, %v6935_v14, %v6937_v31  ;;  %v2373_v25 = vsel %vm10191_vm8, 0, %v2371_v24  ;;  %v8374_v60 = vpop.eup %8373  ;;  %v10268_v54 = vadd.f32 %v8443_v53, %v14858_v45  ;;  %v10273_v51 = vsel %vm6923_vm0, %v6907_v58, %v10110_v38  ;;  %v14865_v14 = vld [vmem:[#allocation10_spill] sm:$0xff]  ;;  %v14872_v45 = vld [vmem:[#allocation9_spill] sm:$0xff] }
 0x1de   : > { %v10255_v28 = vshll.u32 %v14860_v43, 8  ;;  %14863 = vst [vmem:[#allocation40_spill] sm:$0xff] %v10273_v51  ;;  %v6005_v63 = vadd.s32 1, %v8155_v18  ;;  %v10277_v31 = vadd.f32 %v14865_v14, %v14864_v41  ;;  %v8376_v32 = vpop.eup %8375  ;;  %v4527_v35 = vclz %v8136_v61  ;;  %v14869_v43 = vld [vmem:[#allocation44_spill] sm:$0xff] }
 0x1df   : > { %14862 = vst [vmem:[#allocation48_spill] sm:$0xff] %v10268_v54  ;;  %v3010_v53 = vsub.s32 4, %v14869_v43  ;;  %v10289_v38 = vsel %vm6925_vm3, %v10136_v7, %v6928_v42  ;;  %v2377_v14 = vand.u32 3, %v2373_v25  ;;  %vm3822_vm7 = vcmp.lt.s32.totalorder %v14872_v45, 0  ;;  %v14874_v7 = vld [vmem:[#allocation20_spill] sm:$0xff] }
 0x1e0   : > { %14861 = vst [vmem:[#allocation26_spill] sm:$0xff] %v10255_v28  ;;  %14866 = vst [vmem:[#allocation37_spill] sm:$0xff] %v10277_v31  ;;  %v10281_v24 = vmul.u32.u64.low %v10255_v28, %v10251_v29  ;;  %v10282_v37 = vmul.u32.u64.high %v10255_v28, %v10251_v29, %v10281_v24  ;;  %v10293_v18 = vmul.u32.u64.low %v10255_v28, %v10260_v8  ;;  %v10294_v58 = vmul.u32.u64.high %v10255_v28, %v10260_v8, %v10293_v18  ;;  %v14876_v31 = vld [vmem:[#allocation51_spill] sm:$0xff] }
 0x1e1   : > { %14870 = vst [vmem:[#allocation31_spill] sm:$0xff] %v10289_v38  ;;  %v3904_v29 = vxor.u32 2147483648, %v3903_v40  ;;  %v10299_v3 = vmin.u32 %v5421_v16, %v10221_v50  ;;  %v3011_v61 = vsel %vm2926_vm9, %v3010_v53, %v14869_v43  ;;  %v10306_v42 = vsub.f32 %v14874_v7, %v8629_v6 }
 0x1e2   : > { %14867 = vst [vmem:[#allocation45_spill] sm:$0xff] %v10282_v37  ;;  %14868 = vst [vmem:[#allocation23_spill] sm:$0xff] %v10281_v24  ;;  %vm6006_vm5 = vcmp.gt.s32.totalorder %v6005_v63, 0  ;;  %v3013_v8 = vsel %vm10156_vm12, 0, %v3011_v61  ;;  %v3020_v18 = vxor.u32 2147483648, %v8376_v32  ;;  %v3023_v25 = vxor.u32 2147483648, %v8374_v60 }
 0x1e3   : > { %14871 = vst [vmem:[#allocation46_spill] sm:$0xff] %v10294_v58  ;;  %14873 = vst [vmem:[#allocation42_spill] sm:$0xff] %v10299_v3  ;;  %v8137_v54 = vadd.s32 4294967294, %v4527_v35  ;;  %v2713_v16 = vcombine.high %v14876_v31, %v14876_v31  ;;  %v278_v58 = vcombine.high %v9554_v21, %v9554_v21  ;;  %v3017_v24 = vand.u32 3, %v3013_v8 }
 0x1e4   : > { %14875 = vst [vmem:[#allocation43_spill] sm:$0xff] %v10306_v42  ;;  %v8378_v41 = vpop.eup %8377  ;;  %vm2379_vm11 = vcmp.eq.s32.totalorder %v2377_v14, 0  ;;  %v263_v7 = vcombine.high %v9548_v62, %v9548_v62  ;;  %v3247_v12 = vand.u32 2139095040, %v10306_v42  ;;  %vm2382_vm6 = vcmp.eq.s32.totalorder %v2377_v14, 2 }
 0x1e5   : > { %v8380_v43 = vpop.eup %8379  ;;  %v2383_v53 = vxor.u32 2147483648, %v8378_v41  ;;  %vm3019_vm9 = vcmp.eq.s32.totalorder %v3017_v24, 0  ;;  %vm3022_vm10 = vcmp.eq.s32.totalorder %v3017_v24, 2  ;;  %vm3018_vm12 = vcmp.lt.s32.totalorder %v3017_v24, 2 }
 0x1e6   : > { %v2380_v61 = vxor.u32 2147483648, %v8380_v43  ;;  %v3021_v50 = vsel %vm3019_vm9, %v8374_v60, %v3020_v18  ;;  %v3024_v37 = vsel %vm3022_vm10, %v3023_v25, %v8376_v32  ;;  %vm2378_vm13 = vcmp.lt.s32.totalorder %v2377_v14, 2 }
 0x1e7   : > { %v2384_v35 = vsel %vm2382_vm6, %v2383_v53, %v8380_v43  ;;  %vm3016_vm15 = vweird.f32 %v14841_v0  ;;  %v3025_v21 = vsel %vm3018_vm12, %v3021_v50, %v3024_v37  ;;  %vm2376_vm0 = vweird.f32 %v14813_v17 }
 0x1e8   : > { %v2381_v28 = vsel %vm2379_vm11, %v8378_v41, %v2380_v61  ;;  %v3026_v26 = vsel %vm3016_vm15, nan, %v3025_v21  ;;  %v3248_v62 = vshrl.u32 %v3247_v12, 23  ;;  %vm8138_vm1 = vcmp.lt.s32.totalorder %v8137_v54, 0 }
 0x1e9   : > { %v2385_v8 = vsel %vm2378_vm13, %v2381_v28, %v2384_v35  ;;  %v2758_v38 = vcombine.high %v9308_v55, %v9308_v55  ;;  %v2727_v43 = vrot.slane %v2713_v16, %v9238_v23  ;;  %v10324_v60 = vsel %vm3822_vm7, %v3904_v29, %v3903_v40 }
 0x1ea   : > { %v2386_v51 = vsel %vm2376_vm0, nan, %v2385_v8  ;;  %14877 = vst [vmem:[#allocation12_spill] sm:$0xff] %v10324_v60  ;;  %v10330_v17 = vrot.slane %v278_v58, %v9238_v23  ;;  %v10333_v50 = vsel %vm6006_vm5, %v6005_v63, 0  ;;  %v277_v28 = vrot.slane %v263_v7, %v9238_v23 }
 0x1eb   : > { %v10327_v0 = vmul.f32 0.75, %v2386_v51  ;;  %v849_v55 = vcombine.high %v9782_v27, %v9782_v27  ;;  %v10338_v32 = vmul.f32 0.1875, %v3026_v26  ;;  %v10340_v24 = vsel %vm8138_vm1, 0, %v8137_v54  ;;  %v14879_v27 = vld [vmem:[#allocation52_spill] sm:$0xff] }
 0x1ec   : > { %v8119_v37 = vadd.s32 4294967169, %v3248_v62  ;;  %v2708_v63 = vmul.f32 %v14876_v31, %v14876_v31  ;;  %v2773_v58 = vrot.slane %v2758_v38, %v9251_v2  ;;  %v10350_v14 = vrot.slane %v2727_v43, %v9238_v23 }
 0x1ed   : > { %14878 = vst [vmem:[#allocation39_spill] sm:$0xff] %v10338_v32  ;;  %v2388_v40 = vmul.f32 %v10327_v0, %v10327_v0  ;;  %v2400_v51 = vrot.slane %v10327_v0, %v9238_v23  ;;  %v539_v26 = vcombine.high %v14879_v27, %v14879_v27  ;;  %v10361_v16 = vrot.slane %v277_v28, %v9238_v23 }
 0x1ee   : > { %v863_v31 = vrot.slane %v849_v55, %v9238_v23  ;;  %v2729_v38 = vcombine.high %v2727_v43, %v2727_v43  ;;  %v3028_v53 = vmul.f32 %v10338_v32, %v10338_v32  ;;  %v2781_v35 = vrot.slane %v10350_v14, %v9251_v2 }
 0x1ef   : > { %v10355_v54 = vrot.slane %v2400_v51, %v9238_v23  ;;  %v2389_v29 = vadd.f32 %v2388_v40, %v10205_v11  ;;  %v2408_v25 = vcombine.high %v2400_v51, %v2400_v51  ;;  %v3254_v11 = vadd.s32 1, %v8119_v37  ;;  %v14882_v51 = vld [vmem:[#allocation17_spill] sm:$0xff] }
 0x1f0   : > { %v10374_v21 = vrot.slane %v539_v26, %v9238_v23  ;;  %v894_v8 = vcombine.high %v9803_v19, %v9803_v19  ;;  %v279_v62 = vcombine.high %v277_v28, %v277_v28  ;;  %v2760_v55 = vcombine.high %v9681_v4, %v9681_v4  ;;  %v14884_v26 = vld [vmem:[#allocation19_spill] sm:$0xff] }
 0x1f1   : > { %14880 = vst [vmem:[#allocation36_spill] sm:$0xff] %v10355_v54  ;;  %v2445_v7 = vrot.slane %v10355_v54, %v9251_v2  ;;  %v2709_v12 = vadd.f32 %v2708_v63, %v2389_v29  ;;  %v10369_v61 = vrot.slane %v2408_v25, %v9238_v23  ;;  %v10386_v37 = vsub.f32 %v14882_v51, %v8629_v6 }
 0x1f2   : > { %v10391_v27 = vrot.slane %v863_v31, %v9238_v23  ;;  %v1219_v19 = vcombine.high %v9646_v52, %v9646_v52  ;;  %v14600_v28 = vand.u32 2147483647, %v10306_v42  ;;  %v10397_v4 = vrot.slane %v2729_v38, %v9238_v23 }
 0x1f3   : > { %2475 = vperm.xlu1 %8340, %v2445_v7   ;;  %v2449_v43 = vrot.slane %v10369_v61, %v9251_v2  ;;  %v10382_v40 = vadd.f32 %v3028_v53, %v2709_v12  ;;  %v1188_v29 = vcombine.high %v14884_v26, %v14884_v26  ;;  %v570_v25 = vcombine.high %v9999_v33, %v9999_v33  ;;  %v14886_v12 = vld [vmem:[#allocation15_spill] sm:$0xff] }
 0x1f4   : > { %14883 = vst [vmem:[#allocation5_spill] sm:$0xff] %v10397_v4  ;;  %vm3255_vm14 = vcmp.gt.s32.totalorder %v3254_v11, 0  ;;  %v10406_v7 = vrot.slane %v894_v8, %v9251_v2  ;;  %v10409_v52 = vrot.slane %v279_v62, %v9238_v23  ;;  %v1497_v38 = vcombine.high %v14886_v12, %v14886_v12 }
 0x1f5   : > { %14881 = vst [vmem:[#allocation35_spill] sm:$0xff] %v10382_v40  ;;  %2479 = vperm.xlu0 %8339, %v2449_v43   ;;  %v2777_v43 = vrot.slane %v2760_v55, %v9251_v2  ;;  %v865_v51 = vcombine.high %v863_v31, %v863_v31  ;;  %v1817_v33 = vcombine.high %v10046_v34, %v10046_v34  ;;  %v3503_v26 = vand.u32 2139095040, %v10386_v37 }
 0x1f6   : > { %14885 = vst [vmem:[#allocation24_spill] sm:$0xff] %v10409_v52  ;;  %v10420_v8 = vrot.slane %v1219_v19, %v9251_v2  ;;  %v3251_v62 = vand.u32 8388607, %v14600_v28  ;;  %v3256_v53 = vsel %vm3255_vm14, %v3254_v11, 0  ;;  %v10427_v31 = vrot.slane %v1188_v29, %v9238_v23 }
 0x1f7   : > { %2803 = vperm.xlu1 %8340, %v2773_v58   ;;  %v2785_v58 = vrot.slane %v10397_v4, %v9251_v2  ;;  %v600_v34 = vrot.slane %v570_v25, %v9251_v2  ;;  %v3258_v55 = vand.u32 31, %v3256_v53  ;;  %v335_v12 = vrot.slane %v10409_v52, %v9251_v2 }
 0x1f8   : > { %v10433_v19 = vrot.slane %v1497_v38, %v9238_v23  ;;  %v896_v28 = vcombine.high %v10011_v5, %v10011_v5  ;;  %v1544_v11 = vcombine.high %v10036_v20, %v10036_v20  ;;  %v10443_v29 = vrot.slane %v1817_v33, %v9238_v23 }
 0x1f9   : > { %2807 = vperm.xlu0 %8339, %v2777_v43   ;;  %v10440_v43 = vrot.slane %v865_v51, %v9238_v23  ;;  %v3259_v25 = vsub.s32 32, %v3258_v55  ;;  %v3504_v41 = vshrl.u32 %v3503_v26, 23  ;;  %v3252_v63 = vor.u32 8388608, %v3251_v62 }
 0x1fa   : > { %v3257_v18 = vshrl.u32 %v3256_v53, 5  ;;  %v3261_v38 = vshll.u32 %v14746_v36, %v3258_v55  ;;  %v3264_v32 = vshll.u32 %v14770_v44, %v3258_v55  ;;  %v3270_v33 = vshll.u32 %v14761_v57, %v3258_v55 }
 0x1fb   : > { %2811 = vperm.xlu1 %8340, %v2781_v35   ;;  %v3262_v5 = vshrl.u32 %v14770_v44, %v3259_v25  ;;  %v3265_v20 = vshrl.u32 %v14776_v30, %v3259_v25  ;;  %v3267_v35 = vshll.u32 %v14776_v30, %v3258_v55  ;;  %v3268_v51 = vshrl.u32 %v14761_v57, %v3259_v25 }
 0x1fc   : > { %v3271_v4 = vshrl.u32 %v14747_v46, %v3259_v25  ;;  %v3273_v26 = vshll.u32 %v14747_v46, %v3258_v55  ;;  %v3274_v53 = vshrl.u32 %v14762_v1, %v3259_v25  ;;  %v14887_v62 = vrot.slane %v10330_v17, %v9251_v2 }
 0x1fd   : > { %2815 = vperm.xlu0 %8339, %v2785_v58   ;;  %v3263_v58 = vor.u32 %v3262_v5, %v3261_v38  ;;  %v3266_v3 = vor.u32 %v3265_v20, %v3264_v32  ;;  %v3269_v49 = vor.u32 %v3268_v51, %v3267_v35  ;;  %v8123_v40 = vadd.s32 4294967169, %v3504_v41 }
 0x1fe   : > { %v3272_v60 = vor.u32 %v3271_v4, %v3270_v33  ;;  %v3275_v45 = vor.u32 %v3274_v53, %v3273_v26  ;;  %vm3276_vm2 = vcmp.lt.s32.totalorder %v3257_v18, 1  ;;  %vm3279_vm8 = vcmp.lt.s32.totalorder %v3257_v18, 4 }
 0x1ff   : > { %349 = vperm.xlu1 %8340, %v14887_v62   ;;  %v1513_v42 = vcombine.high %v10433_v19, %v10433_v19  ;;  %v3281_v54 = vsel %vm3279_vm8, %v3269_v49, 2102212464  ;;  %v3284_v55 = vsel %vm3276_vm2, %v3263_v58, %v3266_v3  ;;  %v3292_v52 = vshll.u32 %v3252_v63, 8 }
 0x200   : > { %v3260_v59 = vshrl.u32 %v14746_v36, %v3259_v25  ;;  %vm3278_vm3 = vcmp.lt.s32.totalorder %v3257_v18, 3  ;;  %v3285_v62 = vsel %vm3279_vm8, %v3272_v60, 920167782  ;;  %v3288_v32 = vsel %vm3276_vm2, %v3266_v3, %v3269_v49 }
 0x201   : > { %365 = vperm.xlu0 %8339, %v335_v12   ;;  %v14888_v41 = vrot.slane %v10361_v16, %v9251_v2  ;;  %vm3277_vm5 = vcmp.lt.s32.totalorder %v3257_v18, 2  ;;  %v3286_v4 = vsel %vm3278_vm3, %v3269_v49, %v3285_v62  ;;  %v3289_v12 = vsel %vm3279_vm8, %v3275_v45, 1326507024 }
 0x202   : > { %v3510_v38 = vadd.s32 1, %v8123_v40  ;;  %v3280_v5 = vsel %vm3276_vm2, %v3260_v59, %v3263_v58  ;;  %v3282_v20 = vsel %vm3278_vm3, %v3266_v3, %v3281_v54  ;;  %v3287_v35 = vsel %vm3277_vm5, %v3284_v55, %v3286_v4  ;;  %v14890_v59 = vld [vmem:[#allocation14_spill] sm:$0xff] }
 0x203   : > { %361 = vperm.xlu1 %8340, %v14888_v41   ;;  %v3290_v63 = vsel %vm3278_vm3, %v3272_v60, %v3289_v12  ;;  %v10469_v51 = vmul.u32.u64.low %v3292_v52, %v3287_v35  ;;  %v10470_v33 = vmul.u32.u64.high %v3292_v52, %v3287_v35, %v10469_v51  ;;  %v14614_v49 = vand.u32 2147483647, %v10386_v37 }
 0x204   : > { %v3291_v25 = vsel %vm3277_vm5, %v3288_v32, %v3290_v63  ;;  %vm3511_vm11 = vcmp.gt.s32.totalorder %v3510_v38, 0  ;;  %v14889_v3 = vrot.slane %v10374_v21, %v9251_v2  ;;  %v913_v54 = vrot.slane %v896_v28, %v9251_v2 }
 0x205   : > { %630 = vperm.xlu0 %8339, %v600_v34   ;;  %v10473_v26 = vmul.u32.u64.low %v3292_v52, %v3291_v25  ;;  %v10474_v53 = vmul.u32.u64.high %v3292_v52, %v3291_v25, %v10473_v26  ;;  %v3512_v45 = vsel %vm3511_vm11, %v3510_v38, 0  ;;  %v3283_v40 = vsel %vm3277_vm5, %v3280_v5, %v3282_v20 }
 0x206   : > { %v3514_v34 = vand.u32 31, %v3512_v45  ;;  %v921_v55 = vrot.slane %v10440_v43, %v9251_v2  ;;  %v1561_v62 = vrot.slane %v1544_v11, %v9251_v2  ;;  %v10492_v41 = vrot.slane %v1513_v42, %v9238_v23 }
 0x207   : > { %610 = vperm.xlu1 %8340, %v14889_v3   ;;  %v1833_v18 = vcombine.high %v10443_v29, %v10443_v29  ;;  %v3302_v28 = vadd.s32 1, %v10470_v33  ;;  %v3299_v12 = vmul.u32 %v3292_v52, %v3283_v40  ;;  %vm3301_vm6 = vc.u32 %v10474_v53, %v10469_v51 }
 0x208   : > { %v3515_v4 = vsub.s32 32, %v3514_v34  ;;  %v3507_v11 = vand.u32 8388607, %v14614_v49  ;;  %v3513_v38 = vshrl.u32 %v3512_v45, 5  ;;  %v3517_v42 = vshll.u32 %v14746_v36, %v3514_v34 }
 0x209   : > { %943 = vperm.xlu0 %8339, %v913_v54   ;;  %v3303_v5 = vsel %vm3301_vm6, %v3302_v28, %v10470_v33  ;;  %v3520_v20 = vshll.u32 %v14770_v44, %v3514_v34  ;;  %v3523_v35 = vshll.u32 %v14776_v30, %v3514_v34  ;;  %v3526_v45 = vshll.u32 %v14761_v57, %v3514_v34 }
 0x20a   : > { %v3304_v63 = vadd.s32 %v3303_v5, %v3299_v12  ;;  %v3518_v52 = vshrl.u32 %v14770_v44, %v3515_v4  ;;  %v3521_v25 = vshrl.u32 %v14776_v30, %v3515_v4  ;;  %v3524_v26 = vshrl.u32 %v14761_v57, %v3515_v4 }
 0x20b   : > { %939 = vperm.xlu1 %8340, %v10406_v7   ;;  %v3527_v7 = vshrl.u32 %v14747_v46, %v3515_v4  ;;  %v3529_v33 = vshll.u32 %v14747_v46, %v3514_v34  ;;  %v3530_v3 = vshrl.u32 %v14762_v1, %v3515_v4  ;;  %v14891_v12 = vrot.slane %v10391_v27, %v9251_v2 }
 0x20c   : > { %v3305_v54 = vadd.s32 536870912, %v3304_v63  ;;  %v3519_v40 = vor.u32 %v3518_v52, %v3517_v42  ;;  %v3522_v28 = vor.u32 %v3521_v25, %v3520_v20  ;;  %v3525_v49 = vor.u32 %v3524_v26, %v3523_v35 }
 0x20d   : > { %951 = vperm.xlu0 %8339, %v921_v55   ;;  %v3508_v5 = vor.u32 8388608, %v3507_v11  ;;  %v3528_v60 = vor.u32 %v3527_v7, %v3526_v45  ;;  %v3531_v32 = vor.u32 %v3530_v3, %v3529_v33  ;;  %vm3532_vm9 = vcmp.lt.s32.totalorder %v3513_v38, 1 }
 0x20e   : > { %v1569_v55 = vrot.slane %v10492_v41, %v9251_v2  ;;  %v10518_v58 = vshrl.u32 %v3305_v54, 30  ;;  %vm3535_vm10 = vcmp.lt.s32.totalorder %v3513_v38, 4  ;;  %v3540_v34 = vsel %vm3532_vm9, %v3519_v40, %v3522_v28 }
 0x20f   : > { %947 = vperm.xlu1 %8340, %v14891_v12   ;;  %v2073_v42 = vcombine.high %v10176_v48, %v10176_v48  ;;  %vm3534_vm12 = vcmp.lt.s32.totalorder %v3513_v38, 3  ;;  %v3537_v20 = vsel %vm3535_vm10, %v3525_v49, 2102212464  ;;  %v3541_v35 = vsel %vm3535_vm10, %v3528_v60, 920167782 }
 0x210   : > { %v3307_v11 = vshll.u32 %v10518_v58, 30  ;;  %v3516_v52 = vshrl.u32 %v14746_v36, %v3515_v4  ;;  %vm3533_vm13 = vcmp.lt.s32.totalorder %v3513_v38, 2  ;;  %v3542_v25 = vsel %vm3534_vm12, %v3525_v49, %v3541_v35 }
 0x211   : > { %1591 = vperm.xlu0 %8339, %v1561_v62   ;;  %v3543_v26 = vsel %vm3533_vm13, %v3540_v34, %v3542_v25  ;;  %v3544_v45 = vsel %vm3532_vm9, %v3522_v28, %v3525_v49  ;;  %v3545_v7 = vsel %vm3535_vm10, %v3531_v32, 1326507024  ;;  %v3548_v62 = vshll.u32 %v3508_v5, 8 }
 0x212   : > { %v10528_v33 = vsub.s32 %v3304_v63, %v3307_v11  ;;  %v3536_v48 = vsel %vm3532_vm9, %v3516_v52, %v3519_v40  ;;  %v3538_v3 = vsel %vm3534_vm12, %v3522_v28, %v3537_v20  ;;  %v3546_v54 = vsel %vm3534_vm12, %v3528_v60, %v3545_v7 }
 0x213   : > { %1266 = vperm.xlu1 %8340, %v10420_v8   ;;  %v10532_v12 = vrot.slane %v1833_v18, %v9238_v23  ;;  %v3547_v4 = vsel %vm3533_vm13, %v3544_v45, %v3546_v54  ;;  %v10535_v35 = vmul.u32.u64.low %v3548_v62, %v3543_v26  ;;  %v10536_v8 = vmul.u32.u64.high %v3548_v62, %v3543_v26, %v10535_v35 }
 0x214   : > { %v10540_v49 = vrot.slane %v2073_v42, %v9238_v23  ;;  %v3310_v32 = vsub.s32 0, %v10528_v33  ;;  %v10543_v63 = vmul.u32.u64.low %v3548_v62, %v3547_v4  ;;  %v10544_v5 = vmul.u32.u64.high %v3548_v62, %v3547_v4, %v10543_v63 }
 0x215   : > { %1599 = vperm.xlu0 %8339, %v1569_v55   ;;  %v14892_v18 = vrot.slane %v10427_v31, %v9251_v2  ;;  %v14893_v40 = vcombine.high %v10098_v47, %v10098_v47  ;;  %v3539_v55 = vsel %vm3533_vm13, %v3536_v48, %v3538_v3  ;;  %v10557_v34 = vsub.f32 %v10240_v22, %v8629_v6 }
 0x216   : > { %v4515_v42 = vadd.s32 %v9856_v39, %v9992_v56  ;;  %v4535_v20 = vsub.s32 4294967266, %v10340_v24  ;;  %v10563_v11 = vand.u32 31, %v10333_v50  ;;  %v8120_v52 = vmin.u32 %v3310_v32, %v10528_v33 }
 0x217   : > { %1274 = vperm.xlu1 %8340, %v14892_v18   ;;  %v1881_v28 = vrot.slane %v14893_v40, %v9251_v2  ;;  %14894 = vst [vmem:[#allocation10_spill] sm:$0xff] %v10557_v34  ;;  %v14895_v47 = vcombine.high %v14890_v59, %v14890_v59  ;;  %v10572_v25 = vrot.slane %v10433_v19, %v9238_v23  ;;  %v3558_v56 = vadd.s32 1, %v10536_v8 }
 0x218   : > { %v1889_v39 = vrot.slane %v10532_v12, %v9251_v2  ;;  %v2089_v22 = vcombine.high %v10540_v49, %v10540_v49  ;;  %v3312_v26 = vclz %v8120_v52  ;;  %v3555_v45 = vmul.u32 %v3548_v62, %v3539_v55 }
 0x219   : > { %v1557_v38 = vrot.slane %v14895_v47, %v9251_v2  ;;  %1911 = vperm.xlu0 %8339, %v1881_v28   ;;  %vm3557_vm15 = vc.u32 %v10544_v5, %v10535_v35  ;;  %v2393_v59 = vcombine.high %v10327_v0, %v10327_v0  ;;  %v2120_v19 = vcombine.high %v10218_v13, %v10218_v13 }
 0x21a   : > { %v3559_v7 = vsel %vm3557_vm15, %v3558_v56, %v10536_v8  ;;  %v4142_v48 = vand.u32 2139095040, %v10557_v34  ;;  %v4531_v3 = vsub.s32 32, %v10340_v24  ;;  %v8121_v62 = vadd.s32 4294967294, %v3312_v26 }
 0x21b   : > { %1587 = vperm.xlu1 %8340, %v1557_v38   ;;  %v3560_v4 = vadd.s32 %v3559_v7, %v3555_v45  ;;  %v10590_v32 = vadd.s32 127, %v4535_v20  ;;  %v1565_v63 = vrot.slane %v10572_v25, %v9251_v2  ;;  %v1862_v0 = vcombine.high %v10073_v9, %v10073_v9  ;;  %v10617_v45 = vpop.permute.xlu0 %1254 }
 0x21c   : > { %v4143_v13 = vshrl.u32 %v4142_v48, 23  ;;  %v10598_v8 = vrot.slane %v10443_v29, %v9238_v23  ;;  %v10601_v18 = vrot.slane %v2089_v22, %v9238_v23  ;;  %vm8122_vm0 = vcmp.lt.s32.totalorder %v8121_v62, 0 }
 0x21d   : > { %1919 = vperm.xlu0 %8339, %v1889_v39   ;;  %v3561_v40 = vadd.s32 536870912, %v3560_v4  ;;  %v10604_v28 = vrot.slane %v2393_v59, %v9238_v23  ;;  %v2137_v55 = vrot.slane %v2120_v19, %v9251_v2  ;;  %v3315_v20 = vsel %vm8122_vm0, 0, %v8121_v62 }
 0x21e   : > { %v8131_v52 = vadd.s32 4294967169, %v4143_v13  ;;  %v3300_v9 = vadd.s32 %v10469_v51, %v10474_v53  ;;  %v3316_v47 = vsub.s32 32, %v3315_v20  ;;  %v3320_v38 = vsub.s32 4294967266, %v3315_v20 }
 0x21f   : > { %1595 = vperm.xlu1 %8340, %v1565_v63   ;;  %v10609_v29 = vshrl.u32 %v3561_v40, 30  ;;  %v10611_v39 = vshrl.u32 %v4515_v42, %v4531_v3  ;;  %v1877_v22 = vrot.slane %v1862_v0, %v9251_v2  ;;  %v2759_v26 = vcombine.high %v10350_v14, %v10350_v14  ;;  %v14896_v0 = vld [vmem:[#allocation41_spill] sm:$0xff] }
 0x220   : > { %v3317_v59 = vshll.u32 %v10528_v33, %v3315_v20  ;;  %v3318_v19 = vshrl.u32 %v3300_v9, %v3316_v47  ;;  %v3321_v51 = vadd.s32 127, %v3320_v38  ;;  %v2145_v42 = vrot.slane %v10601_v18, %v9251_v2  ;;  %v14897_v20 = vld [vmem:[#allocation24_spill] sm:$0xff] }
 0x221   : > { %2167 = vperm.xlu0 %8339, %v2137_v55   ;;  %v3563_v53 = vshll.u32 %v10609_v29, 30  ;;  %v2440_v7 = vcombine.high %v10369_v61, %v10369_v61  ;;  %v2409_v48 = vcombine.high %v10604_v28, %v10604_v28  ;;  %v4149_v3 = vadd.s32 1, %v8131_v52 }
 0x222   : > { %v1885_v14 = vrot.slane %v10598_v8, %v9251_v2  ;;  %v3319_v62 = vor.u32 %v3318_v19, %v3317_v59  ;;  %v3322_v33 = vshll.u32 %v3321_v51, 23  ;;  %v2118_v13 = vcombine.high %v14896_v0, %v14896_v0 }
 0x223   : > { %1907 = vperm.xlu1 %8340, %v1877_v22   ;;  %v10629_v63 = vsub.s32 %v3560_v4, %v3563_v53  ;;  %v10634_v40 = vrot.slane %v2759_v26, %v9251_v2  ;;  %v310_v61 = vcombine.high %v10330_v17, %v10330_v17  ;;  %v309_v55 = vcombine.high %v10361_v16, %v10361_v16  ;;  %v10655_v26 = vpop.permute.xlu0 %606 }
 0x224   : > { %v311_v52 = vcombine.high %v14897_v20, %v14897_v20  ;;  %v897_v4 = vcombine.high %v10440_v43, %v10440_v43  ;;  %v3323_v9 = vor.u32 4788187, %v3322_v33  ;;  %v2457_v38 = vrot.slane %v2440_v7, %v9251_v2 }
 0x225   : > { %2175 = vperm.xlu0 %8339, %v2145_v42   ;;  %v3566_v47 = vsub.s32 0, %v10629_v63  ;;  %v10647_v22 = vrot.slane %v2409_v48, %v9238_v23  ;;  %v1545_v17 = vcombine.high %v10492_v41, %v10492_v41  ;;  %vm4150_vm1 = vcmp.gt.s32.totalorder %v4149_v3, 0 }
 0x226   : > { %v10653_v16 = vrot.slane %v10540_v49, %v9238_v23  ;;  %v3324_v43 = vand.u32 2147483647, %v3323_v9  ;;  %v3326_v59 = vcvt.s32.f32 %v3319_v62  ;;  %v2133_v51 = vrot.slane %v2118_v13, %v9251_v2  ;;  %v14898_v13 = vld [vmem:[#allocation47_spill] sm:$0xff] }
 0x227   : > { %1915 = vperm.xlu1 %8340, %v1885_v14   ;;  %v8124_v19 = vmin.u32 %v3566_v47, %v10629_v63  ;;  %v10660_v53 = vrot.slane %v310_v61, %v9251_v2  ;;  %v10663_v42 = vrot.slane %v309_v55, %v9251_v2  ;;  %v3330_v7 = vsub.s32 4, %v10518_v58 }
 0x228   : > { %v3327_v49 = vmul.f32 %v3326_v59, %v3324_v43  ;;  %v4151_v14 = vsel %vm4150_vm1, %v4149_v3, 0  ;;  %v2465_v62 = vrot.slane %v10647_v22, %v9251_v2  ;;  %v343_v33 = vrot.slane %v311_v52, %v9251_v2  ;;  %v14900_v52 = vld [vmem:[#allocation43_spill] sm:$0xff]  ;;  %v10682_v59 = vpop.permute.xlu0 %1262 }
 0x229   : > { %2487 = vperm.xlu0 %8339, %v2457_v38   ;;  %v3568_v48 = vclz %v8124_v19  ;;  %v929_v0 = vrot.slane %v897_v4, %v9251_v2  ;;  %v2141_v55 = vrot.slane %v10653_v16, %v9251_v2  ;;  %v1577_v20 = vrot.slane %v1545_v17, %v9251_v2  ;;  %v14899_v38 = vld [vmem:[#allocation36_spill] sm:$0xff] }
 0x22a   : > { %v3328_v9 = vxor.u32 2147483648, %v3327_v49  ;;  %v2438_v3 = vcombine.high %v14899_v38, %v14899_v38  ;;  %v1865_v43 = vcombine.high %v10532_v12, %v10532_v12  ;;  %vm3246_vm14 = vcmp.lt.s32.totalorder %v14900_v52, 0 }
 0x22b   : > { %2163 = vperm.xlu1 %8340, %v2133_v51   ;;  %v8125_v47 = vadd.s32 4294967294, %v3568_v48  ;;  %v4153_v4 = vand.u32 31, %v4151_v14  ;;  %v14901_v19 = vand.u32 2147483647, %v14900_v52  ;;  %v3331_v48 = vsel %vm3246_vm14, %v3330_v7, %v10518_v58 }
 0x22c   : > { %v3329_v17 = vsel %vm3246_vm14, %v3328_v9, %v3327_v49  ;;  %v2121_v12 = vcombine.high %v10601_v18, %v10601_v18  ;;  %v3556_v49 = vadd.s32 %v10535_v35, %v10544_v5  ;;  %v2453_v7 = vrot.slane %v2438_v3, %v9251_v2 }
 0x22d   : > { %2495 = vperm.xlu0 %8339, %v2465_v62   ;;  %vm10686_vm2 = vcmp.le.f32.partialorder %v14901_v19, 0.7853982  ;;  %vm8126_vm8 = vcmp.lt.s32.totalorder %v8125_v47, 0  ;;  %v10693_v62 = vrot.slane %v10604_v28, %v9238_v23  ;;  %v14616_v56 = vand.u32 2147483647, %v10557_v34 }
 0x22e   : > { %v3332_v38 = vsel %vm10686_vm2, %v14900_v52, %v3329_v17  ;;  %v3571_v19 = vsel %vm8126_vm8, 0, %v8125_v47  ;;  %v3333_v28 = vsel %vm10686_vm2, 0, %v3331_v48  ;;  %v1897_v35 = vrot.slane %v1865_v43, %v9251_v2  ;;  %v14909_v48 = vld [vmem:[#allocation28_spill] sm:$0xff] }
 0x22f   : > { %2171 = vperm.xlu1 %8340, %v2141_v55   ;;  %14904 = vst [vmem:[#allocation44_spill] sm:$0xff] %v10693_v62  ;;  %8381 = vcosq.f32 %v3332_v38  ;;  %v3572_v9 = vsub.s32 32, %v3571_v19  ;;  %v3576_v58 = vsub.s32 4294967266, %v3571_v19  ;;  %v10705_v55 = vsub.s32 32, %v4153_v4 }
 0x230   : > { %8383 = vsinq.f32 %v3332_v38  ;;  %v3573_v18 = vshll.u32 %v10629_v63, %v3571_v19  ;;  %v10711_v5 = vrot.slane %v2121_v12, %v9251_v2  ;;  %v2461_v63 = vrot.slane %v10693_v62, %v9251_v2  ;;  %v10722_v19 = vpop.permute.xlu0 %1270 }
 0x231   : > { %373 = vperm.xlu0 %8339, %v343_v33   ;;  %v3574_v17 = vshrl.u32 %v3556_v49, %v3572_v9  ;;  %v3577_v47 = vadd.s32 127, %v3576_v58  ;;  %v14905_v33 = vld [vmem:[#allocation9_spill] sm:$0xff]  ;;  %14910 = vst [vmem:[#allocation20_spill] sm:$0xff] %v10722_v19  ;;  %v14911_v58 = vld [vmem:[#allocation12_spill] sm:$0xff]  ;;  %v10729_v12 = vand.u32 3, %v3333_v28  ;;  %vm3502_vm5 = vcmp.lt.s32.totalorder %v10386_v37, 0 }
 0x232   : > { %v14906_v3 = vand.u32 2147483647, %v14905_v33  ;;  %v4163_v54 = vshrl.u32 %v14761_v57, %v10705_v55  ;;  %v4156_v60 = vshll.u32 %v14746_v36, %v4153_v4  ;;  %v4159_v61 = vshll.u32 %v14770_v44, %v4153_v4 }
 0x233   : > { %2483 = vperm.xlu1 %8340, %v2453_v7   ;;  %v3575_v49 = vor.u32 %v3574_v17, %v3573_v18  ;;  %v3578_v9 = vshll.u32 %v3577_v47, 23  ;;  %v4157_v7 = vshrl.u32 %v14770_v44, %v10705_v55  ;;  %v4166_v18 = vshrl.u32 %v14747_v46, %v10705_v55 }
 0x234   : > { %vm10715_vm3 = vcmp.le.f32.partialorder %v14906_v3, 0.7853982  ;;  %v4160_v3 = vshrl.u32 %v14776_v30, %v10705_v55  ;;  %v14912_v17 = vand.u32 2147483647, %v10386_v37  ;;  %v4146_v47 = vand.u32 8388607, %v14616_v56  ;;  %v10768_v19 = vpop.permute.xlu0 %2799 }
 0x235   : > { %v3908_v43 = vsel %vm10715_vm3, %v14905_v33, %v14911_v58  ;;  %959 = vperm.xlu0 %8339, %v929_v0   ;;  %v3579_v28 = vor.u32 4788187, %v3578_v9  ;;  %v10746_v58 = vshrl.u32 %v4151_v14, 5  ;;  %v4162_v38 = vshll.u32 %v14776_v30, %v4153_v4  ;;  %14915 = vst [vmem:[#allocation51_spill] sm:$0xff] %v10768_v19 }
 0x236   : > { %vm10740_vm11 = vcmp.le.f32.partialorder %v14912_v17, 0.7853982  ;;  %v4165_v17 = vshll.u32 %v14761_v57, %v4153_v4  ;;  %v3582_v62 = vcvt.s32.f32 %v3575_v49  ;;  %v4168_v9 = vshll.u32 %v14747_v46, %v4153_v4 }
 0x237   : > { %2491 = vperm.xlu1 %8340, %v2461_v63   ;;  %v3580_v41 = vand.u32 2147483647, %v3579_v28  ;;  %v4169_v14 = vshrl.u32 %v14762_v1, %v10705_v55  ;;  %v2441_v63 = vcombine.high %v10647_v22, %v10647_v22  ;;  %v10764_v56 = vor.u32 %v4157_v7, %v4156_v60  ;;  %v10772_v28 = vpop.permute.xlu1 %2795 }
 0x238   : > { %v10766_v34 = vor.u32 %v4160_v3, %v4159_v61  ;;  %v4167_v6 = vor.u32 %v4166_v18, %v4165_v17  ;;  %vm3336_vm6 = vweird.f32 %v14900_v52  ;;  %8385 = vcosq.f32 %v3908_v43  ;;  %14916 = vst [vmem:[#allocation52_spill] sm:$0xff] %v10772_v28 }
 0x239   : > { %1607 = vperm.xlu0 %8339, %v1577_v20   ;;  %v3583_v4 = vmul.f32 %v3582_v62, %v3580_v41  ;;  %v4164_v49 = vor.u32 %v4163_v54, %v4162_v38  ;;  %v4170_v20 = vor.u32 %v4169_v14, %v4168_v9  ;;  %vm3338_vm9 = vcmp.lt.s32.totalorder %v10729_v12, 2  ;;  %v10804_v9 = vpop.permute.xlu0 %353 }
 0x23a   : > { %vm3339_vm10 = vcmp.eq.s32.totalorder %v10729_v12, 0  ;;  %vm3342_vm12 = vcmp.eq.s32.totalorder %v10729_v12, 2  ;;  %v4147_v60 = vor.u32 8388608, %v4146_v47  ;;  %8387 = vsinq.f32 %v3908_v43  ;;  %14917 = vst [vmem:[#allocation17_spill] sm:$0xff] %v10804_v9 }
 0x23b   : > { %2819 = vperm.xlu1 %8340, %v10634_v40   ;;  %v3584_v22 = vxor.u32 2147483648, %v3583_v4  ;;  %vm4171_vm13 = vcmp.lt.s32.totalorder %v10746_v58, 1  ;;  %vm4174_vm15 = vcmp.lt.s32.totalorder %v10746_v58, 4  ;;  %vm4173_vm0 = vcmp.lt.s32.totalorder %v10746_v58, 3 }
 0x23c   : > { %v8382_v41 = vpop.eup %8381  ;;  %v4179_v54 = vsel %vm4171_vm13, %v10764_v56, %v10766_v34  ;;  %v4180_v40 = vsel %vm4174_vm15, %v4167_v6, 920167782  ;;  %v4184_v61 = vsel %vm4174_vm15, %v4170_v20, 1326507024  ;;  %v4183_v7 = vsel %vm4171_vm13, %v10766_v34, %v4164_v49 }
 0x23d   : > { %1927 = vperm.xlu0 %8339, %v1897_v35   ;;  %v8384_v62 = vpop.eup %8383  ;;  %v3343_v38 = vxor.u32 2147483648, %v8382_v41  ;;  %v3585_v43 = vsel %vm3502_vm5, %v3584_v22, %v3583_v4  ;;  %v4181_v35 = vsel %vm4173_vm0, %v4164_v49, %v4180_v40  ;;  %v4185_v47 = vsel %vm4173_vm0, %v4167_v6, %v4184_v61 }
 0x23e   : > { %v3340_v3 = vxor.u32 2147483648, %v8384_v62  ;;  %v3588_v18 = vsel %vm10740_vm11, %v10386_v37, %v3585_v43  ;;  %v10802_v17 = vshll.u32 %v4147_v60, 8  ;;  %v3586_v4 = vsub.s32 4, %v10609_v29 }
 0x23f   : > { %357 = vperm.xlu1 %8340, %v10660_v53   ;;  %v3344_v14 = vsel %vm3342_vm12, %v3343_v38, %v8384_v62  ;;  %8389 = vcosq.f32 %v3588_v18  ;;  %vm4172_vm1 = vcmp.lt.s32.totalorder %v10746_v58, 2  ;;  %v10815_v53 = vpop.permute.xlu1 %345  ;;  %v4176_v40 = vsel %vm4174_vm15, %v4164_v49, 2102212464  ;;  %v10843_v49 = vld [vmem:[%s10813_s3] sm:$0xff] }
 0x240   : > { %14918 = vst [vmem:[#allocation19_spill] sm:$0xff] %v10815_v53  ;;  %v3341_v6 = vsel %vm3339_vm10, %v8382_v41, %v3340_v3  ;;  %8391 = vsinq.f32 %v3588_v18  ;;  %v4182_v20 = vsel %vm4172_vm1, %v4179_v54, %v4181_v35  ;;  %v4186_v60 = vsel %vm4172_vm1, %v4183_v7, %v4185_v47 }
 0x241   : > { %2183 = vperm.xlu0 %8339, %v10711_v5   ;;  %v3345_v22 = vsel %vm3338_vm9, %v3341_v6, %v3344_v14  ;;  %v10829_v61 = vmul.u32.u64.low %v10802_v17, %v4186_v60  ;;  %v10830_v62 = vmul.u32.u64.high %v10802_v17, %v4186_v60, %v10829_v61  ;;  %v14919_v5 = vcombine.high %v10374_v21, %v10374_v21  ;;  %v10882_v6 = vpop.permute.xlu0 %614 }
 0x242   : > { %v2473_v54 = vrot.slane %v2441_v63, %v9251_v2  ;;  %v3346_v12 = vsel %vm3336_vm6, nan, %v3345_v22  ;;  %v4155_v38 = vshrl.u32 %v14746_v36, %v10705_v55  ;;  %v14922_v52 = vcombine.high %v14898_v13, %v14898_v13  ;;  %v14925_v61 = vld [vmem:[#allocation35_spill] sm:$0xff] }
 0x243   : > { %369 = vperm.xlu1 %8340, %v10663_v42   ;;  %v588_v41 = vrot.slane %v14919_v5, %v9251_v2  ;;  %v10845_v43 = vmul.f32 0.25, %v3346_v12  ;;  %v14921_v42 = vsub.s32 4, %v14909_v48  ;;  %v3587_v63 = vsel %vm3502_vm5, %v3586_v4, %v10609_v29  ;;  %v10896_v60 = vpop.permute.xlu1 %931 }
 0x244   : > { %v10853_v21 = vmul.u32.u64.low %v10802_v17, %v4182_v20  ;;  %v10854_v7 = vmul.u32.u64.high %v10802_v17, %v4182_v20, %v10853_v21  ;;  %v10861_v55 = vrot.slane %v14922_v52, %v9238_v23  ;;  %v4177_v3 = vsel %vm4173_vm0, %v10766_v34, %v4176_v40 }
 0x245   : > { %14920 = vst [vmem:[#allocation15_spill] sm:$0xff] %v10845_v43  ;;  %v3907_v35 = vsel %vm3822_vm7, %v14921_v42, %v14909_v48  ;;  %2503 = vperm.xlu0 %8339, %v2473_v54   ;;  %v4175_v48 = vsel %vm4171_vm13, %v4155_v38, %v10764_v56  ;;  %v14923_v18 = vand.u32 2147483647, %v10162_v10  ;;  %v10877_v13 = vshrl.u32 %v10333_v50, 5  ;;  %v8386_v56 = vpop.eup %8385 }
 0x246   : > { %v10880_v14 = vsub.s32 32, %v10563_v11  ;;  %v3348_v29 = vmul.f32 %v10845_v43, %v10845_v43  ;;  %v14924_v4 = vshll.u32 %v10182_v15, %v10340_v24  ;;  %v10892_v20 = vshll.u32 %v14746_v36, %v10563_v11 }
 0x247   : > { %v10874_v47 = vand.u32 8388607, %v14923_v18  ;;  %618 = vperm.xlu1 %8340, %v588_v41   ;;  %v1285_v50 = vmul.f32 %v10617_v45, %v10843_v49  ;;  %v3909_v22 = vsel %vm10715_vm3, 0, %v3907_v35  ;;  %v3589_v40 = vsel %vm10740_vm11, 0, %v3587_v63 }
 0x248   : > { %v4534_v34 = vor.u32 %v10611_v39, %v14924_v4  ;;  %v10903_v15 = vadd.f32 %v3348_v29, %v14925_v61  ;;  %v4178_v24 = vsel %vm4172_vm1, %v4175_v48, %v4177_v3  ;;  %vm4196_vm7 = vc.u32 %v10830_v62, %v10853_v21  ;;  %v8388_v39 = vpop.eup %8387  ;;  %v10938_v3 = vpop.permute.xlu0 %622 }
 0x249   : > { %v14926_v5 = vshll.u32 %v10590_v32, 23  ;;  %v596_v51 = vrot.slane %v10861_v55, %v9251_v2  ;;  %v895_v0 = vcombine.high %v10391_v27, %v10391_v27  ;;  %1317 = vrot.lane.b32.xlu0 %v1285_v50, %s8533_s4  ;;  %v4197_v54 = vadd.s32 1, %v10854_v7  ;;  %v10946_v61 = vpop.permute.xlu1 %1258 }
 0x24a   : > { %v10919_v58 = vshrl.u32 %v14770_v44, %v10880_v14  ;;  %v10923_v12 = vshrl.u32 %v14776_v30, %v10880_v14  ;;  %v10927_v32 = vshrl.u32 %v14761_v57, %v10880_v14  ;;  %v3913_v38 = vand.u32 3, %v3909_v22 }
 0x24b   : > { %v4538_v41 = vor.u32 4788187, %v14926_v5  ;;  %626 = vperm.xlu1 %8340, %v596_v51   ;;  %v637_v27 = vmul.f32 %v10843_v49, %v10655_v26  ;;  %v3593_v42 = vand.u32 3, %v3589_v40  ;;  %v4194_v35 = vmul.u32 %v10802_v17, %v4178_v24  ;;  %v10942_v40 = vld [vmem:[%s10813_s3 + $0x8] sm:$0xff] }
 0x24c   : > { %v4198_v52 = vsel %vm4196_vm7, %v4197_v54, %v10854_v7  ;;  %v4541_v63 = vcvt.s32.f32 %v4534_v34  ;;  %v6022_v48 = vshrl.u32 %v14747_v46, %v10880_v14  ;;  %v3916_v18 = vxor.u32 2147483648, %v8388_v39  ;;  %v8390_v4 = vpop.eup %8389 }
 0x24d   : > { %v3919_v29 = vxor.u32 2147483648, %v8386_v56  ;;  %v4539_v50 = vand.u32 2147483647, %v4538_v41  ;;  %v925_v22 = vrot.slane %v895_v0, %v9251_v2  ;;  %v1220_v17 = vcombine.high %v10427_v31, %v10427_v31  ;;  %669 = vrot.lane.b32.xlu0 %v637_v27, %s8523_s23  ;;  %v8392_v34 = vpop.eup %8391  ;;  %v14927_v27 = vld [vmem:[#allocation25_spill] sm:$0xff] }
 0x24e   : > { %v4199_v7 = vadd.s32 %v4198_v52, %v4194_v35  ;;  %v1543_v24 = vcombine.high %v10572_v25, %v10572_v25  ;;  %v963_v5 = vmul.f32 %v10942_v40, %v10896_v60  ;;  %v3599_v41 = vxor.u32 2147483648, %v8390_v4 }
 0x24f   : > { %vm3915_vm14 = vcmp.eq.s32.totalorder %v3913_v38, 0  ;;  %955 = vperm.xlu1 %8340, %v925_v22   ;;  %v3596_v51 = vxor.u32 2147483648, %v8392_v34  ;;  %vm3598_vm2 = vcmp.eq.s32.totalorder %v3593_v42, 2  ;;  %vm3918_vm8 = vcmp.eq.s32.totalorder %v3913_v38, 2  ;;  %v10958_v22 = vpop.permute.xlu0 %935 }
 0x250   : > { %v4200_v0 = vadd.s32 536870912, %v4199_v7  ;;  %vm3595_vm3 = vcmp.eq.s32.totalorder %v3593_v42, 0  ;;  %v3600_v31 = vsel %vm3598_vm2, %v3599_v41, %v8392_v34  ;;  %v3917_v54 = vsel %vm3915_vm14, %v8386_v56, %v3916_v18 }
 0x251   : > { %v3920_v9 = vsel %vm3918_vm8, %v3919_v29, %v8388_v39  ;;  %vm4461_vm5 = vcmp.lt.s32.totalorder %v14927_v27, 0  ;;  %v1252_v35 = vrot.slane %v1220_v17, %v9251_v2  ;;  %996 = vrot.lane.b32.xlu0 %v963_v5, %s8524_s24  ;;  %vm3594_vm11 = vcmp.lt.s32.totalorder %v3593_v42, 2  ;;  %v10963_v39 = vpop.permute.xlu1 %1579 }
 0x252   : > { %v3597_v25 = vsel %vm3595_vm3, %v8390_v4, %v3596_v51  ;;  %v10956_v52 = vshrl.u32 %v4200_v0, 30  ;;  %v4542_v53 = vmul.f32 %v4541_v63, %v4539_v50  ;;  %vm3592_vm6 = vweird.f32 %v10386_v37 }
 0x253   : > { %v3601_v43 = vsel %vm3594_vm11, %v3597_v25, %v3600_v31  ;;  %vm3914_vm9 = vcmp.lt.s32.totalorder %v3913_v38, 2  ;;  %1282 = vperm.xlu1 %8340, %v1252_v35   ;;  %v1287_v56 = vmul.f32 %v10946_v61, %v10843_v49  ;;  %v14928_v4 = vand.u32 2147483647, %v14927_v27 }
 0x254   : > { %v3602_v18 = vsel %vm3592_vm6, nan, %v3601_v43  ;;  %v3921_v29 = vsel %vm3914_vm9, %v3917_v54, %v3920_v9  ;;  %v4202_v42 = vshll.u32 %v10956_v52, 30  ;;  %v6021_v37 = vshll.u32 %v14761_v57, %v10563_v11  ;;  %v11003_v54 = vpop.permute.xlu0 %1278 }
 0x255   : > { %vm10968_vm10 = vcmp.le.f32.partialorder %v14928_v4, 0.7853982  ;;  %v6024_v38 = vshll.u32 %v14747_v46, %v10563_v11  ;;  %v6025_v50 = vshrl.u32 %v14762_v1, %v10880_v14  ;;  %v10978_v17 = vmul.f32 0.75, %v3602_v18  ;;  %1321 = vrot.lane.b32.xlu0 %v1287_v56, %s8533_s4  ;;  %14933 = vst [vmem:[#allocation24_spill] sm:$0xff] %v11003_v54  ;;  %v11009_v56 = vpop.permute.xlu1 %1899 }
 0x256   : > { %v1573_v9 = vrot.slane %v1543_v24, %v9251_v2  ;;  %v1863_v43 = vcombine.high %v10598_v8, %v10598_v8  ;;  %vm3912_vm12 = vweird.f32 %v14905_v33  ;;  %v10985_v34 = vsub.s32 %v4199_v7, %v4202_v42  ;;  %14934 = vst [vmem:[#allocation47_spill] sm:$0xff] %v11009_v56  ;;  %v14935_v42 = vld [vmem:[#allocation20_spill] sm:$0xff] }
 0x257   : > { %14931 = vst [vmem:[#allocation14_spill] sm:$0xff] %v10978_v17  ;;  %v4543_v5 = vxor.u32 2147483648, %v4542_v53  ;;  %v6023_v41 = vor.u32 %v6022_v48, %v6021_v37  ;;  %v3604_v51 = vmul.f32 %v10978_v17, %v10978_v17  ;;  %v10989_v0 = vsel %vm3912_vm12, nan, %v3921_v29 }
 0x258   : > { %14932 = vst [vmem:[#allocation41_spill] sm:$0xff] %v10989_v0  ;;  %v6015_v31 = vshll.u32 %v14770_v44, %v10563_v11  ;;  %v6018_v24 = vshll.u32 %v14776_v30, %v10563_v11  ;;  %1603 = vperm.xlu1 %8340, %v1573_v9   ;;  %v1289_v8 = vmul.f32 %v10682_v59, %v10843_v49  ;;  %v4205_v33 = vsub.s32 0, %v10985_v34  ;;  %v14937_v9 = vld [vmem:[#allocation21_spill] sm:$0xff] }
 0x259   : > { %v11000_v48 = vor.u32 %v10919_v58, %v10892_v20  ;;  %v6026_v7 = vor.u32 %v6025_v50, %v6024_v38  ;;  %vm6030_vm13 = vcmp.lt.s32.totalorder %v10877_v13, 4  ;;  %v3605_v35 = vadd.f32 %v3604_v51, %v10903_v15  ;;  %v14936_v50 = vld [vmem:[#allocation8_spill] sm:$0xff] }
 0x25a   : > { %v1893_v25 = vrot.slane %v1863_v43, %v9251_v2  ;;  %v2119_v11 = vcombine.high %v10653_v16, %v10653_v16  ;;  %1325 = vrot.lane.b32.xlu0 %v1289_v8, %s8533_s4  ;;  %v3923_v20 = vmul.f32 %v10989_v0, %v10989_v0  ;;  %v8132_v58 = vmin.u32 %v4205_v33, %v10985_v34 }
 0x25b   : > { %v4544_v18 = vsel %vm4461_vm5, %v4543_v5, %v4542_v53  ;;  %v11018_v29 = vor.u32 %v10923_v12, %v6015_v31  ;;  %v6020_v15 = vor.u32 %v10927_v32, %v6018_v24  ;;  %v6036_v16 = vsel %vm6030_vm13, %v6023_v41, 920167782  ;;  %v14939_v32 = vld [vmem:[#allocation44_spill] sm:$0xff] }
 0x25c   : > { %1923 = vperm.xlu1 %8340, %v1893_v25   ;;  %v1293_v4 = vmul.f32 %v14935_v42, %v10843_v49  ;;  %v11025_v37 = vadd.f32 %v3923_v20, %v3605_v35  ;;  %v4207_v38 = vclz %v8132_v58  ;;  %v11029_v43 = vsub.f32 %v14937_v9, %v14936_v50 }
 0x25d   : > { %v6003_v53 = vor.u32 8388608, %v10874_v47  ;;  %vm6027_vm15 = vcmp.lt.s32.totalorder %v10877_v13, 1  ;;  %v6040_v12 = vsel %vm6030_vm13, %v6026_v7, 1326507024  ;;  %v2439_v5 = vcombine.high %v14939_v32, %v14939_v32  ;;  %v11053_v7 = vpop.permute.xlu0 %1583 }
 0x25e   : > { %14938 = vst [vmem:[#allocation36_spill] sm:$0xff] %v11029_v43  ;;  %v4547_v51 = vsel %vm10968_vm10, %v14927_v27, %v4544_v18  ;;  %vm6029_vm0 = vcmp.lt.s32.totalorder %v10877_v13, 3  ;;  %v2149_v31 = vrot.slane %v2119_v11, %v9251_v2  ;;  %1333 = vrot.lane.b32.xlu0 %v1293_v4, %s8533_s4  ;;  %v8133_v24 = vadd.s32 4294967294, %v4207_v38  ;;  %14940 = vst [vmem:[#allocation43_spill] sm:$0xff] %v11053_v7  ;;  %v11059_v11 = vpop.permute.xlu1 %2155  ;;  %v11066_v4 = vld [vmem:[%s10813_s3 + $0x9] sm:$0xff] }
 0x25f   : > { %vm6028_vm1 = vcmp.lt.s32.totalorder %v10877_v13, 2  ;;  %v6035_v47 = vsel %vm6027_vm15, %v11000_v48, %v11018_v29  ;;  %v6037_v8 = vsel %vm6029_vm0, %v6020_v15, %v6036_v16  ;;  %v6039_v33 = vsel %vm6027_vm15, %v11018_v29, %v6020_v15 }
 0x260   : > { %v6041_v35 = vsel %vm6029_vm0, %v6023_v41, %v6040_v12  ;;  %2179 = vperm.xlu1 %8340, %v2149_v31   ;;  %v1611_v25 = vmul.f32 %v10963_v39, %v10942_v40  ;;  %vm8134_vm7 = vcmp.lt.s32.totalorder %v8133_v24, 0  ;;  %v4782_v20 = vand.u32 2139095040, %v11029_v43 }
 0x261   : > { %8393 = vsinq.f32 %v4547_v51  ;;  %v2469_v58 = vrot.slane %v2439_v5, %v9251_v2  ;;  %v572_v18 = vcombine.high %v10861_v55, %v10861_v55  ;;  %v4210_v16 = vsel %vm8134_vm7, 0, %v8133_v24 }
 0x262   : > { %1644 = vrot.lane.b32.xlu0 %v1611_v25, %s8534_s5  ;;  %v4195_v41 = vadd.s32 %v10853_v21, %v10830_v62  ;;  %v4211_v38 = vsub.s32 32, %v4210_v16  ;;  %v4215_v9 = vsub.s32 4294967266, %v4210_v16  ;;  %v4783_v12 = vshrl.u32 %v4782_v20, 23 }
 0x263   : > { %v11073_v32 = vsel %vm6028_vm1, %v6035_v47, %v6037_v8  ;;  %v11077_v5 = vsel %vm6028_vm1, %v6039_v33, %v6041_v35  ;;  %v11079_v55 = vshll.u32 %v6003_v53, 8  ;;  %v2187_v31 = vmul.f32 %v11066_v4, %v11059_v11  ;;  %v11088_v8 = vpop.permute.xlu0 %1903  ;;  %v14942_v33 = vld [vmem:[#allocation33_spill] sm:$0xff]  ;;  %v14943_v53 = vld [vmem:[#allocation18_spill] sm:$0xff] }
 0x264   : > { %2499 = vperm.xlu1 %8340, %v2469_v58   ;;  %v4212_v24 = vshll.u32 %v10985_v34, %v4210_v16  ;;  %v4213_v62 = vshrl.u32 %v4195_v41, %v4211_v38  ;;  %v4216_v21 = vadd.s32 127, %v4215_v9  ;;  %v8139_v25 = vadd.s32 4294967169, %v4783_v12  ;;  %14941 = vst [vmem:[#allocation9_spill] sm:$0xff] %v11088_v8  ;;  %v14944_v12 = vld [vmem:[#allocation42_spill] sm:$0xff] }
 0x265   : > { %8395 = vcosq.f32 %v4547_v51  ;;  %v11086_v47 = vsel %vm6030_vm13, %v6020_v15, 2102212464  ;;  %v4545_v35 = vsub.s32 4, %v14942_v33  ;;  %v11093_v20 = vsub.f32 %v14943_v53, %v14936_v50 }
 0x266   : > { %v604_v58 = vrot.slane %v572_v18, %v9251_v2  ;;  %2220 = vrot.lane.b32.xlu0 %v2187_v31, %s8523_s23  ;;  %v4214_v34 = vor.u32 %v4213_v62, %v4212_v24  ;;  %v4217_v16 = vshll.u32 %v4216_v21, 23  ;;  %v4789_v41 = vadd.s32 1, %v8139_v25  ;;  %v14947_v24 = vld [vmem:[#allocation10_spill] sm:$0xff] }
 0x267   : > { %v11099_v51 = vmul.u32.u64.low %v11079_v55, %v11077_v5  ;;  %v11100_v15 = vmul.u32.u64.high %v11079_v55, %v11077_v5, %v11099_v51  ;;  %v11105_v38 = vmul.u32.u64.low %v11079_v55, %v11073_v32  ;;  %v11106_v9 = vmul.u32.u64.high %v11079_v55, %v11073_v32, %v11105_v38 }
 0x268   : > { %v14945_v53 = vclz %v14944_v12  ;;  %634 = vperm.xlu1 %8340, %v604_v58   ;;  %v4218_v31 = vor.u32 4788187, %v4217_v16  ;;  %vm4790_vm14 = vcmp.gt.s32.totalorder %v4789_v41, 0  ;;  %v1286_v5 = vmul.f32 %v10617_v45, %v10942_v40  ;;  %v11128_v45 = vpop.permute.xlu0 %2159 }
 0x269   : > { %v4546_v62 = vsel %vm4461_vm5, %v4545_v35, %v14942_v33  ;;  %v4791_v21 = vsel %vm4790_vm14, %v4789_v41, 0  ;;  %v5038_v32 = vand.u32 2139095040, %v11093_v20  ;;  %v638_v25 = vmul.f32 %v10942_v40, %v10655_v26  ;;  %14946 = vst [vmem:[#allocation28_spill] sm:$0xff] %v11128_v45 }
 0x26a   : > { %v11111_v18 = vadd.s32 4294967294, %v14945_v53  ;;  %v4219_v51 = vand.u32 2147483647, %v4218_v31  ;;  %v4221_v12 = vcvt.s32.f32 %v4214_v34  ;;  %v4793_v58 = vand.u32 31, %v4791_v21 }
 0x26b   : > { %v962_v16 = vmul.f32 %v10843_v49, %v10896_v60  ;;  %v11126_v53 = vmul.f32 %v10946_v61, %v10942_v40  ;;  %v14948_v33 = vand.u32 2147483647, %v14947_v24  ;;  %vm4141_vm8 = vcmp.lt.s32.totalorder %v14947_v24, 0 }
 0x26c   : > { %1319 = vrot.lane.b32.xlu1 %v1286_v5, %s8533_s4  ;;  %v4222_v26 = vmul.f32 %v4221_v12, %v4219_v51  ;;  %v4548_v60 = vsel %vm10968_vm10, 0, %v4546_v62  ;;  %v14951_v34 = vand.u32 2147483647, %v11029_v43  ;;  %v4794_v41 = vsub.s32 32, %v4793_v58 }
 0x26d   : > { %vm11132_vm2 = vcmp.le.f32.partialorder %v14948_v33, 0.7853982  ;;  %v11142_v31 = vshrl.u32 %v4791_v21, 5  ;;  %v4796_v8 = vshll.u32 %v14746_v36, %v4793_v58  ;;  %v4799_v33 = vshll.u32 %v14770_v44, %v4793_v58 }
 0x26e   : > { %v4786_v61 = vand.u32 8388607, %v14951_v34  ;;  %v5039_v56 = vshrl.u32 %v5038_v32, 23  ;;  %v11146_v0 = vpop.eup %8393  ;;  %v4223_v17 = vxor.u32 2147483648, %v4222_v26  ;;  %v4797_v5 = vshrl.u32 %v14770_v44, %v4794_v41  ;;  %v11151_v62 = vpop.permute.xlu1 %2475 }
 0x26f   : > { %v4800_v51 = vshrl.u32 %v14776_v30, %v4794_v41  ;;  %v4802_v63 = vshll.u32 %v14776_v30, %v4793_v58  ;;  %v4803_v12 = vshrl.u32 %v14761_v57, %v4794_v41  ;;  %v4805_v21 = vshll.u32 %v14761_v57, %v4793_v58 }
 0x270   : > { %v4806_v34 = vshrl.u32 %v14747_v46, %v4794_v41  ;;  %v4809_v23 = vshrl.u32 %v14762_v1, %v4794_v41  ;;  %v2507_v32 = vmul.f32 %v11066_v4, %v11151_v62  ;;  %671 = vrot.lane.b32.xlu1 %v638_v25, %s8523_s23  ;;  %v4224_v19 = vsel %vm4141_vm8, %v4223_v17, %v4222_v26  ;;  %v11163_v10 = vpop.permute.xlu0 %2479 }
 0x271   : > { %v4798_v28 = vor.u32 %v4797_v5, %v4796_v8  ;;  %v4808_v2 = vshll.u32 %v14747_v46, %v4793_v58  ;;  %v4227_v45 = vsel %vm11132_vm2, %v14947_v24, %v4224_v19  ;;  %v4801_v7 = vor.u32 %v4800_v51, %v4799_v33 }
 0x272   : > { %v4804_v43 = vor.u32 %v4803_v12, %v4802_v63  ;;  %v4807_v54 = vor.u32 %v4806_v34, %v4805_v21  ;;  %v8396_v50 = vpop.eup %8395  ;;  %2540 = vrot.lane.b32.xlu0 %v2507_v32, %s8524_s24  ;;  %8397 = vcosq.f32 %v4227_v45  ;;  %v11169_v25 = vand.u32 3, %v4548_v60  ;;  %v11172_v26 = vpop.permute.xlu1 %2803 }
 0x273   : > { %v4555_v17 = vxor.u32 2147483648, %v11146_v0  ;;  %v4810_v8 = vor.u32 %v4809_v23, %v4808_v2  ;;  %14952 = vst [vmem:[#allocation12_spill] sm:$0xff] %v11172_v26  ;;  %v4225_v58 = vsub.s32 4, %v10956_v52  ;;  %8399 = vsinq.f32 %v4227_v45 }
 0x274   : > { %v4787_v5 = vor.u32 8388608, %v4786_v61  ;;  %vm4811_vm3 = vcmp.lt.s32.totalorder %v11142_v31, 1  ;;  %994 = vrot.lane.b32.xlu1 %v962_v16, %s8524_s24  ;;  %vm4813_vm5 = vcmp.lt.s32.totalorder %v11142_v31, 3  ;;  %vm4814_vm11 = vcmp.lt.s32.totalorder %v11142_v31, 4  ;;  %v11181_v33 = vpop.permute.xlu0 %2807 }
 0x275   : > { %v4819_v19 = vsel %vm4811_vm3, %v4798_v28, %v4801_v7  ;;  %v8143_v60 = vadd.s32 4294967169, %v5039_v56  ;;  %14953 = vst [vmem:[#allocation35_spill] sm:$0xff] %v11181_v33  ;;  %v4816_v23 = vsel %vm4814_vm11, %v4804_v43, 2102212464  ;;  %v4820_v2 = vsel %vm4814_vm11, %v4807_v54, 920167782 }
 0x276   : > { %v4823_v45 = vsel %vm4811_vm3, %v4801_v7, %v4804_v43  ;;  %v4824_v61 = vsel %vm4814_vm11, %v4810_v8, 1326507024  ;;  %v4558_v51 = vxor.u32 2147483648, %v8396_v50  ;;  %v4795_v63 = vshrl.u32 %v14746_v36, %v4794_v41  ;;  %v11189_v12 = vpop.permute.xlu1 %2811 }
 0x277   : > { %vm4812_vm6 = vcmp.lt.s32.totalorder %v11142_v31, 2  ;;  %v4821_v16 = vsel %vm4813_vm5, %v4804_v43, %v4820_v2  ;;  %14954 = vst [vmem:[#allocation25_spill] sm:$0xff] %v11189_v12  ;;  %v4226_v56 = vsel %vm4141_vm8, %v4225_v58, %v10956_v52  ;;  %v4825_v34 = vsel %vm4813_vm5, %v4807_v54, %v4824_v61  ;;  %v14957_v61 = vld [vmem:[#allocation40_spill] sm:$0xff] }
 0x278   : > { %v4822_v21 = vsel %vm4812_vm6, %v4819_v19, %v4821_v16  ;;  %v4827_v32 = vshll.u32 %v4787_v5, 8  ;;  %1323 = vrot.lane.b32.xlu1 %v11126_v53, %s8533_s4  ;;  %v4815_v41 = vsel %vm4811_vm3, %v4795_v63, %v4798_v28  ;;  %v4817_v43 = vsel %vm4813_vm5, %v4801_v7, %v4816_v23  ;;  %v11206_v58 = vpop.permute.xlu0 %2815  ;;  %v14956_v53 = vld [vmem:[#allocation31_spill] sm:$0xff] }
 0x279   : > { %v4826_v8 = vsel %vm4812_vm6, %v4823_v45, %v4825_v34  ;;  %v5045_v52 = vadd.s32 1, %v8143_v60  ;;  %14955 = vst [vmem:[#allocation20_spill] sm:$0xff] %v11206_v58  ;;  %v11219_v28 = vsel %vm6924_vm4, %v14957_v61, %v14956_v53  ;;  %v6011_v7 = vshrl.u32 %v14746_v36, %v10880_v14 }
 0x27a   : > { %v11208_v19 = vmul.u32.u64.low %v4827_v32, %v4826_v8  ;;  %v11209_v2 = vmul.u32.u64.high %v4827_v32, %v4826_v8, %v11208_v19  ;;  %v11211_v54 = vmul.u32.u64.low %v4827_v32, %v4822_v21  ;;  %v11212_v5 = vmul.u32.u64.high %v4827_v32, %v4822_v21, %v11211_v54  ;;  %v11228_v45 = vpop.permute.xlu1 %349 }
 0x27b   : > { %v1290_v60 = vmul.f32 %v10682_v59, %v10942_v40  ;;  %v4228_v23 = vsel %vm11132_vm2, 0, %v4226_v56  ;;  %vm8150_vm9 = vcmp.lt.s32.totalorder %v11111_v18, 0  ;;  %14959 = vst [vmem:[#allocation21_spill] sm:$0xff] %v11228_v45  ;;  %vm4554_vm10 = vcmp.eq.s32.totalorder %v11169_v25, 0 }
 0x27c   : > { %vm4557_vm12 = vcmp.eq.s32.totalorder %v11169_v25, 2  ;;  %v4818_v63 = vsel %vm4812_vm6, %v4815_v41, %v4817_v43  ;;  %v6031_v14 = vsel %vm6027_vm15, %v6011_v7, %v11000_v48  ;;  %v6033_v59 = vsel %vm6029_vm0, %v11018_v29, %v11086_v47  ;;  %v11243_v21 = vpop.permute.xlu0 %365 }
 0x27d   : > { %1327 = vrot.lane.b32.xlu1 %v1290_v60, %s8533_s4  ;;  %v4556_v35 = vsel %vm4554_vm10, %v8396_v50, %v4555_v17  ;;  %v4559_v56 = vsel %vm4557_vm12, %v4558_v51, %v11146_v0  ;;  %14960 = vst [vmem:[#allocation44_spill] sm:$0xff] %v11243_v21  ;;  %v4232_v34 = vand.u32 3, %v4228_v23  ;;  %vm4836_vm4 = vc.u32 %v11209_v2, %v11211_v54 }
 0x27e   : > { %v4837_v31 = vadd.s32 1, %v11212_v5  ;;  %vm5046_vm13 = vcmp.gt.s32.totalorder %v5045_v52, 0  ;;  %v11251_v48 = vsel %vm8150_vm9, 0, %v11111_v18  ;;  %v1294_v29 = vmul.f32 %v14935_v42, %v10942_v40  ;;  %v11259_v51 = vpop.permute.xlu1 %361 }
 0x27f   : > { %vm4553_vm15 = vcmp.lt.s32.totalorder %v11169_v25, 2  ;;  %v4834_v0 = vmul.u32 %v4827_v32, %v4818_v63  ;;  %v8398_v50 = vpop.eup %8397  ;;  %v6034_v47 = vsel %vm6028_vm1, %v6031_v14, %v6033_v59  ;;  %v6053_v17 = vadd.s32 1, %v11106_v9  ;;  %14961 = vst [vmem:[#allocation33_spill] sm:$0xff] %v11259_v51 }
 0x280   : > { %v4560_v41 = vsel %vm4553_vm15, %v4556_v35, %v4559_v56  ;;  %v4838_v43 = vsel %vm4836_vm4, %v4837_v31, %v11212_v5  ;;  %v8400_v8 = vpop.eup %8399  ;;  %vm6052_vm0 = vc.u32 %v11100_v15, %v11105_v38  ;;  %v4238_v42 = vxor.u32 2147483648, %v8398_v50  ;;  %v11270_v32 = vpop.permute.xlu0 %630 }
 0x281   : > { %1335 = vrot.lane.b32.xlu1 %v1294_v29, %s8533_s4  ;;  %v4839_v18 = vadd.s32 %v4838_v43, %v4834_v0  ;;  %v11266_v25 = vsel %vm5046_vm13, %v5045_v52, 0  ;;  %v1610_v13 = vmul.f32 %v10963_v39, %v10843_v49  ;;  %v4235_v19 = vxor.u32 2147483648, %v8400_v8  ;;  %v14964_v0 = vld [vmem:[#allocation34_spill] sm:$0xff] }
 0x282   : > { %vm4237_vm1 = vcmp.eq.s32.totalorder %v4232_v34, 2  ;;  %vm4551_vm7 = vweird.f32 %v14927_v27  ;;  %vm4234_vm14 = vcmp.eq.s32.totalorder %v4232_v34, 0  ;;  %v6054_v16 = vsel %vm6052_vm0, %v6053_v17, %v11106_v9  ;;  %v611_v7 = vpop.permute.xlu1 %610  ;;  %v11285_v9 = vld [vmem:[%s10813_s3 + $0x1] sm:$0xff] }
 0x283   : > { %v4239_v5 = vsel %vm4237_vm1, %v4238_v42, %v8400_v8  ;;  %v4561_v53 = vsel %vm4551_vm7, nan, %v4560_v41  ;;  %v4840_v61 = vadd.s32 536870912, %v4839_v18  ;;  %vm4233_vm2 = vcmp.lt.s32.totalorder %v4232_v34, 2  ;;  %v14967_v42 = vld [vmem:[#allocation45_spill] sm:$0xff] }
 0x284   : > { %v4236_v52 = vsel %vm4234_vm14, %v8398_v50, %v4235_v19  ;;  %v11275_v60 = vand.u32 31, %v11266_v25  ;;  %v639_v39 = vmul.f32 %v10843_v49, %v611_v7  ;;  %vm4231_vm8 = vweird.f32 %v14947_v24  ;;  %v11287_v59 = vpop.permute.xlu0 %943 }
 0x285   : > { %1642 = vrot.lane.b32.xlu1 %v1610_v13, %s8534_s5  ;;  %v4240_v27 = vsel %vm4233_vm2, %v4236_v52, %v4239_v5  ;;  %v11280_v23 = vshrl.u32 %v4840_v61, 30  ;;  %v5427_v63 = vsub.s32 32, %v11251_v48  ;;  %v6050_v14 = vmul.u32 %v11079_v55, %v6034_v47  ;;  %v14965_v55 = vld [vmem:[#allocation32_spill] sm:$0xff]  ;;  %v14969_v52 = vld [vmem:[#allocation23_spill] sm:$0xff] }
 0x286   : > { %v4241_v35 = vsel %vm4231_vm8, nan, %v4240_v27  ;;  %v11289_v56 = vmul.f32 0.25, %v4561_v53  ;;  %v2186_v34 = vmul.f32 %v11285_v9, %v11059_v11  ;;  %673 = vrot.lane.b32.xlu0 %v639_v39, %s8523_s23  ;;  %v14646_v29 = vand.u32 2147483647, %v11093_v20  ;;  %v11303_v41 = vpop.permute.xlu1 %939  ;;  %v14966_v11 = vld [vmem:[#allocation26_spill] sm:$0xff]  ;;  %v14968_v53 = vld [vmem:[#allocation27_spill] sm:$0xff] }
 0x287   : > { %v11294_v24 = vmul.f32 0.75, %v4241_v35  ;;  %v4842_v31 = vshll.u32 %v11280_v23, 30  ;;  %v5411_v50 = vadd.s32 %v14965_v55, %v14964_v0  ;;  %v5431_v47 = vsub.s32 4294967266, %v11251_v48  ;;  %v14970_v39 = vld [vmem:[#allocation46_spill] sm:$0xff] }
 0x288   : > { %14962 = vst [vmem:[#allocation18_spill] sm:$0xff] %v11289_v56  ;;  %v11301_v17 = vadd.s32 %v6054_v16, %v6050_v14  ;;  %v11306_v43 = vsub.s32 32, %v11275_v60  ;;  %v6949_v13 = vadd.s32 1, %v14967_v42  ;;  %v641_v19 = vmul.f32 %v10843_v49, %v10882_v6  ;;  %v11320_v27 = vpop.permute.xlu0 %951 }
 0x289   : > { %14963 = vst [vmem:[#allocation42_spill] sm:$0xff] %v11294_v24  ;;  %2218 = vrot.lane.b32.xlu1 %v2186_v34, %s8523_s23  ;;  %v4243_v5 = vmul.f32 %v11294_v24, %v11294_v24  ;;  %v5428_v61 = vshll.u32 %v14968_v53, %v11251_v48  ;;  %v5429_v16 = vshrl.u32 %v5411_v50, %v5427_v63  ;;  %v5042_v48 = vand.u32 8388607, %v14646_v29 }
 0x28a   : > { %vm6948_vm3 = vc.u32 %v14970_v39, %v14969_v52  ;;  %v11322_v14 = vsub.s32 %v4839_v18, %v4842_v31  ;;  %v2506_v35 = vmul.f32 %v11285_v9, %v11151_v62  ;;  %677 = vrot.lane.b32.xlu0 %v641_v19, %s8523_s23  ;;  %v4563_v0 = vmul.f32 %v11289_v56, %v11289_v56  ;;  %v11335_v50 = vpop.permute.xlu1 %947 }
 0x28b   : > { %v4244_v34 = vadd.f32 %v4243_v5, %v11025_v37  ;;  %v11332_v63 = vadd.s32 127, %v5431_v47  ;;  %v6056_v55 = vadd.s32 536870912, %v11301_v17  ;;  %v5053_v18 = vshrl.u32 %v14770_v44, %v11306_v43 }
 0x28c   : > { %v5056_v62 = vshrl.u32 %v14776_v30, %v11306_v43  ;;  %v645_v37 = vmul.f32 %v10843_v49, %v10938_v3  ;;  %v4845_v47 = vsub.s32 0, %v11322_v14  ;;  %v5062_v19 = vshrl.u32 %v14747_v46, %v11306_v43  ;;  %v11349_v5 = vpop.permute.xlu0 %1591 }
 0x28d   : > { %2538 = vrot.lane.b32.xlu1 %v2506_v35, %s8524_s24  ;;  %v11344_v31 = vadd.f32 %v4563_v0, %v4244_v34  ;;  %v5052_v53 = vshll.u32 %v14746_v36, %v11275_v60  ;;  %v5055_v29 = vshll.u32 %v14770_v44, %v11275_v60  ;;  %v5059_v8 = vshrl.u32 %v14761_v57, %v11306_v43 }
 0x28e   : > { %v5065_v35 = vshrl.u32 %v14762_v1, %v11306_v43  ;;  %v640_v34 = vmul.f32 %v10942_v40, %v611_v7  ;;  %685 = vrot.lane.b32.xlu0 %v645_v37, %s8523_s23  ;;  %v5043_v0 = vor.u32 8388608, %v5042_v48  ;;  %v11362_v51 = vshrl.u32 %v11266_v25, 5  ;;  %v11366_v45 = vpop.permute.xlu1 %1266 }
 0x28f   : > { %v5061_v21 = vshll.u32 %v14761_v57, %v11275_v60  ;;  %v5054_v56 = vor.u32 %v5053_v18, %v5052_v53  ;;  %v5057_v24 = vor.u32 %v5056_v62, %v5055_v29  ;;  %v5058_v58 = vshll.u32 %v14776_v30, %v11275_v60 }
 0x290   : > { %v5064_v12 = vshll.u32 %v14747_v46, %v11275_v60  ;;  %v11376_v7 = vsel %vm6948_vm3, %v6949_v13, %v14967_v42  ;;  %v965_v25 = vmul.f32 %v10942_v40, %v10958_v22  ;;  %v8140_v48 = vmin.u32 %v4845_v47, %v11322_v14  ;;  %v11385_v37 = vpop.permute.xlu0 %1599 }
 0x291   : > { %675 = vrot.lane.b32.xlu1 %v640_v34, %s8523_s23  ;;  %v5063_v29 = vor.u32 %v5062_v19, %v5061_v21  ;;  %v11382_v18 = vor.u32 %v5429_v16, %v5428_v61  ;;  %v5433_v62 = vshll.u32 %v11332_v63, 23  ;;  %14971 = vst [vmem:[#allocation10_spill] sm:$0xff] %v11385_v37  ;;  %v5060_v60 = vor.u32 %v5059_v8, %v5058_v58 }
 0x292   : > { %v5066_v53 = vor.u32 %v5065_v35, %v5064_v12  ;;  %v11387_v33 = vshrl.u32 %v6056_v55, 30  ;;  %v642_v42 = vmul.f32 %v10942_v40, %v10882_v6  ;;  %1000 = vrot.lane.b32.xlu0 %v965_v25, %s8524_s24  ;;  %v4847_v13 = vclz %v8140_v48  ;;  %v11395_v61 = vpop.permute.xlu1 %1274 }
 0x293   : > { %vm5067_vm5 = vcmp.lt.s32.totalorder %v11362_v51, 1  ;;  %v646_v21 = vmul.f32 %v10942_v40, %v10938_v3  ;;  %vm5070_vm11 = vcmp.lt.s32.totalorder %v11362_v51, 4  ;;  %v11400_v58 = vshll.u32 %v5043_v0, 8 }
 0x294   : > { %14972 = vst [vmem:[#allocation31_spill] sm:$0xff] %v11387_v33  ;;  %v5075_v12 = vsel %vm5067_vm5, %v5054_v56, %v5057_v24  ;;  %v967_v6 = vmul.f32 %v10942_v40, %v11303_v41  ;;  %v8141_v8 = vadd.s32 4294967294, %v4847_v13  ;;  %vm5069_vm6 = vcmp.lt.s32.totalorder %v11362_v51, 3  ;;  %v11406_v63 = vpop.permute.xlu0 %1911 }
 0x295   : > { %679 = vrot.lane.b32.xlu1 %v642_v42, %s8523_s23  ;;  %v5076_v16 = vsel %vm5070_vm11, %v5063_v29, 920167782  ;;  %14973 = vst [vmem:[#allocation40_spill] sm:$0xff] %v11406_v63  ;;  %v5051_v3 = vshrl.u32 %v14746_v36, %v11306_v43  ;;  %vm5068_vm9 = vcmp.lt.s32.totalorder %v11362_v51, 2  ;;  %v5080_v47 = vsel %vm5070_vm11, %v5066_v53, 1326507024 }
 0x296   : > { %v5077_v55 = vsel %vm5069_vm6, %v5060_v60, %v5076_v16  ;;  %1004 = vrot.lane.b32.xlu0 %v967_v6, %s8524_s24  ;;  %vm8142_vm10 = vcmp.lt.s32.totalorder %v8141_v8, 0  ;;  %v5072_v19 = vsel %vm5070_vm11, %v5060_v60, 2102212464  ;;  %v5079_v34 = vsel %vm5067_vm5, %v5057_v24, %v5060_v60  ;;  %v11418_v0 = vpop.permute.xlu1 %1587  ;;  %v14976_v63 = vld [vmem:[#allocation37_spill] sm:$0xff] }
 0x297   : > { %v5078_v35 = vsel %vm5068_vm9, %v5075_v12, %v5077_v55  ;;  %v4850_v25 = vsel %vm8142_vm10, 0, %v8141_v8  ;;  %v5081_v43 = vsel %vm5069_vm6, %v5063_v29, %v5080_v47  ;;  %v6058_v53 = vshll.u32 %v11387_v33, 30 }
 0x298   : > { %v11423_v48 = vmul.u32.u64.low %v11400_v58, %v5078_v35  ;;  %v11424_v42 = vmul.u32.u64.high %v11400_v58, %v5078_v35, %v11423_v48  ;;  %v971_v13 = vmul.f32 %v10942_v40, %v11335_v50  ;;  %v4835_v60 = vadd.s32 %v11211_v54, %v11209_v2  ;;  %v11433_v6 = vpop.permute.xlu0 %1919  ;;  %v14975_v35 = vld [vmem:[#allocation8_spill] sm:$0xff] }
 0x299   : > { %687 = vrot.lane.b32.xlu1 %v646_v21, %s8523_s23  ;;  %v4851_v12 = vsub.s32 32, %v4850_v25  ;;  %14974 = vst [vmem:[#allocation38_spill] sm:$0xff] %v11433_v6  ;;  %v4855_v8 = vsub.s32 4294967266, %v4850_v25  ;;  %v5071_v29 = vsel %vm5067_vm5, %v5051_v3, %v5054_v56  ;;  %v5073_v16 = vsel %vm5069_vm6, %v5057_v24, %v5072_v19 }
 0x29a   : > { %v5082_v55 = vsel %vm5068_vm9, %v5079_v34, %v5081_v43  ;;  %v5434_v47 = vor.u32 4788187, %v5433_v62  ;;  %v11443_v21 = vsub.f32 %v14976_v63, %v14975_v35  ;;  %v964_v2 = vmul.f32 %v10843_v49, %v10958_v22  ;;  %1012 = vrot.lane.b32.xlu0 %v971_v13, %s8524_s24  ;;  %v11448_v6 = vpop.permute.xlu1 %1595 }
 0x29b   : > { %v4853_v54 = vshrl.u32 %v4835_v60, %v4851_v12  ;;  %v4852_v56 = vshll.u32 %v11322_v14, %v4850_v25  ;;  %v4856_v3 = vadd.s32 127, %v4855_v8  ;;  %v11456_v62 = vsub.s32 %v11301_v17, %v6058_v53 }
 0x29c   : > { %14977 = vst [vmem:[#allocation34_spill] sm:$0xff] %v11443_v21  ;;  %v11452_v24 = vmul.u32.u64.low %v11400_v58, %v5082_v55  ;;  %v11453_v19 = vmul.u32.u64.high %v11400_v58, %v5082_v55, %v11452_v24  ;;  %v1291_v63 = vmul.f32 %v11366_v45, %v10843_v49  ;;  %v5074_v22 = vsel %vm5068_vm9, %v5071_v29, %v5073_v16  ;;  %v11464_v43 = vpop.permute.xlu0 %2167 }
 0x29d   : > { %998 = vrot.lane.b32.xlu1 %v964_v2, %s8524_s24  ;;  %v5093_v34 = vadd.s32 1, %v11424_v42  ;;  %14978 = vst [vmem:[#allocation32_spill] sm:$0xff] %v11464_v43  ;;  %v4854_v14 = vor.u32 %v4853_v54, %v4852_v56  ;;  %v4857_v25 = vshll.u32 %v4856_v3, 23  ;;  %v5435_v13 = vand.u32 2147483647, %v5434_v47 }
 0x29e   : > { %v5437_v60 = vcvt.s32.f32 %v11382_v18  ;;  %v14979_v17 = vmul.u32 %v14966_v11, %v11219_v28  ;;  %v966_v12 = vmul.f32 %v10843_v49, %v11303_v41  ;;  %1329 = vrot.lane.b32.xlu0 %v1291_v63, %s8533_s4  ;;  %v11476_v51 = vpop.permute.xlu1 %1907  ;;  %v5090_v29 = vmul.u32 %v11400_v58, %v5074_v22  ;;  %v14981_v18 = vld [vmem:[#allocation48_spill] sm:$0xff] }
 0x29f   : > { %14980 = vst [vmem:[#allocation26_spill] sm:$0xff] %v11476_v51  ;;  %v4858_v8 = vor.u32 4788187, %v4857_v25  ;;  %vm5092_vm12 = vc.u32 %v11453_v19, %v11423_v48  ;;  %v11483_v16 = vsub.f32 %v14981_v18, %v14975_v35  ;;  %v6061_v28 = vsub.s32 0, %v11456_v62  ;;  %v14988_v18 = vld [vmem:[#allocation36_spill] sm:$0xff] }
 0x2a0   : > { %v11471_v53 = vadd.s32 %v11376_v7, %v14979_v17  ;;  %v7534_v11 = vand.u32 2139095040, %v11443_v21  ;;  %v1295_v41 = vmul.f32 %v11395_v61, %v10843_v49  ;;  %v5094_v7 = vsel %vm5092_vm12, %v5093_v34, %v11424_v42  ;;  %v11491_v55 = vpop.permute.xlu0 %2175 }
 0x2a1   : > { %14982 = vst [vmem:[#allocation45_spill] sm:$0xff] %v11483_v16  ;;  %1002 = vrot.lane.b32.xlu1 %v966_v12, %s8524_s24  ;;  %14983 = vst [vmem:[#allocation27_spill] sm:$0xff] %v11491_v55  ;;  %v4859_v58 = vand.u32 2147483647, %v4858_v8  ;;  %v4861_v47 = vcvt.s32.f32 %v4854_v14  ;;  %v5095_v2 = vadd.s32 %v5094_v7, %v5090_v29  ;;  %v5438_v54 = vmul.f32 %v5437_v60, %v5435_v13  ;;  %v14985_v14 = vld [vmem:[#allocation24_spill] sm:$0xff] }
 0x2a2   : > { %v6952_v56 = vadd.s32 536870912, %v11471_v53  ;;  %v970_v3 = vmul.f32 %v10843_v49, %v11335_v50  ;;  %1337 = vrot.lane.b32.xlu0 %v1295_v41, %s8533_s4  ;;  %v11497_v24 = vpop.permute.xlu1 %1915  ;;  %v5678_v25 = vand.u32 2139095040, %v11483_v16  ;;  %v8156_v42 = vmin.u32 %v6061_v28, %v11456_v62 }
 0x2a3   : > { %14984 = vst [vmem:[#allocation8_spill] sm:$0xff] %v11497_v24  ;;  %v4862_v63 = vmul.f32 %v4861_v47, %v4859_v58  ;;  %v5096_v22 = vadd.s32 536870912, %v5095_v2  ;;  %v7535_v34 = vshrl.u32 %v7534_v11, 23  ;;  %v1297_v17 = vmul.f32 %v14985_v14, %v10843_v49 }
 0x2a4   : > { %v11504_v13 = vpop.permute.xlu0 %2487  ;;  %v5439_v12 = vxor.u32 2147483648, %v5438_v54  ;;  %v11508_v8 = vshrl.u32 %v6952_v56, 30  ;;  %v1292_v29 = vmul.f32 %v11366_v45, %v10942_v40  ;;  %vm4781_vm4 = vcmp.lt.s32.totalorder %v14988_v18, 0  ;;  %v14992_v56 = vld [vmem:[#allocation43_spill] sm:$0xff] }
 0x2a5   : > { %1010 = vrot.lane.b32.xlu1 %v970_v3, %s8524_s24  ;;  %14986 = vst [vmem:[#allocation37_spill] sm:$0xff] %v11504_v13  ;;  %v4863_v60 = vxor.u32 2147483648, %v4862_v63  ;;  %v11506_v50 = vshrl.u32 %v5096_v22, 30  ;;  %v14989_v49 = vand.u32 2147483647, %v14988_v18  ;;  %v5679_v58 = vshrl.u32 %v5678_v25, 23 }
 0x2a6   : > { %14987 = vst [vmem:[#allocation48_spill] sm:$0xff] %v11508_v8  ;;  %1341 = vrot.lane.b32.xlu0 %v1297_v17, %s8533_s4  ;;  %v11514_v28 = vpop.permute.xlu1 %2163  ;;  %v6063_v47 = vclz %v8156_v42  ;;  %v8175_v45 = vadd.s32 4294967169, %v7535_v34  ;;  %v1613_v3 = vmul.f32 %v14992_v56, %v10942_v40  ;;  %v14993_v17 = vld [vmem:[#allocation11_spill] sm:$0xff]  ;;  %v6954_v25 = vshll.u32 %v11508_v8, 30 }
 0x2a7   : > { %vm11518_vm13 = vcmp.le.f32.partialorder %v14989_v49, 0.7853982  ;;  %v4864_v41 = vsel %vm4781_vm4, %v4863_v60, %v4862_v63  ;;  %v5098_v7 = vshll.u32 %v11506_v50, 30  ;;  %vm5357_vm15 = vcmp.lt.s32.totalorder %v14993_v17, 0 }
 0x2a8   : > { %v4867_v22 = vsel %vm11518_vm13, %v14988_v18, %v4864_v41  ;;  %v11532_v49 = vpop.permute.xlu0 %2495  ;;  %v1296_v42 = vmul.f32 %v11395_v61, %v10942_v40  ;;  %v4865_v34 = vsub.s32 4, %v11280_v23  ;;  %v5440_v60 = vsel %vm5357_vm15, %v5439_v12, %v5438_v54 }
 0x2a9   : > { %1331 = vrot.lane.b32.xlu1 %v1292_v29, %s8533_s4  ;;  %14994 = vst [vmem:[#allocation24_spill] sm:$0xff] %v11532_v49  ;;  %8401 = vcosq.f32 %v4867_v22  ;;  %v11534_v63 = vsub.s32 %v5095_v2, %v5098_v7  ;;  %v8151_v24 = vadd.s32 4294967169, %v5679_v58  ;;  %v8157_v2 = vadd.s32 4294967294, %v6063_v47 }
 0x2aa   : > { %1648 = vrot.lane.b32.xlu0 %v1613_v3, %s8534_s5  ;;  %8403 = vsinq.f32 %v4867_v22  ;;  %v11543_v29 = vpop.permute.xlu1 %2171  ;;  %v7541_v7 = vadd.s32 1, %v8175_v45  ;;  %v1615_v51 = vmul.f32 %v11418_v0, %v10942_v40  ;;  %v14995_v61 = vand.u32 2147483647, %v14993_v17 }
 0x2ab   : > { %v5101_v41 = vsub.s32 0, %v11534_v63  ;;  %v11562_v58 = vsub.s32 %v11471_v53, %v6954_v25  ;;  %v1298_v47 = vmul.f32 %v14985_v14, %v10942_v40  ;;  %v4866_v45 = vsel %vm4781_vm4, %v4865_v34, %v11280_v23  ;;  %v15001_v25 = vld [vmem:[#allocation7_spill] sm:$0xff]  ;;  %v15002_v34 = vld [vmem:[#allocation6_spill] sm:$0xff] }
 0x2ac   : > { %vm11551_vm0 = vcmp.le.f32.partialorder %v14995_v61, 0.7853982  ;;  %v11555_v22 = vpop.permute.xlu0 %373  ;;  %v5685_v61 = vadd.s32 1, %v8151_v24  ;;  %vm8158_vm1 = vcmp.lt.s32.totalorder %v8157_v2, 0  ;;  %vm7542_vm7 = vcmp.gt.s32.totalorder %v7541_v7, 0 }
 0x2ad   : > { %1339 = vrot.lane.b32.xlu1 %v1296_v42, %s8533_s4  ;;  %14998 = vst [vmem:[#allocation36_spill] sm:$0xff] %v11555_v22  ;;  %v8144_v54 = vmin.u32 %v5101_v41, %v11534_v63  ;;  %v5443_v12 = vsel %vm11551_vm0, %v14993_v17, %v5440_v60  ;;  %14999 = vst [vmem:[#allocation43_spill] sm:$0xff] %v11562_v58  ;;  %v1619_v53 = vmul.f32 %v11448_v6, %v10942_v40  ;;  %v11586_v60 = vld [vmem:[%s10813_s3] sm:$0xff] }
 0x2ae   : > { %1652 = vrot.lane.b32.xlu0 %v1615_v51, %s8534_s5  ;;  %v11570_v42 = vpop.permute.xlu1 %2483  ;;  %8405 = vcosq.f32 %v5443_v12  ;;  %v4868_v23 = vsel %vm11518_vm13, 0, %v4866_v45  ;;  %v1612_v40 = vmul.f32 %v11586_v60, %v14992_v56  ;;  %v7543_v22 = vsel %vm7542_vm7, %v7541_v7, 0 }
 0x2af   : > { %v5103_v41 = vclz %v8144_v54  ;;  %v11582_v54 = vadd.f32 %v15002_v34, %v15001_v25  ;;  %8407 = vsinq.f32 %v5443_v12  ;;  %vm5686_vm2 = vcmp.gt.s32.totalorder %v5685_v61, 0  ;;  %v15004_v12 = vld [vmem:[#allocation28_spill] sm:$0xff] }
 0x2b0   : > { %v11576_v51 = vpop.permute.xlu0 %959  ;;  %v15003_v45 = vand.u32 2147483647, %v11443_v21  ;;  %v2189_v25 = vmul.f32 %v11066_v4, %v15004_v12  ;;  %v4872_v24 = vand.u32 3, %v4868_v23  ;;  %v5091_v7 = vadd.s32 %v11423_v48, %v11453_v19 }
 0x2b1   : > { %1343 = vrot.lane.b32.xlu1 %v1298_v47, %s8533_s4  ;;  %15000 = vst [vmem:[#allocation11_spill] sm:$0xff] %v11576_v51  ;;  %v8145_v14 = vadd.s32 4294967294, %v5103_v41  ;;  %v11591_v47 = vsel %vm8158_vm1, 0, %v8157_v2  ;;  %v6051_v2 = vadd.s32 %v11105_v38, %v11100_v15  ;;  %v11609_v51 = vand.u32 31, %v7543_v22 }
 0x2b2   : > { %1660 = vrot.lane.b32.xlu0 %v1619_v53, %s8534_s5  ;;  %v11593_v11 = vpop.permute.xlu1 %2491  ;;  %v11597_v41 = vand.u32 8388607, %v15003_v45  ;;  %v6071_v45 = vsub.s32 4294967266, %v11591_v47  ;;  %v11615_v23 = vsel %vm5686_vm2, %v5685_v61, 0  ;;  %v2191_v52 = vmul.f32 %v11066_v4, %v11514_v28 }
 0x2b3   : > { %vm8146_vm14 = vcmp.lt.s32.totalorder %v8145_v14, 0  ;;  %vm4877_vm8 = vcmp.eq.s32.totalorder %v4872_v24, 2  ;;  %vm4874_vm3 = vcmp.eq.s32.totalorder %v4872_v24, 0  ;;  %vm4873_vm5 = vcmp.lt.s32.totalorder %v4872_v24, 2 }
 0x2b4   : > { %v5106_v56 = vsel %vm8146_vm14, 0, %v8145_v14  ;;  %v11604_v53 = vpop.permute.xlu0 %1607  ;;  %vm4871_vm11 = vweird.f32 %v14988_v18  ;;  %vm5037_vm6 = vcmp.lt.s32.totalorder %v11093_v20, 0 }
 0x2b5   : > { %1646 = vrot.lane.b32.xlu1 %v1612_v40, %s8534_s5  ;;  %15005 = vst [vmem:[#allocation7_spill] sm:$0xff] %v11604_v53  ;;  %v5107_v8 = vsub.s32 32, %v5106_v56  ;;  %v5111_v26 = vsub.s32 4294967266, %v5106_v56  ;;  %v1614_v40 = vmul.f32 %v11586_v60, %v11418_v0  ;;  %v5108_v48 = vshll.u32 %v11534_v63, %v5106_v56  ;;  %v15007_v0 = vld [vmem:[#allocation30_spill] sm:$0xff] }
 0x2b6   : > { %v8402_v21 = vpop.eup %8401  ;;  %2224 = vrot.lane.b32.xlu0 %v2189_v25, %s8523_s23  ;;  %v11617_v38 = vpop.permute.xlu1 %2819  ;;  %v5441_v25 = vsub.s32 4, %v15007_v0  ;;  %v1618_v63 = vmul.f32 %v11586_v60, %v11448_v6  ;;  %v11630_v56 = vshrl.u32 %v7543_v22, 5  ;;  %v2195_v6 = vmul.f32 %v11066_v4, %v11543_v29 }
 0x2b7   : > { %v8404_v15 = vpop.eup %8403  ;;  %15006 = vst [vmem:[#allocation6_spill] sm:$0xff] %v11617_v38  ;;  %v4878_v14 = vxor.u32 2147483648, %v8402_v21  ;;  %v5109_v19 = vshrl.u32 %v5091_v7, %v5107_v8  ;;  %v5112_v53 = vadd.s32 127, %v5111_v26  ;;  %v5689_v8 = vand.u32 31, %v11615_v23 }
 0x2b8   : > { %v4875_v39 = vxor.u32 2147483648, %v8404_v15  ;;  %v11624_v49 = vpop.permute.xlu0 %1927 }
 0x2b9   : > { %1650 = vrot.lane.b32.xlu1 %v1614_v40, %s8534_s5  ;;  %15008 = vst [vmem:[#allocation28_spill] sm:$0xff] %v11624_v49  ;;  %v4879_v61 = vsel %vm4877_vm8, %v4878_v14, %v8404_v15  ;;  %v5110_v13 = vor.u32 %v5109_v19, %v5108_v48  ;;  %v5113_v38 = vshll.u32 %v5112_v53, 23  ;;  %v6067_v15 = vsub.s32 32, %v11591_v47 }
 0x2ba   : > { %2228 = vrot.lane.b32.xlu0 %v2191_v52, %s8523_s23  ;;  %v4876_v26 = vsel %vm4874_vm3, %v8402_v21, %v4875_v39  ;;  %v11632_v7 = vpop.permute.xlu1 %357  ;;  %v11636_v53 = vadd.s32 127, %v6071_v45  ;;  %v11642_v39 = vsub.s32 32, %v11609_v51  ;;  %v11652_v45 = vshll.u32 %v14746_v36, %v11609_v51 }
 0x2bb   : > { %15009 = vst [vmem:[#allocation30_spill] sm:$0xff] %v11632_v7  ;;  %v4880_v40 = vsel %vm4873_vm5, %v4876_v26, %v4879_v61  ;;  %v5114_v49 = vor.u32 4788187, %v5113_v38  ;;  %v5117_v24 = vcvt.s32.f32 %v5110_v13  ;;  %v11648_v38 = vpop.eup %8405  ;;  %v2188_v14 = vmul.f32 %v11285_v9, %v15004_v12 }
 0x2bc   : > { %v4881_v52 = vsel %vm4871_vm11, nan, %v4880_v40  ;;  %v11644_v21 = vpop.permute.xlu0 %2183  ;;  %v5442_v48 = vsel %vm5357_vm15, %v5441_v25, %v15007_v0  ;;  %v5690_v19 = vsub.s32 32, %v5689_v8  ;;  %v11660_v61 = vpop.eup %8407  ;;  %v14680_v12 = vand.u32 2147483647, %v11483_v16 }
 0x2bd   : > { %1658 = vrot.lane.b32.xlu1 %v1618_v63, %s8534_s5  ;;  %15010 = vst [vmem:[#allocation53_spill] sm:$0xff] %v11644_v21  ;;  %v11646_v22 = vmul.f32 0.1875, %v4881_v52  ;;  %v5115_v18 = vand.u32 2147483647, %v5114_v49  ;;  %v11669_v40 = vshrl.u32 %v6051_v2, %v6067_v15  ;;  %v2509_v0 = vmul.f32 %v11066_v4, %v11163_v10 }
 0x2be   : > { %2236 = vrot.lane.b32.xlu0 %v2195_v6, %s8523_s23  ;;  %v11664_v49 = vpop.permute.xlu1 %369  ;;  %v5121_v2 = vsub.s32 4, %v11506_v50  ;;  %v5444_v15 = vsel %vm11551_vm0, 0, %v5442_v48  ;;  %v5702_v3 = vshrl.u32 %v14747_v46, %v5690_v19  ;;  %v5705_v48 = vshrl.u32 %v14762_v1, %v5690_v19 }
 0x2bf   : > { %15011 = vst [vmem:[#allocation54_spill] sm:$0xff] %v11646_v22  ;;  %15012 = vst [vmem:[#allocation55_spill] sm:$0xff] %v11664_v49  ;;  %v4883_v63 = vmul.f32 %v11646_v22, %v11646_v22  ;;  %v5118_v26 = vmul.f32 %v5117_v24, %v5115_v18  ;;  %v15014_v18 = vand.u32 2147483647, %v11093_v20  ;;  %v5699_v49 = vshrl.u32 %v14761_v57, %v5690_v19 }
 0x2c0   : > { %v11676_v25 = vpop.permute.xlu0 %2503  ;;  %v5692_v7 = vshll.u32 %v14746_v36, %v5689_v8  ;;  %v5695_v22 = vshll.u32 %v14770_v44, %v5689_v8  ;;  %v5698_v21 = vshll.u32 %v14776_v30, %v5689_v8  ;;  %v5701_v16 = vshll.u32 %v14761_v57, %v5689_v8 }
 0x2c1   : > { %2222 = vrot.lane.b32.xlu1 %v2188_v14, %s8523_s23  ;;  %15013 = vst [vmem:[#allocation56_spill] sm:$0xff] %v11676_v25  ;;  %v11679_v52 = vadd.f32 %v4883_v63, %v11344_v31  ;;  %vm11683_vm9 = vcmp.le.f32.partialorder %v15014_v18, 0.7853982  ;;  %v2190_v14 = vmul.f32 %v11285_v9, %v11514_v28  ;;  %v5119_v6 = vxor.u32 2147483648, %v5118_v26 }
 0x2c2   : > { %2544 = vrot.lane.b32.xlu0 %v2509_v0, %s8524_s24  ;;  %v5693_v31 = vshrl.u32 %v14770_v44, %v5690_v19  ;;  %v5696_v63 = vshrl.u32 %v14776_v30, %v5690_v19  ;;  %v11695_v13 = vpop.permute.xlu1 %618  ;;  %v5682_v18 = vand.u32 8388607, %v14680_v12  ;;  %v2511_v28 = vmul.f32 %v11066_v4, %v11570_v42 }
 0x2c3   : > { %v5120_v0 = vsel %vm5037_vm6, %v5119_v6, %v5118_v26  ;;  %v5688_v12 = vshrl.u32 %v11615_v23, 5  ;;  %v5704_v55 = vshll.u32 %v14747_v46, %v5689_v8  ;;  %v5700_v23 = vor.u32 %v5699_v49, %v5698_v21 }
 0x2c4   : > { %v11709_v25 = vpop.permute.xlu0 %1317  ;;  %v5123_v26 = vsel %vm11683_vm9, %v11093_v20, %v5120_v0  ;;  %v5694_v6 = vor.u32 %v5693_v31, %v5692_v7  ;;  %v5697_v43 = vor.u32 %v5696_v63, %v5695_v22  ;;  %v5703_v33 = vor.u32 %v5702_v3, %v5701_v16 }
 0x2c5   : > { %2226 = vrot.lane.b32.xlu1 %v2190_v14, %s8523_s23  ;;  %15017 = vst [vmem:[#allocation57_spill] sm:$0xff] %v11709_v25  ;;  %v2194_v14 = vmul.f32 %v11285_v9, %v11543_v29  ;;  %8409 = vcosq.f32 %v5123_v26  ;;  %v5706_v37 = vor.u32 %v5705_v48, %v5704_v55  ;;  %v2515_v8 = vmul.f32 %v11066_v4, %v11593_v11 }
 0x2c6   : > { %2548 = vrot.lane.b32.xlu0 %v2511_v28, %s8524_s24  ;;  %v11721_v25 = vpop.permute.xlu1 %626  ;;  %8411 = vsinq.f32 %v5123_v26  ;;  %v5451_v29 = vxor.u32 2147483648, %v11660_v61  ;;  %v5683_v28 = vor.u32 8388608, %v5682_v18  ;;  %v2508_v0 = vmul.f32 %v11285_v9, %v11163_v10 }
 0x2c7   : > { %v5122_v21 = vsel %vm5037_vm6, %v5121_v2, %v11506_v50  ;;  %v11734_v16 = vand.u32 3, %v5444_v15  ;;  %vm5707_vm10 = vcmp.lt.s32.totalorder %v5688_v12, 1  ;;  %v5691_v4 = vshrl.u32 %v14746_v36, %v5690_v19 }
 0x2c8   : > { %v11729_v7 = vpop.permute.xlu0 %669  ;;  %vm5709_vm12 = vcmp.lt.s32.totalorder %v5688_v12, 3  ;;  %vm5710_vm4 = vcmp.lt.s32.totalorder %v5688_v12, 4  ;;  %v5715_v55 = vsel %vm5707_vm10, %v5694_v6, %v5697_v43  ;;  %v5719_v31 = vsel %vm5707_vm10, %v5697_v43, %v5700_v23 }
 0x2c9   : > { %2234 = vrot.lane.b32.xlu1 %v2194_v14, %s8523_s23  ;;  %15018 = vst [vmem:[#allocation58_spill] sm:$0xff] %v11729_v7  ;;  %v5712_v10 = vsel %vm5710_vm4, %v5700_v23, 2102212464  ;;  %v5716_v49 = vsel %vm5710_vm4, %v5703_v33, 920167782  ;;  %v643_v50 = vmul.f32 %v11586_v60, %v11695_v13  ;;  %vm5708_vm13 = vcmp.lt.s32.totalorder %v5688_v12, 2 }
 0x2ca   : > { %2556 = vrot.lane.b32.xlu0 %v2515_v8, %s8524_s24  ;;  %v11739_v22 = vpop.permute.xlu1 %955  ;;  %v5720_v63 = vsel %vm5710_vm4, %v5706_v37, 1326507024  ;;  %v5717_v2 = vsel %vm5709_vm12, %v5700_v23, %v5716_v49  ;;  %v5723_v19 = vshll.u32 %v5683_v28, 8  ;;  %v5711_v15 = vsel %vm5707_vm10, %v5691_v4, %v5694_v6 }
 0x2cb   : > { %v5713_v18 = vsel %vm5709_vm12, %v5697_v43, %v5712_v10  ;;  %v5718_v3 = vsel %vm5708_vm13, %v5715_v55, %v5717_v2  ;;  %v5721_v48 = vsel %vm5709_vm12, %v5703_v33, %v5720_v63  ;;  %v2510_v37 = vmul.f32 %v11285_v9, %v11570_v42 }
 0x2cc   : > { %v11753_v14 = vpop.permute.xlu0 %996  ;;  %v5722_v26 = vsel %vm5708_vm13, %v5719_v31, %v5721_v48  ;;  %v11756_v8 = vmul.u32.u64.low %v5723_v19, %v5718_v3  ;;  %v11757_v23 = vmul.u32.u64.high %v5723_v19, %v5718_v3, %v11756_v8  ;;  %v5124_v43 = vsel %vm11683_vm9, 0, %v5122_v21 }
 0x2cd   : > { %2542 = vrot.lane.b32.xlu1 %v2508_v0, %s8524_s24  ;;  %15019 = vst [vmem:[#allocation59_spill] sm:$0xff] %v11753_v14  ;;  %v5454_v33 = vxor.u32 2147483648, %v11648_v38  ;;  %v11765_v28 = vmul.u32.u64.low %v5723_v19, %v5722_v26  ;;  %v11766_v0 = vmul.u32.u64.high %v5723_v19, %v5722_v26, %v11765_v28  ;;  %v11770_v42 = vshll.u32 %v14770_v44, %v11609_v51 }
 0x2ce   : > { %681 = vrot.lane.b32.xlu0 %v643_v50, %s8523_s23  ;;  %v11760_v6 = vpop.permute.xlu1 %1282  ;;  %v7557_v4 = vshll.u32 %v14761_v57, %v11609_v51  ;;  %v647_v55 = vmul.f32 %v11586_v60, %v11721_v25  ;;  %v5714_v24 = vsel %vm5708_vm13, %v5711_v15, %v5713_v18  ;;  %v15020_v21 = vshll.u32 %v11456_v62, %v11591_v47 }
 0x2cf   : > { %v15021_v49 = vshll.u32 %v11636_v53, 23  ;;  %v7549_v63 = vshrl.u32 %v14770_v44, %v11642_v39  ;;  %vm5450_vm15 = vcmp.eq.s32.totalorder %v11734_v16, 0  ;;  %v2514_v50 = vmul.f32 %v11285_v9, %v11593_v11 }
 0x2d0   : > { %v6070_v10 = vor.u32 %v11669_v40, %v15020_v21  ;;  %v5128_v12 = vand.u32 3, %v5124_v43  ;;  %vm5453_vm0 = vcmp.eq.s32.totalorder %v11734_v16, 2  ;;  %v5733_v62 = vadd.s32 1, %v11757_v23 }
 0x2d1   : > { %2546 = vrot.lane.b32.xlu1 %v2510_v37, %s8524_s24  ;;  %v6074_v31 = vor.u32 4788187, %v15021_v49  ;;  %v5452_v53 = vsel %vm5450_vm15, %v11648_v38, %v5451_v29  ;;  %v5455_v40 = vsel %vm5453_vm0, %v5454_v33, %v11660_v61  ;;  %v5730_v2 = vmul.u32 %v5723_v19, %v5714_v24  ;;  %v11805_v38 = vpop.permute.xlu0 %1321  ;;  %v11810_v37 = vld [vmem:[%s10813_s3 + $0x8] sm:$0xff] }
 0x2d2   : > { %689 = vrot.lane.b32.xlu0 %v647_v55, %s8523_s23  ;;  %vm5732_vm1 = vc.u32 %v11766_v0, %v11756_v8  ;;  %v8410_v15 = vpop.eup %8409  ;;  %v7552_v9 = vshrl.u32 %v14776_v30, %v11642_v39  ;;  %v7558_v11 = vshrl.u32 %v14747_v46, %v11642_v39  ;;  %v649_v18 = vmul.f32 %v11586_v60, %v11270_v32 }
 0x2d3   : > { %v11792_v47 = vpop.permute.xlu1 %1603  ;;  %15022 = vst [vmem:[#allocation60_spill] sm:$0xff] %v11805_v38  ;;  %v5734_v61 = vsel %vm5732_vm1, %v5733_v62, %v11757_v23  ;;  %v8412_v29 = vpop.eup %8411  ;;  %v6077_v19 = vcvt.s32.f32 %v6070_v10  ;;  %v5134_v3 = vxor.u32 2147483648, %v8410_v15  ;;  %vm5449_vm7 = vcmp.lt.s32.totalorder %v11734_v16, 2 }
 0x2d4   : > { %v5735_v48 = vadd.s32 %v5734_v61, %v5730_v2  ;;  %v644_v26 = vmul.f32 %v11810_v37, %v11695_v13  ;;  %v5131_v43 = vxor.u32 2147483648, %v8412_v29  ;;  %vm5133_vm14 = vcmp.eq.s32.totalorder %v5128_v12, 2 }
 0x2d5   : > { %2554 = vrot.lane.b32.xlu1 %v2514_v50, %s8524_s24  ;;  %v5456_v33 = vsel %vm5449_vm7, %v5452_v53, %v5455_v40  ;;  %v6075_v28 = vand.u32 2147483647, %v6074_v31  ;;  %vm5130_vm2 = vcmp.eq.s32.totalorder %v5128_v12, 0  ;;  %v5135_v23 = vsel %vm5133_vm14, %v5134_v3, %v8412_v29 }
 0x2d6   : > { %693 = vrot.lane.b32.xlu0 %v649_v18, %s8523_s23  ;;  %v5736_v24 = vadd.s32 536870912, %v5735_v48  ;;  %v969_v16 = vmul.f32 %v11810_v37, %v11287_v59  ;;  %vm5129_vm8 = vcmp.lt.s32.totalorder %v5128_v12, 2  ;;  %v5132_v21 = vsel %vm5130_vm2, %v8410_v15, %v5131_v43  ;;  %v11831_v12 = vpop.permute.xlu0 %1325 }
 0x2d7   : > { %v11815_v55 = vpop.permute.xlu1 %1923  ;;  %vm5447_vm3 = vweird.f32 %v14993_v17  ;;  %vm5127_vm5 = vweird.f32 %v11093_v20  ;;  %v5136_v13 = vsel %vm5129_vm8, %v5132_v21, %v5135_v23  ;;  %v7555_v31 = vshrl.u32 %v14761_v57, %v11642_v39  ;;  %15024 = vst [vmem:[#allocation62_spill] sm:$0xff] %v11831_v12 }
 0x2d8   : > { %15023 = vst [vmem:[#allocation61_spill] sm:$0xff] %v11815_v55  ;;  %v5457_v10 = vsel %vm5447_vm3, nan, %v5456_v33  ;;  %v11822_v49 = vshrl.u32 %v5736_v24, 30  ;;  %v11826_v50 = vor.u32 %v7558_v11, %v7557_v4  ;;  %v648_v62 = vmul.f32 %v11810_v37, %v11721_v25 }
 0x2d9   : > { %683 = vrot.lane.b32.xlu1 %v644_v26, %s8523_s23  ;;  %v5137_v53 = vsel %vm5127_vm5, nan, %v5136_v13  ;;  %v6078_v17 = vmul.f32 %v6077_v19, %v6075_v28  ;;  %v7561_v20 = vshrl.u32 %v14762_v1, %v11642_v39  ;;  %v7554_v4 = vshll.u32 %v14776_v30, %v11609_v51 }
 0x2da   : > { %1008 = vrot.lane.b32.xlu0 %v969_v16, %s8524_s24  ;;  %v11837_v2 = vmul.f32 0.5625, %v5137_v53  ;;  %v5738_v15 = vshll.u32 %v11822_v49, 30  ;;  %v973_v25 = vmul.f32 %v11810_v37, %v11320_v27  ;;  %v11845_v11 = vmul.f32 0.75, %v5457_v10  ;;  %v11878_v33 = vpop.permute.xlu0 %1333 }
 0x2db   : > { %v11835_v40 = vpop.permute.xlu1 %2179  ;;  %v11849_v18 = vsub.f32 %v11582_v54, %v14975_v35  ;;  %v11852_v61 = vor.u32 %v7549_v63, %v11652_v45  ;;  %v7560_v29 = vshll.u32 %v14747_v46, %v11609_v51  ;;  %v11861_v26 = vor.u32 %v7552_v9, %v11770_v42  ;;  %15028 = vst [vmem:[#allocation66_spill] sm:$0xff] %v11878_v33 }
 0x2dc   : > { %15025 = vst [vmem:[#allocation63_spill] sm:$0xff] %v11837_v2  ;;  %15026 = vst [vmem:[#allocation64_spill] sm:$0xff] %v11845_v11  ;;  %v5139_v19 = vmul.f32 %v11837_v2, %v11837_v2  ;;  %v11858_v3 = vsub.s32 %v5735_v48, %v5738_v15  ;;  %v11863_v43 = vor.u32 %v7555_v31, %v7554_v4  ;;  %vm7566_vm11 = vcmp.lt.s32.totalorder %v11630_v56, 4  ;;  %v15030_v31 = vld [vmem:[#allocation29_spill] sm:$0xff] }
 0x2dd   : > { %691 = vrot.lane.b32.xlu1 %v648_v62, %s8523_s23  ;;  %15027 = vst [vmem:[#allocation65_spill] sm:$0xff] %v11849_v18  ;;  %v650_v54 = vmul.f32 %v11810_v37, %v11270_v32  ;;  %v6079_v45 = vxor.u32 2147483648, %v6078_v17  ;;  %v7562_v63 = vor.u32 %v7561_v20, %v7560_v29  ;;  %v7572_v51 = vsel %vm7566_vm11, %v11826_v50, 920167782 }
 0x2de   : > { %1016 = vrot.lane.b32.xlu0 %v973_v25, %s8524_s24  ;;  %v5140_v42 = vadd.f32 %v5139_v19, %v11679_v52  ;;  %v975_v9 = vmul.f32 %v11810_v37, %v11739_v22  ;;  %v5459_v32 = vmul.f32 %v11845_v11, %v11845_v11  ;;  %v5741_v28 = vsub.s32 0, %v11858_v3 }
 0x2df   : > { %v11872_v48 = vpop.permute.xlu1 %2499  ;;  %v6318_v23 = vand.u32 2139095040, %v11849_v18  ;;  %v15029_v24 = vsub.s32 0, %v11562_v58  ;;  %v7539_v52 = vor.u32 8388608, %v11597_v41  ;;  %vm7563_vm6 = vcmp.lt.s32.totalorder %v11630_v56, 1 }
 0x2e0   : > { %vm7565_vm9 = vcmp.lt.s32.totalorder %v11630_v56, 3  ;;  %v968_v21 = vmul.f32 %v11586_v60, %v11287_v59  ;;  %v11893_v13 = vadd.f32 %v5459_v32, %v5140_v42  ;;  %v8152_v10 = vmin.u32 %v5741_v28, %v11858_v3 }
 0x2e1   : > { %695 = vrot.lane.b32.xlu1 %v650_v54, %s8523_s23  ;;  %v8168_v16 = vmin.u32 %v15029_v24, %v11562_v58  ;;  %vm5997_vm10 = vcmp.lt.s32.totalorder %v15030_v31, 0  ;;  %v7571_v41 = vsel %vm7563_vm6, %v11852_v61, %v11861_v26  ;;  %v7573_v62 = vsel %vm7565_vm9, %v11863_v43, %v7572_v51  ;;  %v11929_v51 = vpop.permute.xlu0 %1644 }
 0x2e2   : > { %1020 = vrot.lane.b32.xlu0 %v975_v9, %s8524_s24  ;;  %v6080_v59 = vsel %vm5997_vm10, %v6079_v45, %v6078_v17  ;;  %v7576_v20 = vsel %vm7566_vm11, %v7562_v63, 1326507024  ;;  %v1299_v15 = vmul.f32 %v11586_v60, %v11760_v6  ;;  %v6319_v4 = vshrl.u32 %v6318_v23, 23  ;;  %15034 = vst [vmem:[#allocation29_spill] sm:$0xff] %v11929_v51  ;;  %v15036_v23 = vld [vmem:[#allocation13_spill] sm:$0xff] }
 0x2e3   : > { %v11904_v53 = vpop.permute.xlu1 %634  ;;  %v6959_v25 = vclz %v8168_v16  ;;  %vm7564_vm12 = vcmp.lt.s32.totalorder %v11630_v56, 2  ;;  %v5743_v29 = vclz %v8152_v10  ;;  %v15031_v19 = vand.u32 2147483647, %v15030_v31 }
 0x2e4   : > { %v11922_v17 = vsel %vm7564_vm12, %v7571_v41, %v7573_v62  ;;  %v11924_v45 = vshll.u32 %v7539_v52, 8  ;;  %v972_v63 = vmul.f32 %v11586_v60, %v11320_v27  ;;  %v7575_v9 = vsel %vm7563_vm6, %v11861_v26, %v11863_v43 }
 0x2e5   : > { %1006 = vrot.lane.b32.xlu1 %v968_v21, %s8524_s24  ;;  %vm11916_vm4 = vcmp.le.f32.partialorder %v15031_v19, 0.7853982  ;;  %v7577_v32 = vsel %vm7565_vm9, %v11826_v50, %v7576_v20  ;;  %v8153_v27 = vadd.s32 4294967294, %v5743_v29  ;;  %v6569_v24 = vadd.f32 %v15002_v34, %v15036_v23 }
 0x2e6   : > { %1345 = vrot.lane.b32.xlu0 %v1299_v15, %s8533_s4  ;;  %v6083_v42 = vsel %vm11916_vm4, %v15030_v31, %v6080_v59  ;;  %v1617_v16 = vmul.f32 %v11810_v37, %v11349_v5  ;;  %v14689_v52 = vand.u32 2147483647, %v11849_v18  ;;  %v8159_v21 = vadd.s32 4294967169, %v6319_v4 }
 0x2e7   : > { %v11941_v28 = vpop.permute.xlu1 %1319  ;;  %v11949_v10 = vadd.s32 4294967294, %v6959_v25  ;;  %v11953_v41 = vmul.u32.u64.low %v11924_v45, %v11922_v17  ;;  %v11954_v50 = vmul.u32.u64.high %v11924_v45, %v11922_v17, %v11953_v41  ;;  %vm8154_vm13 = vcmp.lt.s32.totalorder %v8153_v27, 0  ;;  %v15038_v17 = vld [vmem:[#allocation10_spill] sm:$0xff] }
 0x2e8   : > { %15035 = vst [vmem:[#allocation67_spill] sm:$0xff] %v11941_v28  ;;  %8413 = vcosq.f32 %v6083_v42  ;;  %v11959_v62 = vsel %vm7564_vm12, %v7575_v9, %v7577_v32  ;;  %v974_v59 = vmul.f32 %v11586_v60, %v11739_v22  ;;  %v5746_v20 = vsel %vm8154_vm13, 0, %v8153_v27  ;;  %v11971_v9 = vpop.permute.xlu0 %2220  ;;  %v15040_v22 = vld [vmem:[#allocation31_spill] sm:$0xff] }
 0x2e9   : > { %1014 = vrot.lane.b32.xlu1 %v972_v63, %s8524_s24  ;;  %v5731_v4 = vadd.s32 %v11756_v8, %v11766_v0  ;;  %v5747_v25 = vsub.s32 32, %v5746_v20  ;;  %v5751_v29 = vsub.s32 4294967266, %v5746_v20  ;;  %v6325_v19 = vadd.s32 1, %v8159_v21  ;;  %15039 = vst [vmem:[#allocation10_spill] sm:$0xff] %v11971_v9 }
 0x2ea   : > { %1656 = vrot.lane.b32.xlu0 %v1617_v16, %s8534_s5  ;;  %8415 = vsinq.f32 %v6083_v42  ;;  %v1621_v63 = vmul.f32 %v11810_v37, %v15038_v17  ;;  %v6081_v32 = vsub.s32 4, %v15040_v22  ;;  %v6322_v27 = vand.u32 8388607, %v14689_v52 }
 0x2eb   : > { %v11964_v15 = vpop.permute.xlu1 %671  ;;  %v5748_v23 = vshll.u32 %v11858_v3, %v5746_v20  ;;  %v5749_v8 = vshrl.u32 %v5731_v4, %v5747_v25  ;;  %v5752_v0 = vadd.s32 127, %v5751_v29  ;;  %vm6326_vm15 = vcmp.gt.s32.totalorder %v6325_v19, 0  ;;  %v11990_v25 = vld [vmem:[%s10813_s3 + $0x9] sm:$0xff] }
 0x2ec   : > { %15037 = vst [vmem:[#allocation13_spill] sm:$0xff] %v11964_v15  ;;  %v1616_v42 = vmul.f32 %v11586_v60, %v11349_v5  ;;  %v1300_v16 = vmul.f32 %v11810_v37, %v11760_v6  ;;  %v6327_v21 = vsel %vm6326_vm15, %v6325_v19, 0  ;;  %v1620_v52 = vmul.f32 %v11586_v60, %v15038_v17  ;;  %v15042_v5 = vld [vmem:[#allocation32_spill] sm:$0xff]  ;;  %v15043_v6 = vld [vmem:[#allocation27_spill] sm:$0xff]  ;;  %v15044_v19 = vld [vmem:[#allocation45_spill] sm:$0xff] }
 0x2ed   : > { %1018 = vrot.lane.b32.xlu1 %v974_v59, %s8524_s24  ;;  %v11983_v59 = vsub.f32 %v6569_v24, %v14975_v35  ;;  %v5750_v3 = vor.u32 %v5749_v8, %v5748_v23  ;;  %v5753_v20 = vshll.u32 %v5752_v0, 23  ;;  %v6329_v4 = vand.u32 31, %v6327_v21 }
 0x2ee   : > { %1664 = vrot.lane.b32.xlu0 %v1621_v63, %s8534_s5  ;;  %v2193_v29 = vmul.f32 %v11990_v25, %v15042_v5  ;;  %v2197_v63 = vmul.f32 %v11990_v25, %v15043_v6  ;;  %v1623_v24 = vmul.f32 %v11810_v37, %v11792_v47  ;;  %vm5677_vm0 = vcmp.lt.s32.totalorder %v15044_v19, 0 }
 0x2ef   : > { %v11987_v33 = vpop.permute.xlu1 %994  ;;  %v12003_v17 = vsel %vm5997_vm10, %v6081_v32, %v15040_v22  ;;  %v1622_v23 = vmul.f32 %v11586_v60, %v11792_v47  ;;  %v15045_v8 = vand.u32 2147483647, %v15044_v19  ;;  %v5754_v12 = vor.u32 4788187, %v5753_v20 }
 0x2f0   : > { %15041 = vst [vmem:[#allocation31_spill] sm:$0xff] %v11987_v33  ;;  %v6323_v38 = vor.u32 8388608, %v6322_v27  ;;  %v6330_v9 = vsub.s32 32, %v6329_v4  ;;  %v5757_v55 = vcvt.s32.f32 %v5750_v3  ;;  %v12016_v51 = vshrl.u32 %v6327_v21, 5 }
 0x2f1   : > { %1347 = vrot.lane.b32.xlu1 %v1300_v16, %s8533_s4  ;;  %vm12009_vm1 = vcmp.le.f32.partialorder %v15045_v8, 0.7853982  ;;  %v12014_v16 = vpop.permute.xlu0 %2540  ;;  %v6332_v22 = vshll.u32 %v14746_v36, %v6329_v4  ;;  %v6574_v47 = vand.u32 2139095040, %v11983_v59  ;;  %v5755_v8 = vand.u32 2147483647, %v5754_v12 }
 0x2f2   : > { %1668 = vrot.lane.b32.xlu0 %v1623_v24, %s8534_s5  ;;  %15048 = vst [vmem:[#allocation32_spill] sm:$0xff] %v12014_v16  ;;  %v6333_v28 = vshrl.u32 %v14770_v44, %v6330_v9  ;;  %v6335_v20 = vshll.u32 %v14770_v44, %v6329_v4  ;;  %v6336_v27 = vshrl.u32 %v14776_v30, %v6330_v9  ;;  %vm6347_vm7 = vcmp.lt.s32.totalorder %v12016_v51, 1 }
 0x2f3   : > { %v12020_v32 = vpop.permute.xlu1 %1323  ;;  %v6338_v24 = vshll.u32 %v14776_v30, %v6329_v4  ;;  %v6339_v21 = vshrl.u32 %v14761_v57, %v6330_v9  ;;  %v6341_v3 = vshll.u32 %v14761_v57, %v6329_v4  ;;  %v6342_v16 = vshrl.u32 %v14747_v46, %v6330_v9 }
 0x2f4   : > { %15049 = vst [vmem:[#allocation27_spill] sm:$0xff] %v12020_v32  ;;  %v5758_v33 = vmul.f32 %v5757_v55, %v5755_v8  ;;  %v5761_v32 = vsub.s32 4, %v11822_v49  ;;  %v6334_v12 = vor.u32 %v6333_v28, %v6332_v22  ;;  %v6337_v14 = vor.u32 %v6336_v27, %v6335_v20 }
 0x2f5   : > { %1654 = vrot.lane.b32.xlu1 %v1616_v42, %s8534_s5  ;;  %v6340_v7 = vor.u32 %v6339_v21, %v6338_v24  ;;  %v6343_v15 = vor.u32 %v6342_v16, %v6341_v3  ;;  %v6344_v11 = vshll.u32 %v14747_v46, %v6329_v4  ;;  %v6345_v42 = vshrl.u32 %v14762_v1, %v6330_v9  ;;  %v12034_v2 = vpop.eup %8413 }
 0x2f6   : > { %2232 = vrot.lane.b32.xlu0 %v2193_v29, %s8523_s23  ;;  %v2199_v18 = vmul.f32 %v11990_v25, %v11835_v40  ;;  %v5759_v55 = vxor.u32 2147483648, %v5758_v33  ;;  %v12040_v8 = vshll.u32 %v6323_v38, 8  ;;  %v6575_v28 = vshrl.u32 %v6574_v47, 23 }
 0x2f7   : > { %v12038_v58 = vpop.permute.xlu1 %1327  ;;  %v6331_v16 = vshrl.u32 %v14746_v36, %v6330_v9  ;;  %v6346_v4 = vor.u32 %v6345_v42, %v6344_v11  ;;  %vm6350_vm14 = vcmp.lt.s32.totalorder %v12016_v51, 4  ;;  %v12048_v22 = vpop.eup %8415  ;;  %vm6348_vm2 = vcmp.lt.s32.totalorder %v12016_v51, 2 }
 0x2f8   : > { %15050 = vst [vmem:[#allocation45_spill] sm:$0xff] %v12038_v58  ;;  %v12043_v29 = vpop.permute.xlu0 %673  ;;  %v5760_v20 = vsel %vm5677_vm0, %v5759_v55, %v5758_v33  ;;  %v6352_v38 = vsel %vm6350_vm14, %v6340_v7, 2102212464  ;;  %v6355_v47 = vsel %vm6347_vm7, %v6334_v12, %v6337_v14  ;;  %vm6349_vm8 = vcmp.lt.s32.totalorder %v12016_v51, 3  ;;  %v15067_v58 = vld [vmem:[#allocation56_spill] sm:$0xff] }
 0x2f9   : > { %1662 = vrot.lane.b32.xlu1 %v1620_v52, %s8534_s5  ;;  %v5763_v52 = vsel %vm12009_vm1, %v15044_v19, %v5760_v20  ;;  %v6356_v11 = vsel %vm6350_vm14, %v6343_v15, 920167782  ;;  %v6359_v9 = vsel %vm6347_vm7, %v6337_v14, %v6340_v7  ;;  %v6351_v24 = vsel %vm6347_vm7, %v6331_v16, %v6334_v12 }
 0x2fa   : > { %2240 = vrot.lane.b32.xlu0 %v2197_v63, %s8523_s23  ;;  %8417 = vcosq.f32 %v5763_v52  ;;  %v6357_v33 = vsel %vm6349_vm8, %v6340_v7, %v6356_v11  ;;  %v6360_v21 = vsel %vm6350_vm14, %v6346_v4, 1326507024  ;;  %v6353_v63 = vsel %vm6349_vm8, %v6337_v14, %v6352_v38 }
 0x2fb   : > { %v12058_v27 = vpop.permute.xlu1 %1335  ;;  %8419 = vsinq.f32 %v5763_v52  ;;  %v6358_v42 = vsel %vm6348_vm2, %v6355_v47, %v6357_v33  ;;  %v6361_v55 = vsel %vm6349_vm8, %v6343_v15, %v6360_v21  ;;  %v6084_v20 = vsel %vm11916_vm4, 0, %v12003_v17 }
 0x2fc   : > { %15051 = vst [vmem:[#allocation68_spill] sm:$0xff] %v12058_v27  ;;  %v12061_v3 = vpop.permute.xlu0 %677  ;;  %v6362_v27 = vsel %vm6348_vm2, %v6359_v9, %v6361_v55  ;;  %v12071_v7 = vmul.u32.u64.low %v12040_v8, %v6358_v42  ;;  %v12072_v12 = vmul.u32.u64.high %v12040_v8, %v6358_v42, %v12071_v7  ;;  %v8163_v54 = vadd.s32 4294967169, %v6575_v28 }
 0x2fd   : > { %1666 = vrot.lane.b32.xlu1 %v1622_v23, %s8534_s5  ;;  %v12076_v23 = vld [vmem:[%s10813_s3 + $0x1] sm:$0xff]  ;;  %v12082_v15 = vmul.u32.u64.low %v12040_v8, %v6362_v27  ;;  %v12083_v16 = vmul.u32.u64.high %v12040_v8, %v6362_v27, %v12082_v15  ;;  %vm8170_vm3 = vcmp.lt.s32.totalorder %v11949_v10, 0  ;;  %v6354_v47 = vsel %vm6348_vm2, %v6351_v24, %v6353_v63 }
 0x2fe   : > { %v2192_v14 = vmul.f32 %v12076_v23, %v15042_v5  ;;  %2244 = vrot.lane.b32.xlu0 %v2199_v18, %s8523_s23  ;;  %v12088_v17 = vmul.u32.u64.low %v11924_v45, %v11959_v62  ;;  %v12089_v4 = vmul.u32.u64.high %v11924_v45, %v11959_v62, %v12088_v17  ;;  %v7568_v18 = vsel %vm7566_vm11, %v11863_v43, 2102212464  ;;  %v15052_v5 = vld [vmem:[#allocation37_spill] sm:$0xff] }
 0x2ff   : > { %v12091_v38 = vpop.permute.xlu1 %1642  ;;  %v2513_v52 = vmul.f32 %v11990_v25, %v15052_v5  ;;  %v5762_v62 = vsel %vm5677_vm0, %v5761_v32, %v11822_v49  ;;  %v6088_v11 = vand.u32 3, %v6084_v20  ;;  %v7547_v51 = vshrl.u32 %v14746_v36, %v11642_v39 }
 0x300   : > { %v12101_v28 = vpop.permute.xlu0 %685  ;;  %v6091_v9 = vxor.u32 2147483648, %v12048_v22  ;;  %v6094_v27 = vxor.u32 2147483648, %v12034_v2  ;;  %v6373_v43 = vadd.s32 1, %v12072_v12  ;;  %v2196_v24 = vmul.f32 %v12076_v23, %v15043_v6 }
 0x301   : > { %2230 = vrot.lane.b32.xlu1 %v2192_v14, %s8523_s23  ;;  %15053 = vst [vmem:[#allocation37_spill] sm:$0xff] %v12101_v28  ;;  %v6370_v33 = vmul.u32 %v12040_v8, %v6354_v47  ;;  %vm6372_vm5 = vc.u32 %v12083_v16, %v12071_v7  ;;  %v6581_v49 = vadd.s32 1, %v8163_v54  ;;  %v7567_v39 = vsel %vm7563_vm6, %v7547_v51, %v11852_v61  ;;  %v15055_v8 = vld [vmem:[#allocation24_spill] sm:$0xff] }
 0x302   : > { %2552 = vrot.lane.b32.xlu0 %v2513_v52, %s8524_s24  ;;  %v7569_v32 = vsel %vm7565_vm9, %v11861_v26, %v7568_v18  ;;  %v5764_v6 = vsel %vm12009_vm1, 0, %v5762_v62  ;;  %v6374_v63 = vsel %vm6372_vm5, %v6373_v43, %v12072_v12  ;;  %v2517_v42 = vmul.f32 %v11990_v25, %v15055_v8 }
 0x303   : > { %v12123_v21 = vpop.permute.xlu1 %2218  ;;  %vm6090_vm11 = vcmp.eq.s32.totalorder %v6088_v11, 0  ;;  %vm6093_vm6 = vcmp.eq.s32.totalorder %v6088_v11, 2  ;;  %v6375_v61 = vadd.s32 %v6374_v63, %v6370_v33  ;;  %v2198_v0 = vmul.f32 %v12076_v23, %v11835_v40 }
 0x304   : > { %15054 = vst [vmem:[#allocation69_spill] sm:$0xff] %v12123_v21  ;;  %v12131_v55 = vpop.permute.xlu0 %1000  ;;  %v6092_v20 = vsel %vm6090_vm11, %v12034_v2, %v6091_v9  ;;  %v6095_v26 = vsel %vm6093_vm6, %v6094_v27, %v12048_v22  ;;  %v5768_v12 = vand.u32 3, %v5764_v6  ;;  %vm6582_vm9 = vcmp.gt.s32.totalorder %v6581_v49, 0 }
 0x305   : > { %2238 = vrot.lane.b32.xlu1 %v2196_v24, %s8523_s23  ;;  %v6376_v14 = vadd.s32 536870912, %v6375_v61  ;;  %v12141_v15 = vsel %vm8170_vm3, 0, %v11949_v10  ;;  %v7570_v54 = vsel %vm7564_vm12, %v7567_v39, %v7569_v32  ;;  %vm6089_vm10 = vcmp.lt.s32.totalorder %v6088_v11, 2  ;;  %v15057_v32 = vld [vmem:[#allocation16_spill] sm:$0xff] }
 0x306   : > { %2560 = vrot.lane.b32.xlu0 %v2517_v42, %s8524_s24  ;;  %v7589_v22 = vadd.s32 1, %v11954_v50  ;;  %v2519_v40 = vmul.f32 %v11990_v25, %v11872_v48  ;;  %v6096_v18 = vsel %vm6089_vm10, %v6092_v20, %v6095_v26  ;;  %vm7588_vm12 = vc.u32 %v12089_v4, %v11953_v41 }
 0x307   : > { %v12145_v17 = vpop.permute.xlu1 %2538  ;;  %v8418_v2 = vpop.eup %8417  ;;  %v12153_v52 = vshrl.u32 %v6376_v14, 30  ;;  %v2512_v56 = vmul.f32 %v12076_v23, %v15052_v5  ;;  %v12160_v11 = vsel %vm6582_vm9, %v6581_v49, 0  ;;  %vm5773_vm4 = vcmp.eq.s32.totalorder %v5768_v12, 2 }
 0x308   : > { %15056 = vst [vmem:[#allocation24_spill] sm:$0xff] %v12145_v17  ;;  %v12151_v47 = vpop.permute.xlu0 %1004  ;;  %v8420_v10 = vpop.eup %8419  ;;  %v5774_v62 = vxor.u32 2147483648, %v8418_v2  ;;  %vm6087_vm13 = vweird.f32 %v15030_v31  ;;  %v651_v27 = vmul.f32 %v11586_v60, %v11904_v53  ;;  %vm5770_vm15 = vcmp.eq.s32.totalorder %v5768_v12, 0  ;;  %v8448_v17 = vld [vmem:[%s10813_s3] sm:$0xff] }
 0x309   : > { %2242 = vrot.lane.b32.xlu1 %v2198_v0, %s8523_s23  ;;  %v5771_v51 = vxor.u32 2147483648, %v8420_v10  ;;  %v6378_v9 = vshll.u32 %v12153_v52, 30  ;;  %v6097_v5 = vsel %vm6087_vm13, nan, %v6096_v18  ;;  %vm5769_vm0 = vcmp.lt.s32.totalorder %v5768_v12, 2 }
 0x30a   : > { %2564 = vrot.lane.b32.xlu0 %v2519_v40, %s8524_s24  ;;  %v5775_v24 = vsel %vm5773_vm4, %v5774_v62, %v8420_v10  ;;  %v6585_v31 = vand.u32 31, %v12160_v11  ;;  %v12177_v6 = vadd.f32 %v15002_v34, %v15057_v32  ;;  %v6967_v63 = vsub.s32 4294967266, %v12141_v15  ;;  %v15058_v40 = vld [vmem:[#allocation46_spill] sm:$0xff] }
 0x30b   : > { %v12167_v43 = vpop.permute.xlu1 %675  ;;  %v5772_v49 = vsel %vm5770_vm15, %v8418_v2, %v5771_v51  ;;  %v12172_v39 = vsub.s32 %v6375_v61, %v6378_v9  ;;  %vm5767_vm1 = vweird.f32 %v15044_v19  ;;  %v7590_v20 = vsel %vm7588_vm12, %v7589_v22, %v11954_v50  ;;  %v15059_v50 = vld [vmem:[#allocation23_spill] sm:$0xff] }
 0x30c   : > { %v12170_v33 = vpop.permute.xlu0 %1012  ;;  %v5776_v42 = vsel %vm5769_vm0, %v5772_v49, %v5775_v24  ;;  %v2516_v61 = vmul.f32 %v12076_v23, %v15055_v8  ;;  %v7586_v34 = vmul.u32 %v11924_v45, %v7570_v54  ;;  %v12194_v19 = vmul.f32 0.1875, %v6097_v5  ;;  %v15060_v8 = vld [vmem:[#allocation11_spill] sm:$0xff] }
 0x30d   : > { %2550 = vrot.lane.b32.xlu1 %v2512_v56, %s8524_s24  ;;  %v5777_v26 = vsel %vm5767_vm1, nan, %v5776_v42  ;;  %v6381_v0 = vsub.s32 0, %v12172_v39  ;;  %v14698_v2 = vand.u32 2147483647, %v11983_v59  ;;  %v12199_v22 = vadd.s32 %v15059_v50, %v15058_v40  ;;  %v15063_v42 = vld [vmem:[#allocation7_spill] sm:$0xff] }
 0x30e   : > { %697 = vrot.lane.b32.xlu0 %v651_v27, %s8523_s23  ;;  %v12192_v14 = vmul.f32 0.5625, %v5777_v26  ;;  %v977_v18 = vmul.f32 %v11810_v37, %v15060_v8  ;;  %v12207_v54 = vsub.s32 32, %v6585_v31  ;;  %v12210_v62 = vadd.s32 127, %v6967_v63  ;;  %v15062_v27 = vld [vmem:[#allocation5_spill] sm:$0xff] }
 0x30f   : > { %v12190_v12 = vpop.permute.xlu1 %679  ;;  %v8160_v45 = vmin.u32 %v6381_v0, %v12172_v39  ;;  %v12212_v51 = vadd.s32 %v7590_v20, %v7586_v34  ;;  %v976_v5 = vmul.f32 %v11586_v60, %v15060_v8  ;;  %v2518_v49 = vmul.f32 %v12076_v23, %v11872_v48 }
 0x310   : > { %v12204_v10 = vpop.permute.xlu0 %1329  ;;  %v5779_v9 = vmul.f32 %v12192_v14, %v12192_v14  ;;  %v1625_v63 = vmul.f32 %v11810_v37, %v15063_v42  ;;  %v6578_v26 = vand.u32 8388607, %v14698_v2  ;;  %v6589_v48 = vshrl.u32 %v14770_v44, %v12207_v54 }
 0x311   : > { %2558 = vrot.lane.b32.xlu1 %v2516_v61, %s8524_s24  ;;  %15061 = vst [vmem:[#allocation16_spill] sm:$0xff] %v12204_v10  ;;  %v6383_v32 = vclz %v8160_v45  ;;  %v6099_v61 = vmul.f32 %v12194_v19, %v12194_v19  ;;  %v6592_v34 = vshrl.u32 %v14776_v30, %v12207_v54  ;;  %v652_v40 = vmul.f32 %v11810_v37, %v11904_v53  ;;  %v15065_v53 = vld [vmem:[#allocation53_spill] sm:$0xff] }
 0x312   : > { %1024 = vrot.lane.b32.xlu0 %v977_v18, %s8524_s24  ;;  %v5780_v20 = vadd.f32 %v5779_v9, %v11893_v13  ;;  %v6598_v13 = vshrl.u32 %v14747_v46, %v12207_v54  ;;  %v6588_v8 = vshll.u32 %v14746_v36, %v6585_v31  ;;  %v6591_v18 = vshll.u32 %v14770_v44, %v6585_v31 }
 0x313   : > { %v8161_v0 = vadd.s32 4294967294, %v6383_v32  ;;  %v12241_v50 = vpop.permute.xlu1 %687  ;;  %v6595_v45 = vshrl.u32 %v14761_v57, %v12207_v54  ;;  %v6601_v37 = vshrl.u32 %v14762_v1, %v12207_v54  ;;  %v2201_v32 = vmul.f32 %v11990_v25, %v15065_v53 }
 0x314   : > { %v12231_v60 = vpop.permute.xlu0 %1337  ;;  %v12248_v9 = vadd.f32 %v6099_v61, %v5780_v20  ;;  %v6579_v2 = vor.u32 8388608, %v6578_v26  ;;  %v12256_v56 = vshrl.u32 %v12160_v11, 5  ;;  %v6594_v24 = vshll.u32 %v14776_v30, %v6585_v31 }
 0x315   : > { %2562 = vrot.lane.b32.xlu1 %v2518_v49, %s8524_s24  ;;  %15064 = vst [vmem:[#allocation46_spill] sm:$0xff] %v12231_v60  ;;  %vm8162_vm7 = vcmp.lt.s32.totalorder %v8161_v0, 0  ;;  %v6597_v49 = vshll.u32 %v14761_v57, %v6585_v31  ;;  %v6590_v20 = vor.u32 %v6589_v48, %v6588_v8  ;;  %v6593_v61 = vor.u32 %v6592_v34, %v6591_v18 }
 0x316   : > { %1672 = vrot.lane.b32.xlu0 %v1625_v63, %s8534_s5  ;;  %v6600_v10 = vshll.u32 %v14747_v46, %v6585_v31  ;;  %v1624_v21 = vmul.f32 %v8448_v17, %v15063_v42  ;;  %v2521_v26 = vmul.f32 %v11990_v25, %v15067_v58  ;;  %v6386_v11 = vsel %vm8162_vm7, 0, %v8161_v0 }
 0x317   : > { %v6599_v60 = vor.u32 %v6598_v13, %v6597_v49  ;;  %v6596_v28 = vor.u32 %v6595_v45, %v6594_v24  ;;  %v12273_v34 = vsub.f32 %v12177_v6, %v14975_v35  ;;  %v12275_v31 = vpop.permute.xlu1 %998  ;;  %v6391_v17 = vsub.s32 4294967266, %v6386_v11 }
 0x318   : > { %v12260_v63 = vpop.permute.xlu0 %1341  ;;  %v6602_v48 = vor.u32 %v6601_v37, %v6600_v10  ;;  %vm6603_vm14 = vcmp.lt.s32.totalorder %v12256_v56, 1  ;;  %vm6606_vm2 = vcmp.lt.s32.totalorder %v12256_v56, 4  ;;  %v12279_v42 = vshll.u32 %v6579_v2, 8 }
 0x319   : > { %699 = vrot.lane.b32.xlu1 %v652_v40, %s8523_s23  ;;  %15066 = vst [vmem:[#allocation23_spill] sm:$0xff] %v12260_v63  ;;  %v6371_v40 = vadd.s32 %v12071_v7, %v12083_v16  ;;  %v6387_v63 = vsub.s32 32, %v6386_v11  ;;  %vm6605_vm8 = vcmp.lt.s32.totalorder %v12256_v56, 3  ;;  %v6611_v35 = vsel %vm6603_vm14, %v6590_v20, %v6593_v61 }
 0x31a   : > { %2248 = vrot.lane.b32.xlu0 %v2201_v32, %s8523_s23  ;;  %v6612_v16 = vsel %vm6606_vm2, %v6599_v60, 920167782  ;;  %v6388_v6 = vshll.u32 %v12172_v39, %v6386_v11  ;;  %v6392_v10 = vadd.s32 127, %v6391_v17  ;;  %v6587_v0 = vshrl.u32 %v14746_v36, %v12207_v54  ;;  %v15068_v54 = vld [vmem:[#allocation50_spill] sm:$0xff] }
 0x31b   : > { %v6389_v7 = vshrl.u32 %v6371_v40, %v6387_v63  ;;  %v6613_v2 = vsel %vm6605_vm8, %v6596_v28, %v6612_v16  ;;  %vm6604_vm3 = vcmp.lt.s32.totalorder %v12256_v56, 2  ;;  %v6608_v13 = vsel %vm6606_vm2, %v6596_v28, 2102212464  ;;  %v12318_v40 = vpop.permute.xlu1 %1002 }
 0x31c   : > { %v12282_v24 = vpop.permute.xlu0 %1648  ;;  %v6616_v39 = vsel %vm6606_vm2, %v6602_v48, 1326507024  ;;  %v6393_v18 = vshll.u32 %v6392_v10, 23  ;;  %v6614_v45 = vsel %vm6604_vm3, %v6611_v35, %v6613_v2  ;;  %v7592_v37 = vadd.s32 536870912, %v12212_v51 }
 0x31d   : > { %1022 = vrot.lane.b32.xlu1 %v976_v5, %s8524_s24  ;;  %v6615_v5 = vsel %vm6603_vm14, %v6593_v61, %v6596_v28  ;;  %v6390_v8 = vor.u32 %v6389_v7, %v6388_v6  ;;  %v6617_v49 = vsel %vm6605_vm8, %v6599_v60, %v6616_v39  ;;  %v15069_v32 = vcombine.high %v15062_v27, %v15062_v27 }
 0x31e   : > { %2568 = vrot.lane.b32.xlu0 %v2521_v26, %s8524_s24  ;;  %v6607_v26 = vsel %vm6603_vm14, %v6587_v0, %v6590_v20  ;;  %v6618_v11 = vsel %vm6604_vm3, %v6615_v5, %v6617_v49  ;;  %v6394_v60 = vor.u32 4788187, %v6393_v18  ;;  %v6609_v48 = vsel %vm6605_vm8, %v6593_v61, %v6608_v13  ;;  %v15071_v5 = vld [vmem:[#allocation52_spill] sm:$0xff] }
 0x31f   : > { %v2793_v28 = vrot.slane %v15069_v32, %v15068_v54  ;;  %v6969_v27 = vshll.u32 %v12210_v62, 23  ;;  %v2200_v7 = vmul.f32 %v12076_v23, %v15065_v53  ;;  %v6397_v6 = vcvt.s32.f32 %v6390_v8  ;;  %v15072_v8 = vld [vmem:[#allocation43_spill] sm:$0xff]  ;;  %v12355_v32 = vpop.permute.xlu1 %1010 }
 0x320   : > { %v12312_v63 = vpop.permute.xlu0 %1652  ;;  %v12330_v20 = vmul.u32.u64.low %v12279_v42, %v6614_v45  ;;  %v12331_v35 = vmul.u32.u64.high %v12279_v42, %v6614_v45, %v12330_v20  ;;  %v6395_v16 = vand.u32 2147483647, %v6394_v60  ;;  %v7214_v10 = vand.u32 2139095040, %v12273_v34 }
 0x321   : > { %1670 = vrot.lane.b32.xlu1 %v1624_v21, %s8534_s5  ;;  %v12323_v21 = vmul.u32.u64.low %v12279_v42, %v6618_v11  ;;  %v12324_v17 = vmul.u32.u64.high %v12279_v42, %v6618_v11, %v12323_v21  ;;  %v15070_v61 = vsub.s32 32, %v12141_v15  ;;  %v2827_v62 = vmul.f32 %v11990_v25, %v15071_v5  ;;  %v15073_v11 = vld [vmem:[#allocation51_spill] sm:$0xff] }
 0x322   : > { %2823 = vperm.xlu0 %8339, %v2793_v28   ;;  %v6610_v0 = vsel %vm6604_vm3, %v6607_v26, %v6609_v48  ;;  %v12345_v13 = vshrl.u32 %v7592_v37, 30  ;;  %v6398_v39 = vmul.f32 %v6397_v6, %v6395_v16  ;;  %v6964_v18 = vshll.u32 %v15072_v8, %v12141_v15  ;;  %v15074_v48 = vld [vmem:[#allocation65_spill] sm:$0xff] }
 0x323   : > { %v6965_v2 = vshrl.u32 %v12199_v22, %v15070_v61  ;;  %vm6628_vm5 = vc.u32 %v12324_v17, %v12330_v20  ;;  %v6970_v22 = vor.u32 4788187, %v6969_v27  ;;  %v2520_v45 = vmul.f32 %v12076_v23, %v15067_v58 }
 0x324   : > { %v12341_v53 = vpop.permute.xlu0 %1660  ;;  %v6629_v49 = vadd.s32 1, %v12331_v35  ;;  %v6399_v56 = vxor.u32 2147483648, %v6398_v39  ;;  %v6626_v37 = vmul.u32 %v12279_v42, %v6610_v0  ;;  %v7215_v28 = vshrl.u32 %v7214_v10, 23  ;;  %v15078_v0 = vld [vmem:[#allocation12_spill] sm:$0xff] }
 0x325   : > { %2246 = vrot.lane.b32.xlu1 %v2200_v7, %s8523_s23  ;;  %v6966_v26 = vor.u32 %v6965_v2, %v6964_v18  ;;  %v2829_v60 = vmul.f32 %v11990_v25, %v15073_v11  ;;  %vm6317_vm11 = vcmp.lt.s32.totalorder %v15074_v48, 0  ;;  %v7594_v21 = vshll.u32 %v12345_v13, 30 }
 0x326   : > { %2860 = vrot.lane.b32.xlu0 %v2827_v62, %s8533_s4  ;;  %v6630_v58 = vsel %vm6628_vm5, %v6629_v49, %v12331_v35  ;;  %v15075_v27 = vand.u32 2147483647, %v15074_v48  ;;  %v6400_v42 = vsel %vm6317_vm11, %v6399_v56, %v6398_v39  ;;  %v6971_v6 = vand.u32 2147483647, %v6970_v22  ;;  %v12389_v22 = vpop.permute.xlu1 %1331 }
 0x327   : > { %v6631_v16 = vadd.s32 %v6630_v58, %v6626_v37  ;;  %v2826_v10 = vmul.f32 %v12076_v23, %v15071_v5  ;;  %v8171_v61 = vadd.s32 4294967169, %v7215_v28  ;;  %v6973_v62 = vcvt.s32.f32 %v6966_v26  ;;  %15079 = vst [vmem:[#allocation11_spill] sm:$0xff] %v12389_v22  ;;  %v15080_v26 = vld [vmem:[#allocation35_spill] sm:$0xff]  ;;  %v15092_v22 = vld [vmem:[#allocation6_spill] sm:$0xff] }
 0x328   : > { %v12361_v15 = vpop.permute.xlu0 %2224  ;;  %vm12368_vm6 = vcmp.le.f32.partialorder %v15075_v27, 0.7853982  ;;  %v2831_v8 = vmul.f32 %v11990_v25, %v15078_v0  ;;  %v6401_v18 = vsub.s32 4, %v12153_v52  ;;  %v12387_v5 = vsub.s32 %v12212_v51, %v7594_v21 }
 0x329   : > { %2566 = vrot.lane.b32.xlu1 %v2520_v45, %s8524_s24  ;;  %v6403_v35 = vsel %vm12368_vm6, %v15074_v48, %v6400_v42  ;;  %v6632_v2 = vadd.s32 536870912, %v6631_v16  ;;  %v6974_v49 = vmul.f32 %v6973_v62, %v6971_v6  ;;  %v2828_v56 = vmul.f32 %v12076_v23, %v15073_v11 }
 0x32a   : > { %2864 = vrot.lane.b32.xlu0 %v2829_v60, %s8533_s4  ;;  %8421 = vcosq.f32 %v6403_v35  ;;  %v7221_v37 = vadd.s32 1, %v8171_v61  ;;  %v2833_v60 = vmul.f32 %v11990_v25, %v15080_v26  ;;  %v6402_v58 = vsel %vm6317_vm11, %v6401_v18, %v12153_v52  ;;  %v12411_v6 = vpop.permute.xlu1 %1339  ;;  %v15083_v61 = vld [vmem:[#allocation25_spill] sm:$0xff] }
 0x32b   : > { %8423 = vsinq.f32 %v6403_v35  ;;  %v12391_v45 = vshrl.u32 %v6632_v2, 30  ;;  %v7597_v21 = vsub.s32 0, %v12387_v5  ;;  %v6975_v11 = vxor.u32 2147483648, %v6974_v49  ;;  %15082 = vst [vmem:[#allocation7_spill] sm:$0xff] %v12411_v6  ;;  %v15085_v2 = vld [vmem:[#allocation22_spill] sm:$0xff] }
 0x32c   : > { %v12383_v39 = vpop.permute.xlu0 %2228  ;;  %v2830_v42 = vmul.f32 %v12076_v23, %v15078_v0  ;;  %vm7222_vm9 = vcmp.gt.s32.totalorder %v7221_v37, 0  ;;  %v2835_v52 = vmul.f32 %v11990_v25, %v15083_v61  ;;  %vm6893_vm10 = vcmp.lt.s32.totalorder %v15085_v2, 0 }
 0x32d   : > { %2858 = vrot.lane.b32.xlu1 %v2826_v10, %s8533_s4  ;;  %v6634_v28 = vshll.u32 %v12391_v45, 30  ;;  %v6404_v10 = vsel %vm12368_vm6, 0, %v6402_v58  ;;  %v8176_v62 = vmin.u32 %v7597_v21, %v12387_v5  ;;  %v6976_v7 = vsel %vm6893_vm10, %v6975_v11, %v6974_v49  ;;  %v15089_v21 = vld [vmem:[#allocation20_spill] sm:$0xff] }
 0x32e   : > { %2868 = vrot.lane.b32.xlu0 %v2831_v8, %s8533_s4  ;;  %v12424_v8 = vsel %vm7222_vm9, %v7221_v37, 0  ;;  %v2832_v18 = vmul.f32 %v12076_v23, %v15080_v26  ;;  %v15086_v58 = vand.u32 2147483647, %v15085_v2  ;;  %v2837_v37 = vmul.f32 %v11990_v25, %v15089_v21 }
 0x32f   : > { %v12406_v27 = vsub.s32 %v6631_v16, %v6634_v28  ;;  %v12443_v26 = vand.u32 31, %v12424_v8  ;;  %v2834_v6 = vmul.f32 %v12076_v23, %v15083_v61  ;;  %vm6407_vm1 = vweird.f32 %v15074_v48 }
 0x330   : > { %v12400_v51 = vpop.permute.xlu0 %2236  ;;  %vm12433_vm12 = vcmp.le.f32.partialorder %v15086_v58, 0.7853982  ;;  %vm6573_vm2 = vcmp.lt.s32.totalorder %v11983_v59, 0 }
 0x331   : > { %2862 = vrot.lane.b32.xlu1 %v2828_v56, %s8533_s4  ;;  %15081 = vst [vmem:[#allocation5_spill] sm:$0xff] %v12400_v51  ;;  %v6637_v35 = vsub.s32 0, %v12406_v27  ;;  %v6408_v56 = vand.u32 3, %v6404_v10  ;;  %v6979_v10 = vsel %vm12433_vm12, %v15085_v2, %v6976_v7  ;;  %v14699_v7 = vand.u32 2147483647, %v12273_v34 }
 0x332   : > { %2872 = vrot.lane.b32.xlu0 %v2833_v60, %s8533_s4  ;;  %v7226_v61 = vsub.s32 32, %v12443_v26  ;;  %8425 = vcosq.f32 %v6979_v10 }
 0x333   : > { %v8164_v0 = vmin.u32 %v6637_v35, %v12406_v27  ;;  %v7599_v35 = vclz %v8176_v62  ;;  %vm6413_vm4 = vcmp.eq.s32.totalorder %v6408_v56, 2  ;;  %vm6410_vm13 = vcmp.eq.s32.totalorder %v6408_v56, 0 }
 0x334   : > { %v12419_v16 = vpop.permute.xlu0 %2544  ;;  %vm6409_vm0 = vcmp.lt.s32.totalorder %v6408_v56, 2  ;;  %8427 = vsinq.f32 %v6979_v10 }
 0x335   : > { %2866 = vrot.lane.b32.xlu1 %v2830_v42, %s8533_s4  ;;  %15084 = vst [vmem:[#allocation53_spill] sm:$0xff] %v12419_v16  ;;  %v6639_v28 = vclz %v8164_v0  ;;  %v12466_v56 = vadd.s32 4294967294, %v7599_v35 }
 0x336   : > { %2876 = vrot.lane.b32.xlu0 %v2835_v52, %s8533_s4  ;;  %v12448_v52 = vpop.permute.xlu1 %1343 }
 0x337   : > { %v8422_v60 = vpop.eup %8421  ;;  %15091 = vst [vmem:[#allocation50_spill] sm:$0xff] %v12448_v52  ;;  %v8165_v58 = vadd.s32 4294967294, %v6639_v28  ;;  %vm8178_vm7 = vcmp.lt.s32.totalorder %v12466_v56, 0 }
 0x338   : > { %v12440_v49 = vpop.permute.xlu0 %2548  ;;  %v8424_v11 = vpop.eup %8423  ;;  %v6414_v0 = vxor.u32 2147483648, %v8422_v60 }
 0x339   : > { %2870 = vrot.lane.b32.xlu1 %v2832_v18, %s8533_s4  ;;  %15090 = vst [vmem:[#allocation56_spill] sm:$0xff] %v12440_v49  ;;  %v2839_v18 = vmul.f32 %v11990_v25, %v15092_v22  ;;  %v6411_v49 = vxor.u32 2147483648, %v8424_v11  ;;  %vm8166_vm15 = vcmp.lt.s32.totalorder %v8165_v58, 0 }
 0x33a   : > { %2880 = vrot.lane.b32.xlu0 %v2837_v37, %s8533_s4  ;;  %v6415_v16 = vsel %vm6413_vm4, %v6414_v0, %v8424_v11  ;;  %v6642_v52 = vsel %vm8166_vm15, 0, %v8165_v58  ;;  %v6627_v37 = vadd.s32 %v12330_v20, %v12324_v17  ;;  %v2836_v11 = vmul.f32 %v12076_v23, %v15089_v21 }
 0x33b   : > { %v6412_v28 = vsel %vm6410_vm13, %v8422_v60, %v6411_v49  ;;  %v6643_v51 = vsub.s32 32, %v6642_v52  ;;  %v6647_v0 = vsub.s32 4294967266, %v6642_v52  ;;  %v12468_v60 = vpop.permute.xlu1 %1646  ;;  %v7218_v21 = vand.u32 8388607, %v14699_v7 }
 0x33c   : > { %v12457_v62 = vpop.permute.xlu0 %2556  ;;  %v6416_v25 = vsel %vm6409_vm0, %v6412_v28, %v6415_v16  ;;  %v2838_v16 = vmul.f32 %v12076_v23, %v15092_v22  ;;  %v7229_v58 = vshrl.u32 %v14770_v44, %v7226_v61  ;;  %v7235_v28 = vshrl.u32 %v14761_v57, %v7226_v61 }
 0x33d   : > { %2874 = vrot.lane.b32.xlu1 %v2834_v6, %s8533_s4  ;;  %15093 = vst [vmem:[#allocation52_spill] sm:$0xff] %v12457_v62  ;;  %v6417_v6 = vsel %vm6407_vm1, nan, %v6416_v25  ;;  %v6645_v48 = vshrl.u32 %v6627_v37, %v6643_v51  ;;  %v6648_v20 = vadd.s32 127, %v6647_v0  ;;  %v7232_v51 = vshrl.u32 %v14776_v30, %v7226_v61 }
 0x33e   : > { %2884 = vrot.lane.b32.xlu0 %v2839_v18, %s8533_s4  ;;  %v12470_v49 = vmul.f32 0.0625, %v6417_v6  ;;  %v6644_v18 = vshll.u32 %v12406_v27, %v6642_v52  ;;  %v7228_v22 = vshll.u32 %v14746_v36, %v12443_v26  ;;  %v7231_v25 = vshll.u32 %v14770_v44, %v12443_v26 }
 0x33f   : > { %v6649_v23 = vshll.u32 %v6648_v20, 23  ;;  %v7238_v37 = vshrl.u32 %v14747_v46, %v7226_v61  ;;  %v7234_v27 = vshll.u32 %v14776_v30, %v12443_v26  ;;  %v7241_v52 = vshrl.u32 %v14762_v1, %v7226_v61 }
 0x340   : > { %v12475_v17 = vpop.permute.xlu0 %681  ;;  %v6419_v35 = vmul.f32 %v12470_v49, %v12470_v49  ;;  %v6646_v6 = vor.u32 %v6645_v48, %v6644_v18  ;;  %v7219_v7 = vor.u32 8388608, %v7218_v21  ;;  %v7224_v62 = vshrl.u32 %v12424_v8, 5  ;;  %v15097_v21 = vld [vmem:[#allocation48_spill] sm:$0xff] }
 0x341   : > { %2878 = vrot.lane.b32.xlu1 %v2836_v11, %s8533_s4  ;;  %15094 = vst [vmem:[#allocation43_spill] sm:$0xff] %v12475_v17  ;;  %v6650_v20 = vor.u32 4788187, %v6649_v23  ;;  %v7237_v44 = vshll.u32 %v14761_v57, %v12443_v26  ;;  %v12502_v17 = vpop.permute.xlu1 %1650  ;;  %v7233_v48 = vor.u32 %v7232_v51, %v7231_v25  ;;  %v7240_v30 = vshll.u32 %v14747_v46, %v12443_v26 }
 0x342   : > { %v12491_v11 = vadd.f32 %v6419_v35, %v12248_v9  ;;  %15096 = vst [vmem:[#allocation65_spill] sm:$0xff] %v12502_v17  ;;  %v7230_v9 = vor.u32 %v7229_v58, %v7228_v22  ;;  %v7236_v35 = vor.u32 %v7235_v28, %v7234_v27  ;;  %v6653_v18 = vcvt.s32.f32 %v6646_v6 }
 0x343   : > { %v6651_v1 = vand.u32 2147483647, %v6650_v20  ;;  %v6977_v23 = vsub.s32 4, %v15097_v21  ;;  %v7242_v8 = vor.u32 %v7241_v52, %v7240_v30  ;;  %v15099_v57 = vand.u32 2147483647, %v11983_v59  ;;  %v8426_v20 = vpop.eup %8425 }
 0x344   : > { %v12497_v0 = vpop.permute.xlu0 %689  ;;  %vm7243_vm8 = vcmp.lt.s32.totalorder %v7224_v62, 1  ;;  %vm7246_vm3 = vcmp.lt.s32.totalorder %v7224_v62, 4  ;;  %v7259_v51 = vshll.u32 %v7219_v7, 8  ;;  %v7227_v28 = vshrl.u32 %v14746_v36, %v7226_v61 }
 0x345   : > { %2882 = vrot.lane.b32.xlu1 %v2838_v16, %s8533_s4  ;;  %15095 = vst [vmem:[#allocation51_spill] sm:$0xff] %v12497_v0  ;;  %v7239_v16 = vor.u32 %v7238_v37, %v7237_v44  ;;  %vm12512_vm14 = vcmp.le.f32.partialorder %v15099_v57, 0.7853982  ;;  %v6654_v46 = vmul.f32 %v6653_v18, %v6651_v1  ;;  %v7248_v26 = vsel %vm7246_vm3, %v7236_v35, 2102212464  ;;  %v12519_v25 = vpop.permute.xlu1 %1658 }
 0x346   : > { %v7251_v10 = vsel %vm7243_vm8, %v7230_v9, %v7233_v48  ;;  %vm7244_vm5 = vcmp.lt.s32.totalorder %v7224_v62, 2  ;;  %vm7245_vm11 = vcmp.lt.s32.totalorder %v7224_v62, 3  ;;  %15102 = vst [vmem:[#allocation35_spill] sm:$0xff] %v12519_v25  ;;  %v7255_v27 = vsel %vm7243_vm8, %v7233_v48, %v7236_v35  ;;  %v8428_v62 = vpop.eup %8427 }
 0x347   : > { %v7252_v22 = vsel %vm7246_vm3, %v7239_v16, 920167782  ;;  %v6655_v37 = vxor.u32 2147483648, %v6654_v46  ;;  %v7256_v52 = vsel %vm7246_vm3, %v7242_v8, 1326507024  ;;  %v7247_v30 = vsel %vm7243_vm8, %v7227_v28, %v7230_v9 }
 0x348   : > { %v12508_v0 = vpop.permute.xlu0 %693  ;;  %v7253_v6 = vsel %vm7245_vm11, %v7236_v35, %v7252_v22  ;;  %v7249_v1 = vsel %vm7245_vm11, %v7233_v48, %v7248_v26  ;;  %v7257_v18 = vsel %vm7245_vm11, %v7239_v16, %v7256_v52  ;;  %v7602_v35 = vsel %vm8178_vm7, 0, %v12466_v56 }
 0x349   : > { %15098 = vst [vmem:[#allocation12_spill] sm:$0xff] %v12508_v0  ;;  %v7254_v7 = vsel %vm7244_vm5, %v7251_v10, %v7253_v6  ;;  %v6656_v36 = vsel %vm6573_vm2, %v6655_v37, %v6654_v46  ;;  %v7258_v61 = vsel %vm7244_vm5, %v7255_v27, %v7257_v18  ;;  %v7250_v16 = vsel %vm7244_vm5, %v7247_v30, %v7249_v1  ;;  %v12549_v28 = vpop.permute.xlu1 %2222 }
 0x34a   : > { %v12529_v57 = vmul.u32.u64.low %v7259_v51, %v7254_v7  ;;  %v12530_v0 = vmul.u32.u64.high %v7259_v51, %v7254_v7, %v12529_v57  ;;  %v6659_v9 = vsel %vm12512_vm14, %v11983_v59, %v6656_v36  ;;  %v6657_v26 = vsub.s32 4, %v12391_v45  ;;  %15105 = vst [vmem:[#allocation20_spill] sm:$0xff] %v12549_v28 }
 0x34b   : > { %v12539_v48 = vmul.u32.u64.low %v7259_v51, %v7258_v61  ;;  %v12540_v8 = vmul.u32.u64.high %v7259_v51, %v7258_v61, %v12539_v48  ;;  %8429 = vcosq.f32 %v6659_v9  ;;  %v6978_v10 = vsel %vm6893_vm10, %v6977_v23, %v15097_v21 }
 0x34c   : > { %v12522_v44 = vpop.permute.xlu0 %1008  ;;  %8431 = vsinq.f32 %v6659_v9  ;;  %v7607_v56 = vsub.s32 4294967266, %v7602_v35  ;;  %v7269_v22 = vadd.s32 1, %v12530_v0  ;;  %v7266_v37 = vmul.u32 %v7259_v51, %v7250_v16 }
 0x34d   : > { %15103 = vst [vmem:[#allocation25_spill] sm:$0xff] %v12522_v44  ;;  %vm7268_vm6 = vc.u32 %v12540_v8, %v12529_v57  ;;  %v6980_v6 = vsel %vm12433_vm12, 0, %v6978_v10  ;;  %v6658_v21 = vsel %vm6573_vm2, %v6657_v26, %v12391_v45  ;;  %v7603_v51 = vsub.s32 32, %v7602_v35  ;;  %v12562_v18 = vpop.permute.xlu1 %2226 }
 0x34e   : > { %v7270_v27 = vsel %vm7268_vm6, %v7269_v22, %v12530_v0  ;;  %v7608_v30 = vadd.s32 127, %v7607_v56  ;;  %v6984_v1 = vand.u32 3, %v6980_v6  ;;  %15107 = vst [vmem:[#allocation48_spill] sm:$0xff] %v12562_v18  ;;  %v6660_v36 = vsel %vm12512_vm14, 0, %v6658_v21 }
 0x34f   : > { %v7271_v23 = vadd.s32 %v7270_v27, %v7266_v37  ;;  %v6987_v42 = vxor.u32 2147483648, %v8428_v62  ;;  %v6990_v61 = vxor.u32 2147483648, %v8426_v20  ;;  %v7587_v48 = vadd.s32 %v11953_v41, %v12089_v4 }
 0x350   : > { %v12543_v46 = vpop.permute.xlu0 %1016  ;;  %v7609_v45 = vshll.u32 %v7608_v30, 23  ;;  %v6664_v16 = vand.u32 3, %v6660_v36  ;;  %vm6986_vm9 = vcmp.eq.s32.totalorder %v6984_v1, 0  ;;  %vm6989_vm10 = vcmp.eq.s32.totalorder %v6984_v1, 2 }
 0x351   : > { %15104 = vst [vmem:[#allocation22_spill] sm:$0xff] %v12543_v46  ;;  %v7272_v7 = vadd.s32 536870912, %v7271_v23  ;;  %v7605_v10 = vshrl.u32 %v7587_v48, %v7603_v51  ;;  %v6988_v56 = vsel %vm6986_vm9, %v8426_v20, %v6987_v42  ;;  %v6991_v22 = vsel %vm6989_vm10, %v6990_v61, %v8428_v62  ;;  %v12576_v18 = vpop.permute.xlu1 %2234 }
 0x352   : > { %v7604_v21 = vshll.u32 %v12387_v5, %v7602_v35  ;;  %15110 = vst [vmem:[#allocation72_spill] sm:$0xff] %v12576_v18  ;;  %vm6985_vm12 = vcmp.lt.s32.totalorder %v6984_v1, 2  ;;  %vm6669_vm4 = vcmp.eq.s32.totalorder %v6664_v16, 2  ;;  %vm6666_vm13 = vcmp.eq.s32.totalorder %v6664_v16, 0 }
 0x353   : > { %v12568_v0 = vshrl.u32 %v7272_v7, 30  ;;  %v7610_v7 = vor.u32 4788187, %v7609_v45  ;;  %v6992_v30 = vsel %vm6985_vm12, %v6988_v56, %v6991_v22  ;;  %vm6665_vm15 = vcmp.lt.s32.totalorder %v6664_v16, 2 }
 0x354   : > { %v12557_v52 = vpop.permute.xlu0 %1020  ;;  %v7606_v28 = vor.u32 %v7605_v10, %v7604_v21  ;;  %vm6983_vm0 = vweird.f32 %v15085_v2  ;;  %vm6663_vm1 = vweird.f32 %v11983_v59  ;;  %vm7213_vm8 = vcmp.lt.s32.totalorder %v12273_v34, 0 }
 0x355   : > { %15106 = vst [vmem:[#allocation6_spill] sm:$0xff] %v12557_v52  ;;  %v7274_v26 = vshll.u32 %v12568_v0, 30  ;;  %v6993_v35 = vsel %vm6983_vm0, nan, %v6992_v30  ;;  %v7611_v42 = vand.u32 2147483647, %v7610_v7  ;;  %v12582_v48 = vpop.permute.xlu1 %2542 }
 0x356   : > { %15112 = vst [vmem:[#allocation74_spill] sm:$0xff] %v12582_v48  ;;  %v12588_v56 = vmul.f32 0.25, %v6993_v35 }
 0x357   : > { %v7275_v6 = vsub.s32 %v7271_v23, %v7274_v26  ;;  %v7613_v26 = vcvt.s32.f32 %v7606_v28 }
 0x358   : > { %v12566_v9 = vpop.permute.xlu0 %1345  ;;  %v8430_v58 = vpop.eup %8429 }
 0x359   : > { %15108 = vst [vmem:[#allocation70_spill] sm:$0xff] %v12566_v9  ;;  %v8432_v27 = vpop.eup %8431  ;;  %v6670_v41 = vxor.u32 2147483648, %v8430_v58  ;;  %v7277_v36 = vsub.s32 0, %v7275_v6  ;;  %v7614_v22 = vmul.f32 %v7613_v26, %v7611_v42  ;;  %v12597_v7 = vpop.permute.xlu1 %2546  ;;  %v15371_v9 = vld [vmem:[#allocation59_spill] sm:$0xff] }
 0x35a   : > { %v6667_v4 = vxor.u32 2147483648, %v8432_v27  ;;  %15115 = vst [vmem:[#allocation77_spill] sm:$0xff] %v12597_v7 }
 0x35b   : > { %v6671_v20 = vsel %vm6669_vm4, %v6670_v41, %v8432_v27  ;;  %v8172_v23 = vmin.u32 %v7277_v36, %v7275_v6  ;;  %v6995_v27 = vmul.f32 %v12588_v56, %v12588_v56  ;;  %v7615_v28 = vxor.u32 2147483648, %v7614_v22 }
 0x35c   : > { %v12573_v37 = vpop.permute.xlu0 %1656  ;;  %v6668_v51 = vsel %vm6666_vm13, %v8430_v58, %v6667_v4  ;;  %v7267_v4 = vadd.s32 %v12529_v57, %v12540_v8  ;;  %vm7303_vm13 = vweird.f32 %v12273_v34 }
 0x35d   : > { %15109 = vst [vmem:[#allocation71_spill] sm:$0xff] %v12573_v37  ;;  %v6672_v5 = vsel %vm6665_vm15, %v6668_v51, %v6671_v20  ;;  %v7279_v61 = vclz %v8172_v23  ;;  %v15117_v20 = vld [vmem:[#allocation34_spill] sm:$0xff]  ;;  %vm7980_vm15 = vcmask 261120  }
 0x35e   : > { %v6673_v1 = vsel %vm6663_vm1, nan, %v6672_v5  ;;  %vm7533_vm14 = vcmp.lt.s32.totalorder %v15117_v20, 0  ;;  %v12608_v5 = vpop.permute.xlu1 %2554  ;;  %vm7623_vm4 = vweird.f32 %v15117_v20 }
 0x35f   : > { %v12584_v45 = vmul.f32 0.1875, %v6673_v1  ;;  %v8173_v16 = vadd.s32 4294967294, %v7279_v61  ;;  %v7616_v23 = vsel %vm7533_vm14, %v7615_v28, %v7614_v22  ;;  %15118 = vst [vmem:[#allocation34_spill] sm:$0xff] %v12608_v5  ;;  %v15119_v1 = vand.u32 2147483647, %v15117_v20 }
 0x360   : > { %v12578_v62 = vpop.permute.xlu0 %1664 }
 0x361   : > { %15111 = vst [vmem:[#allocation73_spill] sm:$0xff] %v12578_v62  ;;  %v6675_v2 = vmul.f32 %v12584_v45, %v12584_v45  ;;  %vm8174_vm7 = vcmp.lt.s32.totalorder %v8173_v16, 0  ;;  %vm12612_vm2 = vcmp.le.f32.partialorder %v15119_v1, 0.7853982  ;;  %v15368_v62 = vld [vmem:[#allocation44_spill] sm:$0xff] }
 0x362   : > { %v7282_v21 = vsel %vm8174_vm7, 0, %v8173_v16  ;;  %v7619_v8 = vsel %vm12612_vm2, %v15117_v20, %v7616_v23 }
 0x363   : > { %v6676_v59 = vadd.f32 %v6675_v2, %v12491_v11  ;;  %v7283_v30 = vsub.s32 32, %v7282_v21  ;;  %v7287_v51 = vsub.s32 4294967266, %v7282_v21  ;;  %v7284_v35 = vshll.u32 %v7275_v6, %v7282_v21  ;;  %v12623_v6 = vpop.permute.xlu1 %683 }
 0x364   : > { %v12586_v10 = vpop.permute.xlu0 %1668  ;;  %8433 = vcosq.f32 %v7619_v8 }
 0x365   : > { %15113 = vst [vmem:[#allocation75_spill] sm:$0xff] %v12586_v10  ;;  %v12599_v41 = vadd.f32 %v6995_v27, %v6676_v59  ;;  %v7285_v11 = vshrl.u32 %v7267_v4, %v7283_v30  ;;  %v7288_v42 = vadd.s32 127, %v7287_v51  ;;  %8435 = vsinq.f32 %v7619_v8 }
 0x366   : > { %v7617_v30 = vsub.s32 4, %v12345_v13  ;;  %v7297_v8 = vsub.s32 4, %v12568_v0 }
 0x367   : > { %v7286_v26 = vor.u32 %v7285_v11, %v7284_v35  ;;  %v7289_v16 = vshll.u32 %v7288_v42, 23  ;;  %v12629_v51 = vpop.permute.xlu1 %691  ;;  %v15125_v11 = vand.u32 2147483647, %v12273_v34 }
 0x368   : > { %v12593_v58 = vpop.permute.xlu0 %2232 }
 0x369   : > { %15114 = vst [vmem:[#allocation76_spill] sm:$0xff] %v12593_v58  ;;  %v7290_v2 = vor.u32 4788187, %v7289_v16  ;;  %v7293_v27 = vcvt.s32.f32 %v7286_v26  ;;  %vm12633_vm3 = vcmp.le.f32.partialorder %v15125_v11, 0.7853982  ;;  %v7618_v26 = vsel %vm7533_vm14, %v7617_v30, %v12345_v13 }
 0x36b   : > { %v7291_v59 = vand.u32 2147483647, %v7290_v2  ;;  %v12648_v2 = vpop.permute.xlu1 %695 }
 0x36c   : > { %v12603_v36 = vpop.permute.xlu0 %2240  ;;  %15129 = vst [vmem:[#allocation83_spill] sm:$0xff] %v12648_v2 }
 0x36d   : > { %15116 = vst [vmem:[#allocation78_spill] sm:$0xff] %v12603_v36  ;;  %v7294_v21 = vmul.f32 %v7293_v27, %v7291_v59  ;;  %v7620_v27 = vsel %vm12612_vm2, 0, %v7618_v26 }
 0x36e   : > { %v7624_v11 = vand.u32 3, %v7620_v27 }
 0x36f   : > { %v7295_v4 = vxor.u32 2147483648, %v7294_v21  ;;  %v12659_v13 = vpop.permute.xlu1 %1006 }
 0x370   : > { %v12616_v57 = vpop.permute.xlu0 %2244  ;;  %15130 = vst [vmem:[#allocation84_spill] sm:$0xff] %v12659_v13  ;;  %vm7626_vm5 = vcmp.eq.s32.totalorder %v7624_v11, 0  ;;  %vm7629_vm11 = vcmp.eq.s32.totalorder %v7624_v11, 2  ;;  %vm7625_vm6 = vcmp.lt.s32.totalorder %v7624_v11, 2  ;;  %v15372_v13 = vld [vmem:[#allocation33_spill] sm:$0xff] }
 0x371   : > { %15122 = vst [vmem:[#allocation79_spill] sm:$0xff] %v12616_v57  ;;  %v7296_v35 = vsel %vm7213_vm8, %v7295_v4, %v7294_v21  ;;  %v8434_v16 = vpop.eup %8433  ;;  %v7298_v4 = vsel %vm7213_vm8, %v7297_v8, %v12568_v0 }
 0x372   : > { %v7299_v1 = vsel %vm12633_vm3, %v12273_v34, %v7296_v35  ;;  %v8436_v21 = vpop.eup %8435  ;;  %v7300_v35 = vsel %vm12633_vm3, 0, %v7298_v4  ;;  %v15137_v34 = vld [vmem:[#allocation39_spill] sm:$0xff] }
 0x373   : > { %8437 = vcosq.f32 %v7299_v1  ;;  %v12663_v23 = vpop.permute.xlu1 %1014 }
 0x374   : > { %v12621_v22 = vpop.permute.xlu0 %2552  ;;  %8439 = vsinq.f32 %v7299_v1  ;;  %v7627_v1 = vxor.u32 2147483648, %v8436_v21  ;;  %15132 = vst [vmem:[#allocation86_spill] sm:$0xff] %v12663_v23 }
 0x375   : > { %15123 = vst [vmem:[#allocation80_spill] sm:$0xff] %v12621_v22 }
 0x376   : > { %v7628_v61 = vsel %vm7626_vm5, %v8434_v16, %v7627_v1 }
 0x377   : > { %v12673_v1 = vpop.permute.xlu1 %1018 }
 0x378   : > { %v12625_v28 = vpop.permute.xlu0 %2560  ;;  %15134 = vst [vmem:[#allocation88_spill] sm:$0xff] %v12673_v1 }
 0x379   : > { %15124 = vst [vmem:[#allocation81_spill] sm:$0xff] %v12625_v28  ;;  %v7304_v28 = vand.u32 3, %v7300_v35 }
 0x37b   : > { %vm7309_vm9 = vcmp.eq.s32.totalorder %v7304_v28, 2  ;;  %vm7306_vm10 = vcmp.eq.s32.totalorder %v7304_v28, 0  ;;  %vm7305_vm12 = vcmp.lt.s32.totalorder %v7304_v28, 2 }
 0x37c   : > { %v12639_v42 = vpop.permute.xlu0 %2564 }
 0x37d   : > { %15128 = vst [vmem:[#allocation82_spill] sm:$0xff] %v12639_v42  ;;  %v7630_v42 = vxor.u32 2147483648, %v8434_v16 }
 0x37f   : > { %v7631_v26 = vsel %vm7629_vm11, %v7630_v42, %v8436_v21 }
 0x380   : > { %v12650_v59 = vpop.permute.xlu0 %697  ;;  %v8438_v22 = vpop.eup %8437  ;;  %v7632_v8 = vsel %vm7625_vm6, %v7628_v61, %v7631_v26 }
 0x381   : > { %v8440_v5 = vpop.eup %8439  ;;  %v7310_v57 = vxor.u32 2147483648, %v8438_v22  ;;  %v7633_v16 = vsel %vm7623_vm4, nan, %v7632_v8  ;;  %v12686_v26 = vpop.permute.xlu1 %1347 }
 0x382   : > { %v7307_v0 = vxor.u32 2147483648, %v8440_v5  ;;  %v12671_v35 = vmul.f32 0.0625, %v7633_v16  ;;  %15139 = vst [vmem:[#allocation39_spill] sm:$0xff] %v12686_v26 }
 0x383   : > { %v7311_v4 = vsel %vm7309_vm9, %v7310_v57, %v8440_v5  ;;  %v15136_v57 = vld [vmem:[#allocation49_spill] sm:$0xff] }
 0x384   : > { %v12661_v30 = vpop.permute.xlu0 %1024  ;;  %v7308_v36 = vsel %vm7306_vm10, %v8438_v22, %v7307_v0  ;;  %v7635_v22 = vmul.f32 %v12671_v35, %v12671_v35 }
 0x385   : > { %15131 = vst [vmem:[#allocation85_spill] sm:$0xff] %v12661_v30  ;;  %v7312_v42 = vsel %vm7305_vm12, %v7308_v36, %v7311_v4  ;;  %v3040_v36 = vrot.slane %v15137_v34, %v15136_v57  ;;  %v3033_v4 = vcombine.high %v15137_v34, %v15137_v34 }
 0x386   : > { %v7313_v21 = vsel %vm7303_vm13, nan, %v7312_v42 }
 0x387   : > { %v12669_v11 = vmul.f32 0.1875, %v7313_v21  ;;  %v3048_v8 = vcombine.high %v3040_v36, %v3040_v36  ;;  %v3056_v16 = vrot.slane %v3040_v36, %v15136_v57 }
 0x388   : > { %v12665_v27 = vpop.permute.xlu0 %1672 }
 0x389   : > { %15133 = vst [vmem:[#allocation87_spill] sm:$0xff] %v12665_v27  ;;  %v7315_v5 = vmul.f32 %v12669_v11, %v12669_v11  ;;  %v3070_v58 = vrot.slane %v3048_v8, %v15136_v57  ;;  %v3078_v36 = vcombine.high %v3056_v16, %v3056_v16  ;;  %v15370_v27 = vld [vmem:[#allocation58_spill] sm:$0xff] }
 0x38b   : > { %v7316_v20 = vadd.f32 %v7315_v5, %v12599_v41  ;;  %v8449_v41 = vld [vmem:[%s10813_s3 + $0x1] sm:$0xff]  ;;  %v8450_v5 = vld [vmem:[%s10813_s3 + $0x9] sm:$0xff]  ;;  %v3089_v34 = vrot.slane %v3070_v58, %v15068_v54 }
 0x38c   : > { %v12675_v61 = vpop.permute.xlu0 %2248 }
 0x38d   : > { %15135 = vst [vmem:[#allocation89_spill] sm:$0xff] %v12675_v61  ;;  %v12684_v28 = vadd.f32 %v7635_v22, %v7316_v20  ;;  %v3047_v20 = vrot.slane %v3033_v4, %v15136_v57  ;;  %v12697_v22 = vpop.permute.xlu1 %1654  ;;  %v3093_v4 = vrot.slane %v3078_v36, %v15068_v54 }
 0x38e   : > { %15141 = vst [vmem:[#allocation91_spill] sm:$0xff] %v12697_v22 }
 0x38f   : > { %15138 = vst [vmem:[#allocation49_spill] sm:$0xff] %v12684_v28  ;;  %v3085_v28 = vrot.slane %v3056_v16, %v15068_v54  ;;  %v3049_v7 = vcombine.high %v3047_v20, %v3047_v20 }
 0x390   : > { %v12688_v0 = vpop.permute.xlu0 %2568 }
 0x391   : > { %15140 = vst [vmem:[#allocation90_spill] sm:$0xff] %v12688_v0  ;;  %v3080_v0 = vcombine.high %v3070_v58, %v3070_v58 }
 0x393   : > { %v3097_v8 = vrot.slane %v3080_v0, %v15068_v54 }
 0x39d   : > { %v2824_v42 = vpop.permute.xlu0 %2823 }
 0x39e   : > { %v2840_v21 = vmul.f32 %v8449_v41, %v2824_v42  ;;  %v2841_v61 = vmul.f32 %v8450_v5, %v2824_v42  ;;  %v12703_v42 = vpop.permute.xlu1 %1662  ;;  %v3077_v41 = vrot.slane %v3049_v7, %v15136_v57 }
 0x39f   : > { %15142 = vst [vmem:[#allocation92_spill] sm:$0xff] %v12703_v42 }
 0x3a0   : > { %2888 = vrot.lane.b32.xlu0 %v2841_v61, %s8533_s4  ;;  %2886 = vrot.lane.b32.xlu1 %v2840_v21, %s8533_s4  ;;  %v3063_v61 = vrot.slane %v3047_v20, %v15136_v57  ;;  %v3105_v21 = vrot.slane %v3077_v41, %v15068_v54  ;;  %v3081_v16 = vcombine.high %v3077_v41, %v3077_v41 }
 0x3a2   : > { %v3101_v58 = vrot.slane %v3063_v61, %v15068_v54  ;;  %v3079_v5 = vcombine.high %v3063_v61, %v3063_v61 }
 0x3a4   : > { %3119 = vperm.xlu0 %8339, %v3089_v34   ;;  %3115 = vperm.xlu1 %8340, %v3085_v28   ;;  %v12711_v34 = vpop.permute.xlu1 %1666  ;;  %v3113_v28 = vrot.slane %v3081_v16, %v15068_v54  ;;  %v3109_v0 = vrot.slane %v3079_v5, %v15068_v54 }
 0x3a5   : > { %15143 = vst [vmem:[#allocation93_spill] sm:$0xff] %v12711_v34 }
 0x3a8   : > { %3127 = vperm.xlu0 %8339, %v3097_v8   ;;  %3123 = vperm.xlu1 %8340, %v3093_v4   ;;  %v12715_v7 = vpop.permute.xlu1 %2230 }
 0x3a9   : > { %15144 = vst [vmem:[#allocation94_spill] sm:$0xff] %v12715_v7 }
 0x3ac   : > { %3135 = vperm.xlu0 %8339, %v3105_v21   ;;  %3131 = vperm.xlu1 %8340, %v3101_v58   ;;  %v12717_v20 = vpop.permute.xlu1 %2238 }
 0x3ad   : > { %15145 = vst [vmem:[#allocation95_spill] sm:$0xff] %v12717_v20 }
 0x3b0   : > { %3143 = vperm.xlu0 %8339, %v3113_v28   ;;  %3139 = vperm.xlu1 %8340, %v3109_v0   ;;  %v12719_v36 = vpop.permute.xlu1 %2242  ;;  %v12739_v0 = vpop.permute.xlu0 %2860 }
 0x3b1   : > { %15146 = vst [vmem:[#allocation96_spill] sm:$0xff] %v12719_v36  ;;  %15155 = vst [vmem:[#allocation105_spill] sm:$0xff] %v12739_v0 }
 0x3b4   : > { %v12721_v8 = vpop.permute.xlu1 %2550 }
 0x3b5   : > { %15147 = vst [vmem:[#allocation97_spill] sm:$0xff] %v12721_v8 }
 0x3b8   : > { %v12723_v4 = vpop.permute.xlu1 %2558 }
 0x3b9   : > { %15148 = vst [vmem:[#allocation98_spill] sm:$0xff] %v12723_v4  ;;  %v12743_v4 = vpop.permute.xlu0 %2864 }
 0x3ba   : > { %15157 = vst [vmem:[#allocation107_spill] sm:$0xff] %v12743_v4 }
 0x3bc   : > { %v12725_v41 = vpop.permute.xlu1 %2562 }
 0x3bd   : > { %15149 = vst [vmem:[#allocation99_spill] sm:$0xff] %v12725_v41  ;;  %v12747_v36 = vpop.permute.xlu0 %2868 }
 0x3be   : > { %15159 = vst [vmem:[#allocation109_spill] sm:$0xff] %v12747_v36  ;;  %v3030_v36 = vld [vmem:[%s10813_s3 + $0x1] sm:$0xff] }
 0x3c0   : > { %v12727_v61 = vpop.permute.xlu1 %699 }
 0x3c1   : > { %v12751_v7 = vpop.permute.xlu0 %2872 }
 0x3c2   : > { %15161 = vst [vmem:[#allocation111_spill] sm:$0xff] %v12751_v7 }
 0x3c4   : > { %v12729_v21 = vpop.permute.xlu1 %1022 }
 0x3c5   : > { %15150 = vst [vmem:[#allocation100_spill] sm:$0xff] %v12729_v21  ;;  %v15379_v21 = vld [vmem:[#allocation26_spill] sm:$0xff] }
 0x3c8   : > { %v12731_v58 = vpop.permute.xlu1 %1670 }
 0x3c9   : > { %15151 = vst [vmem:[#allocation101_spill] sm:$0xff] %v12731_v58 }
 0x3cc   : > { %v12733_v16 = vpop.permute.xlu1 %2246 }
 0x3cd   : > { %15152 = vst [vmem:[#allocation102_spill] sm:$0xff] %v12733_v16 }
 0x3d0   : > { %v12735_v5 = vpop.permute.xlu1 %2566 }
 0x3d1   : > { %15153 = vst [vmem:[#allocation103_spill] sm:$0xff] %v12735_v5  ;;  %v12755_v5 = vpop.permute.xlu0 %2876 }
 0x3d2   : > { %15163 = vst [vmem:[#allocation113_spill] sm:$0xff] %v12755_v5 }
 0x3d4   : > { %v12737_v28 = vpop.permute.xlu1 %2858 }
 0x3d5   : > { %15154 = vst [vmem:[#allocation104_spill] sm:$0xff] %v12737_v28  ;;  %v12759_v0 = vpop.permute.xlu0 %2880 }
 0x3d6   : > { %15165 = vst [vmem:[#allocation115_spill] sm:$0xff] %v12759_v0 }
 0x3d8   : > { %v12741_v8 = vpop.permute.xlu1 %2862 }
 0x3d9   : > { %15156 = vst [vmem:[#allocation106_spill] sm:$0xff] %v12741_v8  ;;  %v12763_v8 = vpop.permute.xlu0 %2884 }
 0x3da   : > { %15167 = vst [vmem:[#allocation117_spill] sm:$0xff] %v12763_v8 }
 0x3dc   : > { %v12745_v41 = vpop.permute.xlu1 %2866 }
 0x3dd   : > { %15158 = vst [vmem:[#allocation108_spill] sm:$0xff] %v12745_v41 }
 0x3e0   : > { %v12749_v20 = vpop.permute.xlu1 %2870 }
 0x3e1   : > { %15160 = vst [vmem:[#allocation110_spill] sm:$0xff] %v12749_v20  ;;  %v3031_v20 = vld [vmem:[%s10813_s3 + $0x9] sm:$0xff] }
 0x3e4   : > { %v12753_v16 = vpop.permute.xlu1 %2874 }
 0x3e5   : > { %15162 = vst [vmem:[#allocation112_spill] sm:$0xff] %v12753_v16 }
 0x3e8   : > { %v12757_v28 = vpop.permute.xlu1 %2878 }
 0x3e9   : > { %15164 = vst [vmem:[#allocation114_spill] sm:$0xff] %v12757_v28 }
 0x3ec   : > { %v12761_v48 = vpop.permute.xlu1 %2882 }
 0x3ed   : > { %15166 = vst [vmem:[#allocation116_spill] sm:$0xff] %v12761_v48 }
 0x412   : > { %v12765_v4 = vpop.permute.xlu1 %2886  ;;  %v12767_v41 = vpop.permute.xlu0 %2888 }
 0x413   : > { %15168 = vst [vmem:[#allocation118_spill] sm:$0xff] %v12765_v4  ;;  %15169 = vst [vmem:[#allocation119_spill] sm:$0xff] %v12767_v41 }
 0x41f   : > { %v3116_v18 = vpop.permute.xlu1 %3115  ;;  %v3120_v16 = vpop.permute.xlu0 %3119 }
 0x420   : > { %v3146_v7 = vmul.f32 %v3116_v18, %v3030_v36  ;;  %v3147_v34 = vmul.f32 %v3116_v18, %v3031_v20  ;;  %v3148_v28 = vmul.f32 %v3120_v16, %v3030_v36  ;;  %v3149_v0 = vmul.f32 %v3120_v16, %v3031_v20 }
 0x422   : > { %3180 = vrot.lane.b32.xlu0 %v3147_v34, %s8534_s5  ;;  %3178 = vrot.lane.b32.xlu1 %v3146_v7, %s8534_s5 }
 0x423   : > { %v3124_v5 = vpop.permute.xlu1 %3123  ;;  %v3128_v41 = vpop.permute.xlu0 %3127 }
 0x424   : > { %v3150_v4 = vmul.f32 %v3124_v5, %v3030_v36  ;;  %v3151_v48 = vmul.f32 %v3124_v5, %v3031_v20  ;;  %v3152_v18 = vmul.f32 %v3128_v41, %v3030_v36  ;;  %v3153_v8 = vmul.f32 %v3128_v41, %v3031_v20 }
 0x426   : > { %3184 = vrot.lane.b32.xlu0 %v3149_v0, %s8534_s5  ;;  %3182 = vrot.lane.b32.xlu1 %v3148_v28, %s8534_s5 }
 0x427   : > { %v3132_v42 = vpop.permute.xlu1 %3131  ;;  %v3136_v16 = vpop.permute.xlu0 %3135 }
 0x428   : > { %v3154_v34 = vmul.f32 %v3132_v42, %v3030_v36  ;;  %v3155_v7 = vmul.f32 %v3132_v42, %v3031_v20  ;;  %v3156_v5 = vmul.f32 %v3136_v16, %v3030_v36  ;;  %v3157_v28 = vmul.f32 %v3136_v16, %v3031_v20 }
 0x42a   : > { %3188 = vrot.lane.b32.xlu0 %v3151_v48, %s8534_s5  ;;  %3186 = vrot.lane.b32.xlu1 %v3150_v4, %s8534_s5  ;;  %v15170_v48 = vld [vmem:[#allocation15_spill] sm:$0xff] }
 0x42b   : > { %v3360_v0 = vrot.slane %v15170_v48, %v15136_v57  ;;  %v3140_v4 = vpop.permute.xlu1 %3139  ;;  %v3353_v42 = vcombine.high %v15170_v48, %v15170_v48  ;;  %v3144_v22 = vpop.permute.xlu0 %3143 }
 0x42c   : > { %v3159_v41 = vmul.f32 %v3140_v4, %v3031_v20  ;;  %v3161_v16 = vmul.f32 %v3144_v22, %v3031_v20 }
 0x42e   : > { %3192 = vrot.lane.b32.xlu0 %v3153_v8, %s8534_s5  ;;  %3190 = vrot.lane.b32.xlu1 %v3152_v18, %s8534_s5  ;;  %v3158_v8 = vmul.f32 %v3140_v4, %v3030_v36  ;;  %v3368_v18 = vcombine.high %v3360_v0, %v3360_v0 }
 0x430   : > { %v3390_v10 = vrot.slane %v3368_v18, %v15136_v57 }
 0x432   : > { %3196 = vrot.lane.b32.xlu0 %v3155_v7, %s8534_s5  ;;  %3194 = vrot.lane.b32.xlu1 %v3154_v34, %s8534_s5  ;;  %v3376_v34 = vrot.slane %v3360_v0, %v15136_v57  ;;  %v3160_v7 = vmul.f32 %v3144_v22, %v3030_v36  ;;  %v3409_v48 = vrot.slane %v3390_v10, %v15068_v54 }
 0x433   : > { %v3400_v4 = vcombine.high %v3390_v10, %v3390_v10 }
 0x435   : > { %v3417_v22 = vrot.slane %v3400_v4, %v15068_v54 }
 0x436   : > { %3200 = vrot.lane.b32.xlu0 %v3157_v28, %s8534_s5  ;;  %3198 = vrot.lane.b32.xlu1 %v3156_v5, %s8534_s5  ;;  %v3367_v28 = vrot.slane %v3353_v42, %v15136_v57  ;;  %v3405_v5 = vrot.slane %v3376_v34, %v15068_v54 }
 0x438   : > { %v3369_v58 = vcombine.high %v3367_v28, %v3367_v28  ;;  %v3383_v36 = vrot.slane %v3367_v28, %v15136_v57 }
 0x43a   : > { %3204 = vrot.lane.b32.xlu0 %v3159_v41, %s8534_s5  ;;  %3202 = vrot.lane.b32.xlu1 %v3158_v8, %s8534_s5  ;;  %v3398_v41 = vcombine.high %v3376_v34, %v3376_v34  ;;  %v3397_v0 = vrot.slane %v3369_v58, %v15136_v57  ;;  %v15171_v8 = vld [vmem:[#allocation14_spill] sm:$0xff]  ;;  %v3421_v42 = vrot.slane %v3383_v36, %v15068_v54 }
 0x43b   : > { %v3616_v18 = vrot.slane %v15171_v8, %v15136_v57  ;;  %v3399_v10 = vcombine.high %v3383_v36, %v3383_v36  ;;  %v3609_v28 = vcombine.high %v15171_v8, %v15171_v8 }
 0x43c   : > { %v3413_v20 = vrot.slane %v3398_v41, %v15068_v54  ;;  %v3425_v34 = vrot.slane %v3397_v0, %v15068_v54 }
 0x43d   : > { %v3623_v41 = vrot.slane %v3609_v28, %v15136_v57 }
 0x43e   : > { %3208 = vrot.lane.b32.xlu0 %v3161_v16, %s8534_s5  ;;  %3206 = vrot.lane.b32.xlu1 %v3160_v7, %s8534_s5  ;;  %v3401_v7 = vcombine.high %v3397_v0, %v3397_v0  ;;  %v3624_v16 = vcombine.high %v3616_v18, %v3616_v18 }
 0x43f   : > { %v3625_v8 = vcombine.high %v3623_v41, %v3623_v41 }
 0x440   : > { %v3433_v58 = vrot.slane %v3401_v7, %v15068_v54  ;;  %v3646_v4 = vrot.slane %v3624_v16, %v15136_v57 }
 0x442   : > { %3439 = vperm.xlu0 %8339, %v3409_v48   ;;  %3435 = vperm.xlu1 %8340, %v3405_v5   ;;  %v3632_v5 = vrot.slane %v3616_v18, %v15136_v57  ;;  %v3429_v48 = vrot.slane %v3399_v10, %v15068_v54  ;;  %v3653_v10 = vrot.slane %v3625_v8, %v15136_v57 }
 0x444   : > { %v3661_v36 = vrot.slane %v3632_v5, %v15068_v54  ;;  %v3654_v0 = vcombine.high %v3632_v5, %v3632_v5  ;;  %v3681_v7 = vrot.slane %v3653_v10, %v15068_v54  ;;  %v3657_v28 = vcombine.high %v3653_v10, %v3653_v10 }
 0x446   : > { %3447 = vperm.xlu0 %8339, %v3417_v22   ;;  %3443 = vperm.xlu1 %8340, %v3413_v20   ;;  %v3665_v22 = vrot.slane %v3646_v4, %v15068_v54  ;;  %v3656_v20 = vcombine.high %v3646_v4, %v3646_v4  ;;  %v3689_v5 = vrot.slane %v3657_v28, %v15068_v54 }
 0x448   : > { %v3673_v18 = vrot.slane %v3656_v20, %v15068_v54 }
 0x44a   : > { %3455 = vperm.xlu0 %8339, %v3425_v34   ;;  %3451 = vperm.xlu1 %8340, %v3421_v42   ;;  %v3669_v42 = vrot.slane %v3654_v0, %v15068_v54  ;;  %v3639_v34 = vrot.slane %v3623_v41, %v15136_v57 }
 0x44c   : > { %v3677_v16 = vrot.slane %v3639_v34, %v15068_v54 }
 0x44e   : > { %3463 = vperm.xlu0 %8339, %v3433_v58   ;;  %3459 = vperm.xlu1 %8340, %v3429_v48   ;;  %v3655_v58 = vcombine.high %v3639_v34, %v3639_v34 }
 0x450   : > { %v3685_v48 = vrot.slane %v3655_v58, %v15068_v54 }
 0x452   : > { %3695 = vperm.xlu0 %8339, %v3665_v22   ;;  %3691 = vperm.xlu1 %8340, %v3661_v36  }
 0x456   : > { %3703 = vperm.xlu0 %8339, %v3673_v18   ;;  %3699 = vperm.xlu1 %8340, %v3669_v42  }
 0x45a   : > { %3711 = vperm.xlu0 %8339, %v3681_v7   ;;  %3707 = vperm.xlu1 %8340, %v3677_v16  }
 0x45e   : > { %3719 = vperm.xlu0 %8339, %v3689_v5   ;;  %3715 = vperm.xlu1 %8340, %v3685_v48  }
 0x494   : > { %v12821_v4 = vpop.permute.xlu1 %3178  ;;  %v12823_v36 = vpop.permute.xlu0 %3180 }
 0x495   : > { %15172 = vst [vmem:[#allocation15_spill] sm:$0xff] %v12821_v4  ;;  %15173 = vst [vmem:[#allocation14_spill] sm:$0xff] %v12823_v36 }
 0x498   : > { %v12825_v41 = vpop.permute.xlu1 %3182  ;;  %v12827_v22 = vpop.permute.xlu0 %3184 }
 0x499   : > { %15174 = vst [vmem:[#allocation120_spill] sm:$0xff] %v12825_v41  ;;  %15175 = vst [vmem:[#allocation121_spill] sm:$0xff] %v12827_v22 }
 0x49c   : > { %v12829_v20 = vpop.permute.xlu1 %3186  ;;  %v12831_v0 = vpop.permute.xlu0 %3188 }
 0x49d   : > { %15176 = vst [vmem:[#allocation122_spill] sm:$0xff] %v12829_v20  ;;  %15177 = vst [vmem:[#allocation123_spill] sm:$0xff] %v12831_v0 }
 0x4a0   : > { %v12833_v8 = vpop.permute.xlu1 %3190  ;;  %v12835_v18 = vpop.permute.xlu0 %3192 }
 0x4a1   : > { %15178 = vst [vmem:[#allocation124_spill] sm:$0xff] %v12833_v8  ;;  %15179 = vst [vmem:[#allocation125_spill] sm:$0xff] %v12835_v18 }
 0x4a4   : > { %v12837_v42 = vpop.permute.xlu1 %3194  ;;  %v12839_v10 = vpop.permute.xlu0 %3196 }
 0x4a5   : > { %15180 = vst [vmem:[#allocation126_spill] sm:$0xff] %v12837_v42  ;;  %15181 = vst [vmem:[#allocation127_spill] sm:$0xff] %v12839_v10 }
 0x4a8   : > { %v12841_v34 = vpop.permute.xlu1 %3198  ;;  %v12843_v7 = vpop.permute.xlu0 %3200 }
 0x4a9   : > { %15182 = vst [vmem:[#allocation128_spill] sm:$0xff] %v12841_v34  ;;  %15183 = vst [vmem:[#allocation129_spill] sm:$0xff] %v12843_v7 }
 0x4ac   : > { %v12845_v16 = vpop.permute.xlu1 %3202  ;;  %v12847_v28 = vpop.permute.xlu0 %3204 }
 0x4ad   : > { %15184 = vst [vmem:[#allocation130_spill] sm:$0xff] %v12845_v16  ;;  %15185 = vst [vmem:[#allocation131_spill] sm:$0xff] %v12847_v28  ;;  %v12870_v28 = vld [vmem:[%s10813_s3 + $0x2] sm:$0xff] }
 0x4b0   : > { %v12849_v58 = vpop.permute.xlu1 %3206  ;;  %v12851_v5 = vpop.permute.xlu0 %3208 }
 0x4b1   : > { %15186 = vst [vmem:[#allocation132_spill] sm:$0xff] %v12849_v58  ;;  %15187 = vst [vmem:[#allocation133_spill] sm:$0xff] %v12851_v5  ;;  %v12873_v58 = vld [vmem:[%s10813_s3 + $0xa] sm:$0xff] }
 0x4bd   : > { %v12853_v48 = vpop.permute.xlu1 %3435  ;;  %v12855_v18 = vpop.permute.xlu0 %3439 }
 0x4be   : > { %15188 = vst [vmem:[#allocation134_spill] sm:$0xff] %v12853_v48  ;;  %15189 = vst [vmem:[#allocation135_spill] sm:$0xff] %v12855_v18 }
 0x4c1   : > { %v12857_v42 = vpop.permute.xlu1 %3443  ;;  %v12859_v10 = vpop.permute.xlu0 %3447 }
 0x4c2   : > { %15190 = vst [vmem:[#allocation136_spill] sm:$0xff] %v12857_v42  ;;  %15191 = vst [vmem:[#allocation137_spill] sm:$0xff] %v12859_v10 }
 0x4c5   : > { %v12861_v8 = vpop.permute.xlu1 %3451  ;;  %v12863_v34 = vpop.permute.xlu0 %3455 }
 0x4c6   : > { %15192 = vst [vmem:[#allocation138_spill] sm:$0xff] %v12861_v8  ;;  %15193 = vst [vmem:[#allocation139_spill] sm:$0xff] %v12863_v34 }
 0x4c9   : > { %v12865_v7 = vpop.permute.xlu1 %3459  ;;  %v12867_v16 = vpop.permute.xlu0 %3463 }
 0x4ca   : > { %15194 = vst [vmem:[#allocation140_spill] sm:$0xff] %v12865_v7  ;;  %15195 = vst [vmem:[#allocation141_spill] sm:$0xff] %v12867_v16 }
 0x4cd   : > { %v3692_v5 = vpop.permute.xlu1 %3691  ;;  %v3696_v42 = vpop.permute.xlu0 %3695 }
 0x4ce   : > { %v3722_v48 = vmul.f32 %v3692_v5, %v12870_v28  ;;  %v3723_v18 = vmul.f32 %v3692_v5, %v12873_v58  ;;  %v3724_v34 = vmul.f32 %v3696_v42, %v12870_v28  ;;  %v3725_v7 = vmul.f32 %v3696_v42, %v12873_v58 }
 0x4d0   : > { %3756 = vrot.lane.b32.xlu0 %v3723_v18, %s8523_s23  ;;  %3754 = vrot.lane.b32.xlu1 %v3722_v48, %s8523_s23 }
 0x4d1   : > { %v3700_v8 = vpop.permute.xlu1 %3699  ;;  %v3704_v0 = vpop.permute.xlu0 %3703 }
 0x4d2   : > { %v3726_v16 = vmul.f32 %v3700_v8, %v12870_v28  ;;  %v3727_v10 = vmul.f32 %v3700_v8, %v12873_v58  ;;  %v3728_v18 = vmul.f32 %v3704_v0, %v12870_v28  ;;  %v3729_v5 = vmul.f32 %v3704_v0, %v12873_v58  ;;  %v15196_v0 = vld [vmem:[#allocation41_spill] sm:$0xff] }
 0x4d4   : > { %3760 = vrot.lane.b32.xlu0 %v3725_v7, %s8523_s23  ;;  %3758 = vrot.lane.b32.xlu1 %v3724_v34, %s8523_s23 }
 0x4d5   : > { %v3708_v48 = vpop.permute.xlu1 %3707  ;;  %v3712_v7 = vpop.permute.xlu0 %3711 }
 0x4d6   : > { %v3730_v42 = vmul.f32 %v3708_v48, %v12870_v28  ;;  %v3731_v34 = vmul.f32 %v3708_v48, %v12873_v58  ;;  %v3732_v8 = vmul.f32 %v3712_v7, %v12870_v28 }
 0x4d8   : > { %3764 = vrot.lane.b32.xlu0 %v3727_v10, %s8523_s23  ;;  %3762 = vrot.lane.b32.xlu1 %v3726_v16, %s8523_s23  ;;  %v3733_v10 = vmul.f32 %v3712_v7, %v12873_v58  ;;  %v3935_v16 = vrot.slane %v15196_v0, %v15136_v57 }
 0x4d9   : > { %v3716_v20 = vpop.permute.xlu1 %3715 }
 0x4da   : > { %v3943_v48 = vcombine.high %v3935_v16, %v3935_v16  ;;  %v3951_v7 = vrot.slane %v3935_v16, %v15136_v57 }
 0x4dc   : > { %3768 = vrot.lane.b32.xlu0 %v3729_v5, %s8523_s23  ;;  %3766 = vrot.lane.b32.xlu1 %v3728_v18, %s8523_s23  ;;  %v3734_v18 = vmul.f32 %v3716_v20, %v12870_v28  ;;  %v3735_v5 = vmul.f32 %v3716_v20, %v12873_v58  ;;  %v3980_v20 = vrot.slane %v3951_v7, %v15068_v54 }
 0x4e0   : > { %3772 = vrot.lane.b32.xlu0 %v3731_v34, %s8523_s23  ;;  %3770 = vrot.lane.b32.xlu1 %v3730_v42, %s8523_s23  ;;  %v3928_v42 = vcombine.high %v15196_v0, %v15196_v0  ;;  %v3720_v34 = vpop.permute.xlu0 %3719 }
 0x4e1   : > { %v3736_v22 = vmul.f32 %v3720_v34, %v12870_v28 }
 0x4e2   : > { %v3942_v41 = vrot.slane %v3928_v42, %v15136_v57 }
 0x4e4   : > { %3776 = vrot.lane.b32.xlu0 %v3733_v10, %s8523_s23  ;;  %3774 = vrot.lane.b32.xlu1 %v3732_v8, %s8523_s23  ;;  %v3737_v10 = vmul.f32 %v3720_v34, %v12873_v58  ;;  %v3965_v8 = vrot.slane %v3943_v48, %v15136_v57  ;;  %v3944_v36 = vcombine.high %v3942_v41, %v3942_v41 }
 0x4e5   : > { %v3958_v42 = vrot.slane %v3942_v41, %v15136_v57 }
 0x4e6   : > { %v3984_v0 = vrot.slane %v3965_v8, %v15068_v54  ;;  %v3972_v48 = vrot.slane %v3944_v36, %v15136_v57 }
 0x4e8   : > { %3780 = vrot.lane.b32.xlu0 %v3735_v5, %s8523_s23  ;;  %3778 = vrot.lane.b32.xlu1 %v3734_v18, %s8523_s23  ;;  %v3975_v5 = vcombine.high %v3965_v8, %v3965_v8  ;;  %v3973_v18 = vcombine.high %v3951_v7, %v3951_v7  ;;  %v3976_v4 = vcombine.high %v3972_v48, %v3972_v48 }
 0x4e9   : > { %v3974_v8 = vcombine.high %v3958_v42, %v3958_v42 }
 0x4ea   : > { %v3992_v16 = vrot.slane %v3975_v5, %v15068_v54  ;;  %v3988_v34 = vrot.slane %v3973_v18, %v15068_v54  ;;  %v4008_v7 = vrot.slane %v3976_v4, %v15068_v54 }
 0x4ec   : > { %3784 = vrot.lane.b32.xlu0 %v3737_v10, %s8523_s23  ;;  %3782 = vrot.lane.b32.xlu1 %v3736_v22, %s8523_s23  ;;  %v4000_v22 = vrot.slane %v3972_v48, %v15068_v54  ;;  %v3996_v10 = vrot.slane %v3958_v42, %v15068_v54 }
 0x4f0   : > { %4014 = vperm.xlu0 %8339, %v3984_v0   ;;  %4010 = vperm.xlu1 %8340, %v3980_v20   ;;  %v4004_v20 = vrot.slane %v3974_v8, %v15068_v54 }
 0x4f4   : > { %4022 = vperm.xlu0 %8339, %v3992_v16   ;;  %4018 = vperm.xlu1 %8340, %v3988_v34  }
 0x4f8   : > { %4030 = vperm.xlu0 %8339, %v4000_v22   ;;  %4026 = vperm.xlu1 %8340, %v3996_v10  }
 0x4fc   : > { %4038 = vperm.xlu0 %8339, %v4008_v7   ;;  %4034 = vperm.xlu1 %8340, %v4004_v20  }
 0x542   : > { %v12924_v0 = vpop.permute.xlu1 %3754  ;;  %v12926_v36 = vpop.permute.xlu0 %3756 }
 0x543   : > { %15197 = vst [vmem:[#allocation41_spill] sm:$0xff] %v12924_v0  ;;  %15198 = vst [vmem:[#allocation142_spill] sm:$0xff] %v12926_v36 }
 0x546   : > { %v12928_v41 = vpop.permute.xlu1 %3758  ;;  %v12930_v5 = vpop.permute.xlu0 %3760 }
 0x547   : > { %15199 = vst [vmem:[#allocation143_spill] sm:$0xff] %v12928_v41  ;;  %15200 = vst [vmem:[#allocation144_spill] sm:$0xff] %v12930_v5 }
 0x54a   : > { %v12932_v18 = vpop.permute.xlu1 %3762  ;;  %v12934_v16 = vpop.permute.xlu0 %3764 }
 0x54b   : > { %15201 = vst [vmem:[#allocation145_spill] sm:$0xff] %v12932_v18  ;;  %15202 = vst [vmem:[#allocation146_spill] sm:$0xff] %v12934_v16 }
 0x54e   : > { %v12936_v34 = vpop.permute.xlu1 %3766  ;;  %v12938_v48 = vpop.permute.xlu0 %3768 }
 0x54f   : > { %15203 = vst [vmem:[#allocation147_spill] sm:$0xff] %v12936_v34  ;;  %15204 = vst [vmem:[#allocation148_spill] sm:$0xff] %v12938_v48 }
 0x552   : > { %v12940_v4 = vpop.permute.xlu1 %3770  ;;  %v12942_v42 = vpop.permute.xlu0 %3772 }
 0x553   : > { %15205 = vst [vmem:[#allocation149_spill] sm:$0xff] %v12940_v4  ;;  %15206 = vst [vmem:[#allocation150_spill] sm:$0xff] %v12942_v42 }
 0x556   : > { %v12944_v22 = vpop.permute.xlu1 %3774  ;;  %v12946_v10 = vpop.permute.xlu0 %3776 }
 0x557   : > { %15207 = vst [vmem:[#allocation151_spill] sm:$0xff] %v12944_v22  ;;  %15208 = vst [vmem:[#allocation152_spill] sm:$0xff] %v12946_v10 }
 0x55a   : > { %v12948_v8 = vpop.permute.xlu1 %3778  ;;  %v12950_v7 = vpop.permute.xlu0 %3780 }
 0x55b   : > { %15209 = vst [vmem:[#allocation153_spill] sm:$0xff] %v12948_v8  ;;  %15210 = vst [vmem:[#allocation154_spill] sm:$0xff] %v12950_v7 }
 0x55e   : > { %v12952_v20 = vpop.permute.xlu1 %3782  ;;  %v12954_v18 = vpop.permute.xlu0 %3784 }
 0x55f   : > { %15211 = vst [vmem:[#allocation155_spill] sm:$0xff] %v12952_v20  ;;  %15212 = vst [vmem:[#allocation156_spill] sm:$0xff] %v12954_v18 }
 0x56b   : > { %v4011_v16 = vpop.permute.xlu1 %4010  ;;  %v4015_v4 = vpop.permute.xlu0 %4014 }
 0x56c   : > { %v4041_v34 = vmul.f32 %v4011_v16, %v12870_v28  ;;  %v4042_v48 = vmul.f32 %v4011_v16, %v12873_v58  ;;  %v4043_v10 = vmul.f32 %v4015_v4, %v12870_v28  ;;  %v4044_v8 = vmul.f32 %v4015_v4, %v12873_v58 }
 0x56e   : > { %4075 = vrot.lane.b32.xlu0 %v4042_v48, %s8524_s24  ;;  %4073 = vrot.lane.b32.xlu1 %v4041_v34, %s8524_s24 }
 0x56f   : > { %v4019_v22 = vpop.permute.xlu1 %4018  ;;  %v4023_v7 = vpop.permute.xlu0 %4022 }
 0x570   : > { %v4045_v18 = vmul.f32 %v4019_v22, %v12870_v28  ;;  %v4046_v20 = vmul.f32 %v4019_v22, %v12873_v58  ;;  %v4047_v16 = vmul.f32 %v4023_v7, %v12870_v28  ;;  %v4048_v34 = vmul.f32 %v4023_v7, %v12873_v58  ;;  %v15213_v7 = vld [vmem:[#allocation42_spill] sm:$0xff] }
 0x572   : > { %4079 = vrot.lane.b32.xlu0 %v4044_v8, %s8524_s24  ;;  %4077 = vrot.lane.b32.xlu1 %v4043_v10, %s8524_s24 }
 0x573   : > { %v4027_v48 = vpop.permute.xlu1 %4026  ;;  %v4031_v8 = vpop.permute.xlu0 %4030 }
 0x574   : > { %v4049_v4 = vmul.f32 %v4027_v48, %v12870_v28  ;;  %v4050_v10 = vmul.f32 %v4027_v48, %v12873_v58  ;;  %v4052_v22 = vmul.f32 %v4031_v8, %v12873_v58 }
 0x576   : > { %4083 = vrot.lane.b32.xlu0 %v4046_v20, %s8524_s24  ;;  %4081 = vrot.lane.b32.xlu1 %v4045_v18, %s8524_s24  ;;  %v4051_v18 = vmul.f32 %v4031_v8, %v12870_v28  ;;  %v4255_v20 = vrot.slane %v15213_v7, %v15136_v57 }
 0x577   : > { %v4035_v42 = vpop.permute.xlu1 %4034 }
 0x578   : > { %v4263_v48 = vcombine.high %v4255_v20, %v4255_v20  ;;  %v4271_v8 = vrot.slane %v4255_v20, %v15136_v57 }
 0x57a   : > { %4087 = vrot.lane.b32.xlu0 %v4048_v34, %s8524_s24  ;;  %4085 = vrot.lane.b32.xlu1 %v4047_v16, %s8524_s24  ;;  %v4053_v16 = vmul.f32 %v4035_v42, %v12870_v28  ;;  %v4054_v34 = vmul.f32 %v4035_v42, %v12873_v58  ;;  %v4300_v42 = vrot.slane %v4271_v8, %v15068_v54 }
 0x57e   : > { %4091 = vrot.lane.b32.xlu0 %v4050_v10, %s8524_s24  ;;  %4089 = vrot.lane.b32.xlu1 %v4049_v4, %s8524_s24  ;;  %v4248_v4 = vcombine.high %v15213_v7, %v15213_v7  ;;  %v4039_v10 = vpop.permute.xlu0 %4038 }
 0x57f   : > { %v4055_v5 = vmul.f32 %v4039_v10, %v12870_v28 }
 0x580   : > { %v4262_v41 = vrot.slane %v4248_v4, %v15136_v57 }
 0x582   : > { %4095 = vrot.lane.b32.xlu0 %v4052_v22, %s8524_s24  ;;  %4093 = vrot.lane.b32.xlu1 %v4051_v18, %s8524_s24  ;;  %v4056_v22 = vmul.f32 %v4039_v10, %v12873_v58  ;;  %v4285_v18 = vrot.slane %v4263_v48, %v15136_v57  ;;  %v4264_v36 = vcombine.high %v4262_v41, %v4262_v41 }
 0x583   : > { %v4278_v4 = vrot.slane %v4262_v41, %v15136_v57 }
 0x584   : > { %v4304_v7 = vrot.slane %v4285_v18, %v15068_v54  ;;  %v4292_v48 = vrot.slane %v4264_v36, %v15136_v57 }
 0x586   : > { %4099 = vrot.lane.b32.xlu0 %v4054_v34, %s8524_s24  ;;  %4097 = vrot.lane.b32.xlu1 %v4053_v16, %s8524_s24  ;;  %v4295_v34 = vcombine.high %v4285_v18, %v4285_v18  ;;  %v4293_v16 = vcombine.high %v4271_v8, %v4271_v8  ;;  %v4296_v0 = vcombine.high %v4292_v48, %v4292_v48 }
 0x587   : > { %v4294_v18 = vcombine.high %v4278_v4, %v4278_v4 }
 0x588   : > { %v4312_v20 = vrot.slane %v4295_v34, %v15068_v54  ;;  %v4308_v10 = vrot.slane %v4293_v16, %v15068_v54  ;;  %v4328_v8 = vrot.slane %v4296_v0, %v15068_v54 }
 0x58a   : > { %4103 = vrot.lane.b32.xlu0 %v4056_v22, %s8524_s24  ;;  %4101 = vrot.lane.b32.xlu1 %v4055_v5, %s8524_s24  ;;  %v4320_v5 = vrot.slane %v4292_v48, %v15068_v54  ;;  %v4316_v22 = vrot.slane %v4278_v4, %v15068_v54 }
 0x58e   : > { %4334 = vperm.xlu0 %8339, %v4304_v7   ;;  %4330 = vperm.xlu1 %8340, %v4300_v42   ;;  %v4324_v42 = vrot.slane %v4294_v18, %v15068_v54 }
 0x592   : > { %4342 = vperm.xlu0 %8339, %v4312_v20   ;;  %4338 = vperm.xlu1 %8340, %v4308_v10  }
 0x596   : > { %4350 = vperm.xlu0 %8339, %v4320_v5   ;;  %4346 = vperm.xlu1 %8340, %v4316_v22  }
 0x59a   : > { %4358 = vperm.xlu0 %8339, %v4328_v8   ;;  %4354 = vperm.xlu1 %8340, %v4324_v42  }
 0x5e0   : > { %v13005_v7 = vpop.permute.xlu1 %4073  ;;  %v13007_v36 = vpop.permute.xlu0 %4075 }
 0x5e1   : > { %15214 = vst [vmem:[#allocation42_spill] sm:$0xff] %v13005_v7  ;;  %15215 = vst [vmem:[#allocation157_spill] sm:$0xff] %v13007_v36 }
 0x5e4   : > { %v13009_v41 = vpop.permute.xlu1 %4077  ;;  %v13011_v34 = vpop.permute.xlu0 %4079 }
 0x5e5   : > { %15216 = vst [vmem:[#allocation158_spill] sm:$0xff] %v13009_v41  ;;  %15217 = vst [vmem:[#allocation159_spill] sm:$0xff] %v13011_v34 }
 0x5e8   : > { %v13013_v16 = vpop.permute.xlu1 %4081  ;;  %v13015_v20 = vpop.permute.xlu0 %4083 }
 0x5e9   : > { %15218 = vst [vmem:[#allocation160_spill] sm:$0xff] %v13013_v16  ;;  %15219 = vst [vmem:[#allocation161_spill] sm:$0xff] %v13015_v20 }
 0x5ec   : > { %v13017_v10 = vpop.permute.xlu1 %4085  ;;  %v13019_v48 = vpop.permute.xlu0 %4087 }
 0x5ed   : > { %15220 = vst [vmem:[#allocation162_spill] sm:$0xff] %v13017_v10  ;;  %15221 = vst [vmem:[#allocation163_spill] sm:$0xff] %v13019_v48 }
 0x5f0   : > { %v13021_v0 = vpop.permute.xlu1 %4089  ;;  %v13023_v4 = vpop.permute.xlu0 %4091 }
 0x5f1   : > { %15222 = vst [vmem:[#allocation164_spill] sm:$0xff] %v13021_v0  ;;  %15223 = vst [vmem:[#allocation165_spill] sm:$0xff] %v13023_v4 }
 0x5f4   : > { %v13025_v5 = vpop.permute.xlu1 %4093  ;;  %v13027_v22 = vpop.permute.xlu0 %4095 }
 0x5f5   : > { %15224 = vst [vmem:[#allocation166_spill] sm:$0xff] %v13025_v5  ;;  %15225 = vst [vmem:[#allocation167_spill] sm:$0xff] %v13027_v22 }
 0x5f8   : > { %v13029_v18 = vpop.permute.xlu1 %4097  ;;  %v13031_v8 = vpop.permute.xlu0 %4099 }
 0x5f9   : > { %15226 = vst [vmem:[#allocation168_spill] sm:$0xff] %v13029_v18  ;;  %15227 = vst [vmem:[#allocation169_spill] sm:$0xff] %v13031_v8 }
 0x5fc   : > { %v13033_v42 = vpop.permute.xlu1 %4101  ;;  %v13035_v16 = vpop.permute.xlu0 %4103 }
 0x5fd   : > { %15228 = vst [vmem:[#allocation170_spill] sm:$0xff] %v13033_v42  ;;  %15229 = vst [vmem:[#allocation171_spill] sm:$0xff] %v13035_v16 }
 0x609   : > { %v4331_v20 = vpop.permute.xlu1 %4330  ;;  %v4335_v0 = vpop.permute.xlu0 %4334 }
 0x60a   : > { %v4361_v10 = vmul.f32 %v4331_v20, %v12870_v28  ;;  %v4362_v48 = vmul.f32 %v4331_v20, %v12873_v58  ;;  %v4363_v22 = vmul.f32 %v4335_v0, %v12870_v28  ;;  %v4364_v18 = vmul.f32 %v4335_v0, %v12873_v58 }
 0x60c   : > { %4395 = vrot.lane.b32.xlu0 %v4362_v48, %s8533_s4  ;;  %4393 = vrot.lane.b32.xlu1 %v4361_v10, %s8533_s4 }
 0x60d   : > { %v4339_v5 = vpop.permute.xlu1 %4338  ;;  %v4343_v8 = vpop.permute.xlu0 %4342 }
 0x60e   : > { %v4365_v16 = vmul.f32 %v4339_v5, %v12870_v28  ;;  %v4366_v42 = vmul.f32 %v4339_v5, %v12873_v58  ;;  %v4367_v20 = vmul.f32 %v4343_v8, %v12870_v28  ;;  %v4368_v10 = vmul.f32 %v4343_v8, %v12873_v58  ;;  %v15230_v8 = vld [vmem:[#allocation18_spill] sm:$0xff] }
 0x610   : > { %4399 = vrot.lane.b32.xlu0 %v4364_v18, %s8533_s4  ;;  %4397 = vrot.lane.b32.xlu1 %v4363_v22, %s8533_s4 }
 0x611   : > { %v4347_v48 = vpop.permute.xlu1 %4346  ;;  %v4351_v18 = vpop.permute.xlu0 %4350 }
 0x612   : > { %v4369_v0 = vmul.f32 %v4347_v48, %v12870_v28  ;;  %v4370_v22 = vmul.f32 %v4347_v48, %v12873_v58  ;;  %v4372_v5 = vmul.f32 %v4351_v18, %v12873_v58 }
 0x614   : > { %4403 = vrot.lane.b32.xlu0 %v4366_v42, %s8533_s4  ;;  %4401 = vrot.lane.b32.xlu1 %v4365_v16, %s8533_s4  ;;  %v4371_v16 = vmul.f32 %v4351_v18, %v12870_v28  ;;  %v4575_v42 = vrot.slane %v15230_v8, %v15136_v57 }
 0x615   : > { %v4355_v4 = vpop.permute.xlu1 %4354 }
 0x616   : > { %v4583_v48 = vcombine.high %v4575_v42, %v4575_v42  ;;  %v4591_v18 = vrot.slane %v4575_v42, %v15136_v57 }
 0x618   : > { %4407 = vrot.lane.b32.xlu0 %v4368_v10, %s8533_s4  ;;  %4405 = vrot.lane.b32.xlu1 %v4367_v20, %s8533_s4  ;;  %v4373_v20 = vmul.f32 %v4355_v4, %v12870_v28  ;;  %v4374_v10 = vmul.f32 %v4355_v4, %v12873_v58  ;;  %v4620_v4 = vrot.slane %v4591_v18, %v15068_v54 }
 0x61c   : > { %4411 = vrot.lane.b32.xlu0 %v4370_v22, %s8533_s4  ;;  %4409 = vrot.lane.b32.xlu1 %v4369_v0, %s8533_s4  ;;  %v4568_v0 = vcombine.high %v15230_v8, %v15230_v8  ;;  %v4359_v22 = vpop.permute.xlu0 %4358 }
 0x61d   : > { %v4375_v34 = vmul.f32 %v4359_v22, %v12870_v28 }
 0x61e   : > { %v4582_v41 = vrot.slane %v4568_v0, %v15136_v57 }
 0x620   : > { %4415 = vrot.lane.b32.xlu0 %v4372_v5, %s8533_s4  ;;  %4413 = vrot.lane.b32.xlu1 %v4371_v16, %s8533_s4  ;;  %v4376_v5 = vmul.f32 %v4359_v22, %v12873_v58  ;;  %v4605_v16 = vrot.slane %v4583_v48, %v15136_v57  ;;  %v4584_v36 = vcombine.high %v4582_v41, %v4582_v41 }
 0x621   : > { %v4598_v0 = vrot.slane %v4582_v41, %v15136_v57 }
 0x622   : > { %v4624_v8 = vrot.slane %v4605_v16, %v15068_v54  ;;  %v4612_v48 = vrot.slane %v4584_v36, %v15136_v57 }
 0x624   : > { %4419 = vrot.lane.b32.xlu0 %v4374_v10, %s8533_s4  ;;  %4417 = vrot.lane.b32.xlu1 %v4373_v20, %s8533_s4  ;;  %v4615_v10 = vcombine.high %v4605_v16, %v4605_v16  ;;  %v4613_v20 = vcombine.high %v4591_v18, %v4591_v18  ;;  %v4616_v7 = vcombine.high %v4612_v48, %v4612_v48 }
 0x625   : > { %v4614_v16 = vcombine.high %v4598_v0, %v4598_v0 }
 0x626   : > { %v4632_v42 = vrot.slane %v4615_v10, %v15068_v54  ;;  %v4628_v22 = vrot.slane %v4613_v20, %v15068_v54  ;;  %v4648_v18 = vrot.slane %v4616_v7, %v15068_v54 }
 0x628   : > { %4423 = vrot.lane.b32.xlu0 %v4376_v5, %s8533_s4  ;;  %4421 = vrot.lane.b32.xlu1 %v4375_v34, %s8533_s4  ;;  %v4640_v34 = vrot.slane %v4612_v48, %v15068_v54  ;;  %v4636_v5 = vrot.slane %v4598_v0, %v15068_v54 }
 0x62c   : > { %4654 = vperm.xlu0 %8339, %v4624_v8   ;;  %4650 = vperm.xlu1 %8340, %v4620_v4   ;;  %v4644_v4 = vrot.slane %v4614_v16, %v15068_v54 }
 0x630   : > { %4662 = vperm.xlu0 %8339, %v4632_v42   ;;  %4658 = vperm.xlu1 %8340, %v4628_v22  }
 0x634   : > { %4670 = vperm.xlu0 %8339, %v4640_v34   ;;  %4666 = vperm.xlu1 %8340, %v4636_v5  }
 0x638   : > { %4678 = vperm.xlu0 %8339, %v4648_v18   ;;  %4674 = vperm.xlu1 %8340, %v4644_v4  }
 0x67e   : > { %v13086_v8 = vpop.permute.xlu1 %4393  ;;  %v13088_v36 = vpop.permute.xlu0 %4395 }
 0x67f   : > { %15231 = vst [vmem:[#allocation18_spill] sm:$0xff] %v13086_v8  ;;  %15232 = vst [vmem:[#allocation172_spill] sm:$0xff] %v13088_v36 }
 0x682   : > { %v13090_v41 = vpop.permute.xlu1 %4397  ;;  %v13092_v10 = vpop.permute.xlu0 %4399 }
 0x683   : > { %15233 = vst [vmem:[#allocation173_spill] sm:$0xff] %v13090_v41  ;;  %15234 = vst [vmem:[#allocation174_spill] sm:$0xff] %v13092_v10 }
 0x686   : > { %v13094_v20 = vpop.permute.xlu1 %4401  ;;  %v13096_v42 = vpop.permute.xlu0 %4403 }
 0x687   : > { %15235 = vst [vmem:[#allocation175_spill] sm:$0xff] %v13094_v20  ;;  %15236 = vst [vmem:[#allocation176_spill] sm:$0xff] %v13096_v42 }
 0x68a   : > { %v13098_v22 = vpop.permute.xlu1 %4405  ;;  %v13100_v48 = vpop.permute.xlu0 %4407 }
 0x68b   : > { %15237 = vst [vmem:[#allocation177_spill] sm:$0xff] %v13098_v22  ;;  %15238 = vst [vmem:[#allocation178_spill] sm:$0xff] %v13100_v48 }
 0x68e   : > { %v13102_v7 = vpop.permute.xlu1 %4409  ;;  %v13104_v0 = vpop.permute.xlu0 %4411 }
 0x68f   : > { %15239 = vst [vmem:[#allocation179_spill] sm:$0xff] %v13102_v7  ;;  %15240 = vst [vmem:[#allocation180_spill] sm:$0xff] %v13104_v0 }
 0x692   : > { %v13106_v34 = vpop.permute.xlu1 %4413  ;;  %v13108_v5 = vpop.permute.xlu0 %4415 }
 0x693   : > { %15241 = vst [vmem:[#allocation181_spill] sm:$0xff] %v13106_v34  ;;  %15242 = vst [vmem:[#allocation182_spill] sm:$0xff] %v13108_v5 }
 0x696   : > { %v13110_v16 = vpop.permute.xlu1 %4417  ;;  %v13112_v18 = vpop.permute.xlu0 %4419 }
 0x697   : > { %15243 = vst [vmem:[#allocation183_spill] sm:$0xff] %v13110_v16  ;;  %15244 = vst [vmem:[#allocation184_spill] sm:$0xff] %v13112_v18 }
 0x69a   : > { %v13114_v4 = vpop.permute.xlu1 %4421  ;;  %v13116_v20 = vpop.permute.xlu0 %4423 }
 0x69b   : > { %15245 = vst [vmem:[#allocation185_spill] sm:$0xff] %v13114_v4  ;;  %15246 = vst [vmem:[#allocation186_spill] sm:$0xff] %v13116_v20 }
 0x6a7   : > { %v4651_v42 = vpop.permute.xlu1 %4650  ;;  %v4655_v7 = vpop.permute.xlu0 %4654 }
 0x6a8   : > { %v4681_v22 = vmul.f32 %v4651_v42, %v12870_v28  ;;  %v4682_v48 = vmul.f32 %v4651_v42, %v12873_v58  ;;  %v4683_v5 = vmul.f32 %v4655_v7, %v12870_v28  ;;  %v4684_v16 = vmul.f32 %v4655_v7, %v12873_v58 }
 0x6aa   : > { %4715 = vrot.lane.b32.xlu0 %v4682_v48, %s8534_s5  ;;  %4713 = vrot.lane.b32.xlu1 %v4681_v22, %s8534_s5 }
 0x6ab   : > { %v4659_v34 = vpop.permute.xlu1 %4658  ;;  %v4663_v18 = vpop.permute.xlu0 %4662 }
 0x6ac   : > { %v4685_v20 = vmul.f32 %v4659_v34, %v12870_v28  ;;  %v4686_v4 = vmul.f32 %v4659_v34, %v12873_v58  ;;  %v4687_v42 = vmul.f32 %v4663_v18, %v12870_v28  ;;  %v4688_v22 = vmul.f32 %v4663_v18, %v12873_v58  ;;  %v15247_v18 = vld [vmem:[#allocation54_spill] sm:$0xff] }
 0x6ae   : > { %4719 = vrot.lane.b32.xlu0 %v4684_v16, %s8534_s5  ;;  %4717 = vrot.lane.b32.xlu1 %v4683_v5, %s8534_s5 }
 0x6af   : > { %v4667_v48 = vpop.permute.xlu1 %4666  ;;  %v4671_v16 = vpop.permute.xlu0 %4670 }
 0x6b0   : > { %v4689_v7 = vmul.f32 %v4667_v48, %v12870_v28  ;;  %v4690_v5 = vmul.f32 %v4667_v48, %v12873_v58  ;;  %v4692_v34 = vmul.f32 %v4671_v16, %v12873_v58 }
 0x6b2   : > { %4723 = vrot.lane.b32.xlu0 %v4686_v4, %s8534_s5  ;;  %4721 = vrot.lane.b32.xlu1 %v4685_v20, %s8534_s5  ;;  %v4691_v20 = vmul.f32 %v4671_v16, %v12870_v28  ;;  %v4895_v4 = vrot.slane %v15247_v18, %v15136_v57 }
 0x6b3   : > { %v4675_v0 = vpop.permute.xlu1 %4674 }
 0x6b4   : > { %v4903_v48 = vcombine.high %v4895_v4, %v4895_v4  ;;  %v4911_v16 = vrot.slane %v4895_v4, %v15136_v57 }
 0x6b6   : > { %4727 = vrot.lane.b32.xlu0 %v4688_v22, %s8534_s5  ;;  %4725 = vrot.lane.b32.xlu1 %v4687_v42, %s8534_s5  ;;  %v4693_v42 = vmul.f32 %v4675_v0, %v12870_v28  ;;  %v4694_v22 = vmul.f32 %v4675_v0, %v12873_v58  ;;  %v4940_v0 = vrot.slane %v4911_v16, %v15068_v54 }
 0x6ba   : > { %4731 = vrot.lane.b32.xlu0 %v4690_v5, %s8534_s5  ;;  %4729 = vrot.lane.b32.xlu1 %v4689_v7, %s8534_s5  ;;  %v4888_v7 = vcombine.high %v15247_v18, %v15247_v18  ;;  %v4679_v5 = vpop.permute.xlu0 %4678 }
 0x6bb   : > { %v4695_v10 = vmul.f32 %v4679_v5, %v12870_v28 }
 0x6bc   : > { %v4902_v41 = vrot.slane %v4888_v7, %v15136_v57  ;;  %v15248_v7 = vld [vmem:[#allocation63_spill] sm:$0xff] }
 0x6be   : > { %4735 = vrot.lane.b32.xlu0 %v4692_v34, %s8534_s5  ;;  %4733 = vrot.lane.b32.xlu1 %v4691_v20, %s8534_s5  ;;  %v4696_v34 = vmul.f32 %v4679_v5, %v12873_v58  ;;  %v4925_v20 = vrot.slane %v4903_v48, %v15136_v57  ;;  %v4904_v36 = vcombine.high %v4902_v41, %v4902_v41 }
 0x6bf   : > { %v4918_v28 = vrot.slane %v4902_v41, %v15136_v57  ;;  %v5144_v41 = vcombine.high %v15248_v7, %v15248_v7 }
 0x6c0   : > { %v4944_v18 = vrot.slane %v4925_v20, %v15068_v54  ;;  %v4932_v48 = vrot.slane %v4904_v36, %v15136_v57 }
 0x6c1   : > { %v4956_v5 = vrot.slane %v4918_v28, %v15068_v54 }
 0x6c2   : > { %4739 = vrot.lane.b32.xlu0 %v4694_v22, %s8534_s5  ;;  %4737 = vrot.lane.b32.xlu1 %v4693_v42, %s8534_s5  ;;  %v4935_v22 = vcombine.high %v4925_v20, %v4925_v20  ;;  %v4933_v42 = vcombine.high %v4911_v16, %v4911_v16  ;;  %v4960_v16 = vrot.slane %v4932_v48, %v15068_v54 }
 0x6c3   : > { %v4936_v20 = vcombine.high %v4932_v48, %v4932_v48 }
 0x6c4   : > { %v4952_v58 = vrot.slane %v4935_v22, %v15068_v54  ;;  %v4948_v4 = vrot.slane %v4933_v42, %v15068_v54 }
 0x6c5   : > { %v4968_v36 = vrot.slane %v4936_v20, %v15068_v54 }
 0x6c6   : > { %4743 = vrot.lane.b32.xlu0 %v4696_v34, %s8534_s5  ;;  %4741 = vrot.lane.b32.xlu1 %v4695_v10, %s8534_s5  ;;  %v5151_v10 = vrot.slane %v15248_v7, %v15136_v57  ;;  %v4934_v34 = vcombine.high %v4918_v28, %v4918_v28 }
 0x6c8   : > { %v4964_v22 = vrot.slane %v4934_v34, %v15068_v54 }
 0x6ca   : > { %4974 = vperm.xlu0 %8339, %v4944_v18   ;;  %4970 = vperm.xlu1 %8340, %v4940_v0   ;;  %v5159_v0 = vcombine.high %v5151_v10, %v5151_v10  ;;  %v5167_v18 = vrot.slane %v5151_v10, %v15136_v57 }
 0x6cc   : > { %v5181_v42 = vrot.slane %v5159_v0, %v15136_v57  ;;  %v5196_v28 = vrot.slane %v5167_v18, %v15068_v54  ;;  %v5189_v7 = vcombine.high %v5167_v18, %v5167_v18 }
 0x6ce   : > { %4982 = vperm.xlu0 %8339, %v4952_v58   ;;  %4978 = vperm.xlu1 %8340, %v4948_v4   ;;  %v5158_v58 = vrot.slane %v5144_v41, %v15136_v57  ;;  %v5200_v4 = vrot.slane %v5181_v42, %v15068_v54  ;;  %v5191_v48 = vcombine.high %v5181_v42, %v5181_v42 }
 0x6d0   : > { %v5208_v10 = vrot.slane %v5191_v48, %v15068_v54  ;;  %v5174_v20 = vrot.slane %v5158_v58, %v15136_v57 }
 0x6d2   : > { %4990 = vperm.xlu0 %8339, %v4960_v16   ;;  %4986 = vperm.xlu1 %8340, %v4956_v5   ;;  %v5160_v16 = vcombine.high %v5158_v58, %v5158_v58  ;;  %v5204_v5 = vrot.slane %v5189_v7, %v15068_v54  ;;  %v5212_v41 = vrot.slane %v5174_v20, %v15068_v54 }
 0x6d4   : > { %v5188_v34 = vrot.slane %v5160_v16, %v15136_v57 }
 0x6d6   : > { %4998 = vperm.xlu0 %8339, %v4968_v36   ;;  %4994 = vperm.xlu1 %8340, %v4964_v22   ;;  %v5216_v0 = vrot.slane %v5188_v34, %v15068_v54  ;;  %v5192_v36 = vcombine.high %v5188_v34, %v5188_v34  ;;  %v5190_v22 = vcombine.high %v5174_v20, %v5174_v20 }
 0x6d8   : > { %v5224_v18 = vrot.slane %v5192_v36, %v15068_v54  ;;  %v5220_v42 = vrot.slane %v5190_v22, %v15068_v54 }
 0x6da   : > { %5230 = vperm.xlu0 %8339, %v5200_v4   ;;  %5226 = vperm.xlu1 %8340, %v5196_v28  }
 0x6de   : > { %5238 = vperm.xlu0 %8339, %v5208_v10   ;;  %5234 = vperm.xlu1 %8340, %v5204_v5  }
 0x6e2   : > { %5246 = vperm.xlu0 %8339, %v5216_v0   ;;  %5242 = vperm.xlu1 %8340, %v5212_v41  }
 0x6e6   : > { %5254 = vperm.xlu0 %8339, %v5224_v18   ;;  %5250 = vperm.xlu1 %8340, %v5220_v42  }
 0x71c   : > { %v13184_v28 = vpop.permute.xlu1 %4713  ;;  %v13186_v4 = vpop.permute.xlu0 %4715 }
 0x71d   : > { %15249 = vst [vmem:[#allocation54_spill] sm:$0xff] %v13184_v28  ;;  %15250 = vst [vmem:[#allocation63_spill] sm:$0xff] %v13186_v4 }
 0x720   : > { %v13188_v58 = vpop.permute.xlu1 %4717  ;;  %v13190_v48 = vpop.permute.xlu0 %4719 }
 0x721   : > { %15251 = vst [vmem:[#allocation187_spill] sm:$0xff] %v13188_v58  ;;  %15252 = vst [vmem:[#allocation188_spill] sm:$0xff] %v13190_v48 }
 0x724   : > { %v13192_v7 = vpop.permute.xlu1 %4721  ;;  %v13194_v16 = vpop.permute.xlu0 %4723 }
 0x725   : > { %15253 = vst [vmem:[#allocation189_spill] sm:$0xff] %v13192_v7  ;;  %15254 = vst [vmem:[#allocation190_spill] sm:$0xff] %v13194_v16 }
 0x728   : > { %v13196_v10 = vpop.permute.xlu1 %4725  ;;  %v13198_v5 = vpop.permute.xlu0 %4727 }
 0x729   : > { %15255 = vst [vmem:[#allocation191_spill] sm:$0xff] %v13196_v10  ;;  %15256 = vst [vmem:[#allocation192_spill] sm:$0xff] %v13198_v5 }
 0x72c   : > { %v13200_v34 = vpop.permute.xlu1 %4729  ;;  %v13202_v20 = vpop.permute.xlu0 %4731 }
 0x72d   : > { %15257 = vst [vmem:[#allocation193_spill] sm:$0xff] %v13200_v34  ;;  %15258 = vst [vmem:[#allocation194_spill] sm:$0xff] %v13202_v20 }
 0x730   : > { %v13204_v0 = vpop.permute.xlu1 %4733  ;;  %v13206_v41 = vpop.permute.xlu0 %4735 }
 0x731   : > { %15259 = vst [vmem:[#allocation195_spill] sm:$0xff] %v13204_v0  ;;  %15260 = vst [vmem:[#allocation196_spill] sm:$0xff] %v13206_v41 }
 0x734   : > { %v13208_v36 = vpop.permute.xlu1 %4737  ;;  %v13210_v22 = vpop.permute.xlu0 %4739 }
 0x735   : > { %15261 = vst [vmem:[#allocation197_spill] sm:$0xff] %v13208_v36  ;;  %15262 = vst [vmem:[#allocation198_spill] sm:$0xff] %v13210_v22  ;;  %v13233_v22 = vld [vmem:[%s10813_s3 + $0x3] sm:$0xff] }
 0x738   : > { %v13212_v18 = vpop.permute.xlu1 %4741  ;;  %v13214_v42 = vpop.permute.xlu0 %4743 }
 0x739   : > { %15263 = vst [vmem:[#allocation199_spill] sm:$0xff] %v13212_v18  ;;  %15264 = vst [vmem:[#allocation200_spill] sm:$0xff] %v13214_v42  ;;  %v13236_v18 = vld [vmem:[%s10813_s3 + $0xb] sm:$0xff] }
 0x745   : > { %v13216_v10 = vpop.permute.xlu1 %4970  ;;  %v13218_v5 = vpop.permute.xlu0 %4974 }
 0x746   : > { %15265 = vst [vmem:[#allocation201_spill] sm:$0xff] %v13216_v10  ;;  %15266 = vst [vmem:[#allocation202_spill] sm:$0xff] %v13218_v5 }
 0x749   : > { %v13220_v34 = vpop.permute.xlu1 %4978  ;;  %v13222_v20 = vpop.permute.xlu0 %4982 }
 0x74a   : > { %15267 = vst [vmem:[#allocation203_spill] sm:$0xff] %v13220_v34  ;;  %15268 = vst [vmem:[#allocation204_spill] sm:$0xff] %v13222_v20 }
 0x74d   : > { %v13224_v16 = vpop.permute.xlu1 %4986  ;;  %v13226_v0 = vpop.permute.xlu0 %4990 }
 0x74e   : > { %15269 = vst [vmem:[#allocation205_spill] sm:$0xff] %v13224_v16  ;;  %15270 = vst [vmem:[#allocation206_spill] sm:$0xff] %v13226_v0 }
 0x751   : > { %v13228_v41 = vpop.permute.xlu1 %4994  ;;  %v13230_v36 = vpop.permute.xlu0 %4998 }
 0x752   : > { %15271 = vst [vmem:[#allocation207_spill] sm:$0xff] %v13228_v41  ;;  %15272 = vst [vmem:[#allocation208_spill] sm:$0xff] %v13230_v36 }
 0x755   : > { %v5227_v42 = vpop.permute.xlu1 %5226  ;;  %v5231_v34 = vpop.permute.xlu0 %5230 }
 0x756   : > { %v5257_v10 = vmul.f32 %v5227_v42, %v13233_v22  ;;  %v5258_v5 = vmul.f32 %v5227_v42, %v13236_v18  ;;  %v5259_v0 = vmul.f32 %v5231_v34, %v13233_v22  ;;  %v5260_v41 = vmul.f32 %v5231_v34, %v13236_v18 }
 0x758   : > { %5291 = vrot.lane.b32.xlu0 %v5258_v5, %s8523_s23  ;;  %5289 = vrot.lane.b32.xlu1 %v5257_v10, %s8523_s23 }
 0x759   : > { %v5235_v16 = vpop.permute.xlu1 %5234  ;;  %v5239_v7 = vpop.permute.xlu0 %5238 }
 0x75a   : > { %v5261_v36 = vmul.f32 %v5235_v16, %v13233_v22  ;;  %v5262_v20 = vmul.f32 %v5235_v16, %v13236_v18  ;;  %v5263_v10 = vmul.f32 %v5239_v7, %v13233_v22  ;;  %v5264_v5 = vmul.f32 %v5239_v7, %v13236_v18  ;;  %v15273_v7 = vld [vmem:[#allocation64_spill] sm:$0xff] }
 0x75c   : > { %5295 = vrot.lane.b32.xlu0 %v5260_v41, %s8523_s23  ;;  %5293 = vrot.lane.b32.xlu1 %v5259_v0, %s8523_s23 }
 0x75d   : > { %v5243_v42 = vpop.permute.xlu1 %5242  ;;  %v5247_v41 = vpop.permute.xlu0 %5246 }
 0x75e   : > { %v5265_v34 = vmul.f32 %v5243_v42, %v13233_v22  ;;  %v5266_v0 = vmul.f32 %v5243_v42, %v13236_v18  ;;  %v5267_v16 = vmul.f32 %v5247_v41, %v13233_v22 }
 0x760   : > { %5299 = vrot.lane.b32.xlu0 %v5262_v20, %s8523_s23  ;;  %5297 = vrot.lane.b32.xlu1 %v5261_v36, %s8523_s23  ;;  %v5268_v20 = vmul.f32 %v5247_v41, %v13236_v18  ;;  %v5471_v36 = vrot.slane %v15273_v7, %v15136_v57 }
 0x761   : > { %v5251_v48 = vpop.permute.xlu1 %5250 }
 0x762   : > { %v5479_v42 = vcombine.high %v5471_v36, %v5471_v36  ;;  %v5487_v41 = vrot.slane %v5471_v36, %v15136_v57 }
 0x764   : > { %5303 = vrot.lane.b32.xlu0 %v5264_v5, %s8523_s23  ;;  %5301 = vrot.lane.b32.xlu1 %v5263_v10, %s8523_s23  ;;  %v5269_v10 = vmul.f32 %v5251_v48, %v13233_v22  ;;  %v5270_v5 = vmul.f32 %v5251_v48, %v13236_v18  ;;  %v5516_v48 = vrot.slane %v5487_v41, %v15068_v54 }
 0x768   : > { %5307 = vrot.lane.b32.xlu0 %v5266_v0, %s8523_s23  ;;  %5305 = vrot.lane.b32.xlu1 %v5265_v34, %s8523_s23  ;;  %v5464_v34 = vcombine.high %v15273_v7, %v15273_v7  ;;  %v5255_v0 = vpop.permute.xlu0 %5254 }
 0x769   : > { %v5271_v58 = vmul.f32 %v5255_v0, %v13233_v22 }
 0x76a   : > { %v5478_v4 = vrot.slane %v5464_v34, %v15136_v57 }
 0x76c   : > { %5311 = vrot.lane.b32.xlu0 %v5268_v20, %s8523_s23  ;;  %5309 = vrot.lane.b32.xlu1 %v5267_v16, %s8523_s23  ;;  %v5272_v20 = vmul.f32 %v5255_v0, %v13236_v18  ;;  %v5501_v16 = vrot.slane %v5479_v42, %v15136_v57  ;;  %v5480_v28 = vcombine.high %v5478_v4, %v5478_v4 }
 0x76d   : > { %v5494_v34 = vrot.slane %v5478_v4, %v15136_v57 }
 0x76e   : > { %v5520_v7 = vrot.slane %v5501_v16, %v15068_v54  ;;  %v5508_v42 = vrot.slane %v5480_v28, %v15136_v57 }
 0x770   : > { %5315 = vrot.lane.b32.xlu0 %v5270_v5, %s8523_s23  ;;  %5313 = vrot.lane.b32.xlu1 %v5269_v10, %s8523_s23  ;;  %v5511_v5 = vcombine.high %v5501_v16, %v5501_v16  ;;  %v5509_v10 = vcombine.high %v5487_v41, %v5487_v41  ;;  %v5512_v8 = vcombine.high %v5508_v42, %v5508_v42 }
 0x771   : > { %v5510_v16 = vcombine.high %v5494_v34, %v5494_v34 }
 0x772   : > { %v5528_v36 = vrot.slane %v5511_v5, %v15068_v54  ;;  %v5524_v0 = vrot.slane %v5509_v10, %v15068_v54  ;;  %v5544_v41 = vrot.slane %v5512_v8, %v15068_v54 }
 0x774   : > { %5319 = vrot.lane.b32.xlu0 %v5272_v20, %s8523_s23  ;;  %5317 = vrot.lane.b32.xlu1 %v5271_v58, %s8523_s23  ;;  %v5536_v58 = vrot.slane %v5508_v42, %v15068_v54  ;;  %v5532_v20 = vrot.slane %v5494_v34, %v15068_v54 }
 0x778   : > { %5550 = vperm.xlu0 %8339, %v5520_v7   ;;  %5546 = vperm.xlu1 %8340, %v5516_v48   ;;  %v5540_v48 = vrot.slane %v5510_v16, %v15068_v54 }
 0x77c   : > { %5558 = vperm.xlu0 %8339, %v5528_v36   ;;  %5554 = vperm.xlu1 %8340, %v5524_v0  }
 0x780   : > { %5566 = vperm.xlu0 %8339, %v5536_v58   ;;  %5562 = vperm.xlu1 %8340, %v5532_v20  }
 0x784   : > { %5574 = vperm.xlu0 %8339, %v5544_v41   ;;  %5570 = vperm.xlu1 %8340, %v5540_v48  }
 0x7ca   : > { %v13287_v7 = vpop.permute.xlu1 %5289  ;;  %v13289_v28 = vpop.permute.xlu0 %5291 }
 0x7cb   : > { %15274 = vst [vmem:[#allocation64_spill] sm:$0xff] %v13287_v7  ;;  %15275 = vst [vmem:[#allocation209_spill] sm:$0xff] %v13289_v28  ;;  %v7327_v7 = vrot.slane %v12669_v11, %v15136_v57 }
 0x7cd   : > { %v7335_v44 = vcombine.high %v7327_v7, %v7327_v7 }
 0x7ce   : > { %v13291_v4 = vpop.permute.xlu1 %5293  ;;  %v13293_v5 = vpop.permute.xlu0 %5295 }
 0x7cf   : > { %15276 = vst [vmem:[#allocation210_spill] sm:$0xff] %v13291_v4  ;;  %15277 = vst [vmem:[#allocation211_spill] sm:$0xff] %v13293_v5  ;;  %v7357_v17 = vrot.slane %v7335_v44, %v15136_v57 }
 0x7d2   : > { %v13295_v10 = vpop.permute.xlu1 %5297  ;;  %v13297_v36 = vpop.permute.xlu0 %5299 }
 0x7d3   : > { %15278 = vst [vmem:[#allocation212_spill] sm:$0xff] %v13295_v10  ;;  %15279 = vst [vmem:[#allocation213_spill] sm:$0xff] %v13297_v36 }
 0x7d6   : > { %v13299_v0 = vpop.permute.xlu1 %5301  ;;  %v13301_v42 = vpop.permute.xlu0 %5303 }
 0x7d7   : > { %15280 = vst [vmem:[#allocation214_spill] sm:$0xff] %v13299_v0  ;;  %15281 = vst [vmem:[#allocation215_spill] sm:$0xff] %v13301_v42 }
 0x7da   : > { %v13303_v8 = vpop.permute.xlu1 %5305  ;;  %v13305_v34 = vpop.permute.xlu0 %5307 }
 0x7db   : > { %15282 = vst [vmem:[#allocation216_spill] sm:$0xff] %v13303_v8  ;;  %15283 = vst [vmem:[#allocation217_spill] sm:$0xff] %v13305_v34 }
 0x7de   : > { %v13307_v58 = vpop.permute.xlu1 %5309  ;;  %v13309_v20 = vpop.permute.xlu0 %5311 }
 0x7df   : > { %15284 = vst [vmem:[#allocation218_spill] sm:$0xff] %v13307_v58  ;;  %15285 = vst [vmem:[#allocation219_spill] sm:$0xff] %v13309_v20 }
 0x7e2   : > { %v13311_v16 = vpop.permute.xlu1 %5313  ;;  %v13313_v41 = vpop.permute.xlu0 %5315 }
 0x7e3   : > { %15286 = vst [vmem:[#allocation220_spill] sm:$0xff] %v13311_v16  ;;  %15287 = vst [vmem:[#allocation221_spill] sm:$0xff] %v13313_v41 }
 0x7e6   : > { %v13315_v48 = vpop.permute.xlu1 %5317  ;;  %v13317_v10 = vpop.permute.xlu0 %5319 }
 0x7e7   : > { %15288 = vst [vmem:[#allocation222_spill] sm:$0xff] %v13315_v48  ;;  %15289 = vst [vmem:[#allocation223_spill] sm:$0xff] %v13317_v10 }
 0x7f3   : > { %v5547_v36 = vpop.permute.xlu1 %5546  ;;  %v5551_v8 = vpop.permute.xlu0 %5550 }
 0x7f4   : > { %v5577_v0 = vmul.f32 %v5547_v36, %v13233_v22  ;;  %v5578_v42 = vmul.f32 %v5547_v36, %v13236_v18  ;;  %v5579_v20 = vmul.f32 %v5551_v8, %v13233_v22  ;;  %v5580_v16 = vmul.f32 %v5551_v8, %v13236_v18 }
 0x7f6   : > { %5611 = vrot.lane.b32.xlu0 %v5578_v42, %s8524_s24  ;;  %5609 = vrot.lane.b32.xlu1 %v5577_v0, %s8524_s24 }
 0x7f7   : > { %v5555_v58 = vpop.permute.xlu1 %5554  ;;  %v5559_v41 = vpop.permute.xlu0 %5558 }
 0x7f8   : > { %v5581_v10 = vmul.f32 %v5555_v58, %v13233_v22  ;;  %v5582_v48 = vmul.f32 %v5555_v58, %v13236_v18  ;;  %v5583_v36 = vmul.f32 %v5559_v41, %v13233_v22  ;;  %v5584_v0 = vmul.f32 %v5559_v41, %v13236_v18 }
 0x7f9   : > { %v5791_v41 = vrot.slane %v12192_v14, %v15136_v57 }
 0x7fa   : > { %5615 = vrot.lane.b32.xlu0 %v5580_v16, %s8524_s24  ;;  %5613 = vrot.lane.b32.xlu1 %v5579_v20, %s8524_s24 }
 0x7fb   : > { %v5563_v42 = vpop.permute.xlu1 %5562  ;;  %v5567_v16 = vpop.permute.xlu0 %5566 }
 0x7fc   : > { %v5585_v8 = vmul.f32 %v5563_v42, %v13233_v22  ;;  %v5586_v20 = vmul.f32 %v5563_v42, %v13236_v18  ;;  %v5588_v58 = vmul.f32 %v5567_v16, %v13236_v18  ;;  %v5799_v42 = vcombine.high %v5791_v41, %v5791_v41 }
 0x7fe   : > { %5619 = vrot.lane.b32.xlu0 %v5582_v48, %s8524_s24  ;;  %5617 = vrot.lane.b32.xlu1 %v5581_v10, %s8524_s24  ;;  %v5587_v10 = vmul.f32 %v5567_v16, %v13233_v22  ;;  %v5807_v16 = vrot.slane %v5791_v41, %v15136_v57 }
 0x7ff   : > { %v5571_v48 = vpop.permute.xlu1 %5570 }
 0x802   : > { %5623 = vrot.lane.b32.xlu0 %v5584_v0, %s8524_s24  ;;  %5621 = vrot.lane.b32.xlu1 %v5583_v36, %s8524_s24  ;;  %v5589_v36 = vmul.f32 %v5571_v48, %v13233_v22  ;;  %v5590_v0 = vmul.f32 %v5571_v48, %v13236_v18 }
 0x806   : > { %5627 = vrot.lane.b32.xlu0 %v5586_v20, %s8524_s24  ;;  %5625 = vrot.lane.b32.xlu1 %v5585_v8, %s8524_s24  ;;  %v5784_v8 = vcombine.high %v12192_v14, %v12192_v14  ;;  %v5575_v20 = vpop.permute.xlu0 %5574  ;;  %v5836_v14 = vrot.slane %v5807_v16, %v15068_v54 }
 0x807   : > { %v5591_v34 = vmul.f32 %v5575_v20, %v13233_v22 }
 0x808   : > { %v5798_v5 = vrot.slane %v5784_v8, %v15136_v57 }
 0x80a   : > { %5631 = vrot.lane.b32.xlu0 %v5588_v58, %s8524_s24  ;;  %5629 = vrot.lane.b32.xlu1 %v5587_v10, %s8524_s24  ;;  %v5592_v58 = vmul.f32 %v5575_v20, %v13236_v18  ;;  %v5821_v10 = vrot.slane %v5799_v42, %v15136_v57  ;;  %v5800_v4 = vcombine.high %v5798_v5, %v5798_v5 }
 0x80b   : > { %v5814_v8 = vrot.slane %v5798_v5, %v15136_v57 }
 0x80c   : > { %v5840_v48 = vrot.slane %v5821_v10, %v15068_v54  ;;  %v5828_v42 = vrot.slane %v5800_v4, %v15136_v57 }
 0x80e   : > { %5635 = vrot.lane.b32.xlu0 %v5590_v0, %s8524_s24  ;;  %5633 = vrot.lane.b32.xlu1 %v5589_v36, %s8524_s24  ;;  %v5831_v0 = vcombine.high %v5821_v10, %v5821_v10  ;;  %v5829_v36 = vcombine.high %v5807_v16, %v5807_v16  ;;  %v5832_v28 = vcombine.high %v5828_v42, %v5828_v42 }
 0x80f   : > { %v5830_v10 = vcombine.high %v5814_v8, %v5814_v8 }
 0x810   : > { %v5848_v41 = vrot.slane %v5831_v0, %v15068_v54  ;;  %v5844_v20 = vrot.slane %v5829_v36, %v15068_v54  ;;  %v5864_v16 = vrot.slane %v5832_v28, %v15068_v54 }
 0x812   : > { %5639 = vrot.lane.b32.xlu0 %v5592_v58, %s8524_s24  ;;  %5637 = vrot.lane.b32.xlu1 %v5591_v34, %s8524_s24  ;;  %v5856_v34 = vrot.slane %v5828_v42, %v15068_v54  ;;  %v5852_v58 = vrot.slane %v5814_v8, %v15068_v54 }
 0x816   : > { %5870 = vperm.xlu0 %8339, %v5840_v48   ;;  %5866 = vperm.xlu1 %8340, %v5836_v14   ;;  %v5860_v14 = vrot.slane %v5830_v10, %v15068_v54 }
 0x81a   : > { %5878 = vperm.xlu0 %8339, %v5848_v41   ;;  %5874 = vperm.xlu1 %8340, %v5844_v20  }
 0x81e   : > { %5886 = vperm.xlu0 %8339, %v5856_v34   ;;  %5882 = vperm.xlu1 %8340, %v5852_v58  }
 0x822   : > { %5894 = vperm.xlu0 %8339, %v5864_v16   ;;  %5890 = vperm.xlu1 %8340, %v5860_v14  }
 0x868   : > { %v13368_v48 = vpop.permute.xlu1 %5609  ;;  %v13370_v4 = vpop.permute.xlu0 %5611 }
 0x869   : > { %15290 = vst [vmem:[#allocation224_spill] sm:$0xff] %v13368_v48  ;;  %15291 = vst [vmem:[#allocation225_spill] sm:$0xff] %v13370_v4 }
 0x86c   : > { %v13372_v5 = vpop.permute.xlu1 %5613  ;;  %v13374_v0 = vpop.permute.xlu0 %5615 }
 0x86d   : > { %15292 = vst [vmem:[#allocation226_spill] sm:$0xff] %v13372_v5  ;;  %15293 = vst [vmem:[#allocation227_spill] sm:$0xff] %v13374_v0 }
 0x870   : > { %v13376_v36 = vpop.permute.xlu1 %5617  ;;  %v13378_v41 = vpop.permute.xlu0 %5619 }
 0x871   : > { %15294 = vst [vmem:[#allocation228_spill] sm:$0xff] %v13376_v36  ;;  %15295 = vst [vmem:[#allocation229_spill] sm:$0xff] %v13378_v41 }
 0x874   : > { %v13380_v20 = vpop.permute.xlu1 %5621  ;;  %v13382_v42 = vpop.permute.xlu0 %5623 }
 0x875   : > { %15296 = vst [vmem:[#allocation230_spill] sm:$0xff] %v13380_v20  ;;  %15297 = vst [vmem:[#allocation231_spill] sm:$0xff] %v13382_v42 }
 0x878   : > { %v13384_v28 = vpop.permute.xlu1 %5625  ;;  %v13386_v8 = vpop.permute.xlu0 %5627 }
 0x879   : > { %15298 = vst [vmem:[#allocation232_spill] sm:$0xff] %v13384_v28  ;;  %15299 = vst [vmem:[#allocation233_spill] sm:$0xff] %v13386_v8 }
 0x87c   : > { %v13388_v34 = vpop.permute.xlu1 %5629  ;;  %v13390_v58 = vpop.permute.xlu0 %5631 }
 0x87d   : > { %15300 = vst [vmem:[#allocation234_spill] sm:$0xff] %v13388_v34  ;;  %15301 = vst [vmem:[#allocation235_spill] sm:$0xff] %v13390_v58 }
 0x880   : > { %v13392_v10 = vpop.permute.xlu1 %5633  ;;  %v13394_v16 = vpop.permute.xlu0 %5635 }
 0x881   : > { %15302 = vst [vmem:[#allocation236_spill] sm:$0xff] %v13392_v10  ;;  %15303 = vst [vmem:[#allocation237_spill] sm:$0xff] %v13394_v16 }
 0x884   : > { %v13396_v14 = vpop.permute.xlu1 %5637  ;;  %v13398_v36 = vpop.permute.xlu0 %5639 }
 0x885   : > { %15304 = vst [vmem:[#allocation238_spill] sm:$0xff] %v13396_v14  ;;  %15305 = vst [vmem:[#allocation239_spill] sm:$0xff] %v13398_v36 }
 0x891   : > { %v5867_v41 = vpop.permute.xlu1 %5866  ;;  %v5871_v28 = vpop.permute.xlu0 %5870 }
 0x892   : > { %v5897_v20 = vmul.f32 %v5867_v41, %v13233_v22  ;;  %v5898_v42 = vmul.f32 %v5867_v41, %v13236_v18  ;;  %v5899_v58 = vmul.f32 %v5871_v28, %v13233_v22  ;;  %v5900_v10 = vmul.f32 %v5871_v28, %v13236_v18 }
 0x894   : > { %5931 = vrot.lane.b32.xlu0 %v5898_v42, %s8533_s4  ;;  %5929 = vrot.lane.b32.xlu1 %v5897_v20, %s8533_s4 }
 0x895   : > { %v5875_v34 = vpop.permute.xlu1 %5874  ;;  %v5879_v16 = vpop.permute.xlu0 %5878 }
 0x896   : > { %v5901_v36 = vmul.f32 %v5875_v34, %v13233_v22  ;;  %v5902_v14 = vmul.f32 %v5875_v34, %v13236_v18  ;;  %v5903_v41 = vmul.f32 %v5879_v16, %v13233_v22  ;;  %v5904_v20 = vmul.f32 %v5879_v16, %v13236_v18 }
 0x897   : > { %v6111_v16 = vrot.slane %v12194_v19, %v15136_v57 }
 0x898   : > { %5935 = vrot.lane.b32.xlu0 %v5900_v10, %s8533_s4  ;;  %5933 = vrot.lane.b32.xlu1 %v5899_v58, %s8533_s4 }
 0x899   : > { %v5883_v42 = vpop.permute.xlu1 %5882  ;;  %v5887_v10 = vpop.permute.xlu0 %5886 }
 0x89a   : > { %v5905_v28 = vmul.f32 %v5883_v42, %v13233_v22  ;;  %v5906_v58 = vmul.f32 %v5883_v42, %v13236_v18  ;;  %v5908_v34 = vmul.f32 %v5887_v10, %v13236_v18  ;;  %v6119_v42 = vcombine.high %v6111_v16, %v6111_v16 }
 0x89c   : > { %5939 = vrot.lane.b32.xlu0 %v5902_v14, %s8533_s4  ;;  %5937 = vrot.lane.b32.xlu1 %v5901_v36, %s8533_s4  ;;  %v5907_v36 = vmul.f32 %v5887_v10, %v13233_v22  ;;  %v6127_v10 = vrot.slane %v6111_v16, %v15136_v57 }
 0x89d   : > { %v5891_v14 = vpop.permute.xlu1 %5890 }
 0x8a0   : > { %5943 = vrot.lane.b32.xlu0 %v5904_v20, %s8533_s4  ;;  %5941 = vrot.lane.b32.xlu1 %v5903_v41, %s8533_s4  ;;  %v5909_v41 = vmul.f32 %v5891_v14, %v13233_v22  ;;  %v5910_v20 = vmul.f32 %v5891_v14, %v13236_v18 }
 0x8a4   : > { %5947 = vrot.lane.b32.xlu0 %v5906_v58, %s8533_s4  ;;  %5945 = vrot.lane.b32.xlu1 %v5905_v28, %s8533_s4  ;;  %v6104_v28 = vcombine.high %v12194_v19, %v12194_v19  ;;  %v5895_v58 = vpop.permute.xlu0 %5894  ;;  %v6156_v19 = vrot.slane %v6127_v10, %v15068_v54 }
 0x8a5   : > { %v5911_v8 = vmul.f32 %v5895_v58, %v13233_v22 }
 0x8a6   : > { %v6118_v0 = vrot.slane %v6104_v28, %v15136_v57 }
 0x8a8   : > { %5951 = vrot.lane.b32.xlu0 %v5908_v34, %s8533_s4  ;;  %5949 = vrot.lane.b32.xlu1 %v5907_v36, %s8533_s4  ;;  %v5912_v34 = vmul.f32 %v5895_v58, %v13236_v18  ;;  %v6141_v36 = vrot.slane %v6119_v42, %v15136_v57  ;;  %v6120_v5 = vcombine.high %v6118_v0, %v6118_v0 }
 0x8a9   : > { %v6134_v28 = vrot.slane %v6118_v0, %v15136_v57 }
 0x8aa   : > { %v6160_v14 = vrot.slane %v6141_v36, %v15068_v54  ;;  %v6148_v42 = vrot.slane %v6120_v5, %v15136_v57 }
 0x8ac   : > { %5955 = vrot.lane.b32.xlu0 %v5910_v20, %s8533_s4  ;;  %5953 = vrot.lane.b32.xlu1 %v5909_v41, %s8533_s4  ;;  %v6151_v20 = vcombine.high %v6141_v36, %v6141_v36  ;;  %v6149_v41 = vcombine.high %v6127_v10, %v6127_v10  ;;  %v6152_v4 = vcombine.high %v6148_v42, %v6148_v42 }
 0x8ad   : > { %v6150_v36 = vcombine.high %v6134_v28, %v6134_v28 }
 0x8ae   : > { %v6168_v16 = vrot.slane %v6151_v20, %v15068_v54  ;;  %v6164_v58 = vrot.slane %v6149_v41, %v15068_v54  ;;  %v6184_v10 = vrot.slane %v6152_v4, %v15068_v54 }
 0x8b0   : > { %5959 = vrot.lane.b32.xlu0 %v5912_v34, %s8533_s4  ;;  %5957 = vrot.lane.b32.xlu1 %v5911_v8, %s8533_s4  ;;  %v6176_v8 = vrot.slane %v6148_v42, %v15068_v54  ;;  %v6172_v34 = vrot.slane %v6134_v28, %v15068_v54 }
 0x8b4   : > { %6190 = vperm.xlu0 %8339, %v6160_v14   ;;  %6186 = vperm.xlu1 %8340, %v6156_v19   ;;  %v6180_v19 = vrot.slane %v6150_v36, %v15068_v54 }
 0x8b8   : > { %6198 = vperm.xlu0 %8339, %v6168_v16   ;;  %6194 = vperm.xlu1 %8340, %v6164_v58  }
 0x8bc   : > { %6206 = vperm.xlu0 %8339, %v6176_v8   ;;  %6202 = vperm.xlu1 %8340, %v6172_v34  }
 0x8c0   : > { %6214 = vperm.xlu0 %8339, %v6184_v10   ;;  %6210 = vperm.xlu1 %8340, %v6180_v19  }
 0x906   : > { %v13449_v14 = vpop.permute.xlu1 %5929  ;;  %v13451_v5 = vpop.permute.xlu0 %5931 }
 0x907   : > { %15306 = vst [vmem:[#allocation240_spill] sm:$0xff] %v13449_v14  ;;  %15307 = vst [vmem:[#allocation241_spill] sm:$0xff] %v13451_v5 }
 0x90a   : > { %v13453_v0 = vpop.permute.xlu1 %5933  ;;  %v13455_v20 = vpop.permute.xlu0 %5935 }
 0x90b   : > { %15308 = vst [vmem:[#allocation242_spill] sm:$0xff] %v13453_v0  ;;  %15309 = vst [vmem:[#allocation243_spill] sm:$0xff] %v13455_v20 }
 0x90e   : > { %v13457_v41 = vpop.permute.xlu1 %5937  ;;  %v13459_v16 = vpop.permute.xlu0 %5939 }
 0x90f   : > { %15310 = vst [vmem:[#allocation244_spill] sm:$0xff] %v13457_v41  ;;  %15311 = vst [vmem:[#allocation245_spill] sm:$0xff] %v13459_v16 }
 0x912   : > { %v13461_v58 = vpop.permute.xlu1 %5941  ;;  %v13463_v42 = vpop.permute.xlu0 %5943 }
 0x913   : > { %15312 = vst [vmem:[#allocation246_spill] sm:$0xff] %v13461_v58  ;;  %15313 = vst [vmem:[#allocation247_spill] sm:$0xff] %v13463_v42 }
 0x916   : > { %v13465_v4 = vpop.permute.xlu1 %5945  ;;  %v13467_v28 = vpop.permute.xlu0 %5947 }
 0x917   : > { %15314 = vst [vmem:[#allocation248_spill] sm:$0xff] %v13465_v4  ;;  %15315 = vst [vmem:[#allocation249_spill] sm:$0xff] %v13467_v28 }
 0x91a   : > { %v13469_v8 = vpop.permute.xlu1 %5949  ;;  %v13471_v34 = vpop.permute.xlu0 %5951 }
 0x91b   : > { %15316 = vst [vmem:[#allocation250_spill] sm:$0xff] %v13469_v8  ;;  %15317 = vst [vmem:[#allocation251_spill] sm:$0xff] %v13471_v34 }
 0x91e   : > { %v13473_v36 = vpop.permute.xlu1 %5953  ;;  %v13475_v10 = vpop.permute.xlu0 %5955 }
 0x91f   : > { %15318 = vst [vmem:[#allocation252_spill] sm:$0xff] %v13473_v36  ;;  %15319 = vst [vmem:[#allocation253_spill] sm:$0xff] %v13475_v10 }
 0x922   : > { %v13477_v19 = vpop.permute.xlu1 %5957  ;;  %v13479_v41 = vpop.permute.xlu0 %5959 }
 0x923   : > { %15320 = vst [vmem:[#allocation254_spill] sm:$0xff] %v13477_v19  ;;  %15321 = vst [vmem:[#allocation255_spill] sm:$0xff] %v13479_v41 }
 0x92f   : > { %v6187_v16 = vpop.permute.xlu1 %6186  ;;  %v6191_v4 = vpop.permute.xlu0 %6190 }
 0x930   : > { %v6217_v58 = vmul.f32 %v6187_v16, %v13233_v22  ;;  %v6218_v42 = vmul.f32 %v6187_v16, %v13236_v18  ;;  %v6219_v34 = vmul.f32 %v6191_v4, %v13233_v22  ;;  %v6220_v36 = vmul.f32 %v6191_v4, %v13236_v18 }
 0x932   : > { %6251 = vrot.lane.b32.xlu0 %v6218_v42, %s8534_s5  ;;  %6249 = vrot.lane.b32.xlu1 %v6217_v58, %s8534_s5 }
 0x933   : > { %v6195_v8 = vpop.permute.xlu1 %6194  ;;  %v6199_v10 = vpop.permute.xlu0 %6198 }
 0x934   : > { %v6221_v41 = vmul.f32 %v6195_v8, %v13233_v22  ;;  %v6222_v19 = vmul.f32 %v6195_v8, %v13236_v18  ;;  %v6223_v16 = vmul.f32 %v6199_v10, %v13233_v22  ;;  %v6224_v58 = vmul.f32 %v6199_v10, %v13236_v18 }
 0x935   : > { %v6431_v10 = vrot.slane %v12470_v49, %v15136_v57 }
 0x936   : > { %6255 = vrot.lane.b32.xlu0 %v6220_v36, %s8534_s5  ;;  %6253 = vrot.lane.b32.xlu1 %v6219_v34, %s8534_s5 }
 0x937   : > { %v6203_v42 = vpop.permute.xlu1 %6202  ;;  %v6207_v36 = vpop.permute.xlu0 %6206 }
 0x938   : > { %v6225_v4 = vmul.f32 %v6203_v42, %v13233_v22  ;;  %v6226_v34 = vmul.f32 %v6203_v42, %v13236_v18  ;;  %v6228_v8 = vmul.f32 %v6207_v36, %v13236_v18  ;;  %v6439_v42 = vcombine.high %v6431_v10, %v6431_v10 }
 0x93a   : > { %6259 = vrot.lane.b32.xlu0 %v6222_v19, %s8534_s5  ;;  %6257 = vrot.lane.b32.xlu1 %v6221_v41, %s8534_s5  ;;  %v6227_v41 = vmul.f32 %v6207_v36, %v13233_v22  ;;  %v6447_v36 = vrot.slane %v6431_v10, %v15136_v57 }
 0x93b   : > { %v6211_v19 = vpop.permute.xlu1 %6210 }
 0x93e   : > { %6263 = vrot.lane.b32.xlu0 %v6224_v58, %s8534_s5  ;;  %6261 = vrot.lane.b32.xlu1 %v6223_v16, %s8534_s5  ;;  %v6229_v16 = vmul.f32 %v6211_v19, %v13233_v22  ;;  %v6230_v58 = vmul.f32 %v6211_v19, %v13236_v18 }
 0x942   : > { %6267 = vrot.lane.b32.xlu0 %v6226_v34, %s8534_s5  ;;  %6265 = vrot.lane.b32.xlu1 %v6225_v4, %s8534_s5  ;;  %v6424_v4 = vcombine.high %v12470_v49, %v12470_v49  ;;  %v6215_v34 = vpop.permute.xlu0 %6214  ;;  %v6476_v49 = vrot.slane %v6447_v36, %v15068_v54 }
 0x943   : > { %v6231_v28 = vmul.f32 %v6215_v34, %v13233_v22 }
 0x944   : > { %v6438_v20 = vrot.slane %v6424_v4, %v15136_v57 }
 0x946   : > { %6271 = vrot.lane.b32.xlu0 %v6228_v8, %s8534_s5  ;;  %6269 = vrot.lane.b32.xlu1 %v6227_v41, %s8534_s5  ;;  %v6232_v8 = vmul.f32 %v6215_v34, %v13236_v18  ;;  %v6461_v41 = vrot.slane %v6439_v42, %v15136_v57  ;;  %v6440_v0 = vcombine.high %v6438_v20, %v6438_v20 }
 0x947   : > { %v6454_v22 = vrot.slane %v6438_v20, %v15136_v57  ;;  %v6680_v20 = vcombine.high %v12584_v45, %v12584_v45 }
 0x948   : > { %v6480_v19 = vrot.slane %v6461_v41, %v15068_v54  ;;  %v6468_v42 = vrot.slane %v6440_v0, %v15136_v57 }
 0x949   : > { %v6492_v4 = vrot.slane %v6454_v22, %v15068_v54  ;;  %v6470_v34 = vcombine.high %v6454_v22, %v6454_v22 }
 0x94a   : > { %6275 = vrot.lane.b32.xlu0 %v6230_v58, %s8534_s5  ;;  %6273 = vrot.lane.b32.xlu1 %v6229_v16, %s8534_s5  ;;  %v6471_v58 = vcombine.high %v6461_v41, %v6461_v41  ;;  %v6469_v16 = vcombine.high %v6447_v36, %v6447_v36  ;;  %v6496_v36 = vrot.slane %v6468_v42, %v15068_v54 }
 0x94c   : > { %v6488_v18 = vrot.slane %v6471_v58, %v15068_v54  ;;  %v6484_v10 = vrot.slane %v6469_v16, %v15068_v54  ;;  %v6694_v16 = vrot.slane %v6680_v20, %v15136_v57 }
 0x94e   : > { %6279 = vrot.lane.b32.xlu0 %v6232_v8, %s8534_s5  ;;  %6277 = vrot.lane.b32.xlu1 %v6231_v28, %s8534_s5  ;;  %v6687_v28 = vrot.slane %v12584_v45, %v15136_v57  ;;  %v6472_v8 = vcombine.high %v6468_v42, %v6468_v42  ;;  %v6696_v42 = vcombine.high %v6694_v16, %v6694_v16 }
 0x950   : > { %v6695_v41 = vcombine.high %v6687_v28, %v6687_v28  ;;  %v6504_v0 = vrot.slane %v6472_v8, %v15068_v54 }
 0x952   : > { %6510 = vperm.xlu0 %8339, %v6480_v19   ;;  %6506 = vperm.xlu1 %8340, %v6476_v49   ;;  %v6703_v49 = vrot.slane %v6687_v28, %v15136_v57  ;;  %v6500_v19 = vrot.slane %v6470_v34, %v15068_v54  ;;  %v6717_v58 = vrot.slane %v6695_v41, %v15136_v57 }
 0x953   : > { %v6724_v34 = vrot.slane %v6696_v42, %v15136_v57 }
 0x954   : > { %v6732_v22 = vrot.slane %v6703_v49, %v15068_v54  ;;  %v6725_v45 = vcombine.high %v6703_v49, %v6703_v49 }
 0x955   : > { %v6752_v8 = vrot.slane %v6724_v34, %v15068_v54  ;;  %v6728_v20 = vcombine.high %v6724_v34, %v6724_v34 }
 0x956   : > { %6518 = vperm.xlu0 %8339, %v6488_v18   ;;  %6514 = vperm.xlu1 %8340, %v6484_v10   ;;  %v6736_v18 = vrot.slane %v6717_v58, %v15068_v54  ;;  %v6727_v10 = vcombine.high %v6717_v58, %v6717_v58 }
 0x957   : > { %v6760_v49 = vrot.slane %v6728_v20, %v15068_v54 }
 0x958   : > { %v6744_v28 = vrot.slane %v6727_v10, %v15068_v54 }
 0x95a   : > { %6526 = vperm.xlu0 %8339, %v6496_v36   ;;  %6522 = vperm.xlu1 %8340, %v6492_v4   ;;  %v6740_v4 = vrot.slane %v6725_v45, %v15068_v54  ;;  %v6710_v36 = vrot.slane %v6694_v16, %v15136_v57 }
 0x95c   : > { %v6748_v41 = vrot.slane %v6710_v36, %v15068_v54 }
 0x95e   : > { %6534 = vperm.xlu0 %8339, %v6504_v0   ;;  %6530 = vperm.xlu1 %8340, %v6500_v19   ;;  %v6726_v0 = vcombine.high %v6710_v36, %v6710_v36 }
 0x960   : > { %v6756_v19 = vrot.slane %v6726_v0, %v15068_v54 }
 0x962   : > { %6766 = vperm.xlu0 %8339, %v6736_v18   ;;  %6762 = vperm.xlu1 %8340, %v6732_v22  }
 0x966   : > { %6774 = vperm.xlu0 %8339, %v6744_v28   ;;  %6770 = vperm.xlu1 %8340, %v6740_v4  }
 0x96a   : > { %6782 = vperm.xlu0 %8339, %v6752_v8   ;;  %6778 = vperm.xlu1 %8340, %v6748_v41  }
 0x96e   : > { %6790 = vperm.xlu0 %8339, %v6760_v49   ;;  %6786 = vperm.xlu1 %8340, %v6756_v19  }
 0x9a4   : > { %v13547_v58 = vpop.permute.xlu1 %6249  ;;  %v13549_v22 = vpop.permute.xlu0 %6251 }
 0x9a5   : > { %15322 = vst [vmem:[#allocation256_spill] sm:$0xff] %v13547_v58  ;;  %15323 = vst [vmem:[#allocation257_spill] sm:$0xff] %v13549_v22 }
 0x9a8   : > { %v13551_v16 = vpop.permute.xlu1 %6253  ;;  %v13553_v18 = vpop.permute.xlu0 %6255 }
 0x9a9   : > { %15324 = vst [vmem:[#allocation258_spill] sm:$0xff] %v13551_v16  ;;  %15325 = vst [vmem:[#allocation259_spill] sm:$0xff] %v13553_v18 }
 0x9ac   : > { %v13555_v10 = vpop.permute.xlu1 %6257  ;;  %v13557_v45 = vpop.permute.xlu0 %6259 }
 0x9ad   : > { %15326 = vst [vmem:[#allocation260_spill] sm:$0xff] %v13555_v10  ;;  %15327 = vst [vmem:[#allocation261_spill] sm:$0xff] %v13557_v45 }
 0x9b0   : > { %v13559_v42 = vpop.permute.xlu1 %6261  ;;  %v13561_v28 = vpop.permute.xlu0 %6263 }
 0x9b1   : > { %15328 = vst [vmem:[#allocation262_spill] sm:$0xff] %v13559_v42  ;;  %15329 = vst [vmem:[#allocation263_spill] sm:$0xff] %v13561_v28 }
 0x9b4   : > { %v13563_v4 = vpop.permute.xlu1 %6265  ;;  %v13565_v34 = vpop.permute.xlu0 %6267 }
 0x9b5   : > { %15330 = vst [vmem:[#allocation264_spill] sm:$0xff] %v13563_v4  ;;  %15331 = vst [vmem:[#allocation265_spill] sm:$0xff] %v13565_v34 }
 0x9b8   : > { %v13567_v36 = vpop.permute.xlu1 %6269  ;;  %v13569_v8 = vpop.permute.xlu0 %6271 }
 0x9b9   : > { %15332 = vst [vmem:[#allocation266_spill] sm:$0xff] %v13567_v36  ;;  %15333 = vst [vmem:[#allocation267_spill] sm:$0xff] %v13569_v8 }
 0x9bc   : > { %v13571_v41 = vpop.permute.xlu1 %6273  ;;  %v13573_v20 = vpop.permute.xlu0 %6275 }
 0x9bd   : > { %15334 = vst [vmem:[#allocation268_spill] sm:$0xff] %v13571_v41  ;;  %15335 = vst [vmem:[#allocation269_spill] sm:$0xff] %v13573_v20  ;;  %v13596_v20 = vld [vmem:[%s10813_s3 + $0x4] sm:$0xff] }
 0x9c0   : > { %v13575_v0 = vpop.permute.xlu1 %6277  ;;  %v13577_v49 = vpop.permute.xlu0 %6279 }
 0x9c1   : > { %15336 = vst [vmem:[#allocation270_spill] sm:$0xff] %v13575_v0  ;;  %15337 = vst [vmem:[#allocation271_spill] sm:$0xff] %v13577_v49  ;;  %v13599_v0 = vld [vmem:[%s10813_s3 + $0xc] sm:$0xff] }
 0x9cd   : > { %v13579_v19 = vpop.permute.xlu1 %6506  ;;  %v13581_v28 = vpop.permute.xlu0 %6510 }
 0x9ce   : > { %15338 = vst [vmem:[#allocation272_spill] sm:$0xff] %v13579_v19  ;;  %15339 = vst [vmem:[#allocation273_spill] sm:$0xff] %v13581_v28  ;;  %v15366_v19 = vld [vmem:[#allocation9_spill] sm:$0xff] }
 0x9d1   : > { %v13583_v4 = vpop.permute.xlu1 %6514  ;;  %v13585_v34 = vpop.permute.xlu0 %6518 }
 0x9d2   : > { %15340 = vst [vmem:[#allocation274_spill] sm:$0xff] %v13583_v4  ;;  %15341 = vst [vmem:[#allocation275_spill] sm:$0xff] %v13585_v34 }
 0x9d5   : > { %v13587_v42 = vpop.permute.xlu1 %6522  ;;  %v13589_v36 = vpop.permute.xlu0 %6526 }
 0x9d6   : > { %15342 = vst [vmem:[#allocation276_spill] sm:$0xff] %v13587_v42  ;;  %15343 = vst [vmem:[#allocation277_spill] sm:$0xff] %v13589_v36 }
 0x9d9   : > { %v13591_v8 = vpop.permute.xlu1 %6530  ;;  %v13593_v41 = vpop.permute.xlu0 %6534 }
 0x9da   : > { %15344 = vst [vmem:[#allocation278_spill] sm:$0xff] %v13591_v8  ;;  %15345 = vst [vmem:[#allocation279_spill] sm:$0xff] %v13593_v41 }
 0x9dd   : > { %v6763_v49 = vpop.permute.xlu1 %6762  ;;  %v6767_v4 = vpop.permute.xlu0 %6766 }
 0x9de   : > { %v6793_v45 = vmul.f32 %v6763_v49, %v13596_v20  ;;  %v6794_v10 = vmul.f32 %v6763_v49, %v13599_v0  ;;  %v6795_v36 = vmul.f32 %v6767_v4, %v13596_v20  ;;  %v6796_v8 = vmul.f32 %v6767_v4, %v13599_v0 }
 0x9e0   : > { %6827 = vrot.lane.b32.xlu0 %v6794_v10, %s8523_s23  ;;  %6825 = vrot.lane.b32.xlu1 %v6793_v45, %s8523_s23 }
 0x9e1   : > { %v6771_v42 = vpop.permute.xlu1 %6770  ;;  %v6775_v18 = vpop.permute.xlu0 %6774 }
 0x9e2   : > { %v6797_v41 = vmul.f32 %v6771_v42, %v13596_v20  ;;  %v6798_v34 = vmul.f32 %v6771_v42, %v13599_v0  ;;  %v6799_v10 = vmul.f32 %v6775_v18, %v13596_v20  ;;  %v6800_v45 = vmul.f32 %v6775_v18, %v13599_v0 }
 0x9e3   : > { %v7007_v18 = vrot.slane %v12588_v56, %v15136_v57 }
 0x9e4   : > { %6831 = vrot.lane.b32.xlu0 %v6796_v8, %s8523_s23  ;;  %6829 = vrot.lane.b32.xlu1 %v6795_v36, %s8523_s23 }
 0x9e5   : > { %v6779_v49 = vpop.permute.xlu1 %6778  ;;  %v6783_v8 = vpop.permute.xlu0 %6782 }
 0x9e6   : > { %v6801_v4 = vmul.f32 %v6779_v49, %v13596_v20  ;;  %v6802_v36 = vmul.f32 %v6779_v49, %v13599_v0  ;;  %v6803_v42 = vmul.f32 %v6783_v8, %v13596_v20  ;;  %v7015_v49 = vcombine.high %v7007_v18, %v7007_v18 }
 0x9e8   : > { %6835 = vrot.lane.b32.xlu0 %v6798_v34, %s8523_s23  ;;  %6833 = vrot.lane.b32.xlu1 %v6797_v41, %s8523_s23  ;;  %v6804_v34 = vmul.f32 %v6783_v8, %v13599_v0  ;;  %v7023_v8 = vrot.slane %v7007_v18, %v15136_v57 }
 0x9e9   : > { %v6787_v41 = vpop.permute.xlu1 %6786 }
 0x9ec   : > { %6839 = vrot.lane.b32.xlu0 %v6800_v45, %s8523_s23  ;;  %6837 = vrot.lane.b32.xlu1 %v6799_v10, %s8523_s23  ;;  %v6805_v10 = vmul.f32 %v6787_v41, %v13596_v20  ;;  %v6806_v45 = vmul.f32 %v6787_v41, %v13599_v0 }
 0x9f0   : > { %6843 = vrot.lane.b32.xlu0 %v6802_v36, %s8523_s23  ;;  %6841 = vrot.lane.b32.xlu1 %v6801_v4, %s8523_s23  ;;  %v7000_v4 = vcombine.high %v12588_v56, %v12588_v56  ;;  %v6791_v36 = vpop.permute.xlu0 %6790  ;;  %v7052_v56 = vrot.slane %v7023_v8, %v15068_v54 }
 0x9f1   : > { %v6807_v16 = vmul.f32 %v6791_v36, %v13596_v20 }
 0x9f2   : > { %v7014_v28 = vrot.slane %v7000_v4, %v15136_v57 }
 0x9f4   : > { %6847 = vrot.lane.b32.xlu0 %v6804_v34, %s8523_s23  ;;  %6845 = vrot.lane.b32.xlu1 %v6803_v42, %s8523_s23  ;;  %v6808_v34 = vmul.f32 %v6791_v36, %v13599_v0  ;;  %v7037_v42 = vrot.slane %v7015_v49, %v15136_v57  ;;  %v7016_v22 = vcombine.high %v7014_v28, %v7014_v28 }
 0x9f5   : > { %v7030_v4 = vrot.slane %v7014_v28, %v15136_v57 }
 0x9f6   : > { %v7056_v41 = vrot.slane %v7037_v42, %v15068_v54  ;;  %v7044_v49 = vrot.slane %v7016_v22, %v15136_v57 }
 0x9f8   : > { %6851 = vrot.lane.b32.xlu0 %v6806_v45, %s8523_s23  ;;  %6849 = vrot.lane.b32.xlu1 %v6805_v10, %s8523_s23  ;;  %v7047_v45 = vcombine.high %v7037_v42, %v7037_v42  ;;  %v7045_v10 = vcombine.high %v7023_v8, %v7023_v8  ;;  %v7048_v58 = vcombine.high %v7044_v49, %v7044_v49 }
 0x9f9   : > { %v7046_v42 = vcombine.high %v7030_v4, %v7030_v4 }
 0x9fa   : > { %v7064_v18 = vrot.slane %v7047_v45, %v15068_v54  ;;  %v7060_v36 = vrot.slane %v7045_v10, %v15068_v54  ;;  %v7080_v8 = vrot.slane %v7048_v58, %v15068_v54 }
 0x9fc   : > { %6855 = vrot.lane.b32.xlu0 %v6808_v34, %s8523_s23  ;;  %6853 = vrot.lane.b32.xlu1 %v6807_v16, %s8523_s23  ;;  %v7072_v16 = vrot.slane %v7044_v49, %v15068_v54  ;;  %v7068_v34 = vrot.slane %v7030_v4, %v15068_v54  ;;  %s8461_s23 = scalar_lea.vmem %s14461_s16, 2048 }
 0x9fd   : > { %p8462_p11 = scmp.ne.s32.totalorder %s14461_s16, %s8461_s23 }
 0x9ff   : > { %p8463_p12 = pnand %p8462_p11, %p8591_p5 }
 0xa00   : > { %7086 = vperm.xlu0 %8339, %v7056_v41   ;;  %7082 = vperm.xlu1 %8340, %v7052_v56   ;;  %v7076_v56 = vrot.slane %v7046_v42, %v15068_v54 }
 0xa01   : > { %p8464_p13 = pneg %p8463_p12 }
 0xa04   : > { %7094 = vperm.xlu0 %8339, %v7064_v18   ;;  %7090 = vperm.xlu1 %8340, %v7060_v36  }
 0xa08   : > { %7102 = vperm.xlu0 %8339, %v7072_v16   ;;  %7098 = vperm.xlu1 %8340, %v7068_v34  }
 0xa0c   : > { %7110 = vperm.xlu0 %8339, %v7080_v8   ;;  %7106 = vperm.xlu1 %8340, %v7076_v56  }
 0xa52   : > { %v13650_v41 = vpop.permute.xlu1 %6825  ;;  %v13652_v22 = vpop.permute.xlu0 %6827 }
 0xa53   : > { %15346 = vst [vmem:[#allocation280_spill] sm:$0xff] %v13650_v41  ;;  %15347 = vst [vmem:[#allocation281_spill] sm:$0xff] %v13652_v22  ;;  %v13727_v41 = vld [vmem:[%s10813_s3 + $0x9] sm:$0xff] }
 0xa56   : > { %v13654_v28 = vpop.permute.xlu1 %6829  ;;  %v13656_v45 = vpop.permute.xlu0 %6831 }
 0xa57   : > { %15348 = vst [vmem:[#allocation282_spill] sm:$0xff] %v13654_v28  ;;  %15349 = vst [vmem:[#allocation283_spill] sm:$0xff] %v13656_v45  ;;  %v15364_v28 = vld [vmem:[#allocation17_spill] sm:$0xff] }
 0xa5a   : > { %v13658_v10 = vpop.permute.xlu1 %6833  ;;  %v13660_v18 = vpop.permute.xlu0 %6835 }
 0xa5b   : > { %15350 = vst [vmem:[#allocation284_spill] sm:$0xff] %v13658_v10  ;;  %15351 = vst [vmem:[#allocation285_spill] sm:$0xff] %v13660_v18 }
 0xa5e   : > { %v13662_v36 = vpop.permute.xlu1 %6837  ;;  %v13664_v49 = vpop.permute.xlu0 %6839 }
 0xa5f   : > { %15352 = vst [vmem:[#allocation286_spill] sm:$0xff] %v13662_v36  ;;  %15353 = vst [vmem:[#allocation287_spill] sm:$0xff] %v13664_v49 }
 0xa62   : > { %v13666_v58 = vpop.permute.xlu1 %6841  ;;  %v13668_v4 = vpop.permute.xlu0 %6843 }
 0xa63   : > { %15354 = vst [vmem:[#allocation288_spill] sm:$0xff] %v13666_v58  ;;  %15355 = vst [vmem:[#allocation289_spill] sm:$0xff] %v13668_v4 }
 0xa66   : > { %v13670_v16 = vpop.permute.xlu1 %6845  ;;  %v13672_v34 = vpop.permute.xlu0 %6847 }
 0xa67   : > { %15356 = vst [vmem:[#allocation290_spill] sm:$0xff] %v13670_v16  ;;  %15357 = vst [vmem:[#allocation291_spill] sm:$0xff] %v13672_v34  ;;  %v15363_v16 = vld [vmem:[#allocation13_spill] sm:$0xff] }
 0xa6a   : > { %v13674_v42 = vpop.permute.xlu1 %6849  ;;  %v13676_v8 = vpop.permute.xlu0 %6851 }
 0xa6b   : > { %15358 = vst [vmem:[#allocation292_spill] sm:$0xff] %v13674_v42  ;;  %15359 = vst [vmem:[#allocation293_spill] sm:$0xff] %v13676_v8 }
 0xa6e   : > { %v13678_v56 = vpop.permute.xlu1 %6853  ;;  %v13680_v10 = vpop.permute.xlu0 %6855 }
 0xa6f   : > { %15360 = vst [vmem:[#allocation294_spill] sm:$0xff] %v13678_v56  ;;  %15361 = vst [vmem:[#allocation295_spill] sm:$0xff] %v13680_v10 }
 0xa7b   : > { %v7083_v18 = vpop.permute.xlu1 %7082  ;;  %v7087_v58 = vpop.permute.xlu0 %7086 }
 0xa7c   : > { %v7113_v36 = vmul.f32 %v7083_v18, %v13596_v20  ;;  %v7114_v49 = vmul.f32 %v7083_v18, %v13599_v0  ;;  %v7115_v34 = vmul.f32 %v7087_v58, %v13596_v20  ;;  %v7116_v42 = vmul.f32 %v7087_v58, %v13599_v0 }
 0xa7e   : > { %7147 = vrot.lane.b32.xlu0 %v7114_v49, %s8524_s24  ;;  %7145 = vrot.lane.b32.xlu1 %v7113_v36, %s8524_s24 }
 0xa7f   : > { %v7091_v8 = vpop.permute.xlu1 %7090  ;;  %v7095_v56 = vpop.permute.xlu0 %7094 }
 0xa80   : > { %v7117_v10 = vmul.f32 %v7091_v8, %v13596_v20  ;;  %v7118_v18 = vmul.f32 %v7091_v8, %v13599_v0  ;;  %v7119_v36 = vmul.f32 %v7095_v56, %v13596_v20  ;;  %v7120_v49 = vmul.f32 %v7095_v56, %v13599_v0  ;;  %v13707_v56 = vld [vmem:[%s10813_s3] sm:$0xff] }
 0xa81   : > { %v13749_v37 = vmul.f32 %v13707_v56, %v15368_v62  ;;  %v13755_v52 = vmul.f32 %v13707_v56, %v15372_v13 }
 0xa82   : > { %7151 = vrot.lane.b32.xlu0 %v7116_v42, %s8524_s24  ;;  %7149 = vrot.lane.b32.xlu1 %v7115_v34, %s8524_s24  ;;  %v13699_v34 = vld [vmem:[%s10813_s3 + $0x8] sm:$0xff]  ;;  %v15362_v42 = vld [vmem:[#allocation19_spill] sm:$0xff] }
 0xa83   : > { %v7099_v58 = vpop.permute.xlu1 %7098  ;;  %v377_v8 = vmul.f32 %v13699_v34, %v15362_v42  ;;  %v7103_v45 = vpop.permute.xlu0 %7102  ;;  %v381_v22 = vmul.f32 %v13699_v34, %v15364_v28  ;;  %15369 = vst [vmem:[#allocation19_spill] sm:$0xff] %v13749_v37  ;;  %v13761_v26 = vmul.f32 %v13699_v34, %v15368_v62 }
 0xa84   : > { %v7123_v14 = vmul.f32 %v7103_v45, %v13596_v20  ;;  %v7124_v48 = vmul.f32 %v7103_v45, %v13599_v0  ;;  %v385_v45 = vmul.f32 %v13699_v34, %v15372_v13  ;;  %v15378_v13 = vld [vmem:[#allocation31_spill] sm:$0xff] }
 0xa85   : > { %v718_v4 = vadd.f32 %v15363_v16, %v377_v8  ;;  %v15365_v16 = vld [vmem:[#allocation47_spill] sm:$0xff] }
 0xa86   : > { %7155 = vrot.lane.b32.xlu0 %v7118_v18, %s8524_s24  ;;  %7153 = vrot.lane.b32.xlu1 %v7117_v10, %s8524_s24  ;;  %v7121_v18 = vmul.f32 %v7099_v58, %v13596_v20  ;;  %v7122_v10 = vmul.f32 %v7099_v58, %v13599_v0  ;;  %v13720_v58 = vld [vmem:[%s10813_s3 + $0x1] sm:$0xff] }
 0xa87   : > { %v13724_v8 = vmul.f32 %v13720_v58, %v15365_v16  ;;  %v13733_v5 = vmul.f32 %v13720_v58, %v15366_v19  ;;  %v1043_v1 = vadd.f32 %v15371_v9, %v718_v4  ;;  %v7107_v23 = vpop.permute.xlu1 %7106  ;;  %v15376_v4 = vld [vmem:[#allocation38_spill] sm:$0xff] }
 0xa88   : > { %v7125_v62 = vmul.f32 %v7107_v23, %v13596_v20 }
 0xa8a   : > { %7159 = vrot.lane.b32.xlu0 %v7120_v49, %s8524_s24  ;;  %7157 = vrot.lane.b32.xlu1 %v7119_v36, %s8524_s24  ;;  %v376_v49 = vmul.f32 %v13707_v56, %v15362_v42  ;;  %v13713_v36 = vmul.f32 %v13707_v56, %v15364_v28  ;;  %v1931_v42 = vmul.f32 %v13727_v41, %v15365_v16 }
 0xa8b   : > { %v13737_v28 = vmul.f32 %v13727_v41, %v15366_v19 }
 0xa8c   : > { %v717_v19 = vadd.f32 %v15370_v27, %v376_v49  ;;  %v13775_v49 = vmul.f32 %v13720_v58, %v15376_v4 }
 0xa8e   : > { %7163 = vrot.lane.b32.xlu0 %v7122_v10, %s8524_s24  ;;  %7161 = vrot.lane.b32.xlu1 %v7121_v18, %s8524_s24  ;;  %v15367_v18 = vld [vmem:[#allocation21_spill] sm:$0xff]  ;;  %15377 = vst [vmem:[#allocation47_spill] sm:$0xff] %v13775_v49  ;;  %v1042_v46 = vadd.f32 %v15378_v13, %v717_v19  ;;  %v13792_v49 = vmul.f32 %v13727_v41, %v15376_v4  ;;  %v15382_v19 = vld [vmem:[#allocation67_spill] sm:$0xff] }
 0xa8f   : > { %v378_v10 = vmul.f32 %v13707_v56, %v15367_v18  ;;  %v379_v16 = vmul.f32 %v13699_v34, %v15367_v18  ;;  %v15373_v18 = vld [vmem:[#allocation40_spill] sm:$0xff]  ;;  %v1366_v13 = vadd.f32 %v15382_v19, %v1043_v1  ;;  %v15387_v1 = vld [vmem:[#allocation57_spill] sm:$0xff] }
 0xa90   : > { %v13767_v27 = vmul.f32 %v13720_v58, %v15373_v18  ;;  %v13771_v9 = vmul.f32 %v13727_v41, %v15373_v18  ;;  %v13788_v18 = vmul.f32 %v13727_v41, %v15379_v21  ;;  %15381 = vst [vmem:[#allocation21_spill] sm:$0xff] %v13792_v49  ;;  %v1365_v19 = vadd.f32 %v15387_v1, %v1042_v46 }
 0xa91   : > { %v720_v49 = vadd.f32 %v12167_v43, %v379_v16  ;;  %v722_v43 = vadd.f32 %v12190_v12, %v381_v22  ;;  %v726_v46 = vadd.f32 %v12241_v50, %v385_v45  ;;  %v7376_v22 = vrot.slane %v7357_v17, %v15068_v54 }
 0xa92   : > { %7167 = vrot.lane.b32.xlu0 %v7124_v48, %s8524_s24  ;;  %7165 = vrot.lane.b32.xlu1 %v7123_v14, %s8524_s24  ;;  %15374 = vst [vmem:[#allocation13_spill] sm:$0xff] %v13767_v27  ;;  %15375 = vst [vmem:[#allocation17_spill] sm:$0xff] %v13771_v9  ;;  %v7126_v48 = vmul.f32 %v7107_v23, %v13599_v0  ;;  %v7320_v14 = vcombine.high %v12669_v11, %v12669_v11  ;;  %v7111_v9 = vpop.permute.xlu0 %7110  ;;  %v15383_v23 = vld [vmem:[#allocation8_spill] sm:$0xff] }
 0xa93   : > { %v13784_v27 = vmul.f32 %v13720_v58, %v15379_v21  ;;  %v13797_v37 = vmul.f32 %v13720_v58, %v15383_v23  ;;  %v13801_v11 = vmul.f32 %v13727_v41, %v15383_v23  ;;  %v15386_v21 = vld [vmem:[#allocation29_spill] sm:$0xff]  ;;  %v7127_v25 = vmul.f32 %v7111_v9, %v13596_v20 }
 0xa94   : > { %v1691_v4 = vadd.f32 %v15386_v21, %v1366_v13  ;;  %v7128_v23 = vmul.f32 %v7111_v9, %v13599_v0  ;;  %v7334_v30 = vrot.slane %v7320_v14, %v15136_v57  ;;  %v1690_v9 = vadd.f32 %v12091_v38, %v1365_v19  ;;  %v15390_v38 = vld [vmem:[#allocation55_spill] sm:$0xff] }
 0xa95   : > { %15380 = vst [vmem:[#allocation9_spill] sm:$0xff] %v13784_v27  ;;  %15384 = vst [vmem:[#allocation44_spill] sm:$0xff] %v13797_v37  ;;  %v15385_v27 = vld [vmem:[#allocation36_spill] sm:$0xff]  ;;  %v7343_v37 = vrot.slane %v7327_v7, %v15136_v57  ;;  %v15389_v7 = vld [vmem:[#allocation30_spill] sm:$0xff]  ;;  %v719_v14 = vadd.f32 %v12043_v29, %v378_v10  ;;  %v1045_v12 = vadd.f32 %v12131_v55, %v720_v49 }
 0xa96   : > { %v13805_v2 = vmul.f32 %v13707_v56, %v15385_v27  ;;  %7171 = vrot.lane.b32.xlu0 %v7126_v48, %s8524_s24  ;;  %7169 = vrot.lane.b32.xlu1 %v7125_v62, %s8524_s24  ;;  %v13819_v48 = vmul.f32 %v13699_v34, %v15385_v27  ;;  %v15388_v62 = vld [vmem:[#allocation28_spill] sm:$0xff]  ;;  %v13829_v16 = vmul.f32 %v13707_v56, %v15389_v7 }
 0xa97   : > { %v13823_v13 = vmul.f32 %v13720_v58, %v15388_v62  ;;  %v13833_v44 = vmul.f32 %v13727_v41, %v15388_v62  ;;  %v1947_v27 = vadd.f32 %v1931_v42, %v1691_v4  ;;  %v7372_v50 = vrot.slane %v7343_v37, %v15068_v54  ;;  %v15393_v4 = vld [vmem:[#allocation27_spill] sm:$0xff] }
 0xa98   : > { %v7367_v45 = vcombine.high %v7357_v17, %v7357_v17  ;;  %v7365_v21 = vcombine.high %v7343_v37, %v7343_v37  ;;  %v7336_v1 = vcombine.high %v7334_v30, %v7334_v30  ;;  %v383_v62 = vmul.f32 %v13699_v34, %v15389_v7  ;;  %v15391_v37 = vld [vmem:[#allocation61_spill] sm:$0xff] }
 0xa99   : > { %v13846_v19 = vmul.f32 %v13707_v56, %v15390_v38  ;;  %v1051_v29 = vadd.f32 %v12170_v33, %v726_v46  ;;  %v13852_v55 = vmul.f32 %v13699_v34, %v15390_v38  ;;  %v1946_v42 = vadd.f32 %v13724_v8, %v1690_v9  ;;  %v15392_v56 = vld [vmem:[#allocation10_spill] sm:$0xff]  ;;  %v15395_v7 = vld [vmem:[#allocation45_spill] sm:$0xff] }
 0xa9a   : > { %7175 = vrot.lane.b32.xlu0 %v7128_v23, %s8524_s24  ;;  %7173 = vrot.lane.b32.xlu1 %v7127_v25, %s8524_s24  ;;  %v1047_v25 = vadd.f32 %v12151_v47, %v722_v43  ;;  %v1044_v17 = vadd.f32 %v12275_v31, %v719_v14  ;;  %v13858_v10 = vmul.f32 %v13720_v58, %v15391_v37  ;;  %v15394_v58 = vld [vmem:[#allocation37_spill] sm:$0xff]  ;;  %s8535_s24 = smov [#allocation2]  }
 0xa9b   : > { %v2267_v49 = vadd.f32 %v15392_v56, %v1947_v27  ;;  %v1368_v47 = vadd.f32 %v15393_v4, %v1045_v12  ;;  %v7647_v33 = vrot.slane %v12671_v35, %v15136_v57  ;;  %v7384_v34 = vrot.slane %v7367_v45, %v15068_v54  ;;  %v15396_v27 = vld [vmem:[#allocation68_spill] sm:$0xff]  ;;  %v15397_v12 = vld [vmem:[#allocation69_spill] sm:$0xff]  ;;  %s8465_s25 = sshll.u32 %s8535_s24, 4  ;;  %s8466_s25 = int_to_ptr.vmem [resolvable:$false] %s8465_s25 }
 0xa9c   : > { %v7380_v23 = vrot.slane %v7365_v21, %v15068_v54  ;;  %v7364_v8 = vrot.slane %v7336_v1, %v15136_v57  ;;  %v7350_v31 = vrot.slane %v7334_v30, %v15136_v57  ;;  %v721_v43 = vadd.f32 %v12061_v3, %v13713_v36  ;;  %v15398_v45 = vld [vmem:[#allocation60_spill] sm:$0xff]  ;;  %s8467_s26 = scalar_lea.vmem %s8466_s25, 4096  ;;  %p8468_p0 = scmp.lt.s32.totalorder %s14461_s16, %s8466_s25 }
 0xa9d   : > { %v725_v46 = vadd.f32 %v15394_v58, %v13755_v52  ;;  %v1370_v9 = vadd.f32 %v15395_v7, %v1047_v25  ;;  %v1374_v14 = vadd.f32 %v15396_v27, %v1051_v29  ;;  %v1367_v21 = vadd.f32 %v15398_v45, %v1044_v17  ;;  %v15400_v56 = vld [vmem:[#allocation24_spill] sm:$0xff]  ;;  %v15404_v27 = vld [vmem:[#allocation85_spill] sm:$0xff]  ;;  %p8469_p1 = scmp.lt.s32.totalorder %s8467_s26, %s8461_s23 }
 0xa9e   : > { %7406 = vperm.xlu0 %8339, %v7376_v22   ;;  %7402 = vperm.xlu1 %8340, %v7372_v50   ;;  %v2266_v50 = vadd.f32 %v15397_v12, %v1946_v42  ;;  %v1693_v22 = vadd.f32 %v12282_v24, %v1368_v47  ;;  %v7655_v3 = vcombine.high %v7647_v33, %v7647_v33  ;;  %v15399_v42 = vld [vmem:[#allocation32_spill] sm:$0xff]  ;;  %v15407_v45 = vld [vmem:[#allocation53_spill] sm:$0xff] }
 0xa9f   : > { %v1695_v30 = vadd.f32 %v12312_v63, %v1370_v9  ;;  %v1699_v1 = vadd.f32 %v12341_v53, %v1374_v14  ;;  %v7640_v52 = vcombine.high %v12671_v35, %v12671_v35  ;;  %v7392_v36 = vrot.slane %v7364_v8, %v15068_v54  ;;  %p8470_p2 = por %p8469_p1, %p8468_p0 }
 0xaa0   : > { %v7388_v38 = vrot.slane %v7350_v31, %v15068_v54  ;;  %v7368_v25 = vcombine.high %v7364_v8, %v7364_v8  ;;  %v7366_v29 = vcombine.high %v7350_v31, %v7350_v31  ;;  %v13885_v24 = vmul.f32 %v13727_v41, %v15391_v37  ;;  %v15401_v8 = vld [vmem:[#allocation62_spill] sm:$0xff] }
 0xaa1   : > { %v13888_v17 = vadd.f32 %v15399_v42, %v2267_v49  ;;  %v1046_v63 = vadd.f32 %v12318_v40, %v721_v43  ;;  %v1050_v53 = vadd.f32 %v12355_v32, %v725_v46  ;;  %v13893_v4 = vadd.f32 %v15400_v56, %v2266_v50  ;;  %p8471_p3 = pnand %p8470_p2, %p8464_p13 }
 0xaa2   : > { %7414 = vperm.xlu0 %8339, %v7384_v34   ;;  %7410 = vperm.xlu1 %8340, %v7380_v23   ;;  %v1692_v35 = vadd.f32 %v12468_v60, %v1367_v21  ;;  %v1949_v47 = vadd.f32 %v13737_v28, %v1693_v22  ;;  %v1951_v34 = vadd.f32 %v13788_v18, %v1695_v30  ;;  %v15409_v30 = vld [vmem:[#allocation43_spill] sm:$0xff] }
 0xaa3   : > { %v1955_v41 = vadd.f32 %v13801_v11, %v1699_v1  ;;  %v7663_v37 = vrot.slane %v7647_v33, %v15136_v57  ;;  %v7654_v49 = vrot.slane %v7640_v52, %v15136_v57  ;;  %v732_v40 = vadd.f32 %v12727_v61, %v13819_v48  ;;  %v15402_v11 = vld [vmem:[#allocation66_spill] sm:$0xff]  ;;  %v15403_v33 = vld [vmem:[#allocation5_spill] sm:$0xff]  ;;  %v15412_v52 = vld [vmem:[#allocation100_spill] sm:$0xff] }
 0xaa4   : > { %v7400_v32 = vrot.slane %v7368_v25, %v15068_v54  ;;  %v7396_v23 = vrot.slane %v7366_v29, %v15068_v54  ;;  %v7677_v60 = vrot.slane %v7655_v3, %v15136_v57  ;;  %v2269_v28 = vadd.f32 %v12361_v15, %v1949_v47  ;;  %v15410_v3 = vld [vmem:[#allocation19_spill] sm:$0xff]  ;;  %v15414_v29 = vld [vmem:[#allocation25_spill] sm:$0xff] }
 0xaa5   : > { %v1369_v31 = vadd.f32 %v15401_v8, %v1046_v63  ;;  %v2271_v18 = vadd.f32 %v12383_v39, %v1951_v34  ;;  %v1373_v43 = vadd.f32 %v15402_v11, %v1050_v53  ;;  %v13911_v58 = vadd.f32 %v15403_v33, %v1955_v41  ;;  %v15415_v63 = vld [vmem:[#allocation22_spill] sm:$0xff]  ;;  %v15421_v8 = vld [vmem:[#allocation9_spill] sm:$0xff]  ;;  %v15422_v11 = vld [vmem:[#allocation44_spill] sm:$0xff] }
 0xaa6   : > { %7422 = vperm.xlu0 %8339, %v7392_v36   ;;  %7418 = vperm.xlu1 %8340, %v7388_v38   ;;  %v1948_v46 = vadd.f32 %v13733_v5, %v1692_v35  ;;  %v724_v61 = vadd.f32 %v12623_v6, %v383_v62  ;;  %v728_v48 = vadd.f32 %v12629_v51, %v13761_v26  ;;  %v15405_v5 = vld [vmem:[#allocation65_spill] sm:$0xff]  ;;  %v15406_v6 = vld [vmem:[#allocation35_spill] sm:$0xff]  ;;  %v15413_v38 = vld [vmem:[#allocation12_spill] sm:$0xff] }
 0xaa7   : > { %v7692_v15 = vrot.slane %v7663_v37, %v15068_v54  ;;  %v7685_v7 = vcombine.high %v7663_v37, %v7663_v37  ;;  %v7656_v9 = vcombine.high %v7654_v49, %v7654_v49  ;;  %v731_v39 = vadd.f32 %v12650_v59, %v13805_v2  ;;  %v15408_v51 = vld [vmem:[#allocation83_spill] sm:$0xff]  ;;  %v15417_v41 = vld [vmem:[#allocation6_spill] sm:$0xff] }
 0xaa8   : > { %v1057_v14 = vadd.f32 %v15404_v27, %v732_v40  ;;  %v7696_v12 = vrot.slane %v7677_v60, %v15068_v54  ;;  %v7687_v50 = vcombine.high %v7677_v60, %v7677_v60  ;;  %v1694_v22 = vadd.f32 %v15405_v5, %v1369_v31  ;;  %v15411_v2 = vld [vmem:[#allocation51_spill] sm:$0xff]  ;;  %v15418_v40 = vld [vmem:[#allocation84_spill] sm:$0xff]  ;;  %v15423_v33 = vld [vmem:[#allocation70_spill] sm:$0xff] }
 0xaa9   : > { %v1698_v62 = vadd.f32 %v15406_v6, %v1373_v43  ;;  %v13925_v21 = vadd.f32 %v15407_v45, %v2269_v28  ;;  %v730_v26 = vadd.f32 %v15408_v51, %v13852_v55  ;;  %v723_v1 = vadd.f32 %v15409_v30, %v13829_v16  ;;  %v15416_v55 = vld [vmem:[#allocation39_spill] sm:$0xff]  ;;  %v15420_v60 = vld [vmem:[#allocation88_spill] sm:$0xff]  ;;  %v15428_v6 = vld [vmem:[#allocation50_spill] sm:$0xff] }
 0xaaa   : > { %7430 = vperm.xlu0 %8339, %v7400_v32   ;;  %7426 = vperm.xlu1 %8340, %v7396_v23   ;;  %v727_v59 = vadd.f32 %v15411_v2, %v15410_v3  ;;  %v1056_v36 = vadd.f32 %v15412_v52, %v731_v39  ;;  %v729_v25 = vadd.f32 %v15413_v38, %v13846_v19  ;;  %v15419_v23 = vld [vmem:[#allocation86_spill] sm:$0xff]  ;;  %v15429_v45 = vld [vmem:[#allocation16_spill] sm:$0xff]  ;;  %v15432_v3 = vld [vmem:[#allocation71_spill] sm:$0xff] }
 0xaab   : > { %v1049_v42 = vadd.f32 %v15414_v29, %v724_v61  ;;  %v1053_v53 = vadd.f32 %v15415_v63, %v728_v48  ;;  %v7684_v56 = vrot.slane %v7656_v9, %v15136_v57  ;;  %v1380_v35 = vadd.f32 %v15416_v55, %v1057_v14  ;;  %v15424_v48 = vld [vmem:[#allocation20_spill] sm:$0xff]  ;;  %v15426_v9 = vld [vmem:[#allocation7_spill] sm:$0xff]  ;;  %v15438_v55 = vld [vmem:[#allocation93_spill] sm:$0xff] }
 0xaac   : > { %v7704_v16 = vrot.slane %v7687_v50, %v15068_v54  ;;  %v7700_v47 = vrot.slane %v7685_v7, %v15068_v54  ;;  %v7670_v34 = vrot.slane %v7654_v49, %v15136_v57  ;;  %v1055_v37 = vadd.f32 %v15417_v41, %v730_v26  ;;  %v15425_v7 = vld [vmem:[#allocation11_spill] sm:$0xff]  ;;  %v15430_v26 = vld [vmem:[#allocation46_spill] sm:$0xff] }
 0xaad   : > { %v1048_v32 = vadd.f32 %v15418_v40, %v723_v1  ;;  %v1052_v19 = vadd.f32 %v15419_v23, %v727_v59  ;;  %v1054_v28 = vadd.f32 %v15420_v60, %v729_v25  ;;  %v1950_v31 = vadd.f32 %v15421_v8, %v1694_v22  ;;  %v15427_v14 = vld [vmem:[#allocation87_spill] sm:$0xff]  ;;  %v15433_v59 = vld [vmem:[#allocation73_spill] sm:$0xff]  ;;  %v15440_v40 = vld [vmem:[#allocation48_spill] sm:$0xff] }
 0xaae   : > { %7726 = vperm.xlu0 %8339, %v7696_v12   ;;  %7722 = vperm.xlu1 %8340, %v7692_v15   ;;  %v1954_v43 = vadd.f32 %v15422_v11, %v1698_v62  ;;  %v1379_v61 = vadd.f32 %v15423_v33, %v1056_v36  ;;  %v2268_v15 = vadd.f32 %v15424_v48, %v1948_v46  ;;  %v15431_v1 = vld [vmem:[#allocation23_spill] sm:$0xff]  ;;  %v15434_v36 = vld [vmem:[#allocation101_spill] sm:$0xff]  ;;  %v15441_v23 = vld [vmem:[#allocation72_spill] sm:$0xff] }
 0xaaf   : > { %v1372_v49 = vadd.f32 %v15425_v7, %v1049_v42  ;;  %v1376_v39 = vadd.f32 %v15426_v9, %v1053_v53  ;;  %v7712_v27 = vrot.slane %v7684_v56, %v15068_v54  ;;  %v1705_v12 = vadd.f32 %v15427_v14, %v1380_v35  ;;  %v15435_v25 = vld [vmem:[#allocation75_spill] sm:$0xff]  ;;  %v15437_v53 = vld [vmem:[#allocation92_spill] sm:$0xff]  ;;  %v15443_v8 = vld [vmem:[#allocation74_spill] sm:$0xff] }
 0xab0   : > { %v7708_v50 = vrot.slane %v7670_v34, %v15068_v54  ;;  %v7688_v5 = vcombine.high %v7684_v56, %v7684_v56  ;;  %v7686_v22 = vcombine.high %v7670_v34, %v7670_v34  ;;  %v1378_v62 = vadd.f32 %v15428_v6, %v1055_v37  ;;  %v15436_v42 = vld [vmem:[#allocation91_spill] sm:$0xff]  ;;  %v15442_v60 = vld [vmem:[#allocation52_spill] sm:$0xff]  ;;  %v15444_v33 = vld [vmem:[#allocation17_spill] sm:$0xff] }
 0xab1   : > { %v1371_v51 = vadd.f32 %v15429_v45, %v1048_v32  ;;  %v1375_v30 = vadd.f32 %v15430_v26, %v1052_v19  ;;  %v1377_v46 = vadd.f32 %v15431_v1, %v1054_v28  ;;  %v1697_v2 = vadd.f32 %v15432_v3, %v1372_v49  ;;  %v15445_v48 = vld [vmem:[#allocation21_spill] sm:$0xff]  ;;  %v15449_v14 = vld [vmem:[#allocation76_spill] sm:$0xff]  ;;  %v15452_v6 = vld [vmem:[#allocation79_spill] sm:$0xff] }
 0xab2   : > { %7734 = vperm.xlu0 %8339, %v7704_v16   ;;  %7730 = vperm.xlu1 %8340, %v7700_v47   ;;  %v1701_v52 = vadd.f32 %v15433_v59, %v1376_v39  ;;  %v1704_v38 = vadd.f32 %v15434_v36, %v1379_v61  ;;  %v1703_v29 = vadd.f32 %v15435_v25, %v1378_v62  ;;  %v15439_v16 = vld [vmem:[#allocation56_spill] sm:$0xff]  ;;  %v15446_v49 = vld [vmem:[#allocation13_spill] sm:$0xff]  ;;  %v15453_v62 = vld [vmem:[#allocation94_spill] sm:$0xff] }
 0xab3   : > { %v1696_v63 = vadd.f32 %v15436_v42, %v1371_v51  ;;  %v1700_v56 = vadd.f32 %v15437_v53, %v1375_v30  ;;  %v1702_v35 = vadd.f32 %v15438_v55, %v1377_v46  ;;  %v2591_v47 = vadd.f32 %v15439_v16, %v2271_v18  ;;  %v15454_v51 = vld [vmem:[#allocation95_spill] sm:$0xff]  ;;  %v15455_v26 = vld [vmem:[#allocation96_spill] sm:$0xff]  ;;  %v15456_v1 = vld [vmem:[#allocation34_spill] sm:$0xff] }
 0xab4   : > { %v1961_v34 = vadd.f32 %v13833_v44, %v1705_v12  ;;  %v7720_v41 = vrot.slane %v7688_v5, %v15068_v54  ;;  %v7716_v37 = vrot.slane %v7686_v22, %v15068_v54  ;;  %v2270_v32 = vadd.f32 %v15440_v40, %v1950_v31  ;;  %v15447_v31 = vld [vmem:[#allocation47_spill] sm:$0xff]  ;;  %v15450_v12 = vld [vmem:[#allocation78_spill] sm:$0xff]  ;;  %v15451_v5 = vld [vmem:[#allocation89_spill] sm:$0xff] }
 0xab5   : > { %v2274_v19 = vadd.f32 %v15441_v23, %v1954_v43  ;;  %v2595_v28 = vadd.f32 %v15442_v60, %v13911_v58  ;;  %v2588_v11 = vadd.f32 %v15443_v8, %v2268_v15  ;;  %v1953_v61 = vadd.f32 %v15444_v33, %v1697_v2  ;;  %v15457_v3 = vld [vmem:[#allocation80_spill] sm:$0xff]  ;;  %v15458_v2 = vld [vmem:[#allocation81_spill] sm:$0xff] }
 0xab6   : > { %7742 = vperm.xlu0 %8339, %v7712_v27   ;;  %7738 = vperm.xlu1 %8340, %v7708_v50   ;;  %v1957_v7 = vadd.f32 %v15445_v48, %v1701_v52  ;;  %v1960_v18 = vadd.f32 %v13823_v13, %v1704_v38  ;;  %v1959_v44 = vadd.f32 %v13885_v24, %v1703_v29  ;;  %v15448_v27 = vld [vmem:[#allocation77_spill] sm:$0xff]  ;;  %v15459_v52 = vld [vmem:[#allocation102_spill] sm:$0xff] }
 0xab7   : > { %v1952_v9 = vadd.f32 %v15446_v49, %v1696_v63  ;;  %v1956_v39 = vadd.f32 %v15447_v31, %v1700_v56  ;;  %v1958_v43 = vadd.f32 %v13858_v10, %v1702_v35  ;;  %v2590_v58 = vadd.f32 %v15448_v27, %v2270_v32  ;;  %v15460_v38 = vld [vmem:[#allocation82_spill] sm:$0xff]  ;;  %v15461_v29 = vld [vmem:[#allocation97_spill] sm:$0xff]  ;;  %v15463_v56 = vld [vmem:[#allocation99_spill] sm:$0xff] }
 0xab8   : > { %v2273_v15 = vadd.f32 %v15449_v14, %v1953_v61  ;;  %v2277_v50 = vadd.f32 %v15450_v12, %v1957_v7  ;;  %v2281_v22 = vadd.f32 %v15451_v5, %v1961_v34  ;;  %v2279_v13 = vadd.f32 %v15452_v6, %v1959_v44  ;;  %v15462_v63 = vld [vmem:[#allocation98_spill] sm:$0xff]  ;;  %v15465_v34 = vld [vmem:[#allocation105_spill] sm:$0xff]  ;;  %v15467_v32 = vld [vmem:[#allocation107_spill] sm:$0xff] }
 0xab9   : > { %v2272_v45 = vadd.f32 %v15453_v62, %v1952_v9  ;;  %v2276_v24 = vadd.f32 %v15454_v51, %v1956_v39  ;;  %v2278_v30 = vadd.f32 %v15455_v26, %v1958_v43  ;;  %v2594_v46 = vadd.f32 %v15456_v1, %v2274_v19  ;;  %v15464_v35 = vld [vmem:[#allocation90_spill] sm:$0xff]  ;;  %v15468_v19 = vld [vmem:[#allocation104_spill] sm:$0xff]  ;;  %v15469_v8 = vld [vmem:[#allocation109_spill] sm:$0xff] }
 0xaba   : > { %7750 = vperm.xlu0 %8339, %v7720_v41   ;;  %7746 = vperm.xlu1 %8340, %v7716_v37   ;;  %v2593_v10 = vadd.f32 %v15457_v3, %v2273_v15  ;;  %v2597_v59 = vadd.f32 %v15458_v2, %v2277_v50  ;;  %v2280_v36 = vadd.f32 %v15459_v52, %v1960_v18  ;;  %v15466_v37 = vld [vmem:[#allocation103_spill] sm:$0xff]  ;;  %v15470_v61 = vld [vmem:[#allocation106_spill] sm:$0xff]  ;;  %v15472_v44 = vld [vmem:[#allocation108_spill] sm:$0xff] }
 0xabb   : > { %v2599_v25 = vadd.f32 %v15460_v38, %v2279_v13  ;;  %v2592_v42 = vadd.f32 %v15461_v29, %v2272_v45  ;;  %v2596_v53 = vadd.f32 %v15462_v63, %v2276_v24  ;;  %v2598_v55 = vadd.f32 %v15463_v56, %v2278_v30  ;;  %v15471_v7 = vld [vmem:[#allocation111_spill] sm:$0xff]  ;;  %v15473_v9 = vld [vmem:[#allocation113_spill] sm:$0xff]  ;;  %v15474_v39 = vld [vmem:[#allocation110_spill] sm:$0xff] }
 0xabc   : > { %v2601_v16 = vadd.f32 %v15464_v35, %v2281_v22  ;;  %v2907_v41 = vadd.f32 %v15465_v34, %v13888_v17  ;;  %v2600_v40 = vadd.f32 %v15466_v37, %v2280_v36  ;;  %v2909_v23 = vadd.f32 %v15467_v32, %v13925_v21  ;;  %v15475_v43 = vld [vmem:[#allocation115_spill] sm:$0xff]  ;;  %v15476_v14 = vld [vmem:[#allocation112_spill] sm:$0xff]  ;;  %v15477_v21 = vld [vmem:[#allocation117_spill] sm:$0xff] }
 0xabd   : > { %v2906_v60 = vadd.f32 %v15468_v19, %v13893_v4  ;;  %v2911_v33 = vadd.f32 %v15469_v8, %v2591_v47  ;;  %v2908_v48 = vadd.f32 %v15470_v61, %v2588_v11  ;;  %v2913_v18 = vadd.f32 %v15471_v7, %v2593_v10  ;;  %v15478_v50 = vld [vmem:[#allocation114_spill] sm:$0xff]  ;;  %v15479_v5 = vld [vmem:[#allocation116_spill] sm:$0xff]  ;;  %v15481_v6 = vld [vmem:[#allocation119_spill] sm:$0xff] }
 0xabe   : > { %v2910_v49 = vadd.f32 %v15472_v44, %v2590_v58  ;;  %v2915_v31 = vadd.f32 %v15473_v9, %v2595_v28  ;;  %v2912_v17 = vadd.f32 %v15474_v39, %v2592_v42  ;;  %v2917_v27 = vadd.f32 %v15475_v43, %v2597_v59  ;;  %v15480_v22 = vld [vmem:[#allocation118_spill] sm:$0xff]  ;;  %v15482_v62 = vld [vmem:[#allocation15_spill] sm:$0xff]  ;;  %v15484_v51 = vld [vmem:[#allocation120_spill] sm:$0xff] }
 0xabf   : > { %v2914_v15 = vadd.f32 %v15476_v14, %v2594_v46  ;;  %v2919_v12 = vadd.f32 %v15477_v21, %v2599_v25  ;;  %v2916_v4 = vadd.f32 %v15478_v50, %v2596_v53  ;;  %v2918_v47 = vadd.f32 %v15479_v5, %v2598_v55  ;;  %v15483_v45 = vld [vmem:[#allocation14_spill] sm:$0xff]  ;;  %v15485_v26 = vld [vmem:[#allocation121_spill] sm:$0xff]  ;;  %v15487_v3 = vld [vmem:[#allocation123_spill] sm:$0xff] }
 0xac0   : > { %v2920_v11 = vadd.f32 %v15480_v22, %v2600_v40  ;;  %v2921_v13 = vadd.f32 %v15481_v6, %v2601_v16  ;;  %v3226_v58 = vadd.f32 %v15482_v62, %v2906_v60  ;;  %v3227_v28 = vadd.f32 %v15483_v45, %v2907_v41  ;;  %v15486_v1 = vld [vmem:[#allocation122_spill] sm:$0xff]  ;;  %v15488_v2 = vld [vmem:[#allocation124_spill] sm:$0xff]  ;;  %v15489_v52 = vld [vmem:[#allocation125_spill] sm:$0xff] }
 0xac1   : > { %v3228_v24 = vadd.f32 %v15484_v51, %v2908_v48  ;;  %v3229_v30 = vadd.f32 %v15485_v26, %v2909_v23  ;;  %v3230_v46 = vadd.f32 %v15486_v1, %v2910_v49  ;;  %v3231_v10 = vadd.f32 %v15487_v3, %v2911_v33  ;;  %v15490_v38 = vld [vmem:[#allocation126_spill] sm:$0xff]  ;;  %v15491_v29 = vld [vmem:[#allocation127_spill] sm:$0xff]  ;;  %v15492_v63 = vld [vmem:[#allocation128_spill] sm:$0xff] }
 0xac2   : > { %v3232_v59 = vadd.f32 %v15488_v2, %v2912_v17  ;;  %v3233_v36 = vadd.f32 %v15489_v52, %v2913_v18  ;;  %v3234_v25 = vadd.f32 %v15490_v38, %v2914_v15  ;;  %v3235_v42 = vadd.f32 %v15491_v29, %v2915_v31  ;;  %v15493_v56 = vld [vmem:[#allocation129_spill] sm:$0xff]  ;;  %v15494_v35 = vld [vmem:[#allocation130_spill] sm:$0xff]  ;;  %v15495_v34 = vld [vmem:[#allocation131_spill] sm:$0xff] }
 0xac3   : > { %v3236_v53 = vadd.f32 %v15492_v63, %v2916_v4  ;;  %v3237_v55 = vadd.f32 %v15493_v56, %v2917_v27  ;;  %v3238_v16 = vadd.f32 %v15494_v35, %v2918_v47  ;;  %v3239_v41 = vadd.f32 %v15495_v34, %v2919_v12  ;;  %v15496_v37 = vld [vmem:[#allocation132_spill] sm:$0xff]  ;;  %v15497_v32 = vld [vmem:[#allocation133_spill] sm:$0xff]  ;;  %v15498_v60 = vld [vmem:[#allocation134_spill] sm:$0xff] }
 0xac4   : > { %v3240_v40 = vadd.f32 %v15496_v37, %v2920_v11  ;;  %v3241_v23 = vadd.f32 %v15497_v32, %v2921_v13  ;;  %v8455_v19 = vld [vmem:[%s10813_s3 + $0x2] sm:$0xff]  ;;  %v8456_v33 = vld [vmem:[%s10813_s3 + $0xa] sm:$0xff]  ;;  %v15500_v44 = vld [vmem:[#allocation136_spill] sm:$0xff] }
 0xac5   : > { %v3466_v8 = vmul.f32 %v8455_v19, %v15498_v60  ;;  %v3467_v61 = vmul.f32 %v8456_v33, %v15498_v60  ;;  %v15499_v48 = vld [vmem:[#allocation135_spill] sm:$0xff]  ;;  %v3470_v49 = vmul.f32 %v8455_v19, %v15500_v44  ;;  %v3471_v9 = vmul.f32 %v8456_v33, %v15500_v44  ;;  %v15501_v31 = vld [vmem:[#allocation137_spill] sm:$0xff]  ;;  %v15502_v43 = vld [vmem:[#allocation138_spill] sm:$0xff] }
 0xac6   : > { %v3468_v7 = vmul.f32 %v8455_v19, %v15499_v48  ;;  %v3469_v18 = vmul.f32 %v8456_v33, %v15499_v48  ;;  %v3472_v39 = vmul.f32 %v8455_v19, %v15501_v31  ;;  %v3473_v17 = vmul.f32 %v8456_v33, %v15501_v31  ;;  %v15503_v15 = vld [vmem:[#allocation139_spill] sm:$0xff]  ;;  %v15504_v50 = vld [vmem:[#allocation140_spill] sm:$0xff]  ;;  %v15505_v47 = vld [vmem:[#allocation141_spill] sm:$0xff] }
 0xac7   : > { %v3474_v27 = vmul.f32 %v8455_v19, %v15502_v43  ;;  %v3475_v14 = vmul.f32 %v8456_v33, %v15502_v43  ;;  %v3476_v21 = vmul.f32 %v8455_v19, %v15503_v15  ;;  %v3477_v12 = vmul.f32 %v8456_v33, %v15503_v15  ;;  %v15506_v35 = vld [vmem:[#allocation41_spill] sm:$0xff]  ;;  %v15507_v37 = vld [vmem:[#allocation142_spill] sm:$0xff] }
 0xac8   : > { %v3478_v4 = vmul.f32 %v8455_v19, %v15504_v50  ;;  %v3479_v5 = vmul.f32 %v8456_v33, %v15504_v50  ;;  %v3480_v22 = vmul.f32 %v8455_v19, %v15505_v47  ;;  %v3481_v11 = vmul.f32 %v8456_v33, %v15505_v47  ;;  %v15519_v44 = vld [vmem:[#allocation154_spill] sm:$0xff]  ;;  %v15525_v50 = vld [vmem:[#allocation159_spill] sm:$0xff] }
 0xac9   : > { %v3482_v6 = vadd.f32 %v3466_v8, %v3226_v58  ;;  %v3483_v13 = vadd.f32 %v3467_v61, %v3227_v28  ;;  %v3484_v62 = vadd.f32 %v3468_v7, %v3228_v24  ;;  %v3485_v45 = vadd.f32 %v3469_v18, %v3229_v30  ;;  %v15508_v58 = vld [vmem:[#allocation143_spill] sm:$0xff]  ;;  %v15509_v24 = vld [vmem:[#allocation144_spill] sm:$0xff]  ;;  %v15515_v8 = vld [vmem:[#allocation150_spill] sm:$0xff] }
 0xaca   : > { %v3486_v51 = vadd.f32 %v3470_v49, %v3230_v46  ;;  %v3487_v26 = vadd.f32 %v3471_v9, %v3231_v10  ;;  %v3488_v1 = vadd.f32 %v3472_v39, %v3232_v59  ;;  %v3489_v3 = vadd.f32 %v3473_v17, %v3233_v36  ;;  %v15510_v46 = vld [vmem:[#allocation145_spill] sm:$0xff]  ;;  %v15511_v59 = vld [vmem:[#allocation146_spill] sm:$0xff]  ;;  %v15516_v61 = vld [vmem:[#allocation151_spill] sm:$0xff] }
 0xacb   : > { %v3490_v2 = vadd.f32 %v3474_v27, %v3234_v25  ;;  %v3491_v52 = vadd.f32 %v3475_v14, %v3235_v42  ;;  %v3492_v38 = vadd.f32 %v3476_v21, %v3236_v53  ;;  %v3493_v29 = vadd.f32 %v3477_v12, %v3237_v55  ;;  %v15512_v25 = vld [vmem:[#allocation147_spill] sm:$0xff]  ;;  %v15513_v53 = vld [vmem:[#allocation148_spill] sm:$0xff]  ;;  %v15518_v7 = vld [vmem:[#allocation153_spill] sm:$0xff] }
 0xacc   : > { %v3494_v63 = vadd.f32 %v3478_v4, %v3238_v16  ;;  %v3495_v56 = vadd.f32 %v3479_v5, %v3239_v41  ;;  %v3802_v34 = vadd.f32 %v15506_v35, %v3482_v6  ;;  %v3803_v32 = vadd.f32 %v15507_v37, %v3483_v13  ;;  %v15514_v16 = vld [vmem:[#allocation149_spill] sm:$0xff]  ;;  %v15520_v9 = vld [vmem:[#allocation155_spill] sm:$0xff]  ;;  %v15521_v39 = vld [vmem:[#allocation156_spill] sm:$0xff] }
 0xacd   : > { %v3496_v19 = vadd.f32 %v3480_v22, %v3240_v40  ;;  %v3497_v60 = vadd.f32 %v3481_v11, %v3241_v23  ;;  %v3804_v28 = vadd.f32 %v15508_v58, %v3484_v62  ;;  %v3805_v30 = vadd.f32 %v15509_v24, %v3485_v45  ;;  %v15517_v40 = vld [vmem:[#allocation152_spill] sm:$0xff]  ;;  %v15522_v43 = vld [vmem:[#allocation42_spill] sm:$0xff]  ;;  %v15523_v14 = vld [vmem:[#allocation157_spill] sm:$0xff] }
 0xace   : > { %v3806_v10 = vadd.f32 %v15510_v46, %v3486_v51  ;;  %v3807_v36 = vadd.f32 %v15511_v59, %v3487_v26  ;;  %v3808_v42 = vadd.f32 %v15512_v25, %v3488_v1  ;;  %v3809_v55 = vadd.f32 %v15513_v53, %v3489_v3  ;;  %v15524_v21 = vld [vmem:[#allocation158_spill] sm:$0xff]  ;;  %v15526_v5 = vld [vmem:[#allocation160_spill] sm:$0xff]  ;;  %v15527_v22 = vld [vmem:[#allocation161_spill] sm:$0xff] }
 0xacf   : > { %v3810_v41 = vadd.f32 %v15514_v16, %v3490_v2  ;;  %v3811_v33 = vadd.f32 %v15515_v8, %v3491_v52  ;;  %v3812_v48 = vadd.f32 %v15516_v61, %v3492_v38  ;;  %v3813_v23 = vadd.f32 %v15517_v40, %v3493_v29  ;;  %v15528_v6 = vld [vmem:[#allocation162_spill] sm:$0xff]  ;;  %v15529_v62 = vld [vmem:[#allocation163_spill] sm:$0xff]  ;;  %v15530_v51 = vld [vmem:[#allocation164_spill] sm:$0xff] }
 0xad0   : > { %v3814_v18 = vadd.f32 %v15518_v7, %v3494_v63  ;;  %v3815_v49 = vadd.f32 %v15519_v44, %v3495_v56  ;;  %v3816_v31 = vadd.f32 %v15520_v9, %v3496_v19  ;;  %v3817_v17 = vadd.f32 %v15521_v39, %v3497_v60  ;;  %v15531_v1 = vld [vmem:[#allocation165_spill] sm:$0xff]  ;;  %v15532_v2 = vld [vmem:[#allocation166_spill] sm:$0xff]  ;;  %v15533_v38 = vld [vmem:[#allocation167_spill] sm:$0xff] }
 0xad1   : > { %v4121_v27 = vadd.f32 %v15522_v43, %v3802_v34  ;;  %v4122_v15 = vadd.f32 %v15523_v14, %v3803_v32  ;;  %v4123_v12 = vadd.f32 %v15524_v21, %v3804_v28  ;;  %v4124_v4 = vadd.f32 %v15525_v50, %v3805_v30  ;;  %v15534_v63 = vld [vmem:[#allocation168_spill] sm:$0xff]  ;;  %v15535_v35 = vld [vmem:[#allocation169_spill] sm:$0xff]  ;;  %v15536_v37 = vld [vmem:[#allocation170_spill] sm:$0xff] }
 0xad2   : > { %v4125_v47 = vadd.f32 %v15526_v5, %v3806_v10  ;;  %v4126_v11 = vadd.f32 %v15527_v22, %v3807_v36  ;;  %v4127_v13 = vadd.f32 %v15528_v6, %v3808_v42  ;;  %v4128_v45 = vadd.f32 %v15529_v62, %v3809_v55  ;;  %v15537_v19 = vld [vmem:[#allocation171_spill] sm:$0xff]  ;;  %v15538_v58 = vld [vmem:[#allocation18_spill] sm:$0xff]  ;;  %v15539_v24 = vld [vmem:[#allocation172_spill] sm:$0xff] }
 0xad3   : > { %v4129_v26 = vadd.f32 %v15530_v51, %v3810_v41  ;;  %v4130_v3 = vadd.f32 %v15531_v1, %v3811_v33  ;;  %v4131_v52 = vadd.f32 %v15532_v2, %v3812_v48  ;;  %v4132_v29 = vadd.f32 %v15533_v38, %v3813_v23  ;;  %v15540_v46 = vld [vmem:[#allocation173_spill] sm:$0xff]  ;;  %v15541_v59 = vld [vmem:[#allocation174_spill] sm:$0xff]  ;;  %v15542_v25 = vld [vmem:[#allocation175_spill] sm:$0xff] }
 0xad4   : > { %v4133_v56 = vadd.f32 %v15534_v63, %v3814_v18  ;;  %v4134_v34 = vadd.f32 %v15535_v35, %v3815_v49  ;;  %v4135_v32 = vadd.f32 %v15536_v37, %v3816_v31  ;;  %v4136_v60 = vadd.f32 %v15537_v19, %v3817_v17  ;;  %v15543_v53 = vld [vmem:[#allocation176_spill] sm:$0xff]  ;;  %v15544_v16 = vld [vmem:[#allocation177_spill] sm:$0xff]  ;;  %v15545_v8 = vld [vmem:[#allocation178_spill] sm:$0xff] }
 0xad5   : > { %v4441_v28 = vadd.f32 %v15538_v58, %v4121_v27  ;;  %v4442_v30 = vadd.f32 %v15539_v24, %v4122_v15  ;;  %v4443_v10 = vadd.f32 %v15540_v46, %v4123_v12  ;;  %v4444_v36 = vadd.f32 %v15541_v59, %v4124_v4  ;;  %v15546_v61 = vld [vmem:[#allocation179_spill] sm:$0xff]  ;;  %v15547_v40 = vld [vmem:[#allocation180_spill] sm:$0xff]  ;;  %v15548_v7 = vld [vmem:[#allocation181_spill] sm:$0xff] }
 0xad6   : > { %v4445_v42 = vadd.f32 %v15542_v25, %v4125_v47  ;;  %v4446_v55 = vadd.f32 %v15543_v53, %v4126_v11  ;;  %v4447_v41 = vadd.f32 %v15544_v16, %v4127_v13  ;;  %v4448_v33 = vadd.f32 %v15545_v8, %v4128_v45  ;;  %v15549_v44 = vld [vmem:[#allocation182_spill] sm:$0xff]  ;;  %v15550_v9 = vld [vmem:[#allocation183_spill] sm:$0xff]  ;;  %v15551_v39 = vld [vmem:[#allocation184_spill] sm:$0xff] }
 0xad7   : > { %v4449_v48 = vadd.f32 %v15546_v61, %v4129_v26  ;;  %v4450_v23 = vadd.f32 %v15547_v40, %v4130_v3  ;;  %v4451_v18 = vadd.f32 %v15548_v7, %v4131_v52  ;;  %v4452_v49 = vadd.f32 %v15549_v44, %v4132_v29  ;;  %v15552_v43 = vld [vmem:[#allocation185_spill] sm:$0xff]  ;;  %v15553_v14 = vld [vmem:[#allocation186_spill] sm:$0xff]  ;;  %v15555_v50 = vld [vmem:[#allocation63_spill] sm:$0xff] }
 0xad8   : > { %v4453_v31 = vadd.f32 %v15550_v9, %v4133_v56  ;;  %v4454_v17 = vadd.f32 %v15551_v39, %v4134_v34  ;;  %v4455_v27 = vadd.f32 %v15552_v43, %v4135_v32  ;;  %v4456_v15 = vadd.f32 %v15553_v14, %v4136_v60  ;;  %v15554_v21 = vld [vmem:[#allocation54_spill] sm:$0xff]  ;;  %v15556_v5 = vld [vmem:[#allocation187_spill] sm:$0xff]  ;;  %v15557_v22 = vld [vmem:[#allocation188_spill] sm:$0xff] }
 0xad9   : > { %v4761_v12 = vadd.f32 %v15554_v21, %v4441_v28  ;;  %v4762_v4 = vadd.f32 %v15555_v50, %v4442_v30  ;;  %v4763_v47 = vadd.f32 %v15556_v5, %v4443_v10  ;;  %v4764_v11 = vadd.f32 %v15557_v22, %v4444_v36  ;;  %v15558_v6 = vld [vmem:[#allocation189_spill] sm:$0xff]  ;;  %v15559_v62 = vld [vmem:[#allocation190_spill] sm:$0xff]  ;;  %v15560_v51 = vld [vmem:[#allocation191_spill] sm:$0xff] }
 0xada   : > { %v4765_v13 = vadd.f32 %v15558_v6, %v4445_v42  ;;  %v4766_v45 = vadd.f32 %v15559_v62, %v4446_v55  ;;  %v4767_v26 = vadd.f32 %v15560_v51, %v4447_v41  ;;  %v15561_v1 = vld [vmem:[#allocation192_spill] sm:$0xff]  ;;  %v8457_v2 = vld [vmem:[%s10813_s3 + $0x3] sm:$0xff]  ;;  %v8458_v29 = vld [vmem:[%s10813_s3 + $0xb] sm:$0xff] }
 0xadb   : > { %v4768_v3 = vadd.f32 %v15561_v1, %v4448_v33  ;;  %v15562_v52 = vld [vmem:[#allocation201_spill] sm:$0xff]  ;;  %v15564_v34 = vld [vmem:[#allocation194_spill] sm:$0xff]  ;;  %v15565_v32 = vld [vmem:[#allocation195_spill] sm:$0xff] }
 0xadc   : > { %v5001_v38 = vmul.f32 %v8457_v2, %v15562_v52  ;;  %v5002_v63 = vmul.f32 %v8458_v29, %v15562_v52  ;;  %v15563_v56 = vld [vmem:[#allocation193_spill] sm:$0xff]  ;;  %v4770_v37 = vadd.f32 %v15564_v34, %v4450_v23  ;;  %v4771_v19 = vadd.f32 %v15565_v32, %v4451_v18  ;;  %v15566_v60 = vld [vmem:[#allocation196_spill] sm:$0xff]  ;;  %v15568_v30 = vld [vmem:[#allocation198_spill] sm:$0xff] }
 0xadd   : > { %v4769_v35 = vadd.f32 %v15563_v56, %v4449_v48  ;;  %v4772_v58 = vadd.f32 %v15566_v60, %v4452_v49  ;;  %v15567_v28 = vld [vmem:[#allocation197_spill] sm:$0xff]  ;;  %v4774_v46 = vadd.f32 %v15568_v30, %v4454_v17  ;;  %v15569_v10 = vld [vmem:[#allocation202_spill] sm:$0xff]  ;;  %v15570_v25 = vld [vmem:[#allocation199_spill] sm:$0xff] }
 0xade   : > { %v4773_v24 = vadd.f32 %v15567_v28, %v4453_v31  ;;  %v5003_v59 = vmul.f32 %v8457_v2, %v15569_v10  ;;  %v5004_v36 = vmul.f32 %v8458_v29, %v15569_v10  ;;  %v4775_v42 = vadd.f32 %v15570_v25, %v4455_v27  ;;  %v15571_v53 = vld [vmem:[#allocation200_spill] sm:$0xff]  ;;  %v15572_v16 = vld [vmem:[#allocation203_spill] sm:$0xff]  ;;  %v15574_v7 = vld [vmem:[#allocation205_spill] sm:$0xff] }
 0xadf   : > { %v4776_v55 = vadd.f32 %v15571_v53, %v4456_v15  ;;  %v5005_v41 = vmul.f32 %v8457_v2, %v15572_v16  ;;  %v5006_v8 = vmul.f32 %v8458_v29, %v15572_v16  ;;  %v15573_v33 = vld [vmem:[#allocation204_spill] sm:$0xff]  ;;  %v5017_v40 = vadd.f32 %v5001_v38, %v4761_v12  ;;  %v15575_v49 = vld [vmem:[#allocation206_spill] sm:$0xff]  ;;  %v15576_v39 = vld [vmem:[#allocation207_spill] sm:$0xff] }
 0xae0   : > { %v5007_v61 = vmul.f32 %v8457_v2, %v15573_v33  ;;  %v5008_v48 = vmul.f32 %v8458_v29, %v15573_v33  ;;  %v5018_v23 = vadd.f32 %v5002_v63, %v4762_v4  ;;  %v5009_v18 = vmul.f32 %v8457_v2, %v15574_v7  ;;  %v15577_v15 = vld [vmem:[#allocation208_spill] sm:$0xff]  ;;  %v15579_v5 = vld [vmem:[#allocation209_spill] sm:$0xff]  ;;  %v15583_v60 = vld [vmem:[#allocation211_spill] sm:$0xff] }
 0xae1   : > { %v5010_v44 = vmul.f32 %v8458_v29, %v15574_v7  ;;  %v5011_v9 = vmul.f32 %v8457_v2, %v15575_v49  ;;  %v5012_v31 = vmul.f32 %v8458_v29, %v15575_v49  ;;  %v5013_v17 = vmul.f32 %v8457_v2, %v15576_v39  ;;  %v15578_v12 = vld [vmem:[#allocation64_spill] sm:$0xff]  ;;  %v15581_v34 = vld [vmem:[#allocation225_spill] sm:$0xff]  ;;  %v15588_v53 = vld [vmem:[#allocation227_spill] sm:$0xff] }
 0xae2   : > { %v5014_v43 = vmul.f32 %v8458_v29, %v15576_v39  ;;  %v5019_v27 = vadd.f32 %v5003_v59, %v4763_v47  ;;  %v5020_v14 = vadd.f32 %v5004_v36, %v4764_v11  ;;  %v5015_v21 = vmul.f32 %v8457_v2, %v15577_v15  ;;  %v15580_v63 = vld [vmem:[#allocation224_spill] sm:$0xff]  ;;  %v15582_v47 = vld [vmem:[#allocation210_spill] sm:$0xff]  ;;  %v15585_v59 = vld [vmem:[#allocation241_spill] sm:$0xff] }
 0xae3   : > { %v5016_v50 = vmul.f32 %v8458_v29, %v15577_v15  ;;  %v5337_v4 = vadd.f32 %v15578_v12, %v5017_v40  ;;  %v5338_v22 = vadd.f32 %v15579_v5, %v5018_v23  ;;  %v5021_v6 = vadd.f32 %v5005_v41, %v4765_v13  ;;  %v15584_v30 = vld [vmem:[#allocation240_spill] sm:$0xff]  ;;  %v15590_v33 = vld [vmem:[#allocation257_spill] sm:$0xff]  ;;  %v15596_v39 = vld [vmem:[#allocation214_spill] sm:$0xff] }
 0xae4   : > { %v5022_v62 = vadd.f32 %v5006_v8, %v4766_v45  ;;  %v5023_v51 = vadd.f32 %v5007_v61, %v4767_v26  ;;  %v5024_v1 = vadd.f32 %v5008_v48, %v4768_v3  ;;  %v5025_v52 = vadd.f32 %v5009_v18, %v4769_v35  ;;  %v15586_v13 = vld [vmem:[#allocation272_spill] sm:$0xff]  ;;  %v15592_v23 = vld [vmem:[#allocation213_spill] sm:$0xff]  ;;  %v15600_v12 = vld [vmem:[#allocation258_spill] sm:$0xff] }
 0xae5   : > { %v5026_v38 = vadd.f32 %v5010_v44, %v4770_v37  ;;  %v5657_v56 = vadd.f32 %v15580_v63, %v5337_v4  ;;  %v5658_v32 = vadd.f32 %v15581_v34, %v5338_v22  ;;  %v5339_v11 = vadd.f32 %v15582_v47, %v5019_v27  ;;  %v15587_v37 = vld [vmem:[#allocation226_spill] sm:$0xff]  ;;  %v15589_v41 = vld [vmem:[#allocation256_spill] sm:$0xff]  ;;  %v15595_v49 = vld [vmem:[#allocation273_spill] sm:$0xff] }
 0xae6   : > { %v5340_v2 = vadd.f32 %v15583_v60, %v5020_v14  ;;  %v5027_v28 = vadd.f32 %v5011_v9, %v4771_v19  ;;  %v5028_v29 = vadd.f32 %v5012_v31, %v4772_v58  ;;  %v6537_v45 = vmul.f32 %v15586_v13, %v13596_v20  ;;  %v15591_v48 = vld [vmem:[#allocation212_spill] sm:$0xff]  ;;  %v15601_v5 = vld [vmem:[#allocation259_spill] sm:$0xff]  ;;  %v15605_v34 = vld [vmem:[#allocation245_spill] sm:$0xff] }
 0xae7   : > { %v5977_v10 = vadd.f32 %v15584_v30, %v5657_v56  ;;  %v5978_v36 = vadd.f32 %v15585_v59, %v5658_v32  ;;  %v6538_v26 = vmul.f32 %v15586_v13, %v13599_v0  ;;  %v14148_v3 = vadd.f32 %v5013_v17, %v4773_v24  ;;  %v15593_v24 = vld [vmem:[#allocation242_spill] sm:$0xff]  ;;  %v15598_v14 = vld [vmem:[#allocation228_spill] sm:$0xff] }
 0xae8   : > { %v14150_v35 = vadd.f32 %v5014_v43, %v4774_v46  ;;  %v5659_v25 = vadd.f32 %v15587_v37, %v5339_v11  ;;  %v5660_v16 = vadd.f32 %v15588_v53, %v5340_v2  ;;  %v14154_v19 = vadd.f32 %v5015_v21, %v4775_v42  ;;  %v15594_v46 = vld [vmem:[#allocation243_spill] sm:$0xff]  ;;  %v15599_v21 = vld [vmem:[#allocation229_spill] sm:$0xff]  ;;  %v15604_v56 = vld [vmem:[#allocation244_spill] sm:$0xff] }
 0xae9   : > { %v14156_v58 = vadd.f32 %v5016_v50, %v4776_v55  ;;  %v6297_v8 = vadd.f32 %v15589_v41, %v5977_v10  ;;  %v6298_v61 = vadd.f32 %v15590_v33, %v5978_v36  ;;  %v5341_v40 = vadd.f32 %v15591_v48, %v5021_v6  ;;  %v15597_v43 = vld [vmem:[#allocation215_spill] sm:$0xff]  ;;  %v15602_v6 = vld [vmem:[#allocation280_spill] sm:$0xff]  ;;  %v14179_v47 = vld [vmem:[%s10813_s3 + $0x4] sm:$0xff] }
 0xaea   : > { %v5342_v7 = vadd.f32 %v15592_v23, %v5022_v62  ;;  %v5979_v18 = vadd.f32 %v15593_v24, %v5659_v25  ;;  %v5980_v44 = vadd.f32 %v15594_v46, %v5660_v16  ;;  %v6539_v9 = vmul.f32 %v15595_v49, %v13596_v20  ;;  %v15603_v62 = vld [vmem:[#allocation281_spill] sm:$0xff]  ;;  %v14184_v11 = vld [vmem:[%s10813_s3 + $0xc] sm:$0xff]  ;;  %v15611_v33 = vld [vmem:[#allocation260_spill] sm:$0xff] }
 0xaeb   : > { %v6540_v42 = vmul.f32 %v15595_v49, %v13599_v0  ;;  %v6553_v55 = vadd.f32 %v6537_v45, %v6297_v8  ;;  %v6554_v31 = vadd.f32 %v6538_v26, %v6298_v61  ;;  %v5343_v17 = vadd.f32 %v15596_v39, %v5023_v51  ;;  %v15606_v51 = vld [vmem:[#allocation274_spill] sm:$0xff]  ;;  %v15607_v45 = vld [vmem:[#allocation216_spill] sm:$0xff]  ;;  %v15608_v37 = vld [vmem:[#allocation217_spill] sm:$0xff] }
 0xaec   : > { %v5344_v27 = vadd.f32 %v15597_v43, %v5024_v1  ;;  %v5661_v15 = vadd.f32 %v15598_v14, %v5341_v40  ;;  %v5662_v50 = vadd.f32 %v15599_v21, %v5342_v7  ;;  %v6299_v4 = vadd.f32 %v15600_v12, %v5979_v18  ;;  %v15609_v53 = vld [vmem:[#allocation230_spill] sm:$0xff]  ;;  %v15610_v41 = vld [vmem:[#allocation231_spill] sm:$0xff]  ;;  %v15612_v48 = vld [vmem:[#allocation261_spill] sm:$0xff] }
 0xaed   : > { %v6300_v22 = vadd.f32 %v15601_v5, %v5980_v44  ;;  %v6873_v20 = vadd.f32 %v15602_v6, %v6553_v55  ;;  %v6874_v63 = vadd.f32 %v15603_v62, %v6554_v31  ;;  %v6541_v1 = vmul.f32 %v14179_v47, %v15606_v51  ;;  %v15613_v23 = vld [vmem:[#allocation282_spill] sm:$0xff]  ;;  %v15614_v24 = vld [vmem:[#allocation283_spill] sm:$0xff]  ;;  %v15620_v12 = vld [vmem:[#allocation232_spill] sm:$0xff] }
 0xaee   : > { %v5981_v0 = vadd.f32 %v15604_v56, %v5661_v15  ;;  %v5982_v32 = vadd.f32 %v15605_v34, %v5662_v50  ;;  %v6542_v60 = vmul.f32 %v14184_v11, %v15606_v51  ;;  %v6555_v10 = vadd.f32 %v6539_v9, %v6299_v4  ;;  %v15615_v46 = vld [vmem:[#allocation246_spill] sm:$0xff]  ;;  %v15616_v49 = vld [vmem:[#allocation247_spill] sm:$0xff]  ;;  %v15621_v5 = vld [vmem:[#allocation233_spill] sm:$0xff] }
 0xaef   : > { %v6556_v59 = vadd.f32 %v6540_v42, %v6300_v22  ;;  %v5345_v26 = vadd.f32 %v15607_v45, %v5025_v52  ;;  %v5346_v25 = vadd.f32 %v15608_v37, %v5026_v38  ;;  %v5663_v16 = vadd.f32 %v15609_v53, %v5343_v17  ;;  %v15617_v42 = vld [vmem:[#allocation275_spill] sm:$0xff]  ;;  %v15618_v14 = vld [vmem:[#allocation218_spill] sm:$0xff]  ;;  %v15624_v56 = vld [vmem:[#allocation284_spill] sm:$0xff] }
 0xaf0   : > { %v7146_v2 = vpop.permute.xlu1 %7145  ;;  %v7148_v30 = vpop.permute.xlu0 %7147  ;;  %v5664_v8 = vadd.f32 %v15610_v41, %v5344_v27  ;;  %v6301_v61 = vadd.f32 %v15611_v33, %v5981_v0  ;;  %v6302_v40 = vadd.f32 %v15612_v48, %v5982_v32  ;;  %v6875_v7 = vadd.f32 %v15613_v23, %v6555_v10  ;;  %v15619_v21 = vld [vmem:[#allocation219_spill] sm:$0xff]  ;;  %v15622_v6 = vld [vmem:[#allocation262_spill] sm:$0xff]  ;;  %v15625_v34 = vld [vmem:[#allocation285_spill] sm:$0xff] }
 0xaf1   : > { %v14188_v36 = vadd.f32 %v7146_v2, %v6873_v20  ;;  %v14190_v13 = vadd.f32 %v7148_v30, %v6874_v63  ;;  %v6876_v18 = vadd.f32 %v15614_v24, %v6556_v59  ;;  %v5983_v44 = vadd.f32 %v15615_v46, %v5663_v16  ;;  %v15623_v62 = vld [vmem:[#allocation263_spill] sm:$0xff]  ;;  %v15626_v51 = vld [vmem:[#allocation248_spill] sm:$0xff]  ;;  %v15630_v41 = vld [vmem:[#allocation221_spill] sm:$0xff] }
 0xaf2   : > { %v5984_v9 = vadd.f32 %v15616_v49, %v5664_v8  ;;  %v6543_v52 = vmul.f32 %v14179_v47, %v15617_v42  ;;  %v6544_v38 = vmul.f32 %v14184_v11, %v15617_v42  ;;  %v6557_v39 = vadd.f32 %v6541_v1, %v6301_v61  ;;  %v15628_v30 = vld [vmem:[#allocation276_spill] sm:$0xff]  ;;  %v15631_v33 = vld [vmem:[#allocation234_spill] sm:$0xff]  ;;  %v15632_v48 = vld [vmem:[#allocation235_spill] sm:$0xff] }
 0xaf3   : > { %v6558_v17 = vadd.f32 %v6542_v60, %v6302_v40  ;;  %v5347_v15 = vadd.f32 %v15618_v14, %v5027_v28  ;;  %v5348_v50 = vadd.f32 %v15619_v21, %v5028_v29  ;;  %v5665_v4 = vadd.f32 %v15620_v12, %v5345_v26  ;;  %v15627_v60 = vld [vmem:[#allocation249_spill] sm:$0xff]  ;;  %v15629_v53 = vld [vmem:[#allocation220_spill] sm:$0xff]  ;;  %v15635_v46 = vld [vmem:[#allocation286_spill] sm:$0xff] }
 0xaf4   : > { %v7150_v55 = vpop.permute.xlu1 %7149  ;;  %v7152_v31 = vpop.permute.xlu0 %7151  ;;  %v5666_v22 = vadd.f32 %v15621_v5, %v5346_v25  ;;  %v6303_v20 = vadd.f32 %v15622_v6, %v5983_v44  ;;  %v6304_v63 = vadd.f32 %v15623_v62, %v5984_v9  ;;  %v6877_v0 = vadd.f32 %v15624_v56, %v6557_v39  ;;  %v15633_v23 = vld [vmem:[#allocation264_spill] sm:$0xff]  ;;  %v15634_v24 = vld [vmem:[#allocation265_spill] sm:$0xff]  ;;  %v15636_v49 = vld [vmem:[#allocation287_spill] sm:$0xff] }
 0xaf5   : > { %v14206_v43 = vadd.f32 %v7150_v55, %v6875_v7  ;;  %v14208_v27 = vadd.f32 %v7152_v31, %v6876_v18  ;;  %v6878_v32 = vadd.f32 %v15625_v34, %v6558_v17  ;;  %v5985_v1 = vadd.f32 %v15626_v51, %v5665_v4  ;;  %v15637_v42 = vld [vmem:[#allocation250_spill] sm:$0xff]  ;;  %v15641_v5 = vld [vmem:[#allocation223_spill] sm:$0xff]  ;;  %v15642_v6 = vld [vmem:[#allocation236_spill] sm:$0xff] }
 0xaf6   : > { %v5986_v2 = vadd.f32 %v15627_v60, %v5666_v22  ;;  %v6545_v28 = vmul.f32 %v14179_v47, %v15628_v30  ;;  %v6546_v29 = vmul.f32 %v14184_v11, %v15628_v30  ;;  %v6559_v45 = vadd.f32 %v6543_v52, %v6303_v20  ;;  %v15640_v12 = vld [vmem:[#allocation222_spill] sm:$0xff]  ;;  %v15643_v62 = vld [vmem:[#allocation237_spill] sm:$0xff]  ;;  %v15645_v34 = vld [vmem:[#allocation267_spill] sm:$0xff] }
 0xaf7   : > { %v6560_v26 = vadd.f32 %v6544_v38, %v6304_v63  ;;  %v5349_v16 = vadd.f32 %v15629_v53, %v14148_v3  ;;  %v5350_v8 = vadd.f32 %v15630_v41, %v14150_v35  ;;  %v5667_v61 = vadd.f32 %v15631_v33, %v5347_v15  ;;  %v15638_v38 = vld [vmem:[#allocation251_spill] sm:$0xff]  ;;  %v15639_v3 = vld [vmem:[#allocation277_spill] sm:$0xff]  ;;  %v15644_v56 = vld [vmem:[#allocation266_spill] sm:$0xff] }
 0xaf8   : > { %v7154_v10 = vpop.permute.xlu1 %7153  ;;  %v7156_v59 = vpop.permute.xlu0 %7155  ;;  %v5668_v40 = vadd.f32 %v15632_v48, %v5348_v50  ;;  %v6305_v7 = vadd.f32 %v15633_v23, %v5985_v1  ;;  %v6306_v18 = vadd.f32 %v15634_v24, %v5986_v2  ;;  %v6879_v44 = vadd.f32 %v15635_v46, %v6559_v45  ;;  %v15646_v51 = vld [vmem:[#allocation288_spill] sm:$0xff]  ;;  %v15647_v60 = vld [vmem:[#allocation289_spill] sm:$0xff]  ;;  %v15651_v33 = vld [vmem:[#allocation238_spill] sm:$0xff] }
 0xaf9   : > { %v14224_v37 = vadd.f32 %v7154_v10, %v6877_v0  ;;  %v14226_v25 = vadd.f32 %v7156_v59, %v6878_v32  ;;  %v6880_v9 = vadd.f32 %v15636_v49, %v6560_v26  ;;  %v5987_v52 = vadd.f32 %v15637_v42, %v5667_v61  ;;  %v15648_v30 = vld [vmem:[#allocation252_spill] sm:$0xff]  ;;  %v15652_v48 = vld [vmem:[#allocation239_spill] sm:$0xff]  ;;  %v15654_v24 = vld [vmem:[#allocation269_spill] sm:$0xff] }
 0xafa   : > { %v5988_v55 = vadd.f32 %v15638_v38, %v5668_v40  ;;  %v6547_v31 = vmul.f32 %v14179_v47, %v15639_v3  ;;  %v6548_v35 = vmul.f32 %v14184_v11, %v15639_v3  ;;  %v6561_v14 = vadd.f32 %v6545_v28, %v6305_v7  ;;  %v15653_v23 = vld [vmem:[#allocation268_spill] sm:$0xff]  ;;  %v15655_v46 = vld [vmem:[#allocation290_spill] sm:$0xff]  ;;  %v15656_v49 = vld [vmem:[#allocation291_spill] sm:$0xff] }
 0xafb   : > { %v6562_v15 = vadd.f32 %v6546_v29, %v6306_v18  ;;  %v5351_v4 = vadd.f32 %v15640_v12, %v14154_v19  ;;  %v5352_v22 = vadd.f32 %v15641_v5, %v14156_v58  ;;  %v5669_v20 = vadd.f32 %v15642_v6, %v5349_v16  ;;  %v15649_v29 = vld [vmem:[#allocation253_spill] sm:$0xff]  ;;  %v15650_v19 = vld [vmem:[#allocation278_spill] sm:$0xff]  ;;  %v15658_v38 = vld [vmem:[#allocation255_spill] sm:$0xff] }
 0xafc   : > { %v7158_v39 = vpop.permute.xlu1 %7157  ;;  %v7160_v17 = vpop.permute.xlu0 %7159  ;;  %v5670_v63 = vadd.f32 %v15643_v62, %v5350_v8  ;;  %v6307_v0 = vadd.f32 %v15644_v56, %v5987_v52  ;;  %v6308_v32 = vadd.f32 %v15645_v34, %v5988_v55  ;;  %v6881_v1 = vadd.f32 %v15646_v51, %v6561_v14  ;;  %v15657_v42 = vld [vmem:[#allocation254_spill] sm:$0xff]  ;;  %v15659_v3 = vld [vmem:[#allocation279_spill] sm:$0xff]  ;;  %v15662_v62 = vld [vmem:[#allocation292_spill] sm:$0xff] }
 0xafd   : > { %v14244_v21 = vadd.f32 %v7158_v39, %v6879_v44  ;;  %v14246_v50 = vadd.f32 %v7160_v17, %v6880_v9  ;;  %v6882_v2 = vadd.f32 %v15647_v60, %v6562_v15  ;;  %v5989_v28 = vadd.f32 %v15648_v30, %v5669_v20  ;;  %v15660_v5 = vld [vmem:[#allocation270_spill] sm:$0xff]  ;;  %v15661_v6 = vld [vmem:[#allocation271_spill] sm:$0xff]  ;;  %v15663_v56 = vld [vmem:[#allocation293_spill] sm:$0xff] }
 0xafe   : > { %v5990_v10 = vadd.f32 %v15649_v29, %v5670_v63  ;;  %v6549_v59 = vmul.f32 %v14179_v47, %v15650_v19  ;;  %v6550_v58 = vmul.f32 %v14184_v11, %v15650_v19  ;;  %v6563_v53 = vadd.f32 %v6547_v31, %v6307_v0  ;;  %v15664_v30 = vld [vmem:[#allocation294_spill] sm:$0xff]  ;;  %v15665_v29 = vld [vmem:[#allocation295_spill] sm:$0xff] }
 0xaff   : > { %v6564_v16 = vadd.f32 %v6548_v35, %v6308_v32  ;;  %v5671_v61 = vadd.f32 %v15651_v33, %v5351_v4  ;;  %v5672_v40 = vadd.f32 %v15652_v48, %v5352_v22  ;;  %v6309_v7 = vadd.f32 %v15653_v23, %v5989_v28 }
 0xb00   : > { %v7162_v45 = vpop.permute.xlu1 %7161  ;;  %v7164_v26 = vpop.permute.xlu0 %7163  ;;  %v6310_v18 = vadd.f32 %v15654_v24, %v5990_v10  ;;  %v6883_v44 = vadd.f32 %v15655_v46, %v6563_v53  ;;  %v6551_v31 = vmul.f32 %v14179_v47, %v15659_v3  ;;  %v6552_v35 = vmul.f32 %v14184_v11, %v15659_v3 }
 0xb01   : > { %v14264_v41 = vadd.f32 %v7162_v45, %v6881_v1  ;;  %v14266_v8 = vadd.f32 %v7164_v26, %v6882_v2  ;;  %v6884_v9 = vadd.f32 %v15656_v49, %v6564_v16  ;;  %v5991_v52 = vadd.f32 %v15657_v42, %v5671_v61  ;;  %v15666_v61 = vld [vmem:[#allocation49_spill] sm:$0xff] }
 0xb02   : > { %v5992_v55 = vadd.f32 %v15658_v38, %v5672_v40  ;;  %v6565_v14 = vadd.f32 %v6549_v59, %v6309_v7  ;;  %v6566_v15 = vadd.f32 %v6550_v58, %v6310_v18  ;;  %8441 = vrsqrt.f32 %v15666_v61 }
 0xb03   : > { %v6311_v22 = vadd.f32 %v15660_v5, %v5991_v52 }
 0xb04   : > { %v7166_v39 = vpop.permute.xlu1 %7165  ;;  %v7168_v17 = vpop.permute.xlu0 %7167  ;;  %v6312_v20 = vadd.f32 %v15661_v6, %v5992_v55  ;;  %v6885_v63 = vadd.f32 %v15662_v62, %v6565_v14  ;;  %v6886_v0 = vadd.f32 %v15663_v56, %v6566_v15 }
 0xb05   : > { %v14280_v12 = vadd.f32 %v7166_v39, %v6883_v44  ;;  %v14282_v4 = vadd.f32 %v7168_v17, %v6884_v9  ;;  %v6567_v51 = vadd.f32 %v6551_v31, %v6311_v22 }
 0xb06   : > { %v6568_v1 = vadd.f32 %v6552_v35, %v6312_v20 }
 0xb07   : > { %v6887_v28 = vadd.f32 %v15664_v30, %v6567_v51 }
 0xb08   : > { %v7170_v34 = vpop.permute.xlu1 %7169  ;;  %v7172_v32 = vpop.permute.xlu0 %7171  ;;  %v6888_v10 = vadd.f32 %v15665_v29, %v6568_v1 }
 0xb09   : > { %v14288_v60 = vadd.f32 %v7170_v34, %v6885_v63  ;;  %v14290_v2 = vadd.f32 %v7172_v32, %v6886_v0 }
 0xb0c   : > { %v7174_v19 = vpop.permute.xlu1 %7173  ;;  %v7176_v59 = vpop.permute.xlu0 %7175 }
 0xb0d   : > { %v14294_v58 = vadd.f32 %v7174_v19, %v6887_v28  ;;  %v14296_v45 = vadd.f32 %v7176_v59, %v6888_v10 }
 0xb0f   : > { %v8442_v52 = vpop.eup %8441 }
 0xb10   : > { %v7858_v31 = vrot.slane %v8442_v52, %v15136_v57  ;;  %v7851_v39 = vcombine.high %v8442_v52, %v8442_v52 }
 0xb12   : > { %v7874_v15 = vrot.slane %v7858_v31, %v15136_v57  ;;  %v7866_v5 = vcombine.high %v7858_v31, %v7858_v31  ;;  %v7865_v6 = vrot.slane %v7851_v39, %v15136_v57 }
 0xb14   : > { %v7903_v62 = vrot.slane %v7874_v15, %v15068_v54  ;;  %v7896_v63 = vcombine.high %v7874_v15, %v7874_v15  ;;  %v7888_v56 = vrot.slane %v7866_v5, %v15136_v57  ;;  %v7881_v0 = vrot.slane %v7865_v6, %v15136_v57 }
 0xb15   : > { %v7867_v1 = vcombine.high %v7865_v6, %v7865_v6 }
 0xb16   : > { %v7911_v34 = vrot.slane %v7896_v63, %v15068_v54  ;;  %v7907_v32 = vrot.slane %v7888_v56, %v15068_v54  ;;  %v7898_v51 = vcombine.high %v7888_v56, %v7888_v56  ;;  %v7919_v30 = vrot.slane %v7881_v0, %v15068_v54 }
 0xb17   : > { %v7897_v29 = vcombine.high %v7881_v0, %v7881_v0  ;;  %v7895_v10 = vrot.slane %v7867_v1, %v15136_v57 }
 0xb18   : > { %v7915_v28 = vrot.slane %v7898_v51, %v15068_v54 }
 0xb19   : > { %v7403_v26 = vpop.permute.xlu1 %7402  ;;  %v7407_v33 = vpop.permute.xlu0 %7406  ;;  %v7927_v19 = vrot.slane %v7897_v29, %v15068_v54  ;;  %v7923_v59 = vrot.slane %v7895_v10, %v15068_v54 }
 0xb1a   : > { %v7433_v53 = vmul.f32 %v14179_v47, %v7403_v26  ;;  %v7434_v16 = vmul.f32 %v14184_v11, %v7403_v26  ;;  %v7435_v48 = vmul.f32 %v14179_v47, %v7407_v33  ;;  %v7436_v40 = vmul.f32 %v14184_v11, %v7407_v33 }
 0xb1b   : > { %v7899_v26 = vcombine.high %v7895_v10, %v7895_v10 }
 0xb1c   : > { %7467 = vrot.lane.b32.xlu0 %v7434_v16, %s8533_s4  ;;  %7465 = vrot.lane.b32.xlu1 %v7433_v53, %s8533_s4 }
 0xb1d   : > { %v7411_v23 = vpop.permute.xlu1 %7410  ;;  %v7415_v18 = vpop.permute.xlu0 %7414  ;;  %v7931_v16 = vrot.slane %v7899_v26, %v15068_v54 }
 0xb1e   : > { %v7437_v7 = vmul.f32 %v14179_v47, %v7411_v23  ;;  %v7438_v24 = vmul.f32 %v14184_v11, %v7411_v23  ;;  %v7439_v46 = vmul.f32 %v14179_v47, %v7415_v18  ;;  %v7440_v44 = vmul.f32 %v14184_v11, %v7415_v18 }
 0xb20   : > { %7471 = vrot.lane.b32.xlu0 %v7436_v40, %s8533_s4  ;;  %7469 = vrot.lane.b32.xlu1 %v7435_v48, %s8533_s4 }
 0xb21   : > { %v7419_v49 = vpop.permute.xlu1 %7418  ;;  %v7423_v38 = vpop.permute.xlu0 %7422 }
 0xb22   : > { %v7441_v9 = vmul.f32 %v14179_v47, %v7419_v49  ;;  %v7442_v42 = vmul.f32 %v14184_v11, %v7419_v49  ;;  %v7443_v55 = vmul.f32 %v14179_v47, %v7423_v38  ;;  %v7444_v3 = vmul.f32 %v14184_v11, %v7423_v38 }
 0xb24   : > { %7475 = vrot.lane.b32.xlu0 %v7438_v24, %s8533_s4  ;;  %7473 = vrot.lane.b32.xlu1 %v7437_v7, %s8533_s4 }
 0xb25   : > { %v7427_v35 = vpop.permute.xlu1 %7426  ;;  %v7431_v22 = vpop.permute.xlu0 %7430 }
 0xb26   : > { %v7445_v17 = vmul.f32 %v14179_v47, %v7427_v35  ;;  %v7446_v14 = vmul.f32 %v14184_v11, %v7427_v35  ;;  %v7447_v20 = vmul.f32 %v14179_v47, %v7431_v22  ;;  %v7448_v53 = vmul.f32 %v14184_v11, %v7431_v22 }
 0xb28   : > { %7479 = vrot.lane.b32.xlu0 %v7440_v44, %s8533_s4  ;;  %7477 = vrot.lane.b32.xlu1 %v7439_v46, %s8533_s4 }
 0xb29   : > { %v7723_v33 = vpop.permute.xlu1 %7722  ;;  %v7727_v48 = vpop.permute.xlu0 %7726 }
 0xb2a   : > { %v7753_v61 = vmul.f32 %v14179_v47, %v7723_v33  ;;  %v7754_v57 = vmul.f32 %v14184_v11, %v7723_v33  ;;  %v7755_v40 = vmul.f32 %v14179_v47, %v7727_v48  ;;  %v7756_v23 = vmul.f32 %v14184_v11, %v7727_v48 }
 0xb2c   : > { %7483 = vrot.lane.b32.xlu0 %v7442_v42, %s8533_s4  ;;  %7481 = vrot.lane.b32.xlu1 %v7441_v9, %s8533_s4 }
 0xb2d   : > { %v7731_v7 = vpop.permute.xlu1 %7730  ;;  %v7735_v18 = vpop.permute.xlu0 %7734 }
 0xb2e   : > { %v7757_v54 = vmul.f32 %v14179_v47, %v7731_v7  ;;  %v7758_v24 = vmul.f32 %v14184_v11, %v7731_v7  ;;  %v7759_v46 = vmul.f32 %v14179_v47, %v7735_v18  ;;  %v7760_v44 = vmul.f32 %v14184_v11, %v7735_v18 }
 0xb30   : > { %7487 = vrot.lane.b32.xlu0 %v7444_v3, %s8533_s4  ;;  %7485 = vrot.lane.b32.xlu1 %v7443_v55, %s8533_s4 }
 0xb31   : > { %v7739_v49 = vpop.permute.xlu1 %7738  ;;  %v7743_v52 = vpop.permute.xlu0 %7742 }
 0xb32   : > { %v7761_v9 = vmul.f32 %v14179_v47, %v7739_v49  ;;  %v7762_v42 = vmul.f32 %v14184_v11, %v7739_v49  ;;  %v7763_v38 = vmul.f32 %v14179_v47, %v7743_v52  ;;  %v7764_v55 = vmul.f32 %v14184_v11, %v7743_v52 }
 0xb34   : > { %7491 = vrot.lane.b32.xlu0 %v7446_v14, %s8533_s4  ;;  %7489 = vrot.lane.b32.xlu1 %v7445_v17, %s8533_s4 }
 0xb35   : > { %v7747_v3 = vpop.permute.xlu1 %7746  ;;  %v7751_v39 = vpop.permute.xlu0 %7750 }
 0xb36   : > { %v7765_v31 = vmul.f32 %v14179_v47, %v7747_v3  ;;  %v7766_v35 = vmul.f32 %v14184_v11, %v7747_v3  ;;  %v7767_v17 = vmul.f32 %v14179_v47, %v7751_v39  ;;  %v7768_v14 = vmul.f32 %v14184_v11, %v7751_v39 }
 0xb38   : > { %7933 = vperm.xlu0 %8339, %v7903_v62   ;;  %7493 = vrot.lane.b32.xlu1 %v7447_v20, %s8533_s4 }
 0xb3c   : > { %7941 = vperm.xlu0 %8339, %v7911_v34   ;;  %7937 = vperm.xlu1 %8340, %v7907_v32  }
 0xb40   : > { %7949 = vperm.xlu0 %8339, %v7919_v30   ;;  %7945 = vperm.xlu1 %8340, %v7915_v28  }
 0xb44   : > { %7957 = vperm.xlu0 %8339, %v7927_v19   ;;  %7953 = vperm.xlu1 %8340, %v7923_v59  }
 0xb48   : > { %7495 = vrot.lane.b32.xlu0 %v7448_v53, %s8533_s4  ;;  %7961 = vperm.xlu1 %8340, %v7931_v16  }
 0xb4c   : > { %7787 = vrot.lane.b32.xlu0 %v7754_v57, %s8534_s5  ;;  %7785 = vrot.lane.b32.xlu1 %v7753_v61, %s8534_s5 }
 0xb50   : > { %7791 = vrot.lane.b32.xlu0 %v7756_v23, %s8534_s5  ;;  %7789 = vrot.lane.b32.xlu1 %v7755_v40, %s8534_s5 }
 0xb54   : > { %7795 = vrot.lane.b32.xlu0 %v7758_v24, %s8534_s5  ;;  %7793 = vrot.lane.b32.xlu1 %v7757_v54, %s8534_s5 }
 0xb58   : > { %7799 = vrot.lane.b32.xlu0 %v7760_v44, %s8534_s5  ;;  %7797 = vrot.lane.b32.xlu1 %v7759_v46, %s8534_s5 }
 0xb5c   : > { %7803 = vrot.lane.b32.xlu0 %v7762_v42, %s8534_s5  ;;  %7801 = vrot.lane.b32.xlu1 %v7761_v9, %s8534_s5 }
 0xb60   : > { %7807 = vrot.lane.b32.xlu0 %v7764_v55, %s8534_s5  ;;  %7805 = vrot.lane.b32.xlu1 %v7763_v38, %s8534_s5 }
 0xb64   : > { %7811 = vrot.lane.b32.xlu0 %v7766_v35, %s8534_s5  ;;  %7809 = vrot.lane.b32.xlu1 %v7765_v31, %s8534_s5 }
 0xb68   : > { %7815 = vrot.lane.b32.xlu0 %v7768_v14, %s8534_s5  ;;  %7813 = vrot.lane.b32.xlu1 %v7767_v17, %s8534_s5 }
 0xb8e   : > { %v7466_v15 = vpop.permute.xlu1 %7465  ;;  %v7468_v5 = vpop.permute.xlu0 %7467 }
 0xb8f   : > { %v7513_v33 = vadd.f32 %v7466_v15, %v14188_v36  ;;  %v7514_v61 = vadd.f32 %v7468_v5, %v14190_v13 }
 0xb92   : > { %v7470_v22 = vpop.permute.xlu1 %7469  ;;  %v7472_v6 = vpop.permute.xlu0 %7471 }
 0xb93   : > { %v7515_v7 = vadd.f32 %v7470_v22, %v14206_v43  ;;  %v7516_v54 = vadd.f32 %v7472_v6, %v14208_v27 }
 0xb96   : > { %v7474_v20 = vpop.permute.xlu1 %7473  ;;  %v7476_v62 = vpop.permute.xlu0 %7475 }
 0xb97   : > { %v7517_v43 = vadd.f32 %v7474_v20, %v14224_v37  ;;  %v7518_v27 = vadd.f32 %v7476_v62, %v14226_v25 }
 0xb9a   : > { %v7478_v63 = vpop.permute.xlu1 %7477  ;;  %v7480_v56 = vpop.permute.xlu0 %7479 }
 0xb9b   : > { %v7519_v3 = vadd.f32 %v7478_v63, %v14244_v21  ;;  %v7520_v31 = vadd.f32 %v7480_v56, %v14246_v50 }
 0xb9e   : > { %v7482_v0 = vpop.permute.xlu1 %7481  ;;  %v7484_v34 = vpop.permute.xlu0 %7483 }
 0xb9f   : > { %v7521_v15 = vadd.f32 %v7482_v0, %v14264_v41  ;;  %v7522_v5 = vadd.f32 %v7484_v34, %v14266_v8 }
 0xba2   : > { %v14377_v32 = vpop.permute.xlu1 %7485  ;;  %v14379_v47 = vpop.permute.xlu0 %7487 }
 0xba3   : > { %v7523_v63 = vadd.f32 %v14377_v32, %v14280_v12  ;;  %v7524_v41 = vadd.f32 %v14379_v47, %v14282_v4 }
 0xba6   : > { %v14381_v11 = vpop.permute.xlu1 %7489  ;;  %v14383_v51 = vpop.permute.xlu0 %7491 }
 0xba7   : > { %v7525_v12 = vadd.f32 %v14381_v11, %v14288_v60  ;;  %v7526_v32 = vadd.f32 %v14383_v51, %v14290_v2 }
 0xbaa   : > { %v14385_v1 = vpop.permute.xlu1 %7493 }
 0xbab   : > { %v7527_v60 = vadd.f32 %v14385_v1, %v14294_v58 }
 0xbb3   : > { %v7934_v30 = vpop.permute.xlu0 %7933 }
 0xbb7   : > { %v7938_v28 = vpop.permute.xlu1 %7937  ;;  %v7942_v29 = vpop.permute.xlu0 %7941 }
 0xbbb   : > { %v7946_v10 = vpop.permute.xlu1 %7945  ;;  %v7950_v19 = vpop.permute.xlu0 %7949 }
 0xbbf   : > { %v14387_v59 = vpop.permute.xlu1 %7953  ;;  %v14389_v26 = vpop.permute.xlu0 %7957 }
 0xbc3   : > { %v14391_v53 = vpop.permute.xlu1 %7961  ;;  %v14393_v16 = vpop.permute.xlu0 %7495 }
 0xbc4   : > { %v7528_v2 = vadd.f32 %v14393_v16, %v14296_v45 }
 0xbc7   : > { %v7786_v57 = vpop.permute.xlu1 %7785  ;;  %v7788_v48 = vpop.permute.xlu0 %7787 }
 0xbc8   : > { %v7833_v40 = vadd.f32 %v7786_v57, %v7513_v33  ;;  %v7834_v23 = vadd.f32 %v7788_v48, %v7514_v61 }
 0xbca   : > { %v7964_v24 = vmul.f32 %v7934_v30, %v7833_v40  ;;  %v7965_v18 = vmul.f32 %v7934_v30, %v7834_v23 }
 0xbcb   : > { %v7790_v46 = vpop.permute.xlu1 %7789  ;;  %v7792_v44 = vpop.permute.xlu0 %7791 }
 0xbcc   : > { %7981 = vst.msk [vmem:[%s14402_s8] sm:$0xff] %vm7980_vm15, %v7964_v24  ;;  %7982 = vst.msk [vmem:[%s14402_s8 + $0x8] sm:$0xff] %vm7980_vm15, %v7965_v18  ;;  %v7835_v36 = vadd.f32 %v7790_v46, %v7515_v7  ;;  %v7836_v13 = vadd.f32 %v7792_v44, %v7516_v54 }
 0xbce   : > { %v7966_v49 = vmul.f32 %v7938_v28, %v7835_v36  ;;  %v7967_v9 = vmul.f32 %v7938_v28, %v7836_v13 }
 0xbcf   : > { %v7794_v42 = vpop.permute.xlu1 %7793  ;;  %v7796_v52 = vpop.permute.xlu0 %7795 }
 0xbd0   : > { %7983 = vst.msk [vmem:[%s14402_s8 + $0x10] sm:$0xff] %vm7980_vm15, %v7966_v49  ;;  %7984 = vst.msk [vmem:[%s14402_s8 + $0x18] sm:$0xff] %vm7980_vm15, %v7967_v9  ;;  %v7837_v38 = vadd.f32 %v7794_v42, %v7517_v43  ;;  %v7838_v55 = vadd.f32 %v7796_v52, %v7518_v27 }
 0xbd2   : > { %v7968_v37 = vmul.f32 %v7942_v29, %v7837_v38  ;;  %v7969_v35 = vmul.f32 %v7942_v29, %v7838_v55 }
 0xbd3   : > { %v7798_v25 = vpop.permute.xlu1 %7797  ;;  %v7800_v39 = vpop.permute.xlu0 %7799 }
 0xbd4   : > { %7985 = vst.msk [vmem:[%s14402_s8 + $0x20] sm:$0xff] %vm7980_vm15, %v7968_v37  ;;  %7986 = vst.msk [vmem:[%s14402_s8 + $0x28] sm:$0xff] %vm7980_vm15, %v7969_v35  ;;  %v7839_v17 = vadd.f32 %v7798_v25, %v7519_v3  ;;  %v7840_v14 = vadd.f32 %v7800_v39, %v7520_v31 }
 0xbd6   : > { %v7970_v21 = vmul.f32 %v7946_v10, %v7839_v17  ;;  %v7971_v22 = vmul.f32 %v7946_v10, %v7840_v14 }
 0xbd7   : > { %v7802_v50 = vpop.permute.xlu1 %7801  ;;  %v7804_v6 = vpop.permute.xlu0 %7803 }
 0xbd8   : > { %7987 = vst.msk [vmem:[%s14402_s8 + $0x30] sm:$0xff] %vm7980_vm15, %v7970_v21  ;;  %7988 = vst.msk [vmem:[%s14402_s8 + $0x38] sm:$0xff] %vm7980_vm15, %v7971_v22  ;;  %v7841_v20 = vadd.f32 %v7802_v50, %v7521_v15  ;;  %v7842_v62 = vadd.f32 %v7804_v6, %v7522_v5 }
 0xbda   : > { %v7972_v8 = vmul.f32 %v7950_v19, %v7841_v20  ;;  %v7973_v56 = vmul.f32 %v7950_v19, %v7842_v62 }
 0xbdb   : > { %v7806_v0 = vpop.permute.xlu1 %7805  ;;  %v7808_v34 = vpop.permute.xlu0 %7807 }
 0xbdc   : > { %7989 = vst.msk [vmem:[%s14402_s8 + $0x40] sm:$0xff] %vm7980_vm15, %v7972_v8  ;;  %7990 = vst.msk [vmem:[%s14402_s8 + $0x48] sm:$0xff] %vm7980_vm15, %v7973_v56  ;;  %v7843_v30 = vadd.f32 %v7806_v0, %v7523_v63  ;;  %v7844_v28 = vadd.f32 %v7808_v34, %v7524_v41 }
 0xbde   : > { %v7974_v4 = vmul.f32 %v14387_v59, %v7843_v30  ;;  %v7975_v47 = vmul.f32 %v14387_v59, %v7844_v28 }
 0xbdf   : > { %v7810_v29 = vpop.permute.xlu1 %7809  ;;  %v7812_v10 = vpop.permute.xlu0 %7811 }
 0xbe0   : > { %7991 = vst.msk [vmem:[%s14402_s8 + $0x50] sm:$0xff] %vm7980_vm15, %v7974_v4  ;;  %7992 = vst.msk [vmem:[%s14402_s8 + $0x58] sm:$0xff] %vm7980_vm15, %v7975_v47  ;;  %v7845_v19 = vadd.f32 %v7810_v29, %v7525_v12  ;;  %v7846_v33 = vadd.f32 %v7812_v10, %v7526_v32 }
 0xbe2   : > { %v7976_v11 = vmul.f32 %v14389_v26, %v7845_v19  ;;  %v7977_v51 = vmul.f32 %v14389_v26, %v7846_v33 }
 0xbe3   : > { %v7814_v59 = vpop.permute.xlu1 %7813  ;;  %v7816_v61 = vpop.permute.xlu0 %7815 }
 0xbe4   : > { %7993 = vst.msk [vmem:[%s14402_s8 + $0x60] sm:$0xff] %vm7980_vm15, %v7976_v11  ;;  %7994 = vst.msk [vmem:[%s14402_s8 + $0x68] sm:$0xff] %vm7980_vm15, %v7977_v51  ;;  %v7847_v58 = vadd.f32 %v7814_v59, %v7527_v60  ;;  %v7848_v1 = vadd.f32 %v7816_v61, %v7528_v2 }
 0xbe6   : > { %v7978_v45 = vmul.f32 %v14391_v53, %v7847_v58  ;;  %v7979_v26 = vmul.f32 %v14391_v53, %v7848_v1 }
 0xbe8   : > { %7995 = vst.msk [vmem:[%s14402_s8 + $0x70] sm:$0xff] %vm7980_vm15, %v7978_v45  ;;  %7996 = vst.msk [vmem:[%s14402_s8 + $0x78] sm:$0xff] %vm7980_vm15, %v7979_v26 }
 0xbe9   : > { %8474 = shalt.err (!%p8471_p3)
}
 0xbea   : > { %s8475_s27 = scalar_lea.hbm %s14459_s22, 2048  ;;  %s8479_s30 = scalar_lea.hbm %s14513_s2, 4096 }
 0xbeb   : > { %p8476_p4 = scmp.ne.s32.totalorder %s14459_s22, %s8475_s27  ;;  %p8480_p9 = scmp.lt.s32.totalorder %s14459_s22, %s14513_s2 }
 0xbec   : > { %p8481_p10 = scmp.lt.s32.totalorder %s8479_s30, %s8475_s27 }
 0xbed   : > { %p8477_p7 = pnand %p8476_p4, %p8591_p5 }
 0xbee   : > { %p8482_p11 = por %p8481_p10, %p8480_p9 }
 0xbef   : > { %p8478_p8 = pneg %p8477_p7 }
 0xbf1   : > { %p8483_p12 = pnand %p8482_p11, %p8478_p8 }
 0xbf3   : > { %8486 = shalt.err (!%p8483_p12)
}
 0xbf4   : > { %s8536_s5 = smov 128   ;;  %s8537_s6 = smov 8  }
 0xbf5   : > { %8286 = dma.vmem_to_hbm [thread:$0]  (%p8591_p5), %s14461_s16, 2048, %s14459_s22, %s14471_s13, %s8536_s5, %s8536_s5, %s8537_s6  }
 0xbf6 PF: > { %p8292_p13 = scmp.ge.s32.totalorder %s8521_s12, 2  ;;  %s8026_s7 = sand.u32 1, %s8509_s9  }
 0xbf7   : > { %s8027_s8 = scalar_lea.sflag [#allocation3], %s8026_s7 }
 0xbf8   : > { %p8289_p0 = pnand %p8292_p13, %p8595_p6 }
 0xbfa   : > { %p8290_p1 = pneg %p8289_p0 }
 0xbfc   : > { %8504 = dma.done.wait (%p8290_p1), %s8027_s8, 2048  }
 0xbfd   : > { %8506 = vsyncadd (%p8290_p1), %s8027_s8, 4294965248  ;;  %p12_p2 = scmp.ge.s32.totalorder %s8578_s15, 4   ;;  %s15667_s9 = smov %s8513_s10 }
 0xbfe   : > { %s15668_s10 = smov %s8517_s11  ;;  %s15669_s11 = smov %s8589_s18 }
 0xbff   : > { %s15670_s12 = smov %s8578_s15  ;;  %14 = sbr.rel (!%p12_p2) target bundleno = 3 (0x3), region = 63 }
 0xc04   :  { %8032 = vsyncpa [#allocation3], 1 }
 0xc05   :  { %8034 = vsyncpa [#allocation3 + $0x1], 1 }

</bundles_post_ra>
